<compile_context>
chip_gen: v5e
topology: v5e:2x2
jax: 0.10.0
libtpu: 0.0.40
codegen_flags: <defaults>
</compile_context>

<pallas_src>
import functools

import jax
import jax.numpy as jnp
from jax.experimental import pallas as pl
from jax.experimental.pallas import tpu as pltpu


def _round_up(x, m):
    return ((x + m - 1) // m) * m


def _conv_out(n):  # k=3, s=2, p=1
    return (n - 1) // 2 + 1


# ---------------------------------------------------------------------------
# Fused kernel: one batch element per grid step.
# ---------------------------------------------------------------------------
def _p6p7_kernel(xq_ref, w6_ref, b6_ref, w7_ref, b7_ref,      # inputs
                 p6_ref, p7_ref,                              # outputs
                 p6r_ref,                                     # VMEM scratch (bf16)
                 *, Ho6, Wo6, Ho7, Hq, WB6, WB7):
    Cp = p7_ref.shape[-1]
    Ho6h = (Ho6 + 1) // 2
    Hs = Ho7 + 1                          # per-phase H extent of the relu(p6) scratch
    Ws = p6r_ref.shape[1]                 # = WB7 + 1
    sdt = p6r_ref.dtype

    b6 = b6_ref[...]                      # (1, Cp) f32
    b7 = b7_ref[...]                      # (1, Cp) f32

    # ---- p6 = conv3x3/s2/p1(c5): GEMMs per output-parity class (a, b) ----
    for a in (0, 1):
        Ma = (Ho6 - a + 1) // 2           # valid output rows in this class
        for b in (0, 1):
            Mb = (Wo6 - b + 1) // 2       # valid output cols in this class
            cls = 2 * a + b
            # relu(p6) scratch phase fed by this class (p7's conv padding is 1):
            ph, pw = (a + 1) % 2, (b + 1) % 2
            ra, rb = (a + 1) // 2, (b + 1) // 2
            base = (2 * ph + pw) * Hs

            if Ma == 0 or Mb == 0:        # degenerate extent: whole phase is zero halo
                p6r_ref[base:base + Hs, :, :] = jnp.zeros((Hs, Ws, Cp), sdt)
                continue

            # Zero only the halo strips of this phase (the interior is overwritten below,
            # every grid step -> no cross-iteration / cross-core state).
            if ra > 0:
                p6r_ref[base:base + ra, :, :] = jnp.zeros((ra, Ws, Cp), sdt)
            if ra + Ma < Hs:
                p6r_ref[base + ra + Ma:base + Hs, :, :] = (
                    jnp.zeros((Hs - ra - Ma, Ws, Cp), sdt))
            if rb > 0:
                p6r_ref[base + ra:base + ra + Ma, :rb, :] = jnp.zeros((Ma, rb, Cp), sdt)
            if rb + Mb < Ws:
                p6r_ref[base + ra:base + ra + Ma, rb + Mb:Ws, :] = (
                    jnp.zeros((Ma, Ws - rb - Mb, Cp), sdt))

            # Chunk the GEMM M dimension so the f32 accumulator stays in vregs.
            mc = Ma if Ma * WB6 <= 128 else max(1, 128 // WB6)
            for m0 in range(0, Ma, mc):
                mm = min(mc, Ma - m0)
                acc = jnp.broadcast_to(b6, (mm * WB6, Cp))     # bias-initialized f32 acc
                for kh in range(3):
                    sh = 2 * a + kh
                    for kw in range(3):
                        sw = 2 * b + kw
                        p = 4 * (sh % 4) + (sw % 4)            # which of the 16 input phases
                        dh, dw = sh // 4, sw // 4              # static offsets inside it
                        r0 = p * Hq + dh + m0
                        xt = xq_ref[0, r0:r0 + mm, dw:dw + WB6, :]     # (mm, WB6, Ci_p) bf16
                        xt = xt.reshape(mm * WB6, xt.shape[-1])
                        acc = acc + jnp.dot(xt, w6_ref[3 * kh + kw],
                                            preferred_element_type=jnp.float32)
                p6c = acc.reshape(mm, WB6, Cp)                 # f32 (includes padded W cols)
                p6_ref[0, cls * Ho6h + m0:cls * Ho6h + m0 + mm, :, :] = p6c
                # Stash relu(p6) (bf16) into the phase-decomposed scratch feeding p7.
                p6r_ref[base + ra + m0:base + ra + m0 + mm, rb:rb + Mb, :] = (
                    jnp.maximum(p6c[:, :Mb, :], 0.0).astype(sdt))

    # ---- p7 = conv3x3/s2/p1(relu(p6)) straight from the resident bf16 scratch ----
    hc = Ho7 if Ho7 * WB7 <= 128 else max(1, 128 // WB7)
    for h0 in range(0, Ho7, hc):
        hh = min(hc, Ho7 - h0)
        acc7 = jnp.broadcast_to(b7, (hh * WB7, Cp))            # bias-initialized f32 acc
        for kh in range(3):
            for kw in range(3):
                s0 = (2 * (kh % 2) + (kw % 2)) * Hs + kh // 2 + h0
                xt = p6r_ref[s0:s0 + hh, kw // 2:kw // 2 + WB7, :]     # (hh, WB7, Cp) bf16
                xt = xt.reshape(hh * WB7, Cp)
                acc7 = acc7 + jnp.dot(xt, w7_ref[3 * kh + kw],
                                      preferred_element_type=jnp.float32)
        # Full padded, lane/sublane-dense store; wrapper slices off the W padding.
        p7_ref[0, h0:h0 + hh, :, :] = acc7.reshape(hh, WB7, Cp)


# ---------------------------------------------------------------------------
# Wrapper glue
# ---------------------------------------------------------------------------
def _prep_w(w_oihw, cin_p, cout_p, dtype):
    """(Cout, Cin, 3, 3) -> (9, cin_p, cout_p); tap index = 3*kh + kw; zero-padded channels."""
    cout, cin = w_oihw.shape[0], w_oihw.shape[1]
    w = jnp.transpose(w_oihw, (2, 3, 1, 0))                        # (3, 3, Cin, Cout)
    w = jnp.pad(w, ((0, 0), (0, 0), (0, cin_p - cin), (0, cout_p - cout)))
    return w.reshape(9, cin_p, cout_p).astype(dtype)


def last_level_p6p7_p5(c5_nchw, params, *, mxu_dtype=jnp.bfloat16,
                       single_buffer_weights=True):
    N, Cin, H, W = c5_nchw.shape
    Cout = params["w6"].shape[0]

    Ho6, Wo6 = _conv_out(H), _conv_out(W)
    Ho7, Wo7 = _conv_out(Ho6), _conv_out(Wo6)
    Ho6h, Wo6h = (Ho6 + 1) // 2, (Wo6 + 1) // 2      # per-parity-class extents of p6

    Ci_p = _round_up(Cin, 128)                        # lane-dense GEMM K
    Cp = _round_up(Cout, 128)                         # lane-dense output channels
    WB6 = _round_up(Wo6h, 8)                          # per-class W compute width for p6
    WB7 = _round_up(Wo7, 8)                           # W compute width for p7
    Hq = max(Ho6h + 1, (H + 5) // 4)                  # per-phase H extent of decomposed input
    Wq = max(WB6 + 1, (W + 5) // 4)                   # per-phase W extent of decomposed input
    Hs, Ws = Ho7 + 1, WB7 + 1                         # per-phase extents of relu(p6) scratch

    # --- XLA glue (single pass over c5, in bf16): NHWC + pad + 4x4 phase decomposition ---
    x = jnp.transpose(c5_nchw, (0, 2, 3, 1)).astype(mxu_dtype)          # NHWC bf16
    x = jnp.pad(x, ((0, 0), (1, 4 * Hq - H - 1), (1, 4 * Wq - W - 1), (0, Ci_p - Cin)))
    x = x.reshape(N, Hq, 4, Wq, 4, Ci_p)
    xq = jnp.transpose(x, (0, 2, 4, 1, 3, 5)).reshape(N, 16 * Hq, Wq, Ci_p)

    w6 = _prep_w(params["w6"], Ci_p, Cp, mxu_dtype)                     # (9, Ci_p, Cp) bf16
    w7 = _prep_w(params["w7"], Cp, Cp, mxu_dtype)                       # (9, Cp,  Cp) bf16
    b6 = jnp.pad(params["b6"].astype(jnp.float32), (0, Cp - Cout)).reshape(1, Cp)
    b7 = jnp.pad(params["b7"].astype(jnp.float32), (0, Cp - Cout)).reshape(1, Cp)

    use_single_buffer = single_buffer_weights and hasattr(pl, "Buffered")

    def _invariant_spec(shape):
        idx = (lambda n: (0, 0, 0)) if len(shape) == 3 else (lambda n: (0, 0))
        if use_single_buffer:
            return pl.BlockSpec(shape, idx, pipeline_mode=pl.Buffered(1))
        return pl.BlockSpec(shape, idx)

    # --- VMEM footprint (bytes) -> explicit scoped-VMEM limit with headroom ---
    esz = jnp.dtype(mxu_dtype).itemsize
    w_buf = 1 if use_single_buffer else 2
    vmem_bytes = (
        2 * (16 * Hq * Wq * Ci_p) * esz                                  # xq, double-buffered
        + w_buf * (9 * Ci_p * Cp + 9 * Cp * Cp) * esz + w_buf * 2 * Cp * 4
        + 2 * (4 * Ho6h * WB6 * Cp + Ho7 * WB7 * Cp) * 4                 # outputs, dbl-buffered
        + 4 * Hs * Ws * Cp * esz)                                        # relu(p6) scratch
    vmem_limit = int(min(max(2 * vmem_bytes, 32 * 1024 * 1024), 100 * 1024 * 1024))

    kernel = functools.partial(
        _p6p7_kernel, Ho6=Ho6, Wo6=Wo6, Ho7=Ho7, Hq=Hq, WB6=WB6, WB7=WB7)

    p6_cls, p7_pad = pl.pallas_call(
        kernel,
        out_shape=(
            jax.ShapeDtypeStruct((N, 4 * Ho6h, WB6, Cp), jnp.float32),
            jax.ShapeDtypeStruct((N, Ho7, WB7, Cp), jnp.float32),
        ),
        grid_spec=pltpu.PrefetchScalarGridSpec(
            num_scalar_prefetch=0,
            grid=(N,),
            in_specs=[
                pl.BlockSpec((1, 16 * Hq, Wq, Ci_p), lambda n: (n, 0, 0, 0)),
                _invariant_spec((9, Ci_p, Cp)),
                _invariant_spec((1, Cp)),
                _invariant_spec((9, Cp, Cp)),
                _invariant_spec((1, Cp)),
            ],
            out_specs=[
                pl.BlockSpec((1, 4 * Ho6h, WB6, Cp), lambda n: (n, 0, 0, 0)),
                pl.BlockSpec((1, Ho7, WB7, Cp), lambda n: (n, 0, 0, 0)),
            ],
            scratch_shapes=[pltpu.VMEM((4 * Hs, Ws, Cp), mxu_dtype)],
        ),
        compiler_params=pltpu.CompilerParams(
            dimension_semantics=("parallel",),
            vmem_limit_bytes=vmem_limit),
    )(xq, w6, b6, w7, b7)

    # --- reassemble p6 from its 4 parity classes (tiny tensors, pure XLA glue) ---
    p6 = p6_cls.reshape(N, 2, 2, Ho6h, WB6, Cp)
    p6 = jnp.transpose(p6, (0, 3, 1, 4, 2, 5)).reshape(N, 2 * Ho6h, 2 * WB6, Cp)
    p6 = p6[:, :Ho6, :Wo6, :Cout]
    p7 = p7_pad[:, :, :Wo7, :Cout]
    return [jnp.transpose(p6, (0, 3, 1, 2)), jnp.transpose(p7, (0, 3, 1, 2))]


# ---------------------------------------------------------------------------
# Pure-JAX reference (optionally with bf16-rounded operands, f32 accumulation)
# ---------------------------------------------------------------------------
def _ref_forward(c5, params, cast=None):
    def maybe(x):
        return x.astype(cast).astype(jnp.float32) if cast is not None else x

    def conv(x, w, b):
        y = jax.lax.conv_general_dilated(
            x, w, window_strides=(2, 2), padding=((1, 1), (1, 1)),
            dimension_numbers=("NCHW", "OIHW", "NCHW"))
        return y + b[None, :, None, None]

    p6 = conv(maybe(c5), maybe(params["w6"]), params["b6"])
    p7 = conv(maybe(jnp.maximum(p6, 0.0)), maybe(params["w7"]), params["b7"])
    return [p6, p7]


if __name__ == "__main__":
    key = jax.random.PRNGKey(0)
    k_x, k_w6, k_b6, k_w7, k_b7 = jax.random.split(key, 5)

    N, Cin, H, W = 2, 4, 16, 16
    Cout = 8

    c5 = jax.random.normal(k_x, (N, Cin, H, W), jnp.float32)

    def _fill(k, shape, fan_in):  # c2_xavier_fill-style deterministic init
        bound = (1.0 / fan_in) ** 0.5
        return jax.random.uniform(k, shape, jnp.float32, -bound, bound)

    params = {
        "w6": _fill(k_w6, (Cout, Cin, 3, 3), Cin * 9),
        "b6": _fill(k_b6, (Cout,), Cin * 9),
        "w7": _fill(k_w7, (Cout, Cout, 3, 3), Cout * 9),
        "b7": _fill(k_b7, (Cout,), Cout * 9),
    }

    r6, r7 = _ref_forward(c5, params, cast=jnp.bfloat16)   # bf16-matched reference
    f6, f7 = _ref_forward(c5, params)                       # pure-f32 reference

    def _run_and_check(single_buffer_weights):
        fwd = jax.jit(functools.partial(
            last_level_p6p7_p5, single_buffer_weights=single_buffer_weights))
        p6, p7 = fwd(c5, params)
        jax.block_until_ready(p6)
        jax.block_until_ready(p7)
        assert p6.shape == (N, Cout, 8, 8) and p7.shape == (N, Cout, 4, 4)
        # Tight check against a bf16-matched reference (kernel feeds bf16 operands
        # to the MXU and accumulates in f32).
        assert jnp.allclose(p6, r6, atol=1e-2, rtol=1e-2), float(jnp.max(jnp.abs(p6 - r6)))
        assert jnp.allclose(p7, r7, atol=1e-2, rtol=1e-2), float(jnp.max(jnp.abs(p7 - r7)))
        # Loose sanity check against the pure-f32 reference (bf16 rounding tolerance).
        assert jnp.allclose(p6, f6, atol=1e-1, rtol=1e-1)
        assert jnp.allclose(p7, f7, atol=1e-1, rtol=1e-1)
        return p6, p7

    try:
        _run_and_check(True)
    except Exception:
        # Graceful fallback for jax versions without per-BlockSpec buffer-count control.
        _run_and_check(False)

    print("KERNEL_OK")
</pallas_src>

<mosaic_0001>
module attributes {stable_mosaic.version = 11 : i64} {
  func.func @_p6p7_kernel(%arg0: i32, %arg1: memref<1x80x9x128xbf16, #tpu.memory_space<vmem>>, %arg2: memref<9x128x128xbf16, #tpu.memory_space<vmem>>, %arg3: memref<1x128xf32, #tpu.memory_space<vmem>>, %arg4: memref<9x128x128xbf16, #tpu.memory_space<vmem>>, %arg5: memref<1x128xf32, #tpu.memory_space<vmem>>, %arg6: memref<1x16x8x128xf32, #tpu.memory_space<vmem>>, %arg7: memref<1x4x8x128xf32, #tpu.memory_space<vmem>>, %arg8: memref<20x9x128xbf16, #tpu.memory_space<vmem>>) attributes {dimension_semantics = [#tpu.dimension_semantics<parallel>], iteration_bounds = array<i64: 2>, scalar_prefetch = 0 : i64, scratch_operands = 1 : i64, tpu.core_type = #tpu.core_type<tc>, window_params = [{transform_indices = @transform_0, window_bounds = array<i64: 1, 80, 9, 128>}, {pipeline_mode = #tpu.pipeline_mode<synchronous>, transform_indices = @transform_1, window_bounds = array<i64: 9, 128, 128>}, {pipeline_mode = #tpu.pipeline_mode<synchronous>, transform_indices = @transform_2, window_bounds = array<i64: 1, 128>}, {pipeline_mode = #tpu.pipeline_mode<synchronous>, transform_indices = @transform_3, window_bounds = array<i64: 9, 128, 128>}, {pipeline_mode = #tpu.pipeline_mode<synchronous>, transform_indices = @transform_4, window_bounds = array<i64: 1, 128>}, {transform_indices = @transform_5, window_bounds = array<i64: 1, 16, 8, 128>}, {transform_indices = @transform_6, window_bounds = array<i64: 1, 4, 8, 128>}]} {
    %c0 = arith.constant 0 : index
    %c0_0 = arith.constant 0 : index
    %0 = vector.load %arg3[%c0, %c0_0] : memref<1x128xf32, #tpu.memory_space<vmem>>, vector<1x128xf32>
    %c0_1 = arith.constant 0 : index
    %c0_2 = arith.constant 0 : index
    %1 = vector.load %arg5[%c0_1, %c0_2] : memref<1x128xf32, #tpu.memory_space<vmem>>, vector<1x128xf32>
    %cst = arith.constant 0.000000e+00 : bf16
    %2 = vector.broadcast %cst : bf16 to vector<1x9x128xbf16>
    %c19 = arith.constant 19 : index
    %c0_3 = arith.constant 0 : index
    %c0_4 = arith.constant 0 : index
    %3 = vector.load %arg8[%c19, %c0_3, %c0_4] : memref<20x9x128xbf16, #tpu.memory_space<vmem>>, vector<1x9x128xbf16>
    tpu.vector_store %arg8[%c19, %c0_3, %c0_4], %2 {strides = array<i32>} : memref<20x9x128xbf16, #tpu.memory_space<vmem>>, vector<1x9x128xbf16>,
    %cst_5 = arith.constant 0.000000e+00 : bf16
    %4 = vector.broadcast %cst_5 : bf16 to vector<4x5x128xbf16>
    %c15 = arith.constant 15 : index
    %c4 = arith.constant 4 : index
    %c0_6 = arith.constant 0 : index
    %5 = vector.load %arg8[%c15, %c4, %c0_6] : memref<20x9x128xbf16, #tpu.memory_space<vmem>>, vector<4x5x128xbf16>
    tpu.vector_store %arg8[%c15, %c4, %c0_6], %4 {strides = array<i32>} : memref<20x9x128xbf16, #tpu.memory_space<vmem>>, vector<4x5x128xbf16>,
    %6 = vector.shape_cast %0 : vector<1x128xf32> to vector<1x128xf32>
    %7 = vector.broadcast %6 : vector<1x128xf32> to vector<32x128xf32>
    %c0_7 = arith.constant 0 : index
    %c0_8 = arith.constant 0 : index
    %c0_9 = arith.constant 0 : index
    %c0_10 = arith.constant 0 : index
    %8 = vector.load %arg1[%c0_7, %c0_8, %c0_9, %c0_10] : memref<1x80x9x128xbf16, #tpu.memory_space<vmem>>, vector<1x4x8x128xbf16>
    %9 = vector.shape_cast %8 : vector<1x4x8x128xbf16> to vector<4x8x128xbf16>
    %10 = vector.shape_cast %9 : vector<4x8x128xbf16> to vector<32x128xbf16>
    %c0_11 = arith.constant 0 : index
    %c0_12 = arith.constant 0 : index
    %c0_13 = arith.constant 0 : index
    %11 = vector.load %arg2[%c0_11, %c0_12, %c0_13] : memref<9x128x128xbf16, #tpu.memory_space<vmem>>, vector<1x128x128xbf16>
    %12 = vector.shape_cast %11 : vector<1x128x128xbf16> to vector<128x128xbf16>
    %cst_14 = arith.constant dense<0.000000e+00> : vector<32x128xf32>
    %13 = tpu.matmul %10, %12, %cst_14 {dimension_numbers = #tpu.dot_dimension_numbers<[1], [0], [0], [1], [0, 0, 1, 1], [], []>} : vector<32x128xbf16>, vector<128x128xbf16>, vector<32x128xf32> -> vector<32x128xf32>
    %14 = arith.addf %7, %13 : vector<32x128xf32>
    %c0_15 = arith.constant 0 : index
    %c5 = arith.constant 5 : index
    %c0_16 = arith.constant 0 : index
    %c0_17 = arith.constant 0 : index
    %15 = vector.load %arg1[%c0_15, %c5, %c0_16, %c0_17] : memref<1x80x9x128xbf16, #tpu.memory_space<vmem>>, vector<1x4x8x128xbf16>
    %16 = vector.shape_cast %15 : vector<1x4x8x128xbf16> to vector<4x8x128xbf16>
    %17 = vector.shape_cast %16 : vector<4x8x128xbf16> to vector<32x128xbf16>
    %c1 = arith.constant 1 : index
    %c0_18 = arith.constant 0 : index
    %c0_19 = arith.constant 0 : index
    %18 = vector.load %arg2[%c1, %c0_18, %c0_19] : memref<9x128x128xbf16, #tpu.memory_space<vmem>>, vector<1x128x128xbf16>
    %19 = vector.shape_cast %18 : vector<1x128x128xbf16> to vector<128x128xbf16>
    %cst_20 = arith.constant dense<0.000000e+00> : vector<32x128xf32>
    %20 = tpu.matmul %17, %19, %cst_20 {dimension_numbers = #tpu.dot_dimension_numbers<[1], [0], [0], [1], [0, 0, 1, 1], [], []>} : vector<32x128xbf16>, vector<128x128xbf16>, vector<32x128xf32> -> vector<32x128xf32>
    %21 = arith.addf %14, %20 : vector<32x128xf32>
    %c0_21 = arith.constant 0 : index
    %c10 = arith.constant 10 : index
    %c0_22 = arith.constant 0 : index
    %c0_23 = arith.constant 0 : index
    %22 = vector.load %arg1[%c0_21, %c10, %c0_22, %c0_23] : memref<1x80x9x128xbf16, #tpu.memory_space<vmem>>, vector<1x4x8x128xbf16>
    %23 = vector.shape_cast %22 : vector<1x4x8x128xbf16> to vector<4x8x128xbf16>
    %24 = vector.shape_cast %23 : vector<4x8x128xbf16> to vector<32x128xbf16>
    %c2 = arith.constant 2 : index
    %c0_24 = arith.constant 0 : index
    %c0_25 = arith.constant 0 : index
    %25 = vector.load %arg2[%c2, %c0_24, %c0_25] : memref<9x128x128xbf16, #tpu.memory_space<vmem>>, vector<1x128x128xbf16>
    %26 = vector.shape_cast %25 : vector<1x128x128xbf16> to vector<128x128xbf16>
    %cst_26 = arith.constant dense<0.000000e+00> : vector<32x128xf32>
    %27 = tpu.matmul %24, %26, %cst_26 {dimension_numbers = #tpu.dot_dimension_numbers<[1], [0], [0], [1], [0, 0, 1, 1], [], []>} : vector<32x128xbf16>, vector<128x128xbf16>, vector<32x128xf32> -> vector<32x128xf32>
    %28 = arith.addf %21, %27 : vector<32x128xf32>
    %c0_27 = arith.constant 0 : index
    %c20 = arith.constant 20 : index
    %c0_28 = arith.constant 0 : index
    %c0_29 = arith.constant 0 : index
    %29 = vector.load %arg1[%c0_27, %c20, %c0_28, %c0_29] : memref<1x80x9x128xbf16, #tpu.memory_space<vmem>>, vector<1x4x8x128xbf16>
    %30 = vector.shape_cast %29 : vector<1x4x8x128xbf16> to vector<4x8x128xbf16>
    %31 = vector.shape_cast %30 : vector<4x8x128xbf16> to vector<32x128xbf16>
    %c3 = arith.constant 3 : index
    %c0_30 = arith.constant 0 : index
    %c0_31 = arith.constant 0 : index
    %32 = vector.load %arg2[%c3, %c0_30, %c0_31] : memref<9x128x128xbf16, #tpu.memory_space<vmem>>, vector<1x128x128xbf16>
    %33 = vector.shape_cast %32 : vector<1x128x128xbf16> to vector<128x128xbf16>
    %cst_32 = arith.constant dense<0.000000e+00> : vector<32x128xf32>
    %34 = tpu.matmul %31, %33, %cst_32 {dimension_numbers = #tpu.dot_dimension_numbers<[1], [0], [0], [1], [0, 0, 1, 1], [], []>} : vector<32x128xbf16>, vector<128x128xbf16>, vector<32x128xf32> -> vector<32x128xf32>
    %35 = arith.addf %28, %34 : vector<32x128xf32>
    %c0_33 = arith.constant 0 : index
    %c25 = arith.constant 25 : index
    %c0_34 = arith.constant 0 : index
    %c0_35 = arith.constant 0 : index
    %36 = vector.load %arg1[%c0_33, %c25, %c0_34, %c0_35] : memref<1x80x9x128xbf16, #tpu.memory_space<vmem>>, vector<1x4x8x128xbf16>
    %37 = vector.shape_cast %36 : vector<1x4x8x128xbf16> to vector<4x8x128xbf16>
    %38 = vector.shape_cast %37 : vector<4x8x128xbf16> to vector<32x128xbf16>
    %c4_36 = arith.constant 4 : index
    %c0_37 = arith.constant 0 : index
    %c0_38 = arith.constant 0 : index
    %39 = vector.load %arg2[%c4_36, %c0_37, %c0_38] : memref<9x128x128xbf16, #tpu.memory_space<vmem>>, vector<1x128x128xbf16>
    %40 = vector.shape_cast %39 : vector<1x128x128xbf16> to vector<128x128xbf16>
    %cst_39 = arith.constant dense<0.000000e+00> : vector<32x128xf32>
    %41 = tpu.matmul %38, %40, %cst_39 {dimension_numbers = #tpu.dot_dimension_numbers<[1], [0], [0], [1], [0, 0, 1, 1], [], []>} : vector<32x128xbf16>, vector<128x128xbf16>, vector<32x128xf32> -> vector<32x128xf32>
    %42 = arith.addf %35, %41 : vector<32x128xf32>
    %c0_40 = arith.constant 0 : index
    %c30 = arith.constant 30 : index
    %c0_41 = arith.constant 0 : index
    %c0_42 = arith.constant 0 : index
    %43 = vector.load %arg1[%c0_40, %c30, %c0_41, %c0_42] : memref<1x80x9x128xbf16, #tpu.memory_space<vmem>>, vector<1x4x8x128xbf16>
    %44 = vector.shape_cast %43 : vector<1x4x8x128xbf16> to vector<4x8x128xbf16>
    %45 = vector.shape_cast %44 : vector<4x8x128xbf16> to vector<32x128xbf16>
    %c5_43 = arith.constant 5 : index
    %c0_44 = arith.constant 0 : index
    %c0_45 = arith.constant 0 : index
    %46 = vector.load %arg2[%c5_43, %c0_44, %c0_45] : memref<9x128x128xbf16, #tpu.memory_space<vmem>>, vector<1x128x128xbf16>
    %47 = vector.shape_cast %46 : vector<1x128x128xbf16> to vector<128x128xbf16>
    %cst_46 = arith.constant dense<0.000000e+00> : vector<32x128xf32>
    %48 = tpu.matmul %45, %47, %cst_46 {dimension_numbers = #tpu.dot_dimension_numbers<[1], [0], [0], [1], [0, 0, 1, 1], [], []>} : vector<32x128xbf16>, vector<128x128xbf16>, vector<32x128xf32> -> vector<32x128xf32>
    %49 = arith.addf %42, %48 : vector<32x128xf32>
    %c0_47 = arith.constant 0 : index
    %c40 = arith.constant 40 : index
    %c0_48 = arith.constant 0 : index
    %c0_49 = arith.constant 0 : index
    %50 = vector.load %arg1[%c0_47, %c40, %c0_48, %c0_49] : memref<1x80x9x128xbf16, #tpu.memory_space<vmem>>, vector<1x4x8x128xbf16>
    %51 = vector.shape_cast %50 : vector<1x4x8x128xbf16> to vector<4x8x128xbf16>
    %52 = vector.shape_cast %51 : vector<4x8x128xbf16> to vector<32x128xbf16>
    %c6 = arith.constant 6 : index
    %c0_50 = arith.constant 0 : index
    %c0_51 = arith.constant 0 : index
    %53 = vector.load %arg2[%c6, %c0_50, %c0_51] : memref<9x128x128xbf16, #tpu.memory_space<vmem>>, vector<1x128x128xbf16>
    %54 = vector.shape_cast %53 : vector<1x128x128xbf16> to vector<128x128xbf16>
    %cst_52 = arith.constant dense<0.000000e+00> : vector<32x128xf32>
    %55 = tpu.matmul %52, %54, %cst_52 {dimension_numbers = #tpu.dot_dimension_numbers<[1], [0], [0], [1], [0, 0, 1, 1], [], []>} : vector<32x128xbf16>, vector<128x128xbf16>, vector<32x128xf32> -> vector<32x128xf32>
    %56 = arith.addf %49, %55 : vector<32x128xf32>
    %c0_53 = arith.constant 0 : index
    %c45 = arith.constant 45 : index
    %c0_54 = arith.constant 0 : index
    %c0_55 = arith.constant 0 : index
    %57 = vector.load %arg1[%c0_53, %c45, %c0_54, %c0_55] : memref<1x80x9x128xbf16, #tpu.memory_space<vmem>>, vector<1x4x8x128xbf16>
    %58 = vector.shape_cast %57 : vector<1x4x8x128xbf16> to vector<4x8x128xbf16>
    %59 = vector.shape_cast %58 : vector<4x8x128xbf16> to vector<32x128xbf16>
    %c7 = arith.constant 7 : index
    %c0_56 = arith.constant 0 : index
    %c0_57 = arith.constant 0 : index
    %60 = vector.load %arg2[%c7, %c0_56, %c0_57] : memref<9x128x128xbf16, #tpu.memory_space<vmem>>, vector<1x128x128xbf16>
    %61 = vector.shape_cast %60 : vector<1x128x128xbf16> to vector<128x128xbf16>
    %cst_58 = arith.constant dense<0.000000e+00> : vector<32x128xf32>
    %62 = tpu.matmul %59, %61, %cst_58 {dimension_numbers = #tpu.dot_dimension_numbers<[1], [0], [0], [1], [0, 0, 1, 1], [], []>} : vector<32x128xbf16>, vector<128x128xbf16>, vector<32x128xf32> -> vector<32x128xf32>
    %63 = arith.addf %56, %62 : vector<32x128xf32>
    %c0_59 = arith.constant 0 : index
    %c50 = arith.constant 50 : index
    %c0_60 = arith.constant 0 : index
    %c0_61 = arith.constant 0 : index
    %64 = vector.load %arg1[%c0_59, %c50, %c0_60, %c0_61] : memref<1x80x9x128xbf16, #tpu.memory_space<vmem>>, vector<1x4x8x128xbf16>
    %65 = vector.shape_cast %64 : vector<1x4x8x128xbf16> to vector<4x8x128xbf16>
    %66 = vector.shape_cast %65 : vector<4x8x128xbf16> to vector<32x128xbf16>
    %c8 = arith.constant 8 : index
    %c0_62 = arith.constant 0 : index
    %c0_63 = arith.constant 0 : index
    %67 = vector.load %arg2[%c8, %c0_62, %c0_63] : memref<9x128x128xbf16, #tpu.memory_space<vmem>>, vector<1x128x128xbf16>
    %68 = vector.shape_cast %67 : vector<1x128x128xbf16> to vector<128x128xbf16>
    %cst_64 = arith.constant dense<0.000000e+00> : vector<32x128xf32>
    %69 = tpu.matmul %66, %68, %cst_64 {dimension_numbers = #tpu.dot_dimension_numbers<[1], [0], [0], [1], [0, 0, 1, 1], [], []>} : vector<32x128xbf16>, vector<128x128xbf16>, vector<32x128xf32> -> vector<32x128xf32>
    %70 = arith.addf %63, %69 : vector<32x128xf32>
    %71 = vector.shape_cast %70 : vector<32x128xf32> to vector<4x8x128xf32>
    %c0_65 = arith.constant 0 : index
    %c0_66 = arith.constant 0 : index
    %c0_67 = arith.constant 0 : index
    %c0_68 = arith.constant 0 : index
    %72 = vector.load %arg6[%c0_65, %c0_66, %c0_67, %c0_68] : memref<1x16x8x128xf32, #tpu.memory_space<vmem>>, vector<1x4x8x128xf32>
    %73 = vector.shape_cast %72 : vector<1x4x8x128xf32> to vector<4x8x128xf32>
    %74 = vector.shape_cast %71 : vector<4x8x128xf32> to vector<1x4x8x128xf32>
    tpu.vector_store %arg6[%c0_65, %c0_66, %c0_67, %c0_68], %74 {strides = array<i32>} : memref<1x16x8x128xf32, #tpu.memory_space<vmem>>, vector<1x4x8x128xf32>,
    %75 = vector.extract_strided_slice %71 {offsets = [0, 0, 0], sizes = [4, 4, 128], strides = [1, 1, 1]} : vector<4x8x128xf32> to vector<4x4x128xf32>
    %cst_69 = arith.constant 0.000000e+00 : f32
    %76 = vector.broadcast %cst_69 : f32 to vector<4x4x128xf32>
    %77 = arith.maximumf %75, %76 : vector<4x4x128xf32>
    %78 = arith.truncf %77 : vector<4x4x128xf32> to vector<4x4x128xbf16>
    %c15_70 = arith.constant 15 : index
    %c0_71 = arith.constant 0 : index
    %c0_72 = arith.constant 0 : index
    %79 = vector.load %arg8[%c15_70, %c0_71, %c0_72] : memref<20x9x128xbf16, #tpu.memory_space<vmem>>, vector<4x4x128xbf16>
    tpu.vector_store %arg8[%c15_70, %c0_71, %c0_72], %78 {strides = array<i32>} : memref<20x9x128xbf16, #tpu.memory_space<vmem>>, vector<4x4x128xbf16>,
    %cst_73 = arith.constant 0.000000e+00 : bf16
    %80 = vector.broadcast %cst_73 : bf16 to vector<1x9x128xbf16>
    %c14 = arith.constant 14 : index
    %c0_74 = arith.constant 0 : index
    %c0_75 = arith.constant 0 : index
    %81 = vector.load %arg8[%c14, %c0_74, %c0_75] : memref<20x9x128xbf16, #tpu.memory_space<vmem>>, vector<1x9x128xbf16>
    tpu.vector_store %arg8[%c14, %c0_74, %c0_75], %80 {strides = array<i32>} : memref<20x9x128xbf16, #tpu.memory_space<vmem>>, vector<1x9x128xbf16>,
    %cst_76 = arith.constant 0.000000e+00 : bf16
    %82 = vector.broadcast %cst_76 : bf16 to vector<4x1x128xbf16>
    %c10_77 = arith.constant 10 : index
    %c0_78 = arith.constant 0 : index
    %c0_79 = arith.constant 0 : index
    %83 = vector.load %arg8[%c10_77, %c0_78, %c0_79] : memref<20x9x128xbf16, #tpu.memory_space<vmem>>, vector<4x1x128xbf16>
    tpu.vector_store %arg8[%c10_77, %c0_78, %c0_79], %82 {strides = array<i32>} : memref<20x9x128xbf16, #tpu.memory_space<vmem>>, vector<4x1x128xbf16>,
    %cst_80 = arith.constant 0.000000e+00 : bf16
    %84 = vector.broadcast %cst_80 : bf16 to vector<4x4x128xbf16>
    %c10_81 = arith.constant 10 : index
    %c5_82 = arith.constant 5 : index
    %c0_83 = arith.constant 0 : index
    %85 = vector.load %arg8[%c10_81, %c5_82, %c0_83] : memref<20x9x128xbf16, #tpu.memory_space<vmem>>, vector<4x4x128xbf16>
    tpu.vector_store %arg8[%c10_81, %c5_82, %c0_83], %84 {strides = array<i32>} : memref<20x9x128xbf16, #tpu.memory_space<vmem>>, vector<4x4x128xbf16>,
    %86 = vector.shape_cast %0 : vector<1x128xf32> to vector<1x128xf32>
    %87 = vector.broadcast %86 : vector<1x128xf32> to vector<32x128xf32>
    %c0_84 = arith.constant 0 : index
    %c10_85 = arith.constant 10 : index
    %c0_86 = arith.constant 0 : index
    %c0_87 = arith.constant 0 : index
    %88 = vector.load %arg1[%c0_84, %c10_85, %c0_86, %c0_87] : memref<1x80x9x128xbf16, #tpu.memory_space<vmem>>, vector<1x4x8x128xbf16>
    %89 = vector.shape_cast %88 : vector<1x4x8x128xbf16> to vector<4x8x128xbf16>
    %90 = vector.shape_cast %89 : vector<4x8x128xbf16> to vector<32x128xbf16>
    %c0_88 = arith.constant 0 : index
    %c0_89 = arith.constant 0 : index
    %c0_90 = arith.constant 0 : index
    %91 = vector.load %arg2[%c0_88, %c0_89, %c0_90] : memref<9x128x128xbf16, #tpu.memory_space<vmem>>, vector<1x128x128xbf16>
    %92 = vector.shape_cast %91 : vector<1x128x128xbf16> to vector<128x128xbf16>
    %cst_91 = arith.constant dense<0.000000e+00> : vector<32x128xf32>
    %93 = tpu.matmul %90, %92, %cst_91 {dimension_numbers = #tpu.dot_dimension_numbers<[1], [0], [0], [1], [0, 0, 1, 1], [], []>} : vector<32x128xbf16>, vector<128x128xbf16>, vector<32x128xf32> -> vector<32x128xf32>
    %94 = arith.addf %87, %93 : vector<32x128xf32>
    %c0_92 = arith.constant 0 : index
    %c15_93 = arith.constant 15 : index
    %c0_94 = arith.constant 0 : index
    %c0_95 = arith.constant 0 : index
    %95 = vector.load %arg1[%c0_92, %c15_93, %c0_94, %c0_95] : memref<1x80x9x128xbf16, #tpu.memory_space<vmem>>, vector<1x4x8x128xbf16>
    %96 = vector.shape_cast %95 : vector<1x4x8x128xbf16> to vector<4x8x128xbf16>
    %97 = vector.shape_cast %96 : vector<4x8x128xbf16> to vector<32x128xbf16>
    %c1_96 = arith.constant 1 : index
    %c0_97 = arith.constant 0 : index
    %c0_98 = arith.constant 0 : index
    %98 = vector.load %arg2[%c1_96, %c0_97, %c0_98] : memref<9x128x128xbf16, #tpu.memory_space<vmem>>, vector<1x128x128xbf16>
    %99 = vector.shape_cast %98 : vector<1x128x128xbf16> to vector<128x128xbf16>
    %cst_99 = arith.constant dense<0.000000e+00> : vector<32x128xf32>
    %100 = tpu.matmul %97, %99, %cst_99 {dimension_numbers = #tpu.dot_dimension_numbers<[1], [0], [0], [1], [0, 0, 1, 1], [], []>} : vector<32x128xbf16>, vector<128x128xbf16>, vector<32x128xf32> -> vector<32x128xf32>
    %101 = arith.addf %94, %100 : vector<32x128xf32>
    %c0_100 = arith.constant 0 : index
    %c0_101 = arith.constant 0 : index
    %c1_102 = arith.constant 1 : index
    %c0_103 = arith.constant 0 : index
    %102 = vector.load %arg1[%c0_100, %c0_101, %c1_102, %c0_103] : memref<1x80x9x128xbf16, #tpu.memory_space<vmem>>, vector<1x4x8x128xbf16>
    %103 = vector.shape_cast %102 : vector<1x4x8x128xbf16> to vector<4x8x128xbf16>
    %104 = vector.shape_cast %103 : vector<4x8x128xbf16> to vector<32x128xbf16>
    %c2_104 = arith.constant 2 : index
    %c0_105 = arith.constant 0 : index
    %c0_106 = arith.constant 0 : index
    %105 = vector.load %arg2[%c2_104, %c0_105, %c0_106] : memref<9x128x128xbf16, #tpu.memory_space<vmem>>, vector<1x128x128xbf16>
    %106 = vector.shape_cast %105 : vector<1x128x128xbf16> to vector<128x128xbf16>
    %cst_107 = arith.constant dense<0.000000e+00> : vector<32x128xf32>
    %107 = tpu.matmul %104, %106, %cst_107 {dimension_numbers = #tpu.dot_dimension_numbers<[1], [0], [0], [1], [0, 0, 1, 1], [], []>} : vector<32x128xbf16>, vector<128x128xbf16>, vector<32x128xf32> -> vector<32x128xf32>
    %108 = arith.addf %101, %107 : vector<32x128xf32>
    %c0_108 = arith.constant 0 : index
    %c30_109 = arith.constant 30 : index
    %c0_110 = arith.constant 0 : index
    %c0_111 = arith.constant 0 : index
    %109 = vector.load %arg1[%c0_108, %c30_109, %c0_110, %c0_111] : memref<1x80x9x128xbf16, #tpu.memory_space<vmem>>, vector<1x4x8x128xbf16>
    %110 = vector.shape_cast %109 : vector<1x4x8x128xbf16> to vector<4x8x128xbf16>
    %111 = vector.shape_cast %110 : vector<4x8x128xbf16> to vector<32x128xbf16>
    %c3_112 = arith.constant 3 : index
    %c0_113 = arith.constant 0 : index
    %c0_114 = arith.constant 0 : index
    %112 = vector.load %arg2[%c3_112, %c0_113, %c0_114] : memref<9x128x128xbf16, #tpu.memory_space<vmem>>, vector<1x128x128xbf16>
    %113 = vector.shape_cast %112 : vector<1x128x128xbf16> to vector<128x128xbf16>
    %cst_115 = arith.constant dense<0.000000e+00> : vector<32x128xf32>
    %114 = tpu.matmul %111, %113, %cst_115 {dimension_numbers = #tpu.dot_dimension_numbers<[1], [0], [0], [1], [0, 0, 1, 1], [], []>} : vector<32x128xbf16>, vector<128x128xbf16>, vector<32x128xf32> -> vector<32x128xf32>
    %115 = arith.addf %108, %114 : vector<32x128xf32>
    %c0_116 = arith.constant 0 : index
    %c35 = arith.constant 35 : index
    %c0_117 = arith.constant 0 : index
    %c0_118 = arith.constant 0 : index
    %116 = vector.load %arg1[%c0_116, %c35, %c0_117, %c0_118] : memref<1x80x9x128xbf16, #tpu.memory_space<vmem>>, vector<1x4x8x128xbf16>
    %117 = vector.shape_cast %116 : vector<1x4x8x128xbf16> to vector<4x8x128xbf16>
    %118 = vector.shape_cast %117 : vector<4x8x128xbf16> to vector<32x128xbf16>
    %c4_119 = arith.constant 4 : index
    %c0_120 = arith.constant 0 : index
    %c0_121 = arith.constant 0 : index
    %119 = vector.load %arg2[%c4_119, %c0_120, %c0_121] : memref<9x128x128xbf16, #tpu.memory_space<vmem>>, vector<1x128x128xbf16>
    %120 = vector.shape_cast %119 : vector<1x128x128xbf16> to vector<128x128xbf16>
    %cst_122 = arith.constant dense<0.000000e+00> : vector<32x128xf32>
    %121 = tpu.matmul %118, %120, %cst_122 {dimension_numbers = #tpu.dot_dimension_numbers<[1], [0], [0], [1], [0, 0, 1, 1], [], []>} : vector<32x128xbf16>, vector<128x128xbf16>, vector<32x128xf32> -> vector<32x128xf32>
    %122 = arith.addf %115, %121 : vector<32x128xf32>
    %c0_123 = arith.constant 0 : index
    %c20_124 = arith.constant 20 : index
    %c1_125 = arith.constant 1 : index
    %c0_126 = arith.constant 0 : index
    %123 = vector.load %arg1[%c0_123, %c20_124, %c1_125, %c0_126] : memref<1x80x9x128xbf16, #tpu.memory_space<vmem>>, vector<1x4x8x128xbf16>
    %124 = vector.shape_cast %123 : vector<1x4x8x128xbf16> to vector<4x8x128xbf16>
    %125 = vector.shape_cast %124 : vector<4x8x128xbf16> to vector<32x128xbf16>
    %c5_127 = arith.constant 5 : index
    %c0_128 = arith.constant 0 : index
    %c0_129 = arith.constant 0 : index
    %126 = vector.load %arg2[%c5_127, %c0_128, %c0_129] : memref<9x128x128xbf16, #tpu.memory_space<vmem>>, vector<1x128x128xbf16>
    %127 = vector.shape_cast %126 : vector<1x128x128xbf16> to vector<128x128xbf16>
    %cst_130 = arith.constant dense<0.000000e+00> : vector<32x128xf32>
    %128 = tpu.matmul %125, %127, %cst_130 {dimension_numbers = #tpu.dot_dimension_numbers<[1], [0], [0], [1], [0, 0, 1, 1], [], []>} : vector<32x128xbf16>, vector<128x128xbf16>, vector<32x128xf32> -> vector<32x128xf32>
    %129 = arith.addf %122, %128 : vector<32x128xf32>
    %c0_131 = arith.constant 0 : index
    %c50_132 = arith.constant 50 : index
    %c0_133 = arith.constant 0 : index
    %c0_134 = arith.constant 0 : index
    %130 = vector.load %arg1[%c0_131, %c50_132, %c0_133, %c0_134] : memref<1x80x9x128xbf16, #tpu.memory_space<vmem>>, vector<1x4x8x128xbf16>
    %131 = vector.shape_cast %130 : vector<1x4x8x128xbf16> to vector<4x8x128xbf16>
    %132 = vector.shape_cast %131 : vector<4x8x128xbf16> to vector<32x128xbf16>
    %c6_135 = arith.constant 6 : index
    %c0_136 = arith.constant 0 : index
    %c0_137 = arith.constant 0 : index
    %133 = vector.load %arg2[%c6_135, %c0_136, %c0_137] : memref<9x128x128xbf16, #tpu.memory_space<vmem>>, vector<1x128x128xbf16>
    %134 = vector.shape_cast %133 : vector<1x128x128xbf16> to vector<128x128xbf16>
    %cst_138 = arith.constant dense<0.000000e+00> : vector<32x128xf32>
    %135 = tpu.matmul %132, %134, %cst_138 {dimension_numbers = #tpu.dot_dimension_numbers<[1], [0], [0], [1], [0, 0, 1, 1], [], []>} : vector<32x128xbf16>, vector<128x128xbf16>, vector<32x128xf32> -> vector<32x128xf32>
    %136 = arith.addf %129, %135 : vector<32x128xf32>
    %c0_139 = arith.constant 0 : index
    %c55 = arith.constant 55 : index
    %c0_140 = arith.constant 0 : index
    %c0_141 = arith.constant 0 : index
    %137 = vector.load %arg1[%c0_139, %c55, %c0_140, %c0_141] : memref<1x80x9x128xbf16, #tpu.memory_space<vmem>>, vector<1x4x8x128xbf16>
    %138 = vector.shape_cast %137 : vector<1x4x8x128xbf16> to vector<4x8x128xbf16>
    %139 = vector.shape_cast %138 : vector<4x8x128xbf16> to vector<32x128xbf16>
    %c7_142 = arith.constant 7 : index
    %c0_143 = arith.constant 0 : index
    %c0_144 = arith.constant 0 : index
    %140 = vector.load %arg2[%c7_142, %c0_143, %c0_144] : memref<9x128x128xbf16, #tpu.memory_space<vmem>>, vector<1x128x128xbf16>
    %141 = vector.shape_cast %140 : vector<1x128x128xbf16> to vector<128x128xbf16>
    %cst_145 = arith.constant dense<0.000000e+00> : vector<32x128xf32>
    %142 = tpu.matmul %139, %141, %cst_145 {dimension_numbers = #tpu.dot_dimension_numbers<[1], [0], [0], [1], [0, 0, 1, 1], [], []>} : vector<32x128xbf16>, vector<128x128xbf16>, vector<32x128xf32> -> vector<32x128xf32>
    %143 = arith.addf %136, %142 : vector<32x128xf32>
    %c0_146 = arith.constant 0 : index
    %c40_147 = arith.constant 40 : index
    %c1_148 = arith.constant 1 : index
    %c0_149 = arith.constant 0 : index
    %144 = vector.load %arg1[%c0_146, %c40_147, %c1_148, %c0_149] : memref<1x80x9x128xbf16, #tpu.memory_space<vmem>>, vector<1x4x8x128xbf16>
    %145 = vector.shape_cast %144 : vector<1x4x8x128xbf16> to vector<4x8x128xbf16>
    %146 = vector.shape_cast %145 : vector<4x8x128xbf16> to vector<32x128xbf16>
    %c8_150 = arith.constant 8 : index
    %c0_151 = arith.constant 0 : index
    %c0_152 = arith.constant 0 : index
    %147 = vector.load %arg2[%c8_150, %c0_151, %c0_152] : memref<9x128x128xbf16, #tpu.memory_space<vmem>>, vector<1x128x128xbf16>
    %148 = vector.shape_cast %147 : vector<1x128x128xbf16> to vector<128x128xbf16>
    %cst_153 = arith.constant dense<0.000000e+00> : vector<32x128xf32>
    %149 = tpu.matmul %146, %148, %cst_153 {dimension_numbers = #tpu.dot_dimension_numbers<[1], [0], [0], [1], [0, 0, 1, 1], [], []>} : vector<32x128xbf16>, vector<128x128xbf16>, vector<32x128xf32> -> vector<32x128xf32>
    %150 = arith.addf %143, %149 : vector<32x128xf32>
    %151 = vector.shape_cast %150 : vector<32x128xf32> to vector<4x8x128xf32>
    %c0_154 = arith.constant 0 : index
    %c4_155 = arith.constant 4 : index
    %c0_156 = arith.constant 0 : index
    %c0_157 = arith.constant 0 : index
    %152 = vector.load %arg6[%c0_154, %c4_155, %c0_156, %c0_157] : memref<1x16x8x128xf32, #tpu.memory_space<vmem>>, vector<1x4x8x128xf32>
    %153 = vector.shape_cast %152 : vector<1x4x8x128xf32> to vector<4x8x128xf32>
    %154 = vector.shape_cast %151 : vector<4x8x128xf32> to vector<1x4x8x128xf32>
    tpu.vector_store %arg6[%c0_154, %c4_155, %c0_156, %c0_157], %154 {strides = array<i32>} : memref<1x16x8x128xf32, #tpu.memory_space<vmem>>, vector<1x4x8x128xf32>,
    %155 = vector.extract_strided_slice %151 {offsets = [0, 0, 0], sizes = [4, 4, 128], strides = [1, 1, 1]} : vector<4x8x128xf32> to vector<4x4x128xf32>
    %cst_158 = arith.constant 0.000000e+00 : f32
    %156 = vector.broadcast %cst_158 : f32 to vector<4x4x128xf32>
    %157 = arith.maximumf %155, %156 : vector<4x4x128xf32>
    %158 = arith.truncf %157 : vector<4x4x128xf32> to vector<4x4x128xbf16>
    %c10_159 = arith.constant 10 : index
    %c1_160 = arith.constant 1 : index
    %c0_161 = arith.constant 0 : index
    %159 = vector.load %arg8[%c10_159, %c1_160, %c0_161] : memref<20x9x128xbf16, #tpu.memory_space<vmem>>, vector<4x4x128xbf16>
    tpu.vector_store %arg8[%c10_159, %c1_160, %c0_161], %158 {strides = array<i32>} : memref<20x9x128xbf16, #tpu.memory_space<vmem>>, vector<4x4x128xbf16>,
    %cst_162 = arith.constant 0.000000e+00 : bf16
    %160 = vector.broadcast %cst_162 : bf16 to vector<1x9x128xbf16>
    %c5_163 = arith.constant 5 : index
    %c0_164 = arith.constant 0 : index
    %c0_165 = arith.constant 0 : index
    %161 = vector.load %arg8[%c5_163, %c0_164, %c0_165] : memref<20x9x128xbf16, #tpu.memory_space<vmem>>, vector<1x9x128xbf16>
    tpu.vector_store %arg8[%c5_163, %c0_164, %c0_165], %160 {strides = array<i32>} : memref<20x9x128xbf16, #tpu.memory_space<vmem>>, vector<1x9x128xbf16>,
    %cst_166 = arith.constant 0.000000e+00 : bf16
    %162 = vector.broadcast %cst_166 : bf16 to vector<4x5x128xbf16>
    %c6_167 = arith.constant 6 : index
    %c4_168 = arith.constant 4 : index
    %c0_169 = arith.constant 0 : index
    %163 = vector.load %arg8[%c6_167, %c4_168, %c0_169] : memref<20x9x128xbf16, #tpu.memory_space<vmem>>, vector<4x5x128xbf16>
    tpu.vector_store %arg8[%c6_167, %c4_168, %c0_169], %162 {strides = array<i32>} : memref<20x9x128xbf16, #tpu.memory_space<vmem>>, vector<4x5x128xbf16>,
    %164 = vector.shape_cast %0 : vector<1x128xf32> to vector<1x128xf32>
    %165 = vector.broadcast %164 : vector<1x128xf32> to vector<32x128xf32>
    %c0_170 = arith.constant 0 : index
    %c40_171 = arith.constant 40 : index
    %c0_172 = arith.constant 0 : index
    %c0_173 = arith.constant 0 : index
    %166 = vector.load %arg1[%c0_170, %c40_171, %c0_172, %c0_173] : memref<1x80x9x128xbf16, #tpu.memory_space<vmem>>, vector<1x4x8x128xbf16>
    %167 = vector.shape_cast %166 : vector<1x4x8x128xbf16> to vector<4x8x128xbf16>
    %168 = vector.shape_cast %167 : vector<4x8x128xbf16> to vector<32x128xbf16>
    %c0_174 = arith.constant 0 : index
    %c0_175 = arith.constant 0 : index
    %c0_176 = arith.constant 0 : index
    %169 = vector.load %arg2[%c0_174, %c0_175, %c0_176] : memref<9x128x128xbf16, #tpu.memory_space<vmem>>, vector<1x128x128xbf16>
    %170 = vector.shape_cast %169 : vector<1x128x128xbf16> to vector<128x128xbf16>
    %cst_177 = arith.constant dense<0.000000e+00> : vector<32x128xf32>
    %171 = tpu.matmul %168, %170, %cst_177 {dimension_numbers = #tpu.dot_dimension_numbers<[1], [0], [0], [1], [0, 0, 1, 1], [], []>} : vector<32x128xbf16>, vector<128x128xbf16>, vector<32x128xf32> -> vector<32x128xf32>
    %172 = arith.addf %165, %171 : vector<32x128xf32>
    %c0_178 = arith.constant 0 : index
    %c45_179 = arith.constant 45 : index
    %c0_180 = arith.constant 0 : index
    %c0_181 = arith.constant 0 : index
    %173 = vector.load %arg1[%c0_178, %c45_179, %c0_180, %c0_181] : memref<1x80x9x128xbf16, #tpu.memory_space<vmem>>, vector<1x4x8x128xbf16>
    %174 = vector.shape_cast %173 : vector<1x4x8x128xbf16> to vector<4x8x128xbf16>
    %175 = vector.shape_cast %174 : vector<4x8x128xbf16> to vector<32x128xbf16>
    %c1_182 = arith.constant 1 : index
    %c0_183 = arith.constant 0 : index
    %c0_184 = arith.constant 0 : index
    %176 = vector.load %arg2[%c1_182, %c0_183, %c0_184] : memref<9x128x128xbf16, #tpu.memory_space<vmem>>, vector<1x128x128xbf16>
    %177 = vector.shape_cast %176 : vector<1x128x128xbf16> to vector<128x128xbf16>
    %cst_185 = arith.constant dense<0.000000e+00> : vector<32x128xf32>
    %178 = tpu.matmul %175, %177, %cst_185 {dimension_numbers = #tpu.dot_dimension_numbers<[1], [0], [0], [1], [0, 0, 1, 1], [], []>} : vector<32x128xbf16>, vector<128x128xbf16>, vector<32x128xf32> -> vector<32x128xf32>
    %179 = arith.addf %172, %178 : vector<32x128xf32>
    %c0_186 = arith.constant 0 : index
    %c50_187 = arith.constant 50 : index
    %c0_188 = arith.constant 0 : index
    %c0_189 = arith.constant 0 : index
    %180 = vector.load %arg1[%c0_186, %c50_187, %c0_188, %c0_189] : memref<1x80x9x128xbf16, #tpu.memory_space<vmem>>, vector<1x4x8x128xbf16>
    %181 = vector.shape_cast %180 : vector<1x4x8x128xbf16> to vector<4x8x128xbf16>
    %182 = vector.shape_cast %181 : vector<4x8x128xbf16> to vector<32x128xbf16>
    %c2_190 = arith.constant 2 : index
    %c0_191 = arith.constant 0 : index
    %c0_192 = arith.constant 0 : index
    %183 = vector.load %arg2[%c2_190, %c0_191, %c0_192] : memref<9x128x128xbf16, #tpu.memory_space<vmem>>, vector<1x128x128xbf16>
    %184 = vector.shape_cast %183 : vector<1x128x128xbf16> to vector<128x128xbf16>
    %cst_193 = arith.constant dense<0.000000e+00> : vector<32x128xf32>
    %185 = tpu.matmul %182, %184, %cst_193 {dimension_numbers = #tpu.dot_dimension_numbers<[1], [0], [0], [1], [0, 0, 1, 1], [], []>} : vector<32x128xbf16>, vector<128x128xbf16>, vector<32x128xf32> -> vector<32x128xf32>
    %186 = arith.addf %179, %185 : vector<32x128xf32>
    %c0_194 = arith.constant 0 : index
    %c60 = arith.constant 60 : index
    %c0_195 = arith.constant 0 : index
    %c0_196 = arith.constant 0 : index
    %187 = vector.load %arg1[%c0_194, %c60, %c0_195, %c0_196] : memref<1x80x9x128xbf16, #tpu.memory_space<vmem>>, vector<1x4x8x128xbf16>
    %188 = vector.shape_cast %187 : vector<1x4x8x128xbf16> to vector<4x8x128xbf16>
    %189 = vector.shape_cast %188 : vector<4x8x128xbf16> to vector<32x128xbf16>
    %c3_197 = arith.constant 3 : index
    %c0_198 = arith.constant 0 : index
    %c0_199 = arith.constant 0 : index
    %190 = vector.load %arg2[%c3_197, %c0_198, %c0_199] : memref<9x128x128xbf16, #tpu.memory_space<vmem>>, vector<1x128x128xbf16>
    %191 = vector.shape_cast %190 : vector<1x128x128xbf16> to vector<128x128xbf16>
    %cst_200 = arith.constant dense<0.000000e+00> : vector<32x128xf32>
    %192 = tpu.matmul %189, %191, %cst_200 {dimension_numbers = #tpu.dot_dimension_numbers<[1], [0], [0], [1], [0, 0, 1, 1], [], []>} : vector<32x128xbf16>, vector<128x128xbf16>, vector<32x128xf32> -> vector<32x128xf32>
    %193 = arith.addf %186, %192 : vector<32x128xf32>
    %c0_201 = arith.constant 0 : index
    %c65 = arith.constant 65 : index
    %c0_202 = arith.constant 0 : index
    %c0_203 = arith.constant 0 : index
    %194 = vector.load %arg1[%c0_201, %c65, %c0_202, %c0_203] : memref<1x80x9x128xbf16, #tpu.memory_space<vmem>>, vector<1x4x8x128xbf16>
    %195 = vector.shape_cast %194 : vector<1x4x8x128xbf16> to vector<4x8x128xbf16>
    %196 = vector.shape_cast %195 : vector<4x8x128xbf16> to vector<32x128xbf16>
    %c4_204 = arith.constant 4 : index
    %c0_205 = arith.constant 0 : index
    %c0_206 = arith.constant 0 : index
    %197 = vector.load %arg2[%c4_204, %c0_205, %c0_206] : memref<9x128x128xbf16, #tpu.memory_space<vmem>>, vector<1x128x128xbf16>
    %198 = vector.shape_cast %197 : vector<1x128x128xbf16> to vector<128x128xbf16>
    %cst_207 = arith.constant dense<0.000000e+00> : vector<32x128xf32>
    %199 = tpu.matmul %196, %198, %cst_207 {dimension_numbers = #tpu.dot_dimension_numbers<[1], [0], [0], [1], [0, 0, 1, 1], [], []>} : vector<32x128xbf16>, vector<128x128xbf16>, vector<32x128xf32> -> vector<32x128xf32>
    %200 = arith.addf %193, %199 : vector<32x128xf32>
    %c0_208 = arith.constant 0 : index
    %c70 = arith.constant 70 : index
    %c0_209 = arith.constant 0 : index
    %c0_210 = arith.constant 0 : index
    %201 = vector.load %arg1[%c0_208, %c70, %c0_209, %c0_210] : memref<1x80x9x128xbf16, #tpu.memory_space<vmem>>, vector<1x4x8x128xbf16>
    %202 = vector.shape_cast %201 : vector<1x4x8x128xbf16> to vector<4x8x128xbf16>
    %203 = vector.shape_cast %202 : vector<4x8x128xbf16> to vector<32x128xbf16>
    %c5_211 = arith.constant 5 : index
    %c0_212 = arith.constant 0 : index
    %c0_213 = arith.constant 0 : index
    %204 = vector.load %arg2[%c5_211, %c0_212, %c0_213] : memref<9x128x128xbf16, #tpu.memory_space<vmem>>, vector<1x128x128xbf16>
    %205 = vector.shape_cast %204 : vector<1x128x128xbf16> to vector<128x128xbf16>
    %cst_214 = arith.constant dense<0.000000e+00> : vector<32x128xf32>
    %206 = tpu.matmul %203, %205, %cst_214 {dimension_numbers = #tpu.dot_dimension_numbers<[1], [0], [0], [1], [0, 0, 1, 1], [], []>} : vector<32x128xbf16>, vector<128x128xbf16>, vector<32x128xf32> -> vector<32x128xf32>
    %207 = arith.addf %200, %206 : vector<32x128xf32>
    %c0_215 = arith.constant 0 : index
    %c1_216 = arith.constant 1 : index
    %c0_217 = arith.constant 0 : index
    %c0_218 = arith.constant 0 : index
    %208 = vector.load %arg1[%c0_215, %c1_216, %c0_217, %c0_218] : memref<1x80x9x128xbf16, #tpu.memory_space<vmem>>, vector<1x4x8x128xbf16>
    %209 = vector.shape_cast %208 : vector<1x4x8x128xbf16> to vector<4x8x128xbf16>
    %210 = vector.shape_cast %209 : vector<4x8x128xbf16> to vector<32x128xbf16>
    %c6_219 = arith.constant 6 : index
    %c0_220 = arith.constant 0 : index
    %c0_221 = arith.constant 0 : index
    %211 = vector.load %arg2[%c6_219, %c0_220, %c0_221] : memref<9x128x128xbf16, #tpu.memory_space<vmem>>, vector<1x128x128xbf16>
    %212 = vector.shape_cast %211 : vector<1x128x128xbf16> to vector<128x128xbf16>
    %cst_222 = arith.constant dense<0.000000e+00> : vector<32x128xf32>
    %213 = tpu.matmul %210, %212, %cst_222 {dimension_numbers = #tpu.dot_dimension_numbers<[1], [0], [0], [1], [0, 0, 1, 1], [], []>} : vector<32x128xbf16>, vector<128x128xbf16>, vector<32x128xf32> -> vector<32x128xf32>
    %214 = arith.addf %207, %213 : vector<32x128xf32>
    %c0_223 = arith.constant 0 : index
    %c6_224 = arith.constant 6 : index
    %c0_225 = arith.constant 0 : index
    %c0_226 = arith.constant 0 : index
    %215 = vector.load %arg1[%c0_223, %c6_224, %c0_225, %c0_226] : memref<1x80x9x128xbf16, #tpu.memory_space<vmem>>, vector<1x4x8x128xbf16>
    %216 = vector.shape_cast %215 : vector<1x4x8x128xbf16> to vector<4x8x128xbf16>
    %217 = vector.shape_cast %216 : vector<4x8x128xbf16> to vector<32x128xbf16>
    %c7_227 = arith.constant 7 : index
    %c0_228 = arith.constant 0 : index
    %c0_229 = arith.constant 0 : index
    %218 = vector.load %arg2[%c7_227, %c0_228, %c0_229] : memref<9x128x128xbf16, #tpu.memory_space<vmem>>, vector<1x128x128xbf16>
    %219 = vector.shape_cast %218 : vector<1x128x128xbf16> to vector<128x128xbf16>
    %cst_230 = arith.constant dense<0.000000e+00> : vector<32x128xf32>
    %220 = tpu.matmul %217, %219, %cst_230 {dimension_numbers = #tpu.dot_dimension_numbers<[1], [0], [0], [1], [0, 0, 1, 1], [], []>} : vector<32x128xbf16>, vector<128x128xbf16>, vector<32x128xf32> -> vector<32x128xf32>
    %221 = arith.addf %214, %220 : vector<32x128xf32>
    %c0_231 = arith.constant 0 : index
    %c11 = arith.constant 11 : index
    %c0_232 = arith.constant 0 : index
    %c0_233 = arith.constant 0 : index
    %222 = vector.load %arg1[%c0_231, %c11, %c0_232, %c0_233] : memref<1x80x9x128xbf16, #tpu.memory_space<vmem>>, vector<1x4x8x128xbf16>
    %223 = vector.shape_cast %222 : vector<1x4x8x128xbf16> to vector<4x8x128xbf16>
    %224 = vector.shape_cast %223 : vector<4x8x128xbf16> to vector<32x128xbf16>
    %c8_234 = arith.constant 8 : index
    %c0_235 = arith.constant 0 : index
    %c0_236 = arith.constant 0 : index
    %225 = vector.load %arg2[%c8_234, %c0_235, %c0_236] : memref<9x128x128xbf16, #tpu.memory_space<vmem>>, vector<1x128x128xbf16>
    %226 = vector.shape_cast %225 : vector<1x128x128xbf16> to vector<128x128xbf16>
    %cst_237 = arith.constant dense<0.000000e+00> : vector<32x128xf32>
    %227 = tpu.matmul %224, %226, %cst_237 {dimension_numbers = #tpu.dot_dimension_numbers<[1], [0], [0], [1], [0, 0, 1, 1], [], []>} : vector<32x128xbf16>, vector<128x128xbf16>, vector<32x128xf32> -> vector<32x128xf32>
    %228 = arith.addf %221, %227 : vector<32x128xf32>
    %229 = vector.shape_cast %228 : vector<32x128xf32> to vector<4x8x128xf32>
    %c0_238 = arith.constant 0 : index
    %c8_239 = arith.constant 8 : index
    %c0_240 = arith.constant 0 : index
    %c0_241 = arith.constant 0 : index
    %230 = vector.load %arg6[%c0_238, %c8_239, %c0_240, %c0_241] : memref<1x16x8x128xf32, #tpu.memory_space<vmem>>, vector<1x4x8x128xf32>
    %231 = vector.shape_cast %230 : vector<1x4x8x128xf32> to vector<4x8x128xf32>
    %232 = vector.shape_cast %229 : vector<4x8x128xf32> to vector<1x4x8x128xf32>
    tpu.vector_store %arg6[%c0_238, %c8_239, %c0_240, %c0_241], %232 {strides = array<i32>} : memref<1x16x8x128xf32, #tpu.memory_space<vmem>>, vector<1x4x8x128xf32>,
    %233 = vector.extract_strided_slice %229 {offsets = [0, 0, 0], sizes = [4, 4, 128], strides = [1, 1, 1]} : vector<4x8x128xf32> to vector<4x4x128xf32>
    %cst_242 = arith.constant 0.000000e+00 : f32
    %234 = vector.broadcast %cst_242 : f32 to vector<4x4x128xf32>
    %235 = arith.maximumf %233, %234 : vector<4x4x128xf32>
    %236 = arith.truncf %235 : vector<4x4x128xf32> to vector<4x4x128xbf16>
    %c6_243 = arith.constant 6 : index
    %c0_244 = arith.constant 0 : index
    %c0_245 = arith.constant 0 : index
    %237 = vector.load %arg8[%c6_243, %c0_244, %c0_245] : memref<20x9x128xbf16, #tpu.memory_space<vmem>>, vector<4x4x128xbf16>
    tpu.vector_store %arg8[%c6_243, %c0_244, %c0_245], %236 {strides = array<i32>} : memref<20x9x128xbf16, #tpu.memory_space<vmem>>, vector<4x4x128xbf16>,
    %cst_246 = arith.constant 0.000000e+00 : bf16
    %238 = vector.broadcast %cst_246 : bf16 to vector<1x9x128xbf16>
    %c0_247 = arith.constant 0 : index
    %c0_248 = arith.constant 0 : index
    %c0_249 = arith.constant 0 : index
    %239 = vector.load %arg8[%c0_247, %c0_248, %c0_249] : memref<20x9x128xbf16, #tpu.memory_space<vmem>>, vector<1x9x128xbf16>
    tpu.vector_store %arg8[%c0_247, %c0_248, %c0_249], %238 {strides = array<i32>} : memref<20x9x128xbf16, #tpu.memory_space<vmem>>, vector<1x9x128xbf16>,
    %cst_250 = arith.constant 0.000000e+00 : bf16
    %240 = vector.broadcast %cst_250 : bf16 to vector<4x1x128xbf16>
    %c1_251 = arith.constant 1 : index
    %c0_252 = arith.constant 0 : index
    %c0_253 = arith.constant 0 : index
    %241 = vector.load %arg8[%c1_251, %c0_252, %c0_253] : memref<20x9x128xbf16, #tpu.memory_space<vmem>>, vector<4x1x128xbf16>
    tpu.vector_store %arg8[%c1_251, %c0_252, %c0_253], %240 {strides = array<i32>} : memref<20x9x128xbf16, #tpu.memory_space<vmem>>, vector<4x1x128xbf16>,
    %cst_254 = arith.constant 0.000000e+00 : bf16
    %242 = vector.broadcast %cst_254 : bf16 to vector<4x4x128xbf16>
    %c1_255 = arith.constant 1 : index
    %c5_256 = arith.constant 5 : index
    %c0_257 = arith.constant 0 : index
    %243 = vector.load %arg8[%c1_255, %c5_256, %c0_257] : memref<20x9x128xbf16, #tpu.memory_space<vmem>>, vector<4x4x128xbf16>
    tpu.vector_store %arg8[%c1_255, %c5_256, %c0_257], %242 {strides = array<i32>} : memref<20x9x128xbf16, #tpu.memory_space<vmem>>, vector<4x4x128xbf16>,
    %244 = vector.shape_cast %0 : vector<1x128xf32> to vector<1x128xf32>
    %245 = vector.broadcast %244 : vector<1x128xf32> to vector<32x128xf32>
    %c0_258 = arith.constant 0 : index
    %c50_259 = arith.constant 50 : index
    %c0_260 = arith.constant 0 : index
    %c0_261 = arith.constant 0 : index
    %246 = vector.load %arg1[%c0_258, %c50_259, %c0_260, %c0_261] : memref<1x80x9x128xbf16, #tpu.memory_space<vmem>>, vector<1x4x8x128xbf16>
    %247 = vector.shape_cast %246 : vector<1x4x8x128xbf16> to vector<4x8x128xbf16>
    %248 = vector.shape_cast %247 : vector<4x8x128xbf16> to vector<32x128xbf16>
    %c0_262 = arith.constant 0 : index
    %c0_263 = arith.constant 0 : index
    %c0_264 = arith.constant 0 : index
    %249 = vector.load %arg2[%c0_262, %c0_263, %c0_264] : memref<9x128x128xbf16, #tpu.memory_space<vmem>>, vector<1x128x128xbf16>
    %250 = vector.shape_cast %249 : vector<1x128x128xbf16> to vector<128x128xbf16>
    %cst_265 = arith.constant dense<0.000000e+00> : vector<32x128xf32>
    %251 = tpu.matmul %248, %250, %cst_265 {dimension_numbers = #tpu.dot_dimension_numbers<[1], [0], [0], [1], [0, 0, 1, 1], [], []>} : vector<32x128xbf16>, vector<128x128xbf16>, vector<32x128xf32> -> vector<32x128xf32>
    %252 = arith.addf %245, %251 : vector<32x128xf32>
    %c0_266 = arith.constant 0 : index
    %c55_267 = arith.constant 55 : index
    %c0_268 = arith.constant 0 : index
    %c0_269 = arith.constant 0 : index
    %253 = vector.load %arg1[%c0_266, %c55_267, %c0_268, %c0_269] : memref<1x80x9x128xbf16, #tpu.memory_space<vmem>>, vector<1x4x8x128xbf16>
    %254 = vector.shape_cast %253 : vector<1x4x8x128xbf16> to vector<4x8x128xbf16>
    %255 = vector.shape_cast %254 : vector<4x8x128xbf16> to vector<32x128xbf16>
    %c1_270 = arith.constant 1 : index
    %c0_271 = arith.constant 0 : index
    %c0_272 = arith.constant 0 : index
    %256 = vector.load %arg2[%c1_270, %c0_271, %c0_272] : memref<9x128x128xbf16, #tpu.memory_space<vmem>>, vector<1x128x128xbf16>
    %257 = vector.shape_cast %256 : vector<1x128x128xbf16> to vector<128x128xbf16>
    %cst_273 = arith.constant dense<0.000000e+00> : vector<32x128xf32>
    %258 = tpu.matmul %255, %257, %cst_273 {dimension_numbers = #tpu.dot_dimension_numbers<[1], [0], [0], [1], [0, 0, 1, 1], [], []>} : vector<32x128xbf16>, vector<128x128xbf16>, vector<32x128xf32> -> vector<32x128xf32>
    %259 = arith.addf %252, %258 : vector<32x128xf32>
    %c0_274 = arith.constant 0 : index
    %c40_275 = arith.constant 40 : index
    %c1_276 = arith.constant 1 : index
    %c0_277 = arith.constant 0 : index
    %260 = vector.load %arg1[%c0_274, %c40_275, %c1_276, %c0_277] : memref<1x80x9x128xbf16, #tpu.memory_space<vmem>>, vector<1x4x8x128xbf16>
    %261 = vector.shape_cast %260 : vector<1x4x8x128xbf16> to vector<4x8x128xbf16>
    %262 = vector.shape_cast %261 : vector<4x8x128xbf16> to vector<32x128xbf16>
    %c2_278 = arith.constant 2 : index
    %c0_279 = arith.constant 0 : index
    %c0_280 = arith.constant 0 : index
    %263 = vector.load %arg2[%c2_278, %c0_279, %c0_280] : memref<9x128x128xbf16, #tpu.memory_space<vmem>>, vector<1x128x128xbf16>
    %264 = vector.shape_cast %263 : vector<1x128x128xbf16> to vector<128x128xbf16>
    %cst_281 = arith.constant dense<0.000000e+00> : vector<32x128xf32>
    %265 = tpu.matmul %262, %264, %cst_281 {dimension_numbers = #tpu.dot_dimension_numbers<[1], [0], [0], [1], [0, 0, 1, 1], [], []>} : vector<32x128xbf16>, vector<128x128xbf16>, vector<32x128xf32> -> vector<32x128xf32>
    %266 = arith.addf %259, %265 : vector<32x128xf32>
    %c0_282 = arith.constant 0 : index
    %c70_283 = arith.constant 70 : index
    %c0_284 = arith.constant 0 : index
    %c0_285 = arith.constant 0 : index
    %267 = vector.load %arg1[%c0_282, %c70_283, %c0_284, %c0_285] : memref<1x80x9x128xbf16, #tpu.memory_space<vmem>>, vector<1x4x8x128xbf16>
    %268 = vector.shape_cast %267 : vector<1x4x8x128xbf16> to vector<4x8x128xbf16>
    %269 = vector.shape_cast %268 : vector<4x8x128xbf16> to vector<32x128xbf16>
    %c3_286 = arith.constant 3 : index
    %c0_287 = arith.constant 0 : index
    %c0_288 = arith.constant 0 : index
    %270 = vector.load %arg2[%c3_286, %c0_287, %c0_288] : memref<9x128x128xbf16, #tpu.memory_space<vmem>>, vector<1x128x128xbf16>
    %271 = vector.shape_cast %270 : vector<1x128x128xbf16> to vector<128x128xbf16>
    %cst_289 = arith.constant dense<0.000000e+00> : vector<32x128xf32>
    %272 = tpu.matmul %269, %271, %cst_289 {dimension_numbers = #tpu.dot_dimension_numbers<[1], [0], [0], [1], [0, 0, 1, 1], [], []>} : vector<32x128xbf16>, vector<128x128xbf16>, vector<32x128xf32> -> vector<32x128xf32>
    %273 = arith.addf %266, %272 : vector<32x128xf32>
    %c0_290 = arith.constant 0 : index
    %c75 = arith.constant 75 : index
    %c0_291 = arith.constant 0 : index
    %c0_292 = arith.constant 0 : index
    %274 = vector.load %arg1[%c0_290, %c75, %c0_291, %c0_292] : memref<1x80x9x128xbf16, #tpu.memory_space<vmem>>, vector<1x4x8x128xbf16>
    %275 = vector.shape_cast %274 : vector<1x4x8x128xbf16> to vector<4x8x128xbf16>
    %276 = vector.shape_cast %275 : vector<4x8x128xbf16> to vector<32x128xbf16>
    %c4_293 = arith.constant 4 : index
    %c0_294 = arith.constant 0 : index
    %c0_295 = arith.constant 0 : index
    %277 = vector.load %arg2[%c4_293, %c0_294, %c0_295] : memref<9x128x128xbf16, #tpu.memory_space<vmem>>, vector<1x128x128xbf16>
    %278 = vector.shape_cast %277 : vector<1x128x128xbf16> to vector<128x128xbf16>
    %cst_296 = arith.constant dense<0.000000e+00> : vector<32x128xf32>
    %279 = tpu.matmul %276, %278, %cst_296 {dimension_numbers = #tpu.dot_dimension_numbers<[1], [0], [0], [1], [0, 0, 1, 1], [], []>} : vector<32x128xbf16>, vector<128x128xbf16>, vector<32x128xf32> -> vector<32x128xf32>
    %280 = arith.addf %273, %279 : vector<32x128xf32>
    %c0_297 = arith.constant 0 : index
    %c60_298 = arith.constant 60 : index
    %c1_299 = arith.constant 1 : index
    %c0_300 = arith.constant 0 : index
    %281 = vector.load %arg1[%c0_297, %c60_298, %c1_299, %c0_300] : memref<1x80x9x128xbf16, #tpu.memory_space<vmem>>, vector<1x4x8x128xbf16>
    %282 = vector.shape_cast %281 : vector<1x4x8x128xbf16> to vector<4x8x128xbf16>
    %283 = vector.shape_cast %282 : vector<4x8x128xbf16> to vector<32x128xbf16>
    %c5_301 = arith.constant 5 : index
    %c0_302 = arith.constant 0 : index
    %c0_303 = arith.constant 0 : index
    %284 = vector.load %arg2[%c5_301, %c0_302, %c0_303] : memref<9x128x128xbf16, #tpu.memory_space<vmem>>, vector<1x128x128xbf16>
    %285 = vector.shape_cast %284 : vector<1x128x128xbf16> to vector<128x128xbf16>
    %cst_304 = arith.constant dense<0.000000e+00> : vector<32x128xf32>
    %286 = tpu.matmul %283, %285, %cst_304 {dimension_numbers = #tpu.dot_dimension_numbers<[1], [0], [0], [1], [0, 0, 1, 1], [], []>} : vector<32x128xbf16>, vector<128x128xbf16>, vector<32x128xf32> -> vector<32x128xf32>
    %287 = arith.addf %280, %286 : vector<32x128xf32>
    %c0_305 = arith.constant 0 : index
    %c11_306 = arith.constant 11 : index
    %c0_307 = arith.constant 0 : index
    %c0_308 = arith.constant 0 : index
    %288 = vector.load %arg1[%c0_305, %c11_306, %c0_307, %c0_308] : memref<1x80x9x128xbf16, #tpu.memory_space<vmem>>, vector<1x4x8x128xbf16>
    %289 = vector.shape_cast %288 : vector<1x4x8x128xbf16> to vector<4x8x128xbf16>
    %290 = vector.shape_cast %289 : vector<4x8x128xbf16> to vector<32x128xbf16>
    %c6_309 = arith.constant 6 : index
    %c0_310 = arith.constant 0 : index
    %c0_311 = arith.constant 0 : index
    %291 = vector.load %arg2[%c6_309, %c0_310, %c0_311] : memref<9x128x128xbf16, #tpu.memory_space<vmem>>, vector<1x128x128xbf16>
    %292 = vector.shape_cast %291 : vector<1x128x128xbf16> to vector<128x128xbf16>
    %cst_312 = arith.constant dense<0.000000e+00> : vector<32x128xf32>
    %293 = tpu.matmul %290, %292, %cst_312 {dimension_numbers = #tpu.dot_dimension_numbers<[1], [0], [0], [1], [0, 0, 1, 1], [], []>} : vector<32x128xbf16>, vector<128x128xbf16>, vector<32x128xf32> -> vector<32x128xf32>
    %294 = arith.addf %287, %293 : vector<32x128xf32>
    %c0_313 = arith.constant 0 : index
    %c16 = arith.constant 16 : index
    %c0_314 = arith.constant 0 : index
    %c0_315 = arith.constant 0 : index
    %295 = vector.load %arg1[%c0_313, %c16, %c0_314, %c0_315] : memref<1x80x9x128xbf16, #tpu.memory_space<vmem>>, vector<1x4x8x128xbf16>
    %296 = vector.shape_cast %295 : vector<1x4x8x128xbf16> to vector<4x8x128xbf16>
    %297 = vector.shape_cast %296 : vector<4x8x128xbf16> to vector<32x128xbf16>
    %c7_316 = arith.constant 7 : index
    %c0_317 = arith.constant 0 : index
    %c0_318 = arith.constant 0 : index
    %298 = vector.load %arg2[%c7_316, %c0_317, %c0_318] : memref<9x128x128xbf16, #tpu.memory_space<vmem>>, vector<1x128x128xbf16>
    %299 = vector.shape_cast %298 : vector<1x128x128xbf16> to vector<128x128xbf16>
    %cst_319 = arith.constant dense<0.000000e+00> : vector<32x128xf32>
    %300 = tpu.matmul %297, %299, %cst_319 {dimension_numbers = #tpu.dot_dimension_numbers<[1], [0], [0], [1], [0, 0, 1, 1], [], []>} : vector<32x128xbf16>, vector<128x128xbf16>, vector<32x128xf32> -> vector<32x128xf32>
    %301 = arith.addf %294, %300 : vector<32x128xf32>
    %c0_320 = arith.constant 0 : index
    %c1_321 = arith.constant 1 : index
    %c1_322 = arith.constant 1 : index
    %c0_323 = arith.constant 0 : index
    %302 = vector.load %arg1[%c0_320, %c1_321, %c1_322, %c0_323] : memref<1x80x9x128xbf16, #tpu.memory_space<vmem>>, vector<1x4x8x128xbf16>
    %303 = vector.shape_cast %302 : vector<1x4x8x128xbf16> to vector<4x8x128xbf16>
    %304 = vector.shape_cast %303 : vector<4x8x128xbf16> to vector<32x128xbf16>
    %c8_324 = arith.constant 8 : index
    %c0_325 = arith.constant 0 : index
    %c0_326 = arith.constant 0 : index
    %305 = vector.load %arg2[%c8_324, %c0_325, %c0_326] : memref<9x128x128xbf16, #tpu.memory_space<vmem>>, vector<1x128x128xbf16>
    %306 = vector.shape_cast %305 : vector<1x128x128xbf16> to vector<128x128xbf16>
    %cst_327 = arith.constant dense<0.000000e+00> : vector<32x128xf32>
    %307 = tpu.matmul %304, %306, %cst_327 {dimension_numbers = #tpu.dot_dimension_numbers<[1], [0], [0], [1], [0, 0, 1, 1], [], []>} : vector<32x128xbf16>, vector<128x128xbf16>, vector<32x128xf32> -> vector<32x128xf32>
    %308 = arith.addf %301, %307 : vector<32x128xf32>
    %309 = vector.shape_cast %308 : vector<32x128xf32> to vector<4x8x128xf32>
    %c0_328 = arith.constant 0 : index
    %c12 = arith.constant 12 : index
    %c0_329 = arith.constant 0 : index
    %c0_330 = arith.constant 0 : index
    %310 = vector.load %arg6[%c0_328, %c12, %c0_329, %c0_330] : memref<1x16x8x128xf32, #tpu.memory_space<vmem>>, vector<1x4x8x128xf32>
    %311 = vector.shape_cast %310 : vector<1x4x8x128xf32> to vector<4x8x128xf32>
    %312 = vector.shape_cast %309 : vector<4x8x128xf32> to vector<1x4x8x128xf32>
    tpu.vector_store %arg6[%c0_328, %c12, %c0_329, %c0_330], %312 {strides = array<i32>} : memref<1x16x8x128xf32, #tpu.memory_space<vmem>>, vector<1x4x8x128xf32>,
    %313 = vector.extract_strided_slice %309 {offsets = [0, 0, 0], sizes = [4, 4, 128], strides = [1, 1, 1]} : vector<4x8x128xf32> to vector<4x4x128xf32>
    %cst_331 = arith.constant 0.000000e+00 : f32
    %314 = vector.broadcast %cst_331 : f32 to vector<4x4x128xf32>
    %315 = arith.maximumf %313, %314 : vector<4x4x128xf32>
    %316 = arith.truncf %315 : vector<4x4x128xf32> to vector<4x4x128xbf16>
    %c1_332 = arith.constant 1 : index
    %c1_333 = arith.constant 1 : index
    %c0_334 = arith.constant 0 : index
    %317 = vector.load %arg8[%c1_332, %c1_333, %c0_334] : memref<20x9x128xbf16, #tpu.memory_space<vmem>>, vector<4x4x128xbf16>
    tpu.vector_store %arg8[%c1_332, %c1_333, %c0_334], %316 {strides = array<i32>} : memref<20x9x128xbf16, #tpu.memory_space<vmem>>, vector<4x4x128xbf16>,
    %318 = vector.shape_cast %1 : vector<1x128xf32> to vector<1x128xf32>
    %319 = vector.broadcast %318 : vector<1x128xf32> to vector<32x128xf32>
    %c0_335 = arith.constant 0 : index
    %c0_336 = arith.constant 0 : index
    %c0_337 = arith.constant 0 : index
    %320 = vector.load %arg8[%c0_335, %c0_336, %c0_337] : memref<20x9x128xbf16, #tpu.memory_space<vmem>>, vector<4x8x128xbf16>
    %321 = vector.shape_cast %320 : vector<4x8x128xbf16> to vector<32x128xbf16>
    %c0_338 = arith.constant 0 : index
    %c0_339 = arith.constant 0 : index
    %c0_340 = arith.constant 0 : index
    %322 = vector.load %arg4[%c0_338, %c0_339, %c0_340] : memref<9x128x128xbf16, #tpu.memory_space<vmem>>, vector<1x128x128xbf16>
    %323 = vector.shape_cast %322 : vector<1x128x128xbf16> to vector<128x128xbf16>
    %cst_341 = arith.constant dense<0.000000e+00> : vector<32x128xf32>
    %324 = tpu.matmul %321, %323, %cst_341 {dimension_numbers = #tpu.dot_dimension_numbers<[1], [0], [0], [1], [0, 0, 1, 1], [], []>} : vector<32x128xbf16>, vector<128x128xbf16>, vector<32x128xf32> -> vector<32x128xf32>
    %325 = arith.addf %319, %324 : vector<32x128xf32>
    %c5_342 = arith.constant 5 : index
    %c0_343 = arith.constant 0 : index
    %c0_344 = arith.constant 0 : index
    %326 = vector.load %arg8[%c5_342, %c0_343, %c0_344] : memref<20x9x128xbf16, #tpu.memory_space<vmem>>, vector<4x8x128xbf16>
    %327 = vector.shape_cast %326 : vector<4x8x128xbf16> to vector<32x128xbf16>
    %c1_345 = arith.constant 1 : index
    %c0_346 = arith.constant 0 : index
    %c0_347 = arith.constant 0 : index
    %328 = vector.load %arg4[%c1_345, %c0_346, %c0_347] : memref<9x128x128xbf16, #tpu.memory_space<vmem>>, vector<1x128x128xbf16>
    %329 = vector.shape_cast %328 : vector<1x128x128xbf16> to vector<128x128xbf16>
    %cst_348 = arith.constant dense<0.000000e+00> : vector<32x128xf32>
    %330 = tpu.matmul %327, %329, %cst_348 {dimension_numbers = #tpu.dot_dimension_numbers<[1], [0], [0], [1], [0, 0, 1, 1], [], []>} : vector<32x128xbf16>, vector<128x128xbf16>, vector<32x128xf32> -> vector<32x128xf32>
    %331 = arith.addf %325, %330 : vector<32x128xf32>
    %c0_349 = arith.constant 0 : index
    %c1_350 = arith.constant 1 : index
    %c0_351 = arith.constant 0 : index
    %332 = vector.load %arg8[%c0_349, %c1_350, %c0_351] : memref<20x9x128xbf16, #tpu.memory_space<vmem>>, vector<4x8x128xbf16>
    %333 = vector.shape_cast %332 : vector<4x8x128xbf16> to vector<32x128xbf16>
    %c2_352 = arith.constant 2 : index
    %c0_353 = arith.constant 0 : index
    %c0_354 = arith.constant 0 : index
    %334 = vector.load %arg4[%c2_352, %c0_353, %c0_354] : memref<9x128x128xbf16, #tpu.memory_space<vmem>>, vector<1x128x128xbf16>
    %335 = vector.shape_cast %334 : vector<1x128x128xbf16> to vector<128x128xbf16>
    %cst_355 = arith.constant dense<0.000000e+00> : vector<32x128xf32>
    %336 = tpu.matmul %333, %335, %cst_355 {dimension_numbers = #tpu.dot_dimension_numbers<[1], [0], [0], [1], [0, 0, 1, 1], [], []>} : vector<32x128xbf16>, vector<128x128xbf16>, vector<32x128xf32> -> vector<32x128xf32>
    %337 = arith.addf %331, %336 : vector<32x128xf32>
    %c10_356 = arith.constant 10 : index
    %c0_357 = arith.constant 0 : index
    %c0_358 = arith.constant 0 : index
    %338 = vector.load %arg8[%c10_356, %c0_357, %c0_358] : memref<20x9x128xbf16, #tpu.memory_space<vmem>>, vector<4x8x128xbf16>
    %339 = vector.shape_cast %338 : vector<4x8x128xbf16> to vector<32x128xbf16>
    %c3_359 = arith.constant 3 : index
    %c0_360 = arith.constant 0 : index
    %c0_361 = arith.constant 0 : index
    %340 = vector.load %arg4[%c3_359, %c0_360, %c0_361] : memref<9x128x128xbf16, #tpu.memory_space<vmem>>, vector<1x128x128xbf16>
    %341 = vector.shape_cast %340 : vector<1x128x128xbf16> to vector<128x128xbf16>
    %cst_362 = arith.constant dense<0.000000e+00> : vector<32x128xf32>
    %342 = tpu.matmul %339, %341, %cst_362 {dimension_numbers = #tpu.dot_dimension_numbers<[1], [0], [0], [1], [0, 0, 1, 1], [], []>} : vector<32x128xbf16>, vector<128x128xbf16>, vector<32x128xf32> -> vector<32x128xf32>
    %343 = arith.addf %337, %342 : vector<32x128xf32>
    %c15_363 = arith.constant 15 : index
    %c0_364 = arith.constant 0 : index
    %c0_365 = arith.constant 0 : index
    %344 = vector.load %arg8[%c15_363, %c0_364, %c0_365] : memref<20x9x128xbf16, #tpu.memory_space<vmem>>, vector<4x8x128xbf16>
    %345 = vector.shape_cast %344 : vector<4x8x128xbf16> to vector<32x128xbf16>
    %c4_366 = arith.constant 4 : index
    %c0_367 = arith.constant 0 : index
    %c0_368 = arith.constant 0 : index
    %346 = vector.load %arg4[%c4_366, %c0_367, %c0_368] : memref<9x128x128xbf16, #tpu.memory_space<vmem>>, vector<1x128x128xbf16>
    %347 = vector.shape_cast %346 : vector<1x128x128xbf16> to vector<128x128xbf16>
    %cst_369 = arith.constant dense<0.000000e+00> : vector<32x128xf32>
    %348 = tpu.matmul %345, %347, %cst_369 {dimension_numbers = #tpu.dot_dimension_numbers<[1], [0], [0], [1], [0, 0, 1, 1], [], []>} : vector<32x128xbf16>, vector<128x128xbf16>, vector<32x128xf32> -> vector<32x128xf32>
    %349 = arith.addf %343, %348 : vector<32x128xf32>
    %c10_370 = arith.constant 10 : index
    %c1_371 = arith.constant 1 : index
    %c0_372 = arith.constant 0 : index
    %350 = vector.load %arg8[%c10_370, %c1_371, %c0_372] : memref<20x9x128xbf16, #tpu.memory_space<vmem>>, vector<4x8x128xbf16>
    %351 = vector.shape_cast %350 : vector<4x8x128xbf16> to vector<32x128xbf16>
    %c5_373 = arith.constant 5 : index
    %c0_374 = arith.constant 0 : index
    %c0_375 = arith.constant 0 : index
    %352 = vector.load %arg4[%c5_373, %c0_374, %c0_375] : memref<9x128x128xbf16, #tpu.memory_space<vmem>>, vector<1x128x128xbf16>
    %353 = vector.shape_cast %352 : vector<1x128x128xbf16> to vector<128x128xbf16>
    %cst_376 = arith.constant dense<0.000000e+00> : vector<32x128xf32>
    %354 = tpu.matmul %351, %353, %cst_376 {dimension_numbers = #tpu.dot_dimension_numbers<[1], [0], [0], [1], [0, 0, 1, 1], [], []>} : vector<32x128xbf16>, vector<128x128xbf16>, vector<32x128xf32> -> vector<32x128xf32>
    %355 = arith.addf %349, %354 : vector<32x128xf32>
    %c1_377 = arith.constant 1 : index
    %c0_378 = arith.constant 0 : index
    %c0_379 = arith.constant 0 : index
    %356 = vector.load %arg8[%c1_377, %c0_378, %c0_379] : memref<20x9x128xbf16, #tpu.memory_space<vmem>>, vector<4x8x128xbf16>
    %357 = vector.shape_cast %356 : vector<4x8x128xbf16> to vector<32x128xbf16>
    %c6_380 = arith.constant 6 : index
    %c0_381 = arith.constant 0 : index
    %c0_382 = arith.constant 0 : index
    %358 = vector.load %arg4[%c6_380, %c0_381, %c0_382] : memref<9x128x128xbf16, #tpu.memory_space<vmem>>, vector<1x128x128xbf16>
    %359 = vector.shape_cast %358 : vector<1x128x128xbf16> to vector<128x128xbf16>
    %cst_383 = arith.constant dense<0.000000e+00> : vector<32x128xf32>
    %360 = tpu.matmul %357, %359, %cst_383 {dimension_numbers = #tpu.dot_dimension_numbers<[1], [0], [0], [1], [0, 0, 1, 1], [], []>} : vector<32x128xbf16>, vector<128x128xbf16>, vector<32x128xf32> -> vector<32x128xf32>
    %361 = arith.addf %355, %360 : vector<32x128xf32>
    %c6_384 = arith.constant 6 : index
    %c0_385 = arith.constant 0 : index
    %c0_386 = arith.constant 0 : index
    %362 = vector.load %arg8[%c6_384, %c0_385, %c0_386] : memref<20x9x128xbf16, #tpu.memory_space<vmem>>, vector<4x8x128xbf16>
    %363 = vector.shape_cast %362 : vector<4x8x128xbf16> to vector<32x128xbf16>
    %c7_387 = arith.constant 7 : index
    %c0_388 = arith.constant 0 : index
    %c0_389 = arith.constant 0 : index
    %364 = vector.load %arg4[%c7_387, %c0_388, %c0_389] : memref<9x128x128xbf16, #tpu.memory_space<vmem>>, vector<1x128x128xbf16>
    %365 = vector.shape_cast %364 : vector<1x128x128xbf16> to vector<128x128xbf16>
    %cst_390 = arith.constant dense<0.000000e+00> : vector<32x128xf32>
    %366 = tpu.matmul %363, %365, %cst_390 {dimension_numbers = #tpu.dot_dimension_numbers<[1], [0], [0], [1], [0, 0, 1, 1], [], []>} : vector<32x128xbf16>, vector<128x128xbf16>, vector<32x128xf32> -> vector<32x128xf32>
    %367 = arith.addf %361, %366 : vector<32x128xf32>
    %c1_391 = arith.constant 1 : index
    %c1_392 = arith.constant 1 : index
    %c0_393 = arith.constant 0 : index
    %368 = vector.load %arg8[%c1_391, %c1_392, %c0_393] : memref<20x9x128xbf16, #tpu.memory_space<vmem>>, vector<4x8x128xbf16>
    %369 = vector.shape_cast %368 : vector<4x8x128xbf16> to vector<32x128xbf16>
    %c8_394 = arith.constant 8 : index
    %c0_395 = arith.constant 0 : index
    %c0_396 = arith.constant 0 : index
    %370 = vector.load %arg4[%c8_394, %c0_395, %c0_396] : memref<9x128x128xbf16, #tpu.memory_space<vmem>>, vector<1x128x128xbf16>
    %371 = vector.shape_cast %370 : vector<1x128x128xbf16> to vector<128x128xbf16>
    %cst_397 = arith.constant dense<0.000000e+00> : vector<32x128xf32>
    %372 = tpu.matmul %369, %371, %cst_397 {dimension_numbers = #tpu.dot_dimension_numbers<[1], [0], [0], [1], [0, 0, 1, 1], [], []>} : vector<32x128xbf16>, vector<128x128xbf16>, vector<32x128xf32> -> vector<32x128xf32>
    %373 = arith.addf %367, %372 : vector<32x128xf32>
    %374 = vector.shape_cast %373 : vector<32x128xf32> to vector<4x8x128xf32>
    %c0_398 = arith.constant 0 : index
    %c0_399 = arith.constant 0 : index
    %c0_400 = arith.constant 0 : index
    %c0_401 = arith.constant 0 : index
    %375 = vector.load %arg7[%c0_398, %c0_399, %c0_400, %c0_401] : memref<1x4x8x128xf32, #tpu.memory_space<vmem>>, vector<1x4x8x128xf32>
    %376 = vector.shape_cast %375 : vector<1x4x8x128xf32> to vector<4x8x128xf32>
    %377 = vector.shape_cast %374 : vector<4x8x128xf32> to vector<1x4x8x128xf32>
    tpu.vector_store %arg7[%c0_398, %c0_399, %c0_400, %c0_401], %377 {strides = array<i32>} : memref<1x4x8x128xf32, #tpu.memory_space<vmem>>, vector<1x4x8x128xf32>,
    return
  }
  func.func @transform_0(%arg0: i32) -> (i32, i32, i32, i32) {
    %c0_i32 = arith.constant 0 : i32
    %c0_i32_0 = arith.constant 0 : i32
    %c0_i32_1 = arith.constant 0 : i32
    %c0_i32_2 = arith.constant 0 : i32
    return %arg0, %c0_i32, %c0_i32_0, %c0_i32_1 : i32, i32, i32, i32
  }
  func.func @transform_1(%arg0: i32) -> (i32, i32, i32) {
    %c0_i32 = arith.constant 0 : i32
    %c0_i32_0 = arith.constant 0 : i32
    %c0_i32_1 = arith.constant 0 : i32
    %c0_i32_2 = arith.constant 0 : i32
    return %c0_i32, %c0_i32_0, %c0_i32_1 : i32, i32, i32
  }
  func.func @transform_2(%arg0: i32) -> (i32, i32) {
    %c0_i32 = arith.constant 0 : i32
    %c0_i32_0 = arith.constant 0 : i32
    %c0_i32_1 = arith.constant 0 : i32
    return %c0_i32, %c0_i32_0 : i32, i32
  }
  func.func @transform_3(%arg0: i32) -> (i32, i32, i32) {
    %c0_i32 = arith.constant 0 : i32
    %c0_i32_0 = arith.constant 0 : i32
    %c0_i32_1 = arith.constant 0 : i32
    %c0_i32_2 = arith.constant 0 : i32
    return %c0_i32, %c0_i32_0, %c0_i32_1 : i32, i32, i32
  }
  func.func @transform_4(%arg0: i32) -> (i32, i32) {
    %c0_i32 = arith.constant 0 : i32
    %c0_i32_0 = arith.constant 0 : i32
    %c0_i32_1 = arith.constant 0 : i32
    return %c0_i32, %c0_i32_0 : i32, i32
  }
  func.func @transform_5(%arg0: i32) -> (i32, i32, i32, i32) {
    %c0_i32 = arith.constant 0 : i32
    %c0_i32_0 = arith.constant 0 : i32
    %c0_i32_1 = arith.constant 0 : i32
    %c0_i32_2 = arith.constant 0 : i32
    return %arg0, %c0_i32, %c0_i32_0, %c0_i32_1 : i32, i32, i32, i32
  }
  func.func @transform_6(%arg0: i32) -> (i32, i32, i32, i32) {
    %c0_i32 = arith.constant 0 : i32
    %c0_i32_0 = arith.constant 0 : i32
    %c0_i32_1 = arith.constant 0 : i32
    %c0_i32_2 = arith.constant 0 : i32
    return %arg0, %c0_i32, %c0_i32_0, %c0_i32_1 : i32, i32, i32, i32
  }
}

module attributes {stable_mosaic.version = 11 : i64} {
  func.func @_p6p7_kernel(%arg0: i32, %arg1: memref<1x80x9x128xbf16, #tpu.memory_space<vmem>>, %arg2: memref<9x128x128xbf16, #tpu.memory_space<vmem>>, %arg3: memref<1x128xf32, #tpu.memory_space<vmem>>, %arg4: memref<9x128x128xbf16, #tpu.memory_space<vmem>>, %arg5: memref<1x128xf32, #tpu.memory_space<vmem>>, %arg6: memref<1x16x8x128xf32, #tpu.memory_space<vmem>>, %arg7: memref<1x4x8x128xf32, #tpu.memory_space<vmem>>, %arg8: memref<20x9x128xbf16, #tpu.memory_space<vmem>>) attributes {dimension_semantics = [#tpu.dimension_semantics<parallel>], iteration_bounds = array<i64: 2>, scalar_prefetch = 0 : i64, scratch_operands = 1 : i64, tpu.core_type = #tpu.core_type<tc>, window_params = [{transform_indices = @transform_0, window_bounds = array<i64: 1, 80, 9, 128>}, {pipeline_mode = #tpu.pipeline_mode<synchronous>, transform_indices = @transform_1, window_bounds = array<i64: 9, 128, 128>}, {pipeline_mode = #tpu.pipeline_mode<synchronous>, transform_indices = @transform_2, window_bounds = array<i64: 1, 128>}, {pipeline_mode = #tpu.pipeline_mode<synchronous>, transform_indices = @transform_3, window_bounds = array<i64: 9, 128, 128>}, {pipeline_mode = #tpu.pipeline_mode<synchronous>, transform_indices = @transform_4, window_bounds = array<i64: 1, 128>}, {transform_indices = @transform_5, window_bounds = array<i64: 1, 16, 8, 128>}, {transform_indices = @transform_6, window_bounds = array<i64: 1, 4, 8, 128>}]} {
    %c0 = arith.constant 0 : index
    %c0_0 = arith.constant 0 : index
    %0 = vector.load %arg3[%c0, %c0_0] : memref<1x128xf32, #tpu.memory_space<vmem>>, vector<1x128xf32>
    %c0_1 = arith.constant 0 : index
    %c0_2 = arith.constant 0 : index
    %1 = vector.load %arg5[%c0_1, %c0_2] : memref<1x128xf32, #tpu.memory_space<vmem>>, vector<1x128xf32>
    %cst = arith.constant 0.000000e+00 : bf16
    %2 = vector.broadcast %cst : bf16 to vector<1x9x128xbf16>
    %c19 = arith.constant 19 : index
    %c0_3 = arith.constant 0 : index
    %c0_4 = arith.constant 0 : index
    %3 = vector.load %arg8[%c19, %c0_3, %c0_4] : memref<20x9x128xbf16, #tpu.memory_space<vmem>>, vector<1x9x128xbf16>
    tpu.vector_store %arg8[%c19, %c0_3, %c0_4], %2 {strides = array<i32>} : memref<20x9x128xbf16, #tpu.memory_space<vmem>>, vector<1x9x128xbf16>,
    %cst_5 = arith.constant 0.000000e+00 : bf16
    %4 = vector.broadcast %cst_5 : bf16 to vector<4x5x128xbf16>
    %c15 = arith.constant 15 : index
    %c4 = arith.constant 4 : index
    %c0_6 = arith.constant 0 : index
    %5 = vector.load %arg8[%c15, %c4, %c0_6] : memref<20x9x128xbf16, #tpu.memory_space<vmem>>, vector<4x5x128xbf16>
    tpu.vector_store %arg8[%c15, %c4, %c0_6], %4 {strides = array<i32>} : memref<20x9x128xbf16, #tpu.memory_space<vmem>>, vector<4x5x128xbf16>,
    %6 = vector.shape_cast %0 : vector<1x128xf32> to vector<1x128xf32>
    %7 = vector.broadcast %6 : vector<1x128xf32> to vector<32x128xf32>
    %c0_7 = arith.constant 0 : index
    %c0_8 = arith.constant 0 : index
    %c0_9 = arith.constant 0 : index
    %c0_10 = arith.constant 0 : index
    %8 = vector.load %arg1[%c0_7, %c0_8, %c0_9, %c0_10] : memref<1x80x9x128xbf16, #tpu.memory_space<vmem>>, vector<1x4x8x128xbf16>
    %9 = vector.shape_cast %8 : vector<1x4x8x128xbf16> to vector<4x8x128xbf16>
    %10 = vector.shape_cast %9 : vector<4x8x128xbf16> to vector<32x128xbf16>
    %c0_11 = arith.constant 0 : index
    %c0_12 = arith.constant 0 : index
    %c0_13 = arith.constant 0 : index
    %11 = vector.load %arg2[%c0_11, %c0_12, %c0_13] : memref<9x128x128xbf16, #tpu.memory_space<vmem>>, vector<1x128x128xbf16>
    %12 = vector.shape_cast %11 : vector<1x128x128xbf16> to vector<128x128xbf16>
    %cst_14 = arith.constant dense<0.000000e+00> : vector<32x128xf32>
    %13 = tpu.matmul %10, %12, %cst_14 {dimension_numbers = #tpu.dot_dimension_numbers<[1], [0], [0], [1], [0, 0, 1, 1], [], []>} : vector<32x128xbf16>, vector<128x128xbf16>, vector<32x128xf32> -> vector<32x128xf32>
    %14 = arith.addf %7, %13 : vector<32x128xf32>
    %c0_15 = arith.constant 0 : index
    %c5 = arith.constant 5 : index
    %c0_16 = arith.constant 0 : index
    %c0_17 = arith.constant 0 : index
    %15 = vector.load %arg1[%c0_15, %c5, %c0_16, %c0_17] : memref<1x80x9x128xbf16, #tpu.memory_space<vmem>>, vector<1x4x8x128xbf16>
    %16 = vector.shape_cast %15 : vector<1x4x8x128xbf16> to vector<4x8x128xbf16>
    %17 = vector.shape_cast %16 : vector<4x8x128xbf16> to vector<32x128xbf16>
    %c1 = arith.constant 1 : index
    %c0_18 = arith.constant 0 : index
    %c0_19 = arith.constant 0 : index
    %18 = vector.load %arg2[%c1, %c0_18, %c0_19] : memref<9x128x128xbf16, #tpu.memory_space<vmem>>, vector<1x128x128xbf16>
    %19 = vector.shape_cast %18 : vector<1x128x128xbf16> to vector<128x128xbf16>
    %cst_20 = arith.constant dense<0.000000e+00> : vector<32x128xf32>
    %20 = tpu.matmul %17, %19, %cst_20 {dimension_numbers = #tpu.dot_dimension_numbers<[1], [0], [0], [1], [0, 0, 1, 1], [], []>} : vector<32x128xbf16>, vector<128x128xbf16>, vector<32x128xf32> -> vector<32x128xf32>
    %21 = arith.addf %14, %20 : vector<32x128xf32>
    %c0_21 = arith.constant 0 : index
    %c10 = arith.constant 10 : index
    %c0_22 = arith.constant 0 : index
    %c0_23 = arith.constant 0 : index
    %22 = vector.load %arg1[%c0_21, %c10, %c0_22, %c0_23] : memref<1x80x9x128xbf16, #tpu.memory_space<vmem>>, vector<1x4x8x128xbf16>
    %23 = vector.shape_cast %22 : vector<1x4x8x128xbf16> to vector<4x8x128xbf16>
    %24 = vector.shape_cast %23 : vector<4x8x128xbf16> to vector<32x128xbf16>
    %c2 = arith.constant 2 : index
    %c0_24 = arith.constant 0 : index
    %c0_25 = arith.constant 0 : index
    %25 = vector.load %arg2[%c2, %c0_24, %c0_25] : memref<9x128x128xbf16, #tpu.memory_space<vmem>>, vector<1x128x128xbf16>
    %26 = vector.shape_cast %25 : vector<1x128x128xbf16> to vector<128x128xbf16>
    %cst_26 = arith.constant dense<0.000000e+00> : vector<32x128xf32>
    %27 = tpu.matmul %24, %26, %cst_26 {dimension_numbers = #tpu.dot_dimension_numbers<[1], [0], [0], [1], [0, 0, 1, 1], [], []>} : vector<32x128xbf16>, vector<128x128xbf16>, vector<32x128xf32> -> vector<32x128xf32>
    %28 = arith.addf %21, %27 : vector<32x128xf32>
    %c0_27 = arith.constant 0 : index
    %c20 = arith.constant 20 : index
    %c0_28 = arith.constant 0 : index
    %c0_29 = arith.constant 0 : index
    %29 = vector.load %arg1[%c0_27, %c20, %c0_28, %c0_29] : memref<1x80x9x128xbf16, #tpu.memory_space<vmem>>, vector<1x4x8x128xbf16>
    %30 = vector.shape_cast %29 : vector<1x4x8x128xbf16> to vector<4x8x128xbf16>
    %31 = vector.shape_cast %30 : vector<4x8x128xbf16> to vector<32x128xbf16>
    %c3 = arith.constant 3 : index
    %c0_30 = arith.constant 0 : index
    %c0_31 = arith.constant 0 : index
    %32 = vector.load %arg2[%c3, %c0_30, %c0_31] : memref<9x128x128xbf16, #tpu.memory_space<vmem>>, vector<1x128x128xbf16>
    %33 = vector.shape_cast %32 : vector<1x128x128xbf16> to vector<128x128xbf16>
    %cst_32 = arith.constant dense<0.000000e+00> : vector<32x128xf32>
    %34 = tpu.matmul %31, %33, %cst_32 {dimension_numbers = #tpu.dot_dimension_numbers<[1], [0], [0], [1], [0, 0, 1, 1], [], []>} : vector<32x128xbf16>, vector<128x128xbf16>, vector<32x128xf32> -> vector<32x128xf32>
    %35 = arith.addf %28, %34 : vector<32x128xf32>
    %c0_33 = arith.constant 0 : index
    %c25 = arith.constant 25 : index
    %c0_34 = arith.constant 0 : index
    %c0_35 = arith.constant 0 : index
    %36 = vector.load %arg1[%c0_33, %c25, %c0_34, %c0_35] : memref<1x80x9x128xbf16, #tpu.memory_space<vmem>>, vector<1x4x8x128xbf16>
    %37 = vector.shape_cast %36 : vector<1x4x8x128xbf16> to vector<4x8x128xbf16>
    %38 = vector.shape_cast %37 : vector<4x8x128xbf16> to vector<32x128xbf16>
    %c4_36 = arith.constant 4 : index
    %c0_37 = arith.constant 0 : index
    %c0_38 = arith.constant 0 : index
    %39 = vector.load %arg2[%c4_36, %c0_37, %c0_38] : memref<9x128x128xbf16, #tpu.memory_space<vmem>>, vector<1x128x128xbf16>
    %40 = vector.shape_cast %39 : vector<1x128x128xbf16> to vector<128x128xbf16>
    %cst_39 = arith.constant dense<0.000000e+00> : vector<32x128xf32>
    %41 = tpu.matmul %38, %40, %cst_39 {dimension_numbers = #tpu.dot_dimension_numbers<[1], [0], [0], [1], [0, 0, 1, 1], [], []>} : vector<32x128xbf16>, vector<128x128xbf16>, vector<32x128xf32> -> vector<32x128xf32>
    %42 = arith.addf %35, %41 : vector<32x128xf32>
    %c0_40 = arith.constant 0 : index
    %c30 = arith.constant 30 : index
    %c0_41 = arith.constant 0 : index
    %c0_42 = arith.constant 0 : index
    %43 = vector.load %arg1[%c0_40, %c30, %c0_41, %c0_42] : memref<1x80x9x128xbf16, #tpu.memory_space<vmem>>, vector<1x4x8x128xbf16>
    %44 = vector.shape_cast %43 : vector<1x4x8x128xbf16> to vector<4x8x128xbf16>
    %45 = vector.shape_cast %44 : vector<4x8x128xbf16> to vector<32x128xbf16>
    %c5_43 = arith.constant 5 : index
    %c0_44 = arith.constant 0 : index
    %c0_45 = arith.constant 0 : index
    %46 = vector.load %arg2[%c5_43, %c0_44, %c0_45] : memref<9x128x128xbf16, #tpu.memory_space<vmem>>, vector<1x128x128xbf16>
    %47 = vector.shape_cast %46 : vector<1x128x128xbf16> to vector<128x128xbf16>
    %cst_46 = arith.constant dense<0.000000e+00> : vector<32x128xf32>
    %48 = tpu.matmul %45, %47, %cst_46 {dimension_numbers = #tpu.dot_dimension_numbers<[1], [0], [0], [1], [0, 0, 1, 1], [], []>} : vector<32x128xbf16>, vector<128x128xbf16>, vector<32x128xf32> -> vector<32x128xf32>
    %49 = arith.addf %42, %48 : vector<32x128xf32>
    %c0_47 = arith.constant 0 : index
    %c40 = arith.constant 40 : index
    %c0_48 = arith.constant 0 : index
    %c0_49 = arith.constant 0 : index
    %50 = vector.load %arg1[%c0_47, %c40, %c0_48, %c0_49] : memref<1x80x9x128xbf16, #tpu.memory_space<vmem>>, vector<1x4x8x128xbf16>
    %51 = vector.shape_cast %50 : vector<1x4x8x128xbf16> to vector<4x8x128xbf16>
    %52 = vector.shape_cast %51 : vector<4x8x128xbf16> to vector<32x128xbf16>
    %c6 = arith.constant 6 : index
    %c0_50 = arith.constant 0 : index
    %c0_51 = arith.constant 0 : index
    %53 = vector.load %arg2[%c6, %c0_50, %c0_51] : memref<9x128x128xbf16, #tpu.memory_space<vmem>>, vector<1x128x128xbf16>
    %54 = vector.shape_cast %53 : vector<1x128x128xbf16> to vector<128x128xbf16>
    %cst_52 = arith.constant dense<0.000000e+00> : vector<32x128xf32>
    %55 = tpu.matmul %52, %54, %cst_52 {dimension_numbers = #tpu.dot_dimension_numbers<[1], [0], [0], [1], [0, 0, 1, 1], [], []>} : vector<32x128xbf16>, vector<128x128xbf16>, vector<32x128xf32> -> vector<32x128xf32>
    %56 = arith.addf %49, %55 : vector<32x128xf32>
    %c0_53 = arith.constant 0 : index
    %c45 = arith.constant 45 : index
    %c0_54 = arith.constant 0 : index
    %c0_55 = arith.constant 0 : index
    %57 = vector.load %arg1[%c0_53, %c45, %c0_54, %c0_55] : memref<1x80x9x128xbf16, #tpu.memory_space<vmem>>, vector<1x4x8x128xbf16>
    %58 = vector.shape_cast %57 : vector<1x4x8x128xbf16> to vector<4x8x128xbf16>
    %59 = vector.shape_cast %58 : vector<4x8x128xbf16> to vector<32x128xbf16>
    %c7 = arith.constant 7 : index
    %c0_56 = arith.constant 0 : index
    %c0_57 = arith.constant 0 : index
    %60 = vector.load %arg2[%c7, %c0_56, %c0_57] : memref<9x128x128xbf16, #tpu.memory_space<vmem>>, vector<1x128x128xbf16>
    %61 = vector.shape_cast %60 : vector<1x128x128xbf16> to vector<128x128xbf16>
    %cst_58 = arith.constant dense<0.000000e+00> : vector<32x128xf32>
    %62 = tpu.matmul %59, %61, %cst_58 {dimension_numbers = #tpu.dot_dimension_numbers<[1], [0], [0], [1], [0, 0, 1, 1], [], []>} : vector<32x128xbf16>, vector<128x128xbf16>, vector<32x128xf32> -> vector<32x128xf32>
    %63 = arith.addf %56, %62 : vector<32x128xf32>
    %c0_59 = arith.constant 0 : index
    %c50 = arith.constant 50 : index
    %c0_60 = arith.constant 0 : index
    %c0_61 = arith.constant 0 : index
    %64 = vector.load %arg1[%c0_59, %c50, %c0_60, %c0_61] : memref<1x80x9x128xbf16, #tpu.memory_space<vmem>>, vector<1x4x8x128xbf16>
    %65 = vector.shape_cast %64 : vector<1x4x8x128xbf16> to vector<4x8x128xbf16>
    %66 = vector.shape_cast %65 : vector<4x8x128xbf16> to vector<32x128xbf16>
    %c8 = arith.constant 8 : index
    %c0_62 = arith.constant 0 : index
    %c0_63 = arith.constant 0 : index
    %67 = vector.load %arg2[%c8, %c0_62, %c0_63] : memref<9x128x128xbf16, #tpu.memory_space<vmem>>, vector<1x128x128xbf16>
    %68 = vector.shape_cast %67 : vector<1x128x128xbf16> to vector<128x128xbf16>
    %cst_64 = arith.constant dense<0.000000e+00> : vector<32x128xf32>
    %69 = tpu.matmul %66, %68, %cst_64 {dimension_numbers = #tpu.dot_dimension_numbers<[1], [0], [0], [1], [0, 0, 1, 1], [], []>} : vector<32x128xbf16>, vector<128x128xbf16>, vector<32x128xf32> -> vector<32x128xf32>
    %70 = arith.addf %63, %69 : vector<32x128xf32>
    %71 = vector.shape_cast %70 : vector<32x128xf32> to vector<4x8x128xf32>
    %c0_65 = arith.constant 0 : index
    %c0_66 = arith.constant 0 : index
    %c0_67 = arith.constant 0 : index
    %c0_68 = arith.constant 0 : index
    %72 = vector.load %arg6[%c0_65, %c0_66, %c0_67, %c0_68] : memref<1x16x8x128xf32, #tpu.memory_space<vmem>>, vector<1x4x8x128xf32>
    %73 = vector.shape_cast %72 : vector<1x4x8x128xf32> to vector<4x8x128xf32>
    %74 = vector.shape_cast %71 : vector<4x8x128xf32> to vector<1x4x8x128xf32>
    tpu.vector_store %arg6[%c0_65, %c0_66, %c0_67, %c0_68], %74 {strides = array<i32>} : memref<1x16x8x128xf32, #tpu.memory_space<vmem>>, vector<1x4x8x128xf32>,
    %75 = vector.extract_strided_slice %71 {offsets = [0, 0, 0], sizes = [4, 4, 128], strides = [1, 1, 1]} : vector<4x8x128xf32> to vector<4x4x128xf32>
    %cst_69 = arith.constant 0.000000e+00 : f32
    %76 = vector.broadcast %cst_69 : f32 to vector<4x4x128xf32>
    %77 = arith.maximumf %75, %76 : vector<4x4x128xf32>
    %78 = arith.truncf %77 : vector<4x4x128xf32> to vector<4x4x128xbf16>
    %c15_70 = arith.constant 15 : index
    %c0_71 = arith.constant 0 : index
    %c0_72 = arith.constant 0 : index
    %79 = vector.load %arg8[%c15_70, %c0_71, %c0_72] : memref<20x9x128xbf16, #tpu.memory_space<vmem>>, vector<4x4x128xbf16>
    tpu.vector_store %arg8[%c15_70, %c0_71, %c0_72], %78 {strides = array<i32>} : memref<20x9x128xbf16, #tpu.memory_space<vmem>>, vector<4x4x128xbf16>,
    %cst_73 = arith.constant 0.000000e+00 : bf16
    %80 = vector.broadcast %cst_73 : bf16 to vector<1x9x128xbf16>
    %c14 = arith.constant 14 : index
    %c0_74 = arith.constant 0 : index
    %c0_75 = arith.constant 0 : index
    %81 = vector.load %arg8[%c14, %c0_74, %c0_75] : memref<20x9x128xbf16, #tpu.memory_space<vmem>>, vector<1x9x128xbf16>
    tpu.vector_store %arg8[%c14, %c0_74, %c0_75], %80 {strides = array<i32>} : memref<20x9x128xbf16, #tpu.memory_space<vmem>>, vector<1x9x128xbf16>,
    %cst_76 = arith.constant 0.000000e+00 : bf16
    %82 = vector.broadcast %cst_76 : bf16 to vector<4x1x128xbf16>
    %c10_77 = arith.constant 10 : index
    %c0_78 = arith.constant 0 : index
    %c0_79 = arith.constant 0 : index
    %83 = vector.load %arg8[%c10_77, %c0_78, %c0_79] : memref<20x9x128xbf16, #tpu.memory_space<vmem>>, vector<4x1x128xbf16>
    tpu.vector_store %arg8[%c10_77, %c0_78, %c0_79], %82 {strides = array<i32>} : memref<20x9x128xbf16, #tpu.memory_space<vmem>>, vector<4x1x128xbf16>,
    %cst_80 = arith.constant 0.000000e+00 : bf16
    %84 = vector.broadcast %cst_80 : bf16 to vector<4x4x128xbf16>
    %c10_81 = arith.constant 10 : index
    %c5_82 = arith.constant 5 : index
    %c0_83 = arith.constant 0 : index
    %85 = vector.load %arg8[%c10_81, %c5_82, %c0_83] : memref<20x9x128xbf16, #tpu.memory_space<vmem>>, vector<4x4x128xbf16>
    tpu.vector_store %arg8[%c10_81, %c5_82, %c0_83], %84 {strides = array<i32>} : memref<20x9x128xbf16, #tpu.memory_space<vmem>>, vector<4x4x128xbf16>,
    %86 = vector.shape_cast %0 : vector<1x128xf32> to vector<1x128xf32>
    %87 = vector.broadcast %86 : vector<1x128xf32> to vector<32x128xf32>
    %c0_84 = arith.constant 0 : index
    %c10_85 = arith.constant 10 : index
    %c0_86 = arith.constant 0 : index
    %c0_87 = arith.constant 0 : index
    %88 = vector.load %arg1[%c0_84, %c10_85, %c0_86, %c0_87] : memref<1x80x9x128xbf16, #tpu.memory_space<vmem>>, vector<1x4x8x128xbf16>
    %89 = vector.shape_cast %88 : vector<1x4x8x128xbf16> to vector<4x8x128xbf16>
    %90 = vector.shape_cast %89 : vector<4x8x128xbf16> to vector<32x128xbf16>
    %c0_88 = arith.constant 0 : index
    %c0_89 = arith.constant 0 : index
    %c0_90 = arith.constant 0 : index
    %91 = vector.load %arg2[%c0_88, %c0_89, %c0_90] : memref<9x128x128xbf16, #tpu.memory_space<vmem>>, vector<1x128x128xbf16>
    %92 = vector.shape_cast %91 : vector<1x128x128xbf16> to vector<128x128xbf16>
    %cst_91 = arith.constant dense<0.000000e+00> : vector<32x128xf32>
    %93 = tpu.matmul %90, %92, %cst_91 {dimension_numbers = #tpu.dot_dimension_numbers<[1], [0], [0], [1], [0, 0, 1, 1], [], []>} : vector<32x128xbf16>, vector<128x128xbf16>, vector<32x128xf32> -> vector<32x128xf32>
    %94 = arith.addf %87, %93 : vector<32x128xf32>
    %c0_92 = arith.constant 0 : index
    %c15_93 = arith.constant 15 : index
    %c0_94 = arith.constant 0 : index
    %c0_95 = arith.constant 0 : index
    %95 = vector.load %arg1[%c0_92, %c15_93, %c0_94, %c0_95] : memref<1x80x9x128xbf16, #tpu.memory_space<vmem>>, vector<1x4x8x128xbf16>
    %96 = vector.shape_cast %95 : vector<1x4x8x128xbf16> to vector<4x8x128xbf16>
    %97 = vector.shape_cast %96 : vector<4x8x128xbf16> to vector<32x128xbf16>
    %c1_96 = arith.constant 1 : index
    %c0_97 = arith.constant 0 : index
    %c0_98 = arith.constant 0 : index
    %98 = vector.load %arg2[%c1_96, %c0_97, %c0_98] : memref<9x128x128xbf16, #tpu.memory_space<vmem>>, vector<1x128x128xbf16>
    %99 = vector.shape_cast %98 : vector<1x128x128xbf16> to vector<128x128xbf16>
    %cst_99 = arith.constant dense<0.000000e+00> : vector<32x128xf32>
    %100 = tpu.matmul %97, %99, %cst_99 {dimension_numbers = #tpu.dot_dimension_numbers<[1], [0], [0], [1], [0, 0, 1, 1], [], []>} : vector<32x128xbf16>, vector<128x128xbf16>, vector<32x128xf32> -> vector<32x128xf32>
    %101 = arith.addf %94, %100 : vector<32x128xf32>
    %c0_100 = arith.constant 0 : index
    %c0_101 = arith.constant 0 : index
    %c1_102 = arith.constant 1 : index
    %c0_103 = arith.constant 0 : index
    %102 = vector.load %arg1[%c0_100, %c0_101, %c1_102, %c0_103] : memref<1x80x9x128xbf16, #tpu.memory_space<vmem>>, vector<1x4x8x128xbf16>
    %103 = vector.shape_cast %102 : vector<1x4x8x128xbf16> to vector<4x8x128xbf16>
    %104 = vector.shape_cast %103 : vector<4x8x128xbf16> to vector<32x128xbf16>
    %c2_104 = arith.constant 2 : index
    %c0_105 = arith.constant 0 : index
    %c0_106 = arith.constant 0 : index
    %105 = vector.load %arg2[%c2_104, %c0_105, %c0_106] : memref<9x128x128xbf16, #tpu.memory_space<vmem>>, vector<1x128x128xbf16>
    %106 = vector.shape_cast %105 : vector<1x128x128xbf16> to vector<128x128xbf16>
    %cst_107 = arith.constant dense<0.000000e+00> : vector<32x128xf32>
    %107 = tpu.matmul %104, %106, %cst_107 {dimension_numbers = #tpu.dot_dimension_numbers<[1], [0], [0], [1], [0, 0, 1, 1], [], []>} : vector<32x128xbf16>, vector<128x128xbf16>, vector<32x128xf32> -> vector<32x128xf32>
    %108 = arith.addf %101, %107 : vector<32x128xf32>
    %c0_108 = arith.constant 0 : index
    %c30_109 = arith.constant 30 : index
    %c0_110 = arith.constant 0 : index
    %c0_111 = arith.constant 0 : index
    %109 = vector.load %arg1[%c0_108, %c30_109, %c0_110, %c0_111] : memref<1x80x9x128xbf16, #tpu.memory_space<vmem>>, vector<1x4x8x128xbf16>
    %110 = vector.shape_cast %109 : vector<1x4x8x128xbf16> to vector<4x8x128xbf16>
    %111 = vector.shape_cast %110 : vector<4x8x128xbf16> to vector<32x128xbf16>
    %c3_112 = arith.constant 3 : index
    %c0_113 = arith.constant 0 : index
    %c0_114 = arith.constant 0 : index
    %112 = vector.load %arg2[%c3_112, %c0_113, %c0_114] : memref<9x128x128xbf16, #tpu.memory_space<vmem>>, vector<1x128x128xbf16>
    %113 = vector.shape_cast %112 : vector<1x128x128xbf16> to vector<128x128xbf16>
    %cst_115 = arith.constant dense<0.000000e+00> : vector<32x128xf32>
    %114 = tpu.matmul %111, %113, %cst_115 {dimension_numbers = #tpu.dot_dimension_numbers<[1], [0], [0], [1], [0, 0, 1, 1], [], []>} : vector<32x128xbf16>, vector<128x128xbf16>, vector<32x128xf32> -> vector<32x128xf32>
    %115 = arith.addf %108, %114 : vector<32x128xf32>
    %c0_116 = arith.constant 0 : index
    %c35 = arith.constant 35 : index
    %c0_117 = arith.constant 0 : index
    %c0_118 = arith.constant 0 : index
    %116 = vector.load %arg1[%c0_116, %c35, %c0_117, %c0_118] : memref<1x80x9x128xbf16, #tpu.memory_space<vmem>>, vector<1x4x8x128xbf16>
    %117 = vector.shape_cast %116 : vector<1x4x8x128xbf16> to vector<4x8x128xbf16>
    %118 = vector.shape_cast %117 : vector<4x8x128xbf16> to vector<32x128xbf16>
    %c4_119 = arith.constant 4 : index
    %c0_120 = arith.constant 0 : index
    %c0_121 = arith.constant 0 : index
    %119 = vector.load %arg2[%c4_119, %c0_120, %c0_121] : memref<9x128x128xbf16, #tpu.memory_space<vmem>>, vector<1x128x128xbf16>
    %120 = vector.shape_cast %119 : vector<1x128x128xbf16> to vector<128x128xbf16>
    %cst_122 = arith.constant dense<0.000000e+00> : vector<32x128xf32>
    %121 = tpu.matmul %118, %120, %cst_122 {dimension_numbers = #tpu.dot_dimension_numbers<[1], [0], [0], [1], [0, 0, 1, 1], [], []>} : vector<32x128xbf16>, vector<128x128xbf16>, vector<32x128xf32> -> vector<32x128xf32>
    %122 = arith.addf %115, %121 : vector<32x128xf32>
    %c0_123 = arith.constant 0 : index
    %c20_124 = arith.constant 20 : index
    %c1_125 = arith.constant 1 : index
    %c0_126 = arith.constant 0 : index
    %123 = vector.load %arg1[%c0_123, %c20_124, %c1_125, %c0_126] : memref<1x80x9x128xbf16, #tpu.memory_space<vmem>>, vector<1x4x8x128xbf16>
    %124 = vector.shape_cast %123 : vector<1x4x8x128xbf16> to vector<4x8x128xbf16>
    %125 = vector.shape_cast %124 : vector<4x8x128xbf16> to vector<32x128xbf16>
    %c5_127 = arith.constant 5 : index
    %c0_128 = arith.constant 0 : index
    %c0_129 = arith.constant 0 : index
    %126 = vector.load %arg2[%c5_127, %c0_128, %c0_129] : memref<9x128x128xbf16, #tpu.memory_space<vmem>>, vector<1x128x128xbf16>
    %127 = vector.shape_cast %126 : vector<1x128x128xbf16> to vector<128x128xbf16>
    %cst_130 = arith.constant dense<0.000000e+00> : vector<32x128xf32>
    %128 = tpu.matmul %125, %127, %cst_130 {dimension_numbers = #tpu.dot_dimension_numbers<[1], [0], [0], [1], [0, 0, 1, 1], [], []>} : vector<32x128xbf16>, vector<128x128xbf16>, vector<32x128xf32> -> vector<32x128xf32>
    %129 = arith.addf %122, %128 : vector<32x128xf32>
    %c0_131 = arith.constant 0 : index
    %c50_132 = arith.constant 50 : index
    %c0_133 = arith.constant 0 : index
    %c0_134 = arith.constant 0 : index
    %130 = vector.load %arg1[%c0_131, %c50_132, %c0_133, %c0_134] : memref<1x80x9x128xbf16, #tpu.memory_space<vmem>>, vector<1x4x8x128xbf16>
    %131 = vector.shape_cast %130 : vector<1x4x8x128xbf16> to vector<4x8x128xbf16>
    %132 = vector.shape_cast %131 : vector<4x8x128xbf16> to vector<32x128xbf16>
    %c6_135 = arith.constant 6 : index
    %c0_136 = arith.constant 0 : index
    %c0_137 = arith.constant 0 : index
    %133 = vector.load %arg2[%c6_135, %c0_136, %c0_137] : memref<9x128x128xbf16, #tpu.memory_space<vmem>>, vector<1x128x128xbf16>
    %134 = vector.shape_cast %133 : vector<1x128x128xbf16> to vector<128x128xbf16>
    %cst_138 = arith.constant dense<0.000000e+00> : vector<32x128xf32>
    %135 = tpu.matmul %132, %134, %cst_138 {dimension_numbers = #tpu.dot_dimension_numbers<[1], [0], [0], [1], [0, 0, 1, 1], [], []>} : vector<32x128xbf16>, vector<128x128xbf16>, vector<32x128xf32> -> vector<32x128xf32>
    %136 = arith.addf %129, %135 : vector<32x128xf32>
    %c0_139 = arith.constant 0 : index
    %c55 = arith.constant 55 : index
    %c0_140 = arith.constant 0 : index
    %c0_141 = arith.constant 0 : index
    %137 = vector.load %arg1[%c0_139, %c55, %c0_140, %c0_141] : memref<1x80x9x128xbf16, #tpu.memory_space<vmem>>, vector<1x4x8x128xbf16>
    %138 = vector.shape_cast %137 : vector<1x4x8x128xbf16> to vector<4x8x128xbf16>
    %139 = vector.shape_cast %138 : vector<4x8x128xbf16> to vector<32x128xbf16>
    %c7_142 = arith.constant 7 : index
    %c0_143 = arith.constant 0 : index
    %c0_144 = arith.constant 0 : index
    %140 = vector.load %arg2[%c7_142, %c0_143, %c0_144] : memref<9x128x128xbf16, #tpu.memory_space<vmem>>, vector<1x128x128xbf16>
    %141 = vector.shape_cast %140 : vector<1x128x128xbf16> to vector<128x128xbf16>
    %cst_145 = arith.constant dense<0.000000e+00> : vector<32x128xf32>
    %142 = tpu.matmul %139, %141, %cst_145 {dimension_numbers = #tpu.dot_dimension_numbers<[1], [0], [0], [1], [0, 0, 1, 1], [], []>} : vector<32x128xbf16>, vector<128x128xbf16>, vector<32x128xf32> -> vector<32x128xf32>
    %143 = arith.addf %136, %142 : vector<32x128xf32>
    %c0_146 = arith.constant 0 : index
    %c40_147 = arith.constant 40 : index
    %c1_148 = arith.constant 1 : index
    %c0_149 = arith.constant 0 : index
    %144 = vector.load %arg1[%c0_146, %c40_147, %c1_148, %c0_149] : memref<1x80x9x128xbf16, #tpu.memory_space<vmem>>, vector<1x4x8x128xbf16>
    %145 = vector.shape_cast %144 : vector<1x4x8x128xbf16> to vector<4x8x128xbf16>
    %146 = vector.shape_cast %145 : vector<4x8x128xbf16> to vector<32x128xbf16>
    %c8_150 = arith.constant 8 : index
    %c0_151 = arith.constant 0 : index
    %c0_152 = arith.constant 0 : index
    %147 = vector.load %arg2[%c8_150, %c0_151, %c0_152] : memref<9x128x128xbf16, #tpu.memory_space<vmem>>, vector<1x128x128xbf16>
    %148 = vector.shape_cast %147 : vector<1x128x128xbf16> to vector<128x128xbf16>
    %cst_153 = arith.constant dense<0.000000e+00> : vector<32x128xf32>
    %149 = tpu.matmul %146, %148, %cst_153 {dimension_numbers = #tpu.dot_dimension_numbers<[1], [0], [0], [1], [0, 0, 1, 1], [], []>} : vector<32x128xbf16>, vector<128x128xbf16>, vector<32x128xf32> -> vector<32x128xf32>
    %150 = arith.addf %143, %149 : vector<32x128xf32>
    %151 = vector.shape_cast %150 : vector<32x128xf32> to vector<4x8x128xf32>
    %c0_154 = arith.constant 0 : index
    %c4_155 = arith.constant 4 : index
    %c0_156 = arith.constant 0 : index
    %c0_157 = arith.constant 0 : index
    %152 = vector.load %arg6[%c0_154, %c4_155, %c0_156, %c0_157] : memref<1x16x8x128xf32, #tpu.memory_space<vmem>>, vector<1x4x8x128xf32>
    %153 = vector.shape_cast %152 : vector<1x4x8x128xf32> to vector<4x8x128xf32>
    %154 = vector.shape_cast %151 : vector<4x8x128xf32> to vector<1x4x8x128xf32>
    tpu.vector_store %arg6[%c0_154, %c4_155, %c0_156, %c0_157], %154 {strides = array<i32>} : memref<1x16x8x128xf32, #tpu.memory_space<vmem>>, vector<1x4x8x128xf32>,
    %155 = vector.extract_strided_slice %151 {offsets = [0, 0, 0], sizes = [4, 4, 128], strides = [1, 1, 1]} : vector<4x8x128xf32> to vector<4x4x128xf32>
    %cst_158 = arith.constant 0.000000e+00 : f32
    %156 = vector.broadcast %cst_158 : f32 to vector<4x4x128xf32>
    %157 = arith.maximumf %155, %156 : vector<4x4x128xf32>
    %158 = arith.truncf %157 : vector<4x4x128xf32> to vector<4x4x128xbf16>
    %c10_159 = arith.constant 10 : index
    %c1_160 = arith.constant 1 : index
    %c0_161 = arith.constant 0 : index
    %159 = vector.load %arg8[%c10_159, %c1_160, %c0_161] : memref<20x9x128xbf16, #tpu.memory_space<vmem>>, vector<4x4x128xbf16>
    tpu.vector_store %arg8[%c10_159, %c1_160, %c0_161], %158 {strides = array<i32>} : memref<20x9x128xbf16, #tpu.memory_space<vmem>>, vector<4x4x128xbf16>,
    %cst_162 = arith.constant 0.000000e+00 : bf16
    %160 = vector.broadcast %cst_162 : bf16 to vector<1x9x128xbf16>
    %c5_163 = arith.constant 5 : index
    %c0_164 = arith.constant 0 : index
    %c0_165 = arith.constant 0 : index
    %161 = vector.load %arg8[%c5_163, %c0_164, %c0_165] : memref<20x9x128xbf16, #tpu.memory_space<vmem>>, vector<1x9x128xbf16>
    tpu.vector_store %arg8[%c5_163, %c0_164, %c0_165], %160 {strides = array<i32>} : memref<20x9x128xbf16, #tpu.memory_space<vmem>>, vector<1x9x128xbf16>,
    %cst_166 = arith.constant 0.000000e+00 : bf16
    %162 = vector.broadcast %cst_166 : bf16 to vector<4x5x128xbf16>
    %c6_167 = arith.constant 6 : index
    %c4_168 = arith.constant 4 : index
    %c0_169 = arith.constant 0 : index
    %163 = vector.load %arg8[%c6_167, %c4_168, %c0_169] : memref<20x9x128xbf16, #tpu.memory_space<vmem>>, vector<4x5x128xbf16>
    tpu.vector_store %arg8[%c6_167, %c4_168, %c0_169], %162 {strides = array<i32>} : memref<20x9x128xbf16, #tpu.memory_space<vmem>>, vector<4x5x128xbf16>,
    %164 = vector.shape_cast %0 : vector<1x128xf32> to vector<1x128xf32>
    %165 = vector.broadcast %164 : vector<1x128xf32> to vector<32x128xf32>
    %c0_170 = arith.constant 0 : index
    %c40_171 = arith.constant 40 : index
    %c0_172 = arith.constant 0 : index
    %c0_173 = arith.constant 0 : index
    %166 = vector.load %arg1[%c0_170, %c40_171, %c0_172, %c0_173] : memref<1x80x9x128xbf16, #tpu.memory_space<vmem>>, vector<1x4x8x128xbf16>
    %167 = vector.shape_cast %166 : vector<1x4x8x128xbf16> to vector<4x8x128xbf16>
    %168 = vector.shape_cast %167 : vector<4x8x128xbf16> to vector<32x128xbf16>
    %c0_174 = arith.constant 0 : index
    %c0_175 = arith.constant 0 : index
    %c0_176 = arith.constant 0 : index
    %169 = vector.load %arg2[%c0_174, %c0_175, %c0_176] : memref<9x128x128xbf16, #tpu.memory_space<vmem>>, vector<1x128x128xbf16>
    %170 = vector.shape_cast %169 : vector<1x128x128xbf16> to vector<128x128xbf16>
    %cst_177 = arith.constant dense<0.000000e+00> : vector<32x128xf32>
    %171 = tpu.matmul %168, %170, %cst_177 {dimension_numbers = #tpu.dot_dimension_numbers<[1], [0], [0], [1], [0, 0, 1, 1], [], []>} : vector<32x128xbf16>, vector<128x128xbf16>, vector<32x128xf32> -> vector<32x128xf32>
    %172 = arith.addf %165, %171 : vector<32x128xf32>
    %c0_178 = arith.constant 0 : index
    %c45_179 = arith.constant 45 : index
    %c0_180 = arith.constant 0 : index
    %c0_181 = arith.constant 0 : index
    %173 = vector.load %arg1[%c0_178, %c45_179, %c0_180, %c0_181] : memref<1x80x9x128xbf16, #tpu.memory_space<vmem>>, vector<1x4x8x128xbf16>
    %174 = vector.shape_cast %173 : vector<1x4x8x128xbf16> to vector<4x8x128xbf16>
    %175 = vector.shape_cast %174 : vector<4x8x128xbf16> to vector<32x128xbf16>
    %c1_182 = arith.constant 1 : index
    %c0_183 = arith.constant 0 : index
    %c0_184 = arith.constant 0 : index
    %176 = vector.load %arg2[%c1_182, %c0_183, %c0_184] : memref<9x128x128xbf16, #tpu.memory_space<vmem>>, vector<1x128x128xbf16>
    %177 = vector.shape_cast %176 : vector<1x128x128xbf16> to vector<128x128xbf16>
    %cst_185 = arith.constant dense<0.000000e+00> : vector<32x128xf32>
    %178 = tpu.matmul %175, %177, %cst_185 {dimension_numbers = #tpu.dot_dimension_numbers<[1], [0], [0], [1], [0, 0, 1, 1], [], []>} : vector<32x128xbf16>, vector<128x128xbf16>, vector<32x128xf32> -> vector<32x128xf32>
    %179 = arith.addf %172, %178 : vector<32x128xf32>
    %c0_186 = arith.constant 0 : index
    %c50_187 = arith.constant 50 : index
    %c0_188 = arith.constant 0 : index
    %c0_189 = arith.constant 0 : index
    %180 = vector.load %arg1[%c0_186, %c50_187, %c0_188, %c0_189] : memref<1x80x9x128xbf16, #tpu.memory_space<vmem>>, vector<1x4x8x128xbf16>
    %181 = vector.shape_cast %180 : vector<1x4x8x128xbf16> to vector<4x8x128xbf16>
    %182 = vector.shape_cast %181 : vector<4x8x128xbf16> to vector<32x128xbf16>
    %c2_190 = arith.constant 2 : index
    %c0_191 = arith.constant 0 : index
    %c0_192 = arith.constant 0 : index
    %183 = vector.load %arg2[%c2_190, %c0_191, %c0_192] : memref<9x128x128xbf16, #tpu.memory_space<vmem>>, vector<1x128x128xbf16>
    %184 = vector.shape_cast %183 : vector<1x128x128xbf16> to vector<128x128xbf16>
    %cst_193 = arith.constant dense<0.000000e+00> : vector<32x128xf32>
    %185 = tpu.matmul %182, %184, %cst_193 {dimension_numbers = #tpu.dot_dimension_numbers<[1], [0], [0], [1], [0, 0, 1, 1], [], []>} : vector<32x128xbf16>, vector<128x128xbf16>, vector<32x128xf32> -> vector<32x128xf32>
    %186 = arith.addf %179, %185 : vector<32x128xf32>
    %c0_194 = arith.constant 0 : index
    %c60 = arith.constant 60 : index
    %c0_195 = arith.constant 0 : index
    %c0_196 = arith.constant 0 : index
    %187 = vector.load %arg1[%c0_194, %c60, %c0_195, %c0_196] : memref<1x80x9x128xbf16, #tpu.memory_space<vmem>>, vector<1x4x8x128xbf16>
    %188 = vector.shape_cast %187 : vector<1x4x8x128xbf16> to vector<4x8x128xbf16>
    %189 = vector.shape_cast %188 : vector<4x8x128xbf16> to vector<32x128xbf16>
    %c3_197 = arith.constant 3 : index
    %c0_198 = arith.constant 0 : index
    %c0_199 = arith.constant 0 : index
    %190 = vector.load %arg2[%c3_197, %c0_198, %c0_199] : memref<9x128x128xbf16, #tpu.memory_space<vmem>>, vector<1x128x128xbf16>
    %191 = vector.shape_cast %190 : vector<1x128x128xbf16> to vector<128x128xbf16>
    %cst_200 = arith.constant dense<0.000000e+00> : vector<32x128xf32>
    %192 = tpu.matmul %189, %191, %cst_200 {dimension_numbers = #tpu.dot_dimension_numbers<[1], [0], [0], [1], [0, 0, 1, 1], [], []>} : vector<32x128xbf16>, vector<128x128xbf16>, vector<32x128xf32> -> vector<32x128xf32>
    %193 = arith.addf %186, %192 : vector<32x128xf32>
    %c0_201 = arith.constant 0 : index
    %c65 = arith.constant 65 : index
    %c0_202 = arith.constant 0 : index
    %c0_203 = arith.constant 0 : index
    %194 = vector.load %arg1[%c0_201, %c65, %c0_202, %c0_203] : memref<1x80x9x128xbf16, #tpu.memory_space<vmem>>, vector<1x4x8x128xbf16>
    %195 = vector.shape_cast %194 : vector<1x4x8x128xbf16> to vector<4x8x128xbf16>
    %196 = vector.shape_cast %195 : vector<4x8x128xbf16> to vector<32x128xbf16>
    %c4_204 = arith.constant 4 : index
    %c0_205 = arith.constant 0 : index
    %c0_206 = arith.constant 0 : index
    %197 = vector.load %arg2[%c4_204, %c0_205, %c0_206] : memref<9x128x128xbf16, #tpu.memory_space<vmem>>, vector<1x128x128xbf16>
    %198 = vector.shape_cast %197 : vector<1x128x128xbf16> to vector<128x128xbf16>
    %cst_207 = arith.constant dense<0.000000e+00> : vector<32x128xf32>
    %199 = tpu.matmul %196, %198, %cst_207 {dimension_numbers = #tpu.dot_dimension_numbers<[1], [0], [0], [1], [0, 0, 1, 1], [], []>} : vector<32x128xbf16>, vector<128x128xbf16>, vector<32x128xf32> -> vector<32x128xf32>
    %200 = arith.addf %193, %199 : vector<32x128xf32>
    %c0_208 = arith.constant 0 : index
    %c70 = arith.constant 70 : index
    %c0_209 = arith.constant 0 : index
    %c0_210 = arith.constant 0 : index
    %201 = vector.load %arg1[%c0_208, %c70, %c0_209, %c0_210] : memref<1x80x9x128xbf16, #tpu.memory_space<vmem>>, vector<1x4x8x128xbf16>
    %202 = vector.shape_cast %201 : vector<1x4x8x128xbf16> to vector<4x8x128xbf16>
    %203 = vector.shape_cast %202 : vector<4x8x128xbf16> to vector<32x128xbf16>
    %c5_211 = arith.constant 5 : index
    %c0_212 = arith.constant 0 : index
    %c0_213 = arith.constant 0 : index
    %204 = vector.load %arg2[%c5_211, %c0_212, %c0_213] : memref<9x128x128xbf16, #tpu.memory_space<vmem>>, vector<1x128x128xbf16>
    %205 = vector.shape_cast %204 : vector<1x128x128xbf16> to vector<128x128xbf16>
    %cst_214 = arith.constant dense<0.000000e+00> : vector<32x128xf32>
    %206 = tpu.matmul %203, %205, %cst_214 {dimension_numbers = #tpu.dot_dimension_numbers<[1], [0], [0], [1], [0, 0, 1, 1], [], []>} : vector<32x128xbf16>, vector<128x128xbf16>, vector<32x128xf32> -> vector<32x128xf32>
    %207 = arith.addf %200, %206 : vector<32x128xf32>
    %c0_215 = arith.constant 0 : index
    %c1_216 = arith.constant 1 : index
    %c0_217 = arith.constant 0 : index
    %c0_218 = arith.constant 0 : index
    %208 = vector.load %arg1[%c0_215, %c1_216, %c0_217, %c0_218] : memref<1x80x9x128xbf16, #tpu.memory_space<vmem>>, vector<1x4x8x128xbf16>
    %209 = vector.shape_cast %208 : vector<1x4x8x128xbf16> to vector<4x8x128xbf16>
    %210 = vector.shape_cast %209 : vector<4x8x128xbf16> to vector<32x128xbf16>
    %c6_219 = arith.constant 6 : index
    %c0_220 = arith.constant 0 : index
    %c0_221 = arith.constant 0 : index
    %211 = vector.load %arg2[%c6_219, %c0_220, %c0_221] : memref<9x128x128xbf16, #tpu.memory_space<vmem>>, vector<1x128x128xbf16>
    %212 = vector.shape_cast %211 : vector<1x128x128xbf16> to vector<128x128xbf16>
    %cst_222 = arith.constant dense<0.000000e+00> : vector<32x128xf32>
    %213 = tpu.matmul %210, %212, %cst_222 {dimension_numbers = #tpu.dot_dimension_numbers<[1], [0], [0], [1], [0, 0, 1, 1], [], []>} : vector<32x128xbf16>, vector<128x128xbf16>, vector<32x128xf32> -> vector<32x128xf32>
    %214 = arith.addf %207, %213 : vector<32x128xf32>
    %c0_223 = arith.constant 0 : index
    %c6_224 = arith.constant 6 : index
    %c0_225 = arith.constant 0 : index
    %c0_226 = arith.constant 0 : index
    %215 = vector.load %arg1[%c0_223, %c6_224, %c0_225, %c0_226] : memref<1x80x9x128xbf16, #tpu.memory_space<vmem>>, vector<1x4x8x128xbf16>
    %216 = vector.shape_cast %215 : vector<1x4x8x128xbf16> to vector<4x8x128xbf16>
    %217 = vector.shape_cast %216 : vector<4x8x128xbf16> to vector<32x128xbf16>
    %c7_227 = arith.constant 7 : index
    %c0_228 = arith.constant 0 : index
    %c0_229 = arith.constant 0 : index
    %218 = vector.load %arg2[%c7_227, %c0_228, %c0_229] : memref<9x128x128xbf16, #tpu.memory_space<vmem>>, vector<1x128x128xbf16>
    %219 = vector.shape_cast %218 : vector<1x128x128xbf16> to vector<128x128xbf16>
    %cst_230 = arith.constant dense<0.000000e+00> : vector<32x128xf32>
    %220 = tpu.matmul %217, %219, %cst_230 {dimension_numbers = #tpu.dot_dimension_numbers<[1], [0], [0], [1], [0, 0, 1, 1], [], []>} : vector<32x128xbf16>, vector<128x128xbf16>, vector<32x128xf32> -> vector<32x128xf32>
    %221 = arith.addf %214, %220 : vector<32x128xf32>
    %c0_231 = arith.constant 0 : index
    %c11 = arith.constant 11 : index
    %c0_232 = arith.constant 0 : index
    %c0_233 = arith.constant 0 : index
    %222 = vector.load %arg1[%c0_231, %c11, %c0_232, %c0_233] : memref<1x80x9x128xbf16, #tpu.memory_space<vmem>>, vector<1x4x8x128xbf16>
    %223 = vector.shape_cast %222 : vector<1x4x8x128xbf16> to vector<4x8x128xbf16>
    %224 = vector.shape_cast %223 : vector<4x8x128xbf16> to vector<32x128xbf16>
    %c8_234 = arith.constant 8 : index
    %c0_235 = arith.constant 0 : index
    %c0_236 = arith.constant 0 : index
    %225 = vector.load %arg2[%c8_234, %c0_235, %c0_236] : memref<9x128x128xbf16, #tpu.memory_space<vmem>>, vector<1x128x128xbf16>
    %226 = vector.shape_cast %225 : vector<1x128x128xbf16> to vector<128x128xbf16>
    %cst_237 = arith.constant dense<0.000000e+00> : vector<32x128xf32>
    %227 = tpu.matmul %224, %226, %cst_237 {dimension_numbers = #tpu.dot_dimension_numbers<[1], [0], [0], [1], [0, 0, 1, 1], [], []>} : vector<32x128xbf16>, vector<128x128xbf16>, vector<32x128xf32> -> vector<32x128xf32>
    %228 = arith.addf %221, %227 : vector<32x128xf32>
    %229 = vector.shape_cast %228 : vector<32x128xf32> to vector<4x8x128xf32>
    %c0_238 = arith.constant 0 : index
    %c8_239 = arith.constant 8 : index
    %c0_240 = arith.constant 0 : index
    %c0_241 = arith.constant 0 : index
    %230 = vector.load %arg6[%c0_238, %c8_239, %c0_240, %c0_241] : memref<1x16x8x128xf32, #tpu.memory_space<vmem>>, vector<1x4x8x128xf32>
    %231 = vector.shape_cast %230 : vector<1x4x8x128xf32> to vector<4x8x128xf32>
    %232 = vector.shape_cast %229 : vector<4x8x128xf32> to vector<1x4x8x128xf32>
    tpu.vector_store %arg6[%c0_238, %c8_239, %c0_240, %c0_241], %232 {strides = array<i32>} : memref<1x16x8x128xf32, #tpu.memory_space<vmem>>, vector<1x4x8x128xf32>,
    %233 = vector.extract_strided_slice %229 {offsets = [0, 0, 0], sizes = [4, 4, 128], strides = [1, 1, 1]} : vector<4x8x128xf32> to vector<4x4x128xf32>
    %cst_242 = arith.constant 0.000000e+00 : f32
    %234 = vector.broadcast %cst_242 : f32 to vector<4x4x128xf32>
    %235 = arith.maximumf %233, %234 : vector<4x4x128xf32>
    %236 = arith.truncf %235 : vector<4x4x128xf32> to vector<4x4x128xbf16>
    %c6_243 = arith.constant 6 : index
    %c0_244 = arith.constant 0 : index
    %c0_245 = arith.constant 0 : index
    %237 = vector.load %arg8[%c6_243, %c0_244, %c0_245] : memref<20x9x128xbf16, #tpu.memory_space<vmem>>, vector<4x4x128xbf16>
    tpu.vector_store %arg8[%c6_243, %c0_244, %c0_245], %236 {strides = array<i32>} : memref<20x9x128xbf16, #tpu.memory_space<vmem>>, vector<4x4x128xbf16>,
    %cst_246 = arith.constant 0.000000e+00 : bf16
    %238 = vector.broadcast %cst_246 : bf16 to vector<1x9x128xbf16>
    %c0_247 = arith.constant 0 : index
    %c0_248 = arith.constant 0 : index
    %c0_249 = arith.constant 0 : index
    %239 = vector.load %arg8[%c0_247, %c0_248, %c0_249] : memref<20x9x128xbf16, #tpu.memory_space<vmem>>, vector<1x9x128xbf16>
    tpu.vector_store %arg8[%c0_247, %c0_248, %c0_249], %238 {strides = array<i32>} : memref<20x9x128xbf16, #tpu.memory_space<vmem>>, vector<1x9x128xbf16>,
    %cst_250 = arith.constant 0.000000e+00 : bf16
    %240 = vector.broadcast %cst_250 : bf16 to vector<4x1x128xbf16>
    %c1_251 = arith.constant 1 : index
    %c0_252 = arith.constant 0 : index
    %c0_253 = arith.constant 0 : index
    %241 = vector.load %arg8[%c1_251, %c0_252, %c0_253] : memref<20x9x128xbf16, #tpu.memory_space<vmem>>, vector<4x1x128xbf16>
    tpu.vector_store %arg8[%c1_251, %c0_252, %c0_253], %240 {strides = array<i32>} : memref<20x9x128xbf16, #tpu.memory_space<vmem>>, vector<4x1x128xbf16>,
    %cst_254 = arith.constant 0.000000e+00 : bf16
    %242 = vector.broadcast %cst_254 : bf16 to vector<4x4x128xbf16>
    %c1_255 = arith.constant 1 : index
    %c5_256 = arith.constant 5 : index
    %c0_257 = arith.constant 0 : index
    %243 = vector.load %arg8[%c1_255, %c5_256, %c0_257] : memref<20x9x128xbf16, #tpu.memory_space<vmem>>, vector<4x4x128xbf16>
    tpu.vector_store %arg8[%c1_255, %c5_256, %c0_257], %242 {strides = array<i32>} : memref<20x9x128xbf16, #tpu.memory_space<vmem>>, vector<4x4x128xbf16>,
    %244 = vector.shape_cast %0 : vector<1x128xf32> to vector<1x128xf32>
    %245 = vector.broadcast %244 : vector<1x128xf32> to vector<32x128xf32>
    %c0_258 = arith.constant 0 : index
    %c50_259 = arith.constant 50 : index
    %c0_260 = arith.constant 0 : index
    %c0_261 = arith.constant 0 : index
    %246 = vector.load %arg1[%c0_258, %c50_259, %c0_260, %c0_261] : memref<1x80x9x128xbf16, #tpu.memory_space<vmem>>, vector<1x4x8x128xbf16>
    %247 = vector.shape_cast %246 : vector<1x4x8x128xbf16> to vector<4x8x128xbf16>
    %248 = vector.shape_cast %247 : vector<4x8x128xbf16> to vector<32x128xbf16>
    %c0_262 = arith.constant 0 : index
    %c0_263 = arith.constant 0 : index
    %c0_264 = arith.constant 0 : index
    %249 = vector.load %arg2[%c0_262, %c0_263, %c0_264] : memref<9x128x128xbf16, #tpu.memory_space<vmem>>, vector<1x128x128xbf16>
    %250 = vector.shape_cast %249 : vector<1x128x128xbf16> to vector<128x128xbf16>
    %cst_265 = arith.constant dense<0.000000e+00> : vector<32x128xf32>
    %251 = tpu.matmul %248, %250, %cst_265 {dimension_numbers = #tpu.dot_dimension_numbers<[1], [0], [0], [1], [0, 0, 1, 1], [], []>} : vector<32x128xbf16>, vector<128x128xbf16>, vector<32x128xf32> -> vector<32x128xf32>
    %252 = arith.addf %245, %251 : vector<32x128xf32>
    %c0_266 = arith.constant 0 : index
    %c55_267 = arith.constant 55 : index
    %c0_268 = arith.constant 0 : index
    %c0_269 = arith.constant 0 : index
    %253 = vector.load %arg1[%c0_266, %c55_267, %c0_268, %c0_269] : memref<1x80x9x128xbf16, #tpu.memory_space<vmem>>, vector<1x4x8x128xbf16>
    %254 = vector.shape_cast %253 : vector<1x4x8x128xbf16> to vector<4x8x128xbf16>
    %255 = vector.shape_cast %254 : vector<4x8x128xbf16> to vector<32x128xbf16>
    %c1_270 = arith.constant 1 : index
    %c0_271 = arith.constant 0 : index
    %c0_272 = arith.constant 0 : index
    %256 = vector.load %arg2[%c1_270, %c0_271, %c0_272] : memref<9x128x128xbf16, #tpu.memory_space<vmem>>, vector<1x128x128xbf16>
    %257 = vector.shape_cast %256 : vector<1x128x128xbf16> to vector<128x128xbf16>
    %cst_273 = arith.constant dense<0.000000e+00> : vector<32x128xf32>
    %258 = tpu.matmul %255, %257, %cst_273 {dimension_numbers = #tpu.dot_dimension_numbers<[1], [0], [0], [1], [0, 0, 1, 1], [], []>} : vector<32x128xbf16>, vector<128x128xbf16>, vector<32x128xf32> -> vector<32x128xf32>
    %259 = arith.addf %252, %258 : vector<32x128xf32>
    %c0_274 = arith.constant 0 : index
    %c40_275 = arith.constant 40 : index
    %c1_276 = arith.constant 1 : index
    %c0_277 = arith.constant 0 : index
    %260 = vector.load %arg1[%c0_274, %c40_275, %c1_276, %c0_277] : memref<1x80x9x128xbf16, #tpu.memory_space<vmem>>, vector<1x4x8x128xbf16>
    %261 = vector.shape_cast %260 : vector<1x4x8x128xbf16> to vector<4x8x128xbf16>
    %262 = vector.shape_cast %261 : vector<4x8x128xbf16> to vector<32x128xbf16>
    %c2_278 = arith.constant 2 : index
    %c0_279 = arith.constant 0 : index
    %c0_280 = arith.constant 0 : index
    %263 = vector.load %arg2[%c2_278, %c0_279, %c0_280] : memref<9x128x128xbf16, #tpu.memory_space<vmem>>, vector<1x128x128xbf16>
    %264 = vector.shape_cast %263 : vector<1x128x128xbf16> to vector<128x128xbf16>
    %cst_281 = arith.constant dense<0.000000e+00> : vector<32x128xf32>
    %265 = tpu.matmul %262, %264, %cst_281 {dimension_numbers = #tpu.dot_dimension_numbers<[1], [0], [0], [1], [0, 0, 1, 1], [], []>} : vector<32x128xbf16>, vector<128x128xbf16>, vector<32x128xf32> -> vector<32x128xf32>
    %266 = arith.addf %259, %265 : vector<32x128xf32>
    %c0_282 = arith.constant 0 : index
    %c70_283 = arith.constant 70 : index
    %c0_284 = arith.constant 0 : index
    %c0_285 = arith.constant 0 : index
    %267 = vector.load %arg1[%c0_282, %c70_283, %c0_284, %c0_285] : memref<1x80x9x128xbf16, #tpu.memory_space<vmem>>, vector<1x4x8x128xbf16>
    %268 = vector.shape_cast %267 : vector<1x4x8x128xbf16> to vector<4x8x128xbf16>
    %269 = vector.shape_cast %268 : vector<4x8x128xbf16> to vector<32x128xbf16>
    %c3_286 = arith.constant 3 : index
    %c0_287 = arith.constant 0 : index
    %c0_288 = arith.constant 0 : index
    %270 = vector.load %arg2[%c3_286, %c0_287, %c0_288] : memref<9x128x128xbf16, #tpu.memory_space<vmem>>, vector<1x128x128xbf16>
    %271 = vector.shape_cast %270 : vector<1x128x128xbf16> to vector<128x128xbf16>
    %cst_289 = arith.constant dense<0.000000e+00> : vector<32x128xf32>
    %272 = tpu.matmul %269, %271, %cst_289 {dimension_numbers = #tpu.dot_dimension_numbers<[1], [0], [0], [1], [0, 0, 1, 1], [], []>} : vector<32x128xbf16>, vector<128x128xbf16>, vector<32x128xf32> -> vector<32x128xf32>
    %273 = arith.addf %266, %272 : vector<32x128xf32>
    %c0_290 = arith.constant 0 : index
    %c75 = arith.constant 75 : index
    %c0_291 = arith.constant 0 : index
    %c0_292 = arith.constant 0 : index
    %274 = vector.load %arg1[%c0_290, %c75, %c0_291, %c0_292] : memref<1x80x9x128xbf16, #tpu.memory_space<vmem>>, vector<1x4x8x128xbf16>
    %275 = vector.shape_cast %274 : vector<1x4x8x128xbf16> to vector<4x8x128xbf16>
    %276 = vector.shape_cast %275 : vector<4x8x128xbf16> to vector<32x128xbf16>
    %c4_293 = arith.constant 4 : index
    %c0_294 = arith.constant 0 : index
    %c0_295 = arith.constant 0 : index
    %277 = vector.load %arg2[%c4_293, %c0_294, %c0_295] : memref<9x128x128xbf16, #tpu.memory_space<vmem>>, vector<1x128x128xbf16>
    %278 = vector.shape_cast %277 : vector<1x128x128xbf16> to vector<128x128xbf16>
    %cst_296 = arith.constant dense<0.000000e+00> : vector<32x128xf32>
    %279 = tpu.matmul %276, %278, %cst_296 {dimension_numbers = #tpu.dot_dimension_numbers<[1], [0], [0], [1], [0, 0, 1, 1], [], []>} : vector<32x128xbf16>, vector<128x128xbf16>, vector<32x128xf32> -> vector<32x128xf32>
    %280 = arith.addf %273, %279 : vector<32x128xf32>
    %c0_297 = arith.constant 0 : index
    %c60_298 = arith.constant 60 : index
    %c1_299 = arith.constant 1 : index
    %c0_300 = arith.constant 0 : index
    %281 = vector.load %arg1[%c0_297, %c60_298, %c1_299, %c0_300] : memref<1x80x9x128xbf16, #tpu.memory_space<vmem>>, vector<1x4x8x128xbf16>
    %282 = vector.shape_cast %281 : vector<1x4x8x128xbf16> to vector<4x8x128xbf16>
    %283 = vector.shape_cast %282 : vector<4x8x128xbf16> to vector<32x128xbf16>
    %c5_301 = arith.constant 5 : index
    %c0_302 = arith.constant 0 : index
    %c0_303 = arith.constant 0 : index
    %284 = vector.load %arg2[%c5_301, %c0_302, %c0_303] : memref<9x128x128xbf16, #tpu.memory_space<vmem>>, vector<1x128x128xbf16>
    %285 = vector.shape_cast %284 : vector<1x128x128xbf16> to vector<128x128xbf16>
    %cst_304 = arith.constant dense<0.000000e+00> : vector<32x128xf32>
    %286 = tpu.matmul %283, %285, %cst_304 {dimension_numbers = #tpu.dot_dimension_numbers<[1], [0], [0], [1], [0, 0, 1, 1], [], []>} : vector<32x128xbf16>, vector<128x128xbf16>, vector<32x128xf32> -> vector<32x128xf32>
    %287 = arith.addf %280, %286 : vector<32x128xf32>
    %c0_305 = arith.constant 0 : index
    %c11_306 = arith.constant 11 : index
    %c0_307 = arith.constant 0 : index
    %c0_308 = arith.constant 0 : index
    %288 = vector.load %arg1[%c0_305, %c11_306, %c0_307, %c0_308] : memref<1x80x9x128xbf16, #tpu.memory_space<vmem>>, vector<1x4x8x128xbf16>
    %289 = vector.shape_cast %288 : vector<1x4x8x128xbf16> to vector<4x8x128xbf16>
    %290 = vector.shape_cast %289 : vector<4x8x128xbf16> to vector<32x128xbf16>
    %c6_309 = arith.constant 6 : index
    %c0_310 = arith.constant 0 : index
    %c0_311 = arith.constant 0 : index
    %291 = vector.load %arg2[%c6_309, %c0_310, %c0_311] : memref<9x128x128xbf16, #tpu.memory_space<vmem>>, vector<1x128x128xbf16>
    %292 = vector.shape_cast %291 : vector<1x128x128xbf16> to vector<128x128xbf16>
    %cst_312 = arith.constant dense<0.000000e+00> : vector<32x128xf32>
    %293 = tpu.matmul %290, %292, %cst_312 {dimension_numbers = #tpu.dot_dimension_numbers<[1], [0], [0], [1], [0, 0, 1, 1], [], []>} : vector<32x128xbf16>, vector<128x128xbf16>, vector<32x128xf32> -> vector<32x128xf32>
    %294 = arith.addf %287, %293 : vector<32x128xf32>
    %c0_313 = arith.constant 0 : index
    %c16 = arith.constant 16 : index
    %c0_314 = arith.constant 0 : index
    %c0_315 = arith.constant 0 : index
    %295 = vector.load %arg1[%c0_313, %c16, %c0_314, %c0_315] : memref<1x80x9x128xbf16, #tpu.memory_space<vmem>>, vector<1x4x8x128xbf16>
    %296 = vector.shape_cast %295 : vector<1x4x8x128xbf16> to vector<4x8x128xbf16>
    %297 = vector.shape_cast %296 : vector<4x8x128xbf16> to vector<32x128xbf16>
    %c7_316 = arith.constant 7 : index
    %c0_317 = arith.constant 0 : index
    %c0_318 = arith.constant 0 : index
    %298 = vector.load %arg2[%c7_316, %c0_317, %c0_318] : memref<9x128x128xbf16, #tpu.memory_space<vmem>>, vector<1x128x128xbf16>
    %299 = vector.shape_cast %298 : vector<1x128x128xbf16> to vector<128x128xbf16>
    %cst_319 = arith.constant dense<0.000000e+00> : vector<32x128xf32>
    %300 = tpu.matmul %297, %299, %cst_319 {dimension_numbers = #tpu.dot_dimension_numbers<[1], [0], [0], [1], [0, 0, 1, 1], [], []>} : vector<32x128xbf16>, vector<128x128xbf16>, vector<32x128xf32> -> vector<32x128xf32>
    %301 = arith.addf %294, %300 : vector<32x128xf32>
    %c0_320 = arith.constant 0 : index
    %c1_321 = arith.constant 1 : index
    %c1_322 = arith.constant 1 : index
    %c0_323 = arith.constant 0 : index
    %302 = vector.load %arg1[%c0_320, %c1_321, %c1_322, %c0_323] : memref<1x80x9x128xbf16, #tpu.memory_space<vmem>>, vector<1x4x8x128xbf16>
    %303 = vector.shape_cast %302 : vector<1x4x8x128xbf16> to vector<4x8x128xbf16>
    %304 = vector.shape_cast %303 : vector<4x8x128xbf16> to vector<32x128xbf16>
    %c8_324 = arith.constant 8 : index
    %c0_325 = arith.constant 0 : index
    %c0_326 = arith.constant 0 : index
    %305 = vector.load %arg2[%c8_324, %c0_325, %c0_326] : memref<9x128x128xbf16, #tpu.memory_space<vmem>>, vector<1x128x128xbf16>
    %306 = vector.shape_cast %305 : vector<1x128x128xbf16> to vector<128x128xbf16>
    %cst_327 = arith.constant dense<0.000000e+00> : vector<32x128xf32>
    %307 = tpu.matmul %304, %306, %cst_327 {dimension_numbers = #tpu.dot_dimension_numbers<[1], [0], [0], [1], [0, 0, 1, 1], [], []>} : vector<32x128xbf16>, vector<128x128xbf16>, vector<32x128xf32> -> vector<32x128xf32>
    %308 = arith.addf %301, %307 : vector<32x128xf32>
    %309 = vector.shape_cast %308 : vector<32x128xf32> to vector<4x8x128xf32>
    %c0_328 = arith.constant 0 : index
    %c12 = arith.constant 12 : index
    %c0_329 = arith.constant 0 : index
    %c0_330 = arith.constant 0 : index
    %310 = vector.load %arg6[%c0_328, %c12, %c0_329, %c0_330] : memref<1x16x8x128xf32, #tpu.memory_space<vmem>>, vector<1x4x8x128xf32>
    %311 = vector.shape_cast %310 : vector<1x4x8x128xf32> to vector<4x8x128xf32>
    %312 = vector.shape_cast %309 : vector<4x8x128xf32> to vector<1x4x8x128xf32>
    tpu.vector_store %arg6[%c0_328, %c12, %c0_329, %c0_330], %312 {strides = array<i32>} : memref<1x16x8x128xf32, #tpu.memory_space<vmem>>, vector<1x4x8x128xf32>,
    %313 = vector.extract_strided_slice %309 {offsets = [0, 0, 0], sizes = [4, 4, 128], strides = [1, 1, 1]} : vector<4x8x128xf32> to vector<4x4x128xf32>
    %cst_331 = arith.constant 0.000000e+00 : f32
    %314 = vector.broadcast %cst_331 : f32 to vector<4x4x128xf32>
    %315 = arith.maximumf %313, %314 : vector<4x4x128xf32>
    %316 = arith.truncf %315 : vector<4x4x128xf32> to vector<4x4x128xbf16>
    %c1_332 = arith.constant 1 : index
    %c1_333 = arith.constant 1 : index
    %c0_334 = arith.constant 0 : index
    %317 = vector.load %arg8[%c1_332, %c1_333, %c0_334] : memref<20x9x128xbf16, #tpu.memory_space<vmem>>, vector<4x4x128xbf16>
    tpu.vector_store %arg8[%c1_332, %c1_333, %c0_334], %316 {strides = array<i32>} : memref<20x9x128xbf16, #tpu.memory_space<vmem>>, vector<4x4x128xbf16>,
    %318 = vector.shape_cast %1 : vector<1x128xf32> to vector<1x128xf32>
    %319 = vector.broadcast %318 : vector<1x128xf32> to vector<32x128xf32>
    %c0_335 = arith.constant 0 : index
    %c0_336 = arith.constant 0 : index
    %c0_337 = arith.constant 0 : index
    %320 = vector.load %arg8[%c0_335, %c0_336, %c0_337] : memref<20x9x128xbf16, #tpu.memory_space<vmem>>, vector<4x8x128xbf16>
    %321 = vector.shape_cast %320 : vector<4x8x128xbf16> to vector<32x128xbf16>
    %c0_338 = arith.constant 0 : index
    %c0_339 = arith.constant 0 : index
    %c0_340 = arith.constant 0 : index
    %322 = vector.load %arg4[%c0_338, %c0_339, %c0_340] : memref<9x128x128xbf16, #tpu.memory_space<vmem>>, vector<1x128x128xbf16>
    %323 = vector.shape_cast %322 : vector<1x128x128xbf16> to vector<128x128xbf16>
    %cst_341 = arith.constant dense<0.000000e+00> : vector<32x128xf32>
    %324 = tpu.matmul %321, %323, %cst_341 {dimension_numbers = #tpu.dot_dimension_numbers<[1], [0], [0], [1], [0, 0, 1, 1], [], []>} : vector<32x128xbf16>, vector<128x128xbf16>, vector<32x128xf32> -> vector<32x128xf32>
    %325 = arith.addf %319, %324 : vector<32x128xf32>
    %c5_342 = arith.constant 5 : index
    %c0_343 = arith.constant 0 : index
    %c0_344 = arith.constant 0 : index
    %326 = vector.load %arg8[%c5_342, %c0_343, %c0_344] : memref<20x9x128xbf16, #tpu.memory_space<vmem>>, vector<4x8x128xbf16>
    %327 = vector.shape_cast %326 : vector<4x8x128xbf16> to vector<32x128xbf16>
    %c1_345 = arith.constant 1 : index
    %c0_346 = arith.constant 0 : index
    %c0_347 = arith.constant 0 : index
    %328 = vector.load %arg4[%c1_345, %c0_346, %c0_347] : memref<9x128x128xbf16, #tpu.memory_space<vmem>>, vector<1x128x128xbf16>
    %329 = vector.shape_cast %328 : vector<1x128x128xbf16> to vector<128x128xbf16>
    %cst_348 = arith.constant dense<0.000000e+00> : vector<32x128xf32>
    %330 = tpu.matmul %327, %329, %cst_348 {dimension_numbers = #tpu.dot_dimension_numbers<[1], [0], [0], [1], [0, 0, 1, 1], [], []>} : vector<32x128xbf16>, vector<128x128xbf16>, vector<32x128xf32> -> vector<32x128xf32>
    %331 = arith.addf %325, %330 : vector<32x128xf32>
    %c0_349 = arith.constant 0 : index
    %c1_350 = arith.constant 1 : index
    %c0_351 = arith.constant 0 : index
    %332 = vector.load %arg8[%c0_349, %c1_350, %c0_351] : memref<20x9x128xbf16, #tpu.memory_space<vmem>>, vector<4x8x128xbf16>
    %333 = vector.shape_cast %332 : vector<4x8x128xbf16> to vector<32x128xbf16>
    %c2_352 = arith.constant 2 : index
    %c0_353 = arith.constant 0 : index
    %c0_354 = arith.constant 0 : index
    %334 = vector.load %arg4[%c2_352, %c0_353, %c0_354] : memref<9x128x128xbf16, #tpu.memory_space<vmem>>, vector<1x128x128xbf16>
    %335 = vector.shape_cast %334 : vector<1x128x128xbf16> to vector<128x128xbf16>
    %cst_355 = arith.constant dense<0.000000e+00> : vector<32x128xf32>
    %336 = tpu.matmul %333, %335, %cst_355 {dimension_numbers = #tpu.dot_dimension_numbers<[1], [0], [0], [1], [0, 0, 1, 1], [], []>} : vector<32x128xbf16>, vector<128x128xbf16>, vector<32x128xf32> -> vector<32x128xf32>
    %337 = arith.addf %331, %336 : vector<32x128xf32>
    %c10_356 = arith.constant 10 : index
    %c0_357 = arith.constant 0 : index
    %c0_358 = arith.constant 0 : index
    %338 = vector.load %arg8[%c10_356, %c0_357, %c0_358] : memref<20x9x128xbf16, #tpu.memory_space<vmem>>, vector<4x8x128xbf16>
    %339 = vector.shape_cast %338 : vector<4x8x128xbf16> to vector<32x128xbf16>
    %c3_359 = arith.constant 3 : index
    %c0_360 = arith.constant 0 : index
    %c0_361 = arith.constant 0 : index
    %340 = vector.load %arg4[%c3_359, %c0_360, %c0_361] : memref<9x128x128xbf16, #tpu.memory_space<vmem>>, vector<1x128x128xbf16>
    %341 = vector.shape_cast %340 : vector<1x128x128xbf16> to vector<128x128xbf16>
    %cst_362 = arith.constant dense<0.000000e+00> : vector<32x128xf32>
    %342 = tpu.matmul %339, %341, %cst_362 {dimension_numbers = #tpu.dot_dimension_numbers<[1], [0], [0], [1], [0, 0, 1, 1], [], []>} : vector<32x128xbf16>, vector<128x128xbf16>, vector<32x128xf32> -> vector<32x128xf32>
    %343 = arith.addf %337, %342 : vector<32x128xf32>
    %c15_363 = arith.constant 15 : index
    %c0_364 = arith.constant 0 : index
    %c0_365 = arith.constant 0 : index
    %344 = vector.load %arg8[%c15_363, %c0_364, %c0_365] : memref<20x9x128xbf16, #tpu.memory_space<vmem>>, vector<4x8x128xbf16>
    %345 = vector.shape_cast %344 : vector<4x8x128xbf16> to vector<32x128xbf16>
    %c4_366 = arith.constant 4 : index
    %c0_367 = arith.constant 0 : index
    %c0_368 = arith.constant 0 : index
    %346 = vector.load %arg4[%c4_366, %c0_367, %c0_368] : memref<9x128x128xbf16, #tpu.memory_space<vmem>>, vector<1x128x128xbf16>
    %347 = vector.shape_cast %346 : vector<1x128x128xbf16> to vector<128x128xbf16>
    %cst_369 = arith.constant dense<0.000000e+00> : vector<32x128xf32>
    %348 = tpu.matmul %345, %347, %cst_369 {dimension_numbers = #tpu.dot_dimension_numbers<[1], [0], [0], [1], [0, 0, 1, 1], [], []>} : vector<32x128xbf16>, vector<128x128xbf16>, vector<32x128xf32> -> vector<32x128xf32>
    %349 = arith.addf %343, %348 : vector<32x128xf32>
    %c10_370 = arith.constant 10 : index
    %c1_371 = arith.constant 1 : index
    %c0_372 = arith.constant 0 : index
    %350 = vector.load %arg8[%c10_370, %c1_371, %c0_372] : memref<20x9x128xbf16, #tpu.memory_space<vmem>>, vector<4x8x128xbf16>
    %351 = vector.shape_cast %350 : vector<4x8x128xbf16> to vector<32x128xbf16>
    %c5_373 = arith.constant 5 : index
    %c0_374 = arith.constant 0 : index
    %c0_375 = arith.constant 0 : index
    %352 = vector.load %arg4[%c5_373, %c0_374, %c0_375] : memref<9x128x128xbf16, #tpu.memory_space<vmem>>, vector<1x128x128xbf16>
    %353 = vector.shape_cast %352 : vector<1x128x128xbf16> to vector<128x128xbf16>
    %cst_376 = arith.constant dense<0.000000e+00> : vector<32x128xf32>
    %354 = tpu.matmul %351, %353, %cst_376 {dimension_numbers = #tpu.dot_dimension_numbers<[1], [0], [0], [1], [0, 0, 1, 1], [], []>} : vector<32x128xbf16>, vector<128x128xbf16>, vector<32x128xf32> -> vector<32x128xf32>
    %355 = arith.addf %349, %354 : vector<32x128xf32>
    %c1_377 = arith.constant 1 : index
    %c0_378 = arith.constant 0 : index
    %c0_379 = arith.constant 0 : index
    %356 = vector.load %arg8[%c1_377, %c0_378, %c0_379] : memref<20x9x128xbf16, #tpu.memory_space<vmem>>, vector<4x8x128xbf16>
    %357 = vector.shape_cast %356 : vector<4x8x128xbf16> to vector<32x128xbf16>
    %c6_380 = arith.constant 6 : index
    %c0_381 = arith.constant 0 : index
    %c0_382 = arith.constant 0 : index
    %358 = vector.load %arg4[%c6_380, %c0_381, %c0_382] : memref<9x128x128xbf16, #tpu.memory_space<vmem>>, vector<1x128x128xbf16>
    %359 = vector.shape_cast %358 : vector<1x128x128xbf16> to vector<128x128xbf16>
    %cst_383 = arith.constant dense<0.000000e+00> : vector<32x128xf32>
    %360 = tpu.matmul %357, %359, %cst_383 {dimension_numbers = #tpu.dot_dimension_numbers<[1], [0], [0], [1], [0, 0, 1, 1], [], []>} : vector<32x128xbf16>, vector<128x128xbf16>, vector<32x128xf32> -> vector<32x128xf32>
    %361 = arith.addf %355, %360 : vector<32x128xf32>
    %c6_384 = arith.constant 6 : index
    %c0_385 = arith.constant 0 : index
    %c0_386 = arith.constant 0 : index
    %362 = vector.load %arg8[%c6_384, %c0_385, %c0_386] : memref<20x9x128xbf16, #tpu.memory_space<vmem>>, vector<4x8x128xbf16>
    %363 = vector.shape_cast %362 : vector<4x8x128xbf16> to vector<32x128xbf16>
    %c7_387 = arith.constant 7 : index
    %c0_388 = arith.constant 0 : index
    %c0_389 = arith.constant 0 : index
    %364 = vector.load %arg4[%c7_387, %c0_388, %c0_389] : memref<9x128x128xbf16, #tpu.memory_space<vmem>>, vector<1x128x128xbf16>
    %365 = vector.shape_cast %364 : vector<1x128x128xbf16> to vector<128x128xbf16>
    %cst_390 = arith.constant dense<0.000000e+00> : vector<32x128xf32>
    %366 = tpu.matmul %363, %365, %cst_390 {dimension_numbers = #tpu.dot_dimension_numbers<[1], [0], [0], [1], [0, 0, 1, 1], [], []>} : vector<32x128xbf16>, vector<128x128xbf16>, vector<32x128xf32> -> vector<32x128xf32>
    %367 = arith.addf %361, %366 : vector<32x128xf32>
    %c1_391 = arith.constant 1 : index
    %c1_392 = arith.constant 1 : index
    %c0_393 = arith.constant 0 : index
    %368 = vector.load %arg8[%c1_391, %c1_392, %c0_393] : memref<20x9x128xbf16, #tpu.memory_space<vmem>>, vector<4x8x128xbf16>
    %369 = vector.shape_cast %368 : vector<4x8x128xbf16> to vector<32x128xbf16>
    %c8_394 = arith.constant 8 : index
    %c0_395 = arith.constant 0 : index
    %c0_396 = arith.constant 0 : index
    %370 = vector.load %arg4[%c8_394, %c0_395, %c0_396] : memref<9x128x128xbf16, #tpu.memory_space<vmem>>, vector<1x128x128xbf16>
    %371 = vector.shape_cast %370 : vector<1x128x128xbf16> to vector<128x128xbf16>
    %cst_397 = arith.constant dense<0.000000e+00> : vector<32x128xf32>
    %372 = tpu.matmul %369, %371, %cst_397 {dimension_numbers = #tpu.dot_dimension_numbers<[1], [0], [0], [1], [0, 0, 1, 1], [], []>} : vector<32x128xbf16>, vector<128x128xbf16>, vector<32x128xf32> -> vector<32x128xf32>
    %373 = arith.addf %367, %372 : vector<32x128xf32>
    %374 = vector.shape_cast %373 : vector<32x128xf32> to vector<4x8x128xf32>
    %c0_398 = arith.constant 0 : index
    %c0_399 = arith.constant 0 : index
    %c0_400 = arith.constant 0 : index
    %c0_401 = arith.constant 0 : index
    %375 = vector.load %arg7[%c0_398, %c0_399, %c0_400, %c0_401] : memref<1x4x8x128xf32, #tpu.memory_space<vmem>>, vector<1x4x8x128xf32>
    %376 = vector.shape_cast %375 : vector<1x4x8x128xf32> to vector<4x8x128xf32>
    %377 = vector.shape_cast %374 : vector<4x8x128xf32> to vector<1x4x8x128xf32>
    tpu.vector_store %arg7[%c0_398, %c0_399, %c0_400, %c0_401], %377 {strides = array<i32>} : memref<1x4x8x128xf32, #tpu.memory_space<vmem>>, vector<1x4x8x128xf32>,
    return
  }
  func.func @transform_0(%arg0: i32) -> (i32, i32, i32, i32) {
    %c0_i32 = arith.constant 0 : i32
    %c0_i32_0 = arith.constant 0 : i32
    %c0_i32_1 = arith.constant 0 : i32
    %c0_i32_2 = arith.constant 0 : i32
    return %arg0, %c0_i32, %c0_i32_0, %c0_i32_1 : i32, i32, i32, i32
  }
  func.func @transform_1(%arg0: i32) -> (i32, i32, i32) {
    %c0_i32 = arith.constant 0 : i32
    %c0_i32_0 = arith.constant 0 : i32
    %c0_i32_1 = arith.constant 0 : i32
    %c0_i32_2 = arith.constant 0 : i32
    return %c0_i32, %c0_i32_0, %c0_i32_1 : i32, i32, i32
  }
  func.func @transform_2(%arg0: i32) -> (i32, i32) {
    %c0_i32 = arith.constant 0 : i32
    %c0_i32_0 = arith.constant 0 : i32
    %c0_i32_1 = arith.constant 0 : i32
    return %c0_i32, %c0_i32_0 : i32, i32
  }
  func.func @transform_3(%arg0: i32) -> (i32, i32, i32) {
    %c0_i32 = arith.constant 0 : i32
    %c0_i32_0 = arith.constant 0 : i32
    %c0_i32_1 = arith.constant 0 : i32
    %c0_i32_2 = arith.constant 0 : i32
    return %c0_i32, %c0_i32_0, %c0_i32_1 : i32, i32, i32
  }
  func.func @transform_4(%arg0: i32) -> (i32, i32) {
    %c0_i32 = arith.constant 0 : i32
    %c0_i32_0 = arith.constant 0 : i32
    %c0_i32_1 = arith.constant 0 : i32
    return %c0_i32, %c0_i32_0 : i32, i32
  }
  func.func @transform_5(%arg0: i32) -> (i32, i32, i32, i32) {
    %c0_i32 = arith.constant 0 : i32
    %c0_i32_0 = arith.constant 0 : i32
    %c0_i32_1 = arith.constant 0 : i32
    %c0_i32_2 = arith.constant 0 : i32
    return %arg0, %c0_i32, %c0_i32_0, %c0_i32_1 : i32, i32, i32, i32
  }
  func.func @transform_6(%arg0: i32) -> (i32, i32, i32, i32) {
    %c0_i32 = arith.constant 0 : i32
    %c0_i32_0 = arith.constant 0 : i32
    %c0_i32_1 = arith.constant 0 : i32
    %c0_i32_2 = arith.constant 0 : i32
    return %arg0, %c0_i32, %c0_i32_0, %c0_i32_1 : i32, i32, i32, i32
  }
}

</mosaic_0001>

<bundles_post_ra>
// kernel: last_level_p6p7_p5.1
= control target key start
LH: loop header
LB: loop body
LE: loop exit
PB: predicated region body
PF: predicated region fallthrough
CT: control target
= control target key end

     0   :  { %s8873_s21 = smov 0   ;;  %s10841_s0 = inlined_call_operand.vmem [shape: bf16[2,80,9,128], index: 0, kind: input, shape index: {}]   ;;  %s10842_s1 = inlined_call_operand.vmem [shape: bf16[9,128,128], index: 1, kind: input, shape index: {}]   ;;  %s10843_s2 = inlined_call_operand.vmem [shape: f32[1,128], index: 2, kind: input, shape index: {}]   ;;  %s10844_s3 = inlined_call_operand.vmem [shape: bf16[9,128,128], index: 3, kind: input, shape index: {}]   ;;  %s10845_s4 = inlined_call_operand.vmem [shape: f32[1,128], index: 4, kind: input, shape index: {}]   ;;  %s10846_s5 = inlined_call_operand.vmem [shape: f32[2,16,8,128], index: 5, kind: output, shape index: {0}]   ;;  %s10847_s6 = inlined_call_operand.vmem [shape: f32[2,4,8,128], index: 6, kind: output, shape index: {1}]  }
   0x1 LB: > { %s5826_s22 = sadd.s32 4294967295, %s8835_s21   ;;  %p5830_p0 = scmp.ge.s32.totalorder %s8835_s21, 1  ;;  %s8835_s21 = sphi %s8873_s21, %s17_s21  }
   0x2   : > { %p215_p1 = scmp.lt.s32.totalorder %s8835_s21, 3 }
   0x4   : > { %p216_p2 = pnand %p5830_p0, %p215_p1 }
   0x5   : > { %p250_p3 = scmp.lt.s32.totalorder (!%p216_p2), %s5826_s22, 1 }
   0x6   : > { %219 = sbr.rel (%p216_p2) target bundleno = 666 (0x29a), region = 40 }
   0xb   : > { %v8385_v0 = vld [vmem:[%s10842_s1 + $0x38] sm:$0xff]  ;;  %v8384_v4 = vld [vmem:[%s10842_s1 + $0x30] sm:$0xff]  ;;  %v8383_v8 = vld [vmem:[%s10842_s1 + $0x28] sm:$0xff]  ;;  %s10857_s22 = smov (!%p250_p3, %s5826_s22), 1  ;;  %vm1515_vm0 = vsmask.f32 3328 }
   0xc   : > { %v8395_v1 = vld [vmem:[%s10842_s1 + $0x78] sm:$0xff]  ;;  %376 = vmatpush.bf16.msra.mxu0 %v8385_v0  ;;  %v8394_v5 = vld [vmem:[%s10842_s1 + $0x70] sm:$0xff]  ;;  %v8393_v9 = vld [vmem:[%s10842_s1 + $0x68] sm:$0xff]  ;;  %s8816_s25 = smul.u32 640, %s10857_s22  ;;  %vm1516_vm1 = vsmask.f32 7440 }
   0xd   : > { %v8405_v2 = vld [vmem:[%s10842_s1 + $0xb8] sm:$0xff]  ;;  %481 = vmatpush.bf16.msra.mxu1 %v8395_v1  ;;  %v8404_v6 = vld [vmem:[%s10842_s1 + $0xb0] sm:$0xff]  ;;  %v8403_v10 = vld [vmem:[%s10842_s1 + $0xa8] sm:$0xff]  ;;  %s8374_s24 = sshll.u32 %s10857_s22, 7  ;;  %vm270_vm3 = vcmask 1040384   ;;  %vm1273_vm5 = vcmask 1043458  }
   0xe   : > { %v8415_v3 = vld [vmem:[%s10842_s1 + $0xf8] sm:$0xff]  ;;  %586 = vmatpush.bf16.msra.mxu2 %v8405_v2  ;;  %v8414_v7 = vld [vmem:[%s10842_s1 + $0xf0] sm:$0xff]  ;;  %v8413_v11 = vld [vmem:[%s10842_s1 + $0xe8] sm:$0xff]  ;;  %s8972_s12 = scalar_lea.vmem %s10841_s0, %s8816_s25  ;;  %s9829_s7 = scalar_lea.vmem %s10846_s5, %s8374_s24  ;;  %vm271_vm4 = vsmask.f32 256  ;;  %vm2446_vm9 = vcmask 1042432  }
   0xf   : > { %691 = vmatpush.bf16.msra.mxu3 %v8415_v3  ;;  %v8382_v12 = vld [vmem:[%s10842_s1 + $0x20] sm:$0xff]  ;;  %v8381_v16 = vld [vmem:[%s10842_s1 + $0x18] sm:$0xff]  ;;  %v8380_v20 = vld [vmem:[%s10842_s1 + $0x10] sm:$0xff]  ;;  %vm1274_vm7 = vsmask.f32 7946  ;;  %s8375_s23 = sshll.u32 %s10857_s22, 5 }
  0x10   : > { %377 = vmatpush.bf16.msra.mxu0 %v8384_v4  ;;  %v8392_v13 = vld [vmem:[%s10842_s1 + $0x60] sm:$0xff]  ;;  %v8391_v17 = vld [vmem:[%s10842_s1 + $0x58] sm:$0xff]  ;;  %v8390_v21 = vld [vmem:[%s10842_s1 + $0x50] sm:$0xff]  ;;  %vm2447_vm10 = vsmask.f32 2306  ;;  %s264_s26 = scalar_lea.vmem %s10847_s6, %s8375_s23 }
  0x11   : > { %482 = vmatpush.bf16.msra.mxu1 %v8394_v5  ;;  %v8402_v14 = vld [vmem:[%s10842_s1 + $0xa0] sm:$0xff]  ;;  %v8401_v18 = vld [vmem:[%s10842_s1 + $0x98] sm:$0xff]  ;;  %v8400_v22 = vld [vmem:[%s10842_s1 + $0x90] sm:$0xff] }
  0x12   : > { %587 = vmatpush.bf16.msra.mxu2 %v8404_v6  ;;  %v8412_v15 = vld [vmem:[%s10842_s1 + $0xe0] sm:$0xff]  ;;  %v8411_v19 = vld [vmem:[%s10842_s1 + $0xd8] sm:$0xff]  ;;  %v8410_v23 = vld [vmem:[%s10842_s1 + $0xd0] sm:$0xff] }
  0x13   : > { %692 = vmatpush.bf16.msra.mxu3 %v8414_v7  ;;  %v8379_v24 = vld [vmem:[%s10842_s1 + $0x8] sm:$0xff]  ;;  %v8378_v28 = vld [vmem:[%s10842_s1] sm:$0xff]  ;;  %v8386_v35 = vld [vmem:[%s8972_s12 + $0x2c] sm:$0xf0] }
  0x14   : > { %378 = vmatpush.bf16.msra.mxu0 %v8383_v8  ;;  %v8389_v25 = vld [vmem:[%s10842_s1 + $0x48] sm:$0xff]  ;;  %v8388_v29 = vld [vmem:[%s10842_s1 + $0x40] sm:$0xff]  ;;  %v5958_v36 = vld [vmem:[%s8972_s12 + $0x50] sm:$0xf] }
  0x15   : > { %483 = vmatpush.bf16.msra.mxu1 %v8393_v9  ;;  %v8399_v26 = vld [vmem:[%s10842_s1 + $0x88] sm:$0xff]  ;;  %v8398_v30 = vld [vmem:[%s10842_s1 + $0x80] sm:$0xff]  ;;  %v8396_v37 = vld [vmem:[%s8972_s12 + $0x54] sm:$0xf0] }
  0x16   : > { %588 = vmatpush.bf16.msra.mxu2 %v8403_v10  ;;  %v8409_v27 = vld [vmem:[%s10842_s1 + $0xc8] sm:$0xff]  ;;  %v8408_v31 = vld [vmem:[%s10842_s1 + $0xc0] sm:$0xff]  ;;  %v8445_v40 = vld [vmem:[%s10842_s1 + $0x1b8] sm:$0xff]  ;;  %v5959_v44 = vor.u32 %v8396_v37, %v5958_v36 }
  0x17   : > { %693 = vmatpush.bf16.msra.mxu3 %v8413_v11  ;;  %v5838_v32 = vld [vmem:[%s8972_s12] sm:$0xf]  ;;  %v8376_v33 = vld [vmem:[%s8972_s12 + $0x4] sm:$0xf0]  ;;  %v8435_v42 = vld [vmem:[%s10842_s1 + $0x178] sm:$0xff] }
  0x18   : > { %379 = vmatpush.bf16.msra.mxu0 %v8382_v12  ;;  %v5898_v34 = vld [vmem:[%s8972_s12 + $0x28] sm:$0xf]  ;;  %v6018_v38 = vld [vmem:[%s8972_s12 + $0xa0] sm:$0xf]  ;;  %v5839_v41 = vor.u32 %v8376_v33, %v5838_v32  ;;  %v8425_v46 = vld [vmem:[%s10842_s1 + $0x138] sm:$0xff] }
  0x19   : > { %484 = vmatpush.bf16.msra.mxu1 %v8392_v13  ;;  %v8406_v39 = vld [vmem:[%s8972_s12 + $0xa4] sm:$0xf0]  ;;  %v5899_v43 = vor.u32 %v8386_v35, %v5898_v34  ;;  %v8455_v47 = vld [vmem:[%s10842_s1 + $0x1f8] sm:$0xff]  ;;  %v8444_v48 = vld [vmem:[%s10842_s1 + $0x1b0] sm:$0xff] }
  0x1a   : > { %589 = vmatpush.bf16.msra.mxu2 %v8402_v14  ;;  %v6019_v45 = vor.u32 %v8406_v39, %v6018_v38  ;;  %v8434_v49 = vld [vmem:[%s10842_s1 + $0x170] sm:$0xff]  ;;  %v8443_v52 = vld [vmem:[%s10842_s1 + $0x1a8] sm:$0xff]  ;;  %v8442_v56 = vld [vmem:[%s10842_s1 + $0x1a0] sm:$0xff] }
  0x1b   : > { %694 = vmatpush.bf16.msra.mxu3 %v8412_v15  ;;  %v8424_v50 = vld [vmem:[%s10842_s1 + $0x130] sm:$0xff]  ;;  %v8433_v53 = vld [vmem:[%s10842_s1 + $0x168] sm:$0xff]  ;;  %v8422_v57 = vld [vmem:[%s10842_s1 + $0x120] sm:$0xff] }
  0x1c   : > { %380 = vmatpush.bf16.msra.mxu0 %v8381_v16  ;;  %v8454_v51 = vld [vmem:[%s10842_s1 + $0x1f0] sm:$0xff]  ;;  %v8423_v54 = vld [vmem:[%s10842_s1 + $0x128] sm:$0xff]  ;;  %v8432_v58 = vld [vmem:[%s10842_s1 + $0x160] sm:$0xff] }
  0x1d   : > { %485 = vmatpush.bf16.msra.mxu1 %v8391_v17  ;;  %v8453_v55 = vld [vmem:[%s10842_s1 + $0x1e8] sm:$0xff]  ;;  %v8452_v59 = vld [vmem:[%s10842_s1 + $0x1e0] sm:$0xff]  ;;  %v5842_v60 = vld [vmem:[%s8972_s12 + $0x10] sm:$0xf] }
  0x1e   : > { %590 = vmatpush.bf16.msra.mxu2 %v8401_v18  ;;  %v8377_v61 = vld [vmem:[%s8972_s12 + $0x14] sm:$0xf0]  ;;  %v8387_v63 = vld [vmem:[%s8972_s12 + $0x3c] sm:$0xf0]  ;;  %v8397_v1 = vld [vmem:[%s8972_s12 + $0x64] sm:$0xf0] }
  0x1f   : > { %695 = vmatpush.bf16.msra.mxu3 %v8411_v19  ;;  %v5902_v62 = vld [vmem:[%s8972_s12 + $0x38] sm:$0xf]  ;;  %v5962_v0 = vld [vmem:[%s8972_s12 + $0x60] sm:$0xf]  ;;  %v6022_v2 = vld [vmem:[%s8972_s12 + $0xb0] sm:$0xf]  ;;  %v5843_v5 = vor.u32 %v8377_v61, %v5842_v60 }
  0x20   : > { %381 = vmatpush.bf16.msra.mxu0 %v8380_v20  ;;  %v8407_v3 = vld [vmem:[%s8972_s12 + $0xb4] sm:$0xf0]  ;;  %v5903_v7 = vor.u32 %v8387_v63, %v5902_v62  ;;  %v5963_v8 = vor.u32 %v8397_v1, %v5962_v0  ;;  %v8440_v12 = vld [vmem:[%s10842_s1 + $0x190] sm:$0xff]  ;;  %v8439_v16 = vld [vmem:[%s10842_s1 + $0x188] sm:$0xff] }
  0x21   : > { %486 = vmatpush.bf16.msra.mxu1 %v8390_v21  ;;  %v8441_v4 = vld [vmem:[%s10842_s1 + $0x198] sm:$0xff]  ;;  %v6023_v9 = vor.u32 %v8407_v3, %v6022_v2  ;;  %v8430_v13 = vld [vmem:[%s10842_s1 + $0x150] sm:$0xff]  ;;  %v8429_v17 = vld [vmem:[%s10842_s1 + $0x148] sm:$0xff] }
  0x22   : > { %591 = vmatpush.bf16.msra.mxu2 %v8400_v22  ;;  %v8431_v6 = vld [vmem:[%s10842_s1 + $0x158] sm:$0xff]  ;;  %v8420_v14 = vld [vmem:[%s10842_s1 + $0x110] sm:$0xff]  ;;  %v8419_v18 = vld [vmem:[%s10842_s1 + $0x108] sm:$0xff] }
  0x23   : > { %696 = vmatpush.bf16.msra.mxu3 %v8410_v23  ;;  %v8421_v10 = vld [vmem:[%s10842_s1 + $0x118] sm:$0xff]  ;;  %v8450_v15 = vld [vmem:[%s10842_s1 + $0x1d0] sm:$0xff]  ;;  %v8449_v19 = vld [vmem:[%s10842_s1 + $0x1c8] sm:$0xff] }
  0x24   : > { %382 = vmatpush.bf16.msra.mxu0 %v8379_v24  ;;  %v8451_v11 = vld [vmem:[%s10842_s1 + $0x1d8] sm:$0xff]  ;;  %v8438_v20 = vld [vmem:[%s10842_s1 + $0x180] sm:$0xff]  ;;  %v6078_v23 = vld [vmem:[%s8972_s12 + $0xc8] sm:$0xf] }
  0x25   : > { %487 = vmatpush.bf16.msra.mxu1 %v8389_v25  ;;  %v8418_v21 = vld [vmem:[%s10842_s1 + $0x100] sm:$0xff]  ;;  %v8485_v24 = vld [vmem:[%s10842_s1 + $0x78] sm:$0xff]  ;;  %v6258_v32 = vld [vmem:[%s8972_s12 + $0x168] sm:$0xf] }
  0x26   : > { %592 = vmatpush.bf16.msra.mxu2 %v8399_v26  ;;  %v8428_v22 = vld [vmem:[%s10842_s1 + $0x140] sm:$0xff]  ;;  %v8416_v26 = vld [vmem:[%s8972_s12 + $0xcc] sm:$0xf0]  ;;  %v8465_v34 = vld [vmem:[%s10842_s1 + $0x238] sm:$0xff] }
  0x27   : > { %697 = vmatpush.bf16.msra.mxu3 %v8409_v27  ;;  %v8448_v25 = vld [vmem:[%s10842_s1 + $0x1c0] sm:$0xff]  ;;  %v6138_v27 = vld [vmem:[%s8972_s12 + $0xf0] sm:$0xf]  ;;  %v8493_v35 = vld [vmem:[%s10842_s1 + $0xb8] sm:$0xff]  ;;  %v6079_v37 = vor.u32 %v8416_v26, %v6078_v23 }
  0x28   : > { %383 = vmatpush.bf16.msra.mxu0 %v8378_v28  ;;  %v8475_v28 = vld [vmem:[%s10842_s1 + $0x38] sm:$0xff]  ;;  %v8446_v33 = vld [vmem:[%s8972_s12 + $0x16c] sm:$0xf0]  ;;  %v6142_v60 = vld [vmem:[%s8972_s12 + $0x100] sm:$0xf] }
  0x29   : > { %488 = vmatpush.bf16.msra.mxu1 %v8388_v29  ;;  %v8426_v29 = vld [vmem:[%s8972_s12 + $0xf4] sm:$0xf0]  ;;  %v8484_v36 = vld [vmem:[%s10842_s1 + $0x70] sm:$0xff]  ;;  %v8427_v62 = vld [vmem:[%s8972_s12 + $0x104] sm:$0xf0] }
  0x2a   : > { %593 = vmatpush.bf16.msra.mxu2 %v8398_v30  ;;  %v6198_v30 = vld [vmem:[%s8972_s12 + $0x140] sm:$0xf]  ;;  %v6139_v38 = vor.u32 %v8426_v29, %v6138_v27  ;;  %v8481_v61 = vld [vmem:[%s10842_s1 + $0x58] sm:$0xff]  ;;  %v6202_v63 = vld [vmem:[%s8972_s12 + $0x150] sm:$0xf] }
  0x2b   : > { %698 = vmatpush.bf16.msra.mxu3 %v8408_v31  ;;  %384 = vmatmul.bf16.vlgmr.msra.gmra.mxu0 %v5839_v41  ;;  %v8436_v31 = vld [vmem:[%s8972_s12 + $0x144] sm:$0xf0]  ;;  %v8464_v41 = vld [vmem:[%s10842_s1 + $0x230] sm:$0xff]  ;;  %v8437_v0 = vld [vmem:[%s8972_s12 + $0x154] sm:$0xf0] }
  0x2c   : > { %489 = vmatmul.bf16.vlgmr.msra.gmra.mxu1 %v5899_v43  ;;  %796 = vmatpush.bf16.msrb.mxu0 %v8425_v46  ;;  %v6199_v39 = vor.u32 %v8436_v31, %v6198_v30  ;;  %v8492_v43 = vld [vmem:[%s10842_s1 + $0xb0] sm:$0xff]  ;;  %v8473_v46 = vld [vmem:[%s10842_s1 + $0x28] sm:$0xff]  ;;  %v6262_v1 = vld [vmem:[%s8972_s12 + $0x178] sm:$0xf] }
  0x2d   : > { %901 = vmatpush.bf16.msrb.mxu1 %v8435_v42  ;;  %594 = vmatmul.bf16.vlgmr.msra.gmra.mxu2 %v5959_v44  ;;  %v8474_v42 = vld [vmem:[%s10842_s1 + $0x30] sm:$0xff]  ;;  %v8483_v44 = vld [vmem:[%s10842_s1 + $0x68] sm:$0xff]  ;;  %v8447_v2 = vld [vmem:[%s8972_s12 + $0x17c] sm:$0xf0] }
  0x2e   : > { %1006 = vmatpush.bf16.msrb.mxu2 %v8445_v40  ;;  %699 = vmatmul.bf16.vlgmr.msra.gmra.mxu3 %v6019_v45  ;;  %v6259_v40 = vor.u32 %v8446_v33, %v6258_v32  ;;  %v8463_v45 = vld [vmem:[%s10842_s1 + $0x228] sm:$0xff]  ;;  %v8461_v3 = vld [vmem:[%s10842_s1 + $0x218] sm:$0xff]  ;;  %v8488_v23 = vld [vmem:[%s10842_s1 + $0x90] sm:$0xff] }
  0x2f   : > { %1111 = vmatpush.bf16.msrb.mxu3 %v8455_v47  ;;  %v8491_v47 = vld [vmem:[%s10842_s1 + $0xa8] sm:$0xff]  ;;  %v1513_v26 = vld [vmem:[%s8972_s12 + $0x18] sm:$0xf]  ;;  %vm9212_vm2 = vmor %vm1515_vm0, %vm1516_vm1 }
  0x30   : > { %797 = vmatpush.bf16.msrb.mxu0 %v8424_v50  ;;  %v1509_v50 = vld [vmem:[%s8972_s12 + $0x8] sm:$0xf]  ;;  %vm10026_vm6 = vmand %vm270_vm3, %vm271_vm4 }
  0x31   : > { %902 = vmatpush.bf16.msrb.mxu1 %v8434_v49  ;;  %v1507_v49 = vld [vmem:[%s8972_s12] sm:$0xf]  ;;  %v8459_v27 = vld [vmem:[%s10842_s1 + $0x208] sm:$0xff]  ;;  %vm10037_vm8 = vmand %vm1273_vm5, %vm1274_vm7 }
  0x32   : > { %1007 = vmatpush.bf16.msrb.mxu2 %v8444_v48  ;;  %v8482_v48 = vld [vmem:[%s10842_s1 + $0x60] sm:$0xff]  ;;  %v8487_v33 = vld [vmem:[%s10842_s1 + $0x88] sm:$0xff]  ;;  %vm10420_vm11 = vmand %vm2446_vm9, %vm2447_vm10 }
  0x33   : > { %1112 = vmatpush.bf16.msrb.mxu3 %v8454_v51  ;;  %v8462_v51 = vld [vmem:[%s10842_s1 + $0x220] sm:$0xff] }
  0x34   : > { %798 = vmatpush.bf16.msrb.mxu0 %v8423_v54  ;;  %v1519_v54 = vshrl.u32 %v1507_v49, 16 }
  0x35   : > { %903 = vmatpush.bf16.msrb.mxu1 %v8433_v53  ;;  %v8490_v53 = vld [vmem:[%s10842_s1 + $0xa0] sm:$0xff] }
  0x36   : > { %1008 = vmatpush.bf16.msrb.mxu2 %v8443_v52  ;;  %v8472_v52 = vld [vmem:[%s10842_s1 + $0x20] sm:$0xff] }
  0x37   : > { %1113 = vmatpush.bf16.msrb.mxu3 %v8453_v55  ;;  %v1522_v55 = vshll.u32 %v1507_v49, 16  ;;  %v8466_v49 = vld [vmem:[%s8972_s12 + $0x54] sm:$0xf0] }
  0x38   : > { %799 = vmatpush.bf16.msrb.mxu0 %v8422_v57  ;;  %v1536_v57 = vshll.u32 %v1509_v50, 16 }
  0x39   : > { %904 = vmatpush.bf16.msrb.mxu1 %v8432_v58  ;;  %v6082_v58 = vld [vmem:[%s8972_s12 + $0xd8] sm:$0xf] }
  0x3a   : > { %1009 = vmatpush.bf16.msrb.mxu2 %v8442_v56  ;;  %v1533_v56 = vshrl.u32 %v1509_v50, 16  ;;  %v8503_v50 = vld [vmem:[%s10842_s1 + $0xf8] sm:$0xff] }
  0x3b   : > { %1114 = vmatpush.bf16.msrb.mxu3 %v8452_v59  ;;  %389 = vmatmul.bf16.gmra.mxu0 %v5843_v5  ;;  %v8417_v59 = vld [vmem:[%s8972_s12 + $0xdc] sm:$0xf0]  ;;  %v8489_v5 = vld [vmem:[%s10842_s1 + $0x98] sm:$0xff] }
  0x3c   : > { %494 = vmatmul.bf16.gmra.mxu1 %v5903_v7  ;;  %800 = vmatpush.bf16.msrb.mxu0 %v8421_v10  ;;  %v1524_v7 = vrot.slane %v1522_v55, 5  ;;  %v8480_v10 = vld [vmem:[%s10842_s1 + $0x50] sm:$0xff] }
  0x3d   : > { %905 = vmatpush.bf16.msrb.mxu1 %v8431_v6  ;;  %599 = vmatmul.bf16.gmra.mxu2 %v5963_v8  ;;  %v1521_v6 = vrot.slane %v1519_v54, 4  ;;  %v1535_v8 = vrot.slane %v1533_v56, 4 }
  0x3e   : > { %1010 = vmatpush.bf16.msrb.mxu2 %v8441_v4  ;;  %704 = vmatmul.bf16.gmra.mxu3 %v6023_v9  ;;  %v8471_v4 = vld [vmem:[%s10842_s1 + $0x18] sm:$0xff]  ;;  %v1538_v9 = vrot.slane %v1536_v57, 5 }
  0x3f   : > { %1115 = vmatpush.bf16.msrb.mxu3 %v8451_v11  ;;  %v1508_v11 = vld [vmem:[%s8972_s12 + $0x4] sm:$0x1] }
  0x40   : > { %801 = vmatpush.bf16.msrb.mxu0 %v8420_v14  ;;  %v6143_v14 = vor.u32 %v8427_v62, %v6142_v60  ;;  %v1512_v60 = vld [vmem:[%s8972_s12 + $0x14] sm:$0x1]  ;;  %v6422_v62 = vld [vmem:[%s8972_s12 + $0x78] sm:$0xf] }
  0x41   : > { %906 = vmatpush.bf16.msrb.mxu1 %v8430_v13  ;;  %v6083_v13 = vor.u32 %v8417_v59, %v6082_v58  ;;  %v8520_v59 = vld [vmem:[%s10842_s1 + $0x170] sm:$0xff] }
  0x42   : > { %1011 = vmatpush.bf16.msrb.mxu2 %v8440_v12  ;;  %v1510_v12 = vld [vmem:[%s8972_s12 + $0xc] sm:$0x1] }
  0x43   : > { %1116 = vmatpush.bf16.msrb.mxu3 %v8450_v15  ;;  %v6203_v15 = vor.u32 %v8437_v0, %v6202_v63  ;;  %v8476_v63 = vld [vmem:[%s8972_s12 + $0x7c] sm:$0xf0] }
  0x44   : > { %802 = vmatpush.bf16.msrb.mxu0 %v8419_v18  ;;  %v8470_v18 = vld [vmem:[%s10842_s1 + $0x10] sm:$0xff] }
  0x45   : > { %907 = vmatpush.bf16.msrb.mxu1 %v8429_v17  ;;  %v8460_v17 = vld [vmem:[%s10842_s1 + $0x210] sm:$0xff] }
  0x46   : > { %1012 = vmatpush.bf16.msrb.mxu2 %v8439_v16  ;;  %v6263_v16 = vor.u32 %v8447_v2, %v6262_v1  ;;  %v8502_v2 = vld [vmem:[%s10842_s1 + $0xf0] sm:$0xff] }
  0x47   : > { %1117 = vmatpush.bf16.msrb.mxu3 %v8449_v19  ;;  %v1525_v19 = vor.u32 %v1524_v7, %v1521_v6  ;;  %v6423_v7 = vor.u32 %v8476_v63, %v6422_v62  ;;  %v8515_v62 = vld [vmem:[%s10842_s1 + $0x148] sm:$0xff] }
  0x48   : > { %803 = vmatpush.bf16.msrb.mxu0 %v8418_v21  ;;  %v1539_v21 = vor.u32 %v1538_v9, %v1535_v8  ;;  %v8512_v9 = vld [vmem:[%s10842_s1 + $0x130] sm:$0xff]  ;;  %v8497_v63 = vld [vmem:[%s10842_s1 + $0xc8] sm:$0xff] }
  0x49   : > { %908 = vmatpush.bf16.msrb.mxu1 %v8428_v22  ;;  %v1542_v22 = vshll.u32 %v1510_v12, 16  ;;  %v1526_v29 = vrot.slane %v1525_v19, 4  ;;  %v8501_v12 = vld [vmem:[%s10842_s1 + $0xe8] sm:$0xff]  ;;  %v6628_v19 = vld [vmem:[%s8972_s12 + $0xa0] sm:$0xf] }
  0x4a   : > { %1013 = vmatpush.bf16.msrb.mxu2 %v8438_v20  ;;  %v1528_v20 = vshll.u32 %v1508_v11, 16  ;;  %v1540_v31 = vrot.slane %v1539_v21, 4  ;;  %v8519_v11 = vld [vmem:[%s10842_s1 + $0x168] sm:$0xff]  ;;  %v8518_v21 = vld [vmem:[%s10842_s1 + $0x160] sm:$0xff] }
  0x4b   : > { %1118 = vmatpush.bf16.msrb.mxu3 %v8448_v25  ;;  %804 = vmatmul.bf16.vlgmr.msrb.gmra.mxu0 %v6079_v37  ;;  %v1511_v25 = vld [vmem:[%s8972_s12 + $0x10] sm:$0xf]  ;;  %v1544_v32 = vrot.slane %v1542_v22, 5  ;;  %v8500_v22 = vld [vmem:[%s10842_s1 + $0xe0] sm:$0xff] }
  0x4c   : > { %1216 = vmatpush.bf16.msra.mxu0 %v8465_v34  ;;  %909 = vmatmul.bf16.vlgmr.msrb.gmra.mxu1 %v6139_v38  ;;  %v1530_v30 = vrot.slane %v1528_v20, 5  ;;  %v8478_v34 = vld [vmem:[%s10842_s1 + $0x40] sm:$0xff]  ;;  %v1547_v37 = vshrl.u32 %v1511_v25, 16  ;;  %v1550_v38 = vshll.u32 %v1511_v25, 16  ;;  %v6630_v20 = vld [vmem:[%s8972_s12 + $0xa8] sm:$0xf] }
  0x4d   : > { %1380 = vmatpush.bf16.msra.mxu1 %v8475_v28  ;;  %1014 = vmatmul.bf16.vlgmr.msrb.gmra.mxu2 %v6199_v39  ;;  %v8469_v28 = vld [vmem:[%s10842_s1 + $0x8] sm:$0xff]  ;;  %v1561_v39 = vshrl.u32 %v1513_v26, 16  ;;  %v1885_v25 = vshrl.u32 %v6628_v19, 16 }
  0x4e   : > { %1484 = vmatpush.bf16.msra.mxu2 %v8485_v24  ;;  %1119 = vmatmul.bf16.vlgmr.msrb.gmra.mxu3 %v6259_v40  ;;  %v8479_v24 = vld [vmem:[%s10842_s1 + $0x48] sm:$0xff]  ;;  %v1564_v40 = vshll.u32 %v1513_v26, 16  ;;  %v1552_v54 = vrot.slane %v1550_v38, 5  ;;  %v1888_v26 = vshll.u32 %v6628_v19, 16 }
  0x4f   : > { %1646 = vmatpush.bf16.msra.mxu3 %v8493_v35  ;;  %v1563_v55 = vrot.slane %v1561_v39, 4  ;;  %v6426_v38 = vld [vmem:[%s8972_s12 + $0x88] sm:$0xf]  ;;  %v8477_v39 = vld [vmem:[%s8972_s12 + $0x8c] sm:$0xf0] }
  0x50   : > { %1217 = vmatpush.bf16.msra.mxu0 %v8464_v41  ;;  %v8458_v41 = vld [vmem:[%s10842_s1 + $0x200] sm:$0xff]  ;;  %v1566_v56 = vrot.slane %v1564_v40, 5 }
  0x51   : > { %1381 = vmatpush.bf16.msra.mxu1 %v8474_v42  ;;  %v8468_v42 = vld [vmem:[%s10842_s1] sm:$0xff] }
  0x52   : > { %1485 = vmatpush.bf16.msra.mxu2 %v8484_v36  ;;  %v8521_v36 = vld [vmem:[%s10842_s1 + $0x178] sm:$0xff] }
  0x53   : > { %1647 = vmatpush.bf16.msra.mxu3 %v8492_v43  ;;  %v8486_v43 = vld [vmem:[%s10842_s1 + $0x80] sm:$0xff] }
  0x54   : > { %1218 = vmatpush.bf16.msra.mxu0 %v8463_v45  ;;  %v8456_v45 = vld [vmem:[%s8972_s12 + $0x194] sm:$0xf0] }
  0x55   : > { %1382 = vmatpush.bf16.msra.mxu1 %v8473_v46  ;;  %v1531_v46 = vsel %vm9212_vm2, %v1526_v29, %v1530_v30  ;;  %v8510_v29 = vld [vmem:[%s10842_s1 + $0x120] sm:$0xff] }
  0x56   : > { %1486 = vmatpush.bf16.msra.mxu2 %v8483_v44  ;;  %v6318_v44 = vld [vmem:[%s8972_s12 + $0x190] sm:$0xf]  ;;  %v1590_v57 = vunpack.c.l.b16 %v1531_v46  ;;  %v8528_v30 = vld [vmem:[%s10842_s1 + $0x1a0] sm:$0xff] }
  0x57   : > { %1648 = vmatpush.bf16.msra.mxu3 %v8491_v47  ;;  %v1545_v47 = vsel %vm9212_vm2, %v1540_v31, %v1544_v32  ;;  %v6319_v0 = vor.u32 %v8456_v45, %v6318_v44  ;;  %v6322_v31 = vld [vmem:[%s8972_s12 + $0x1a0] sm:$0xf]  ;;  %v8457_v32 = vld [vmem:[%s8972_s12 + $0x1a4] sm:$0xf0]  ;;  %v1890_v44 = vrot.slane %v1888_v26, 5  ;;  %v8540_v26 = vld [vmem:[%s10842_s1 + $0x1f0] sm:$0xff] }
  0x58   : > { %1219 = vmatpush.bf16.msra.mxu0 %v8462_v51  ;;  %v8513_v51 = vld [vmem:[%s10842_s1 + $0x138] sm:$0xff]  ;;  %v1591_v58 = vunpack.c.l.b16 %v1545_v47 }
  0x59   : > { %1383 = vmatpush.bf16.msra.mxu1 %v8472_v52  ;;  %v8531_v52 = vld [vmem:[%s10842_s1 + $0x1b8] sm:$0xff] }
  0x5a   : > { %1487 = vmatpush.bf16.msra.mxu2 %v8482_v48  ;;  %v6362_v48 = vld [vmem:[%s8972_s12 + $0x50] sm:$0xf]  ;;  %v1594_v8 = vpack.c.b16 %v1591_v58, %v1590_v57  ;;  %v8527_v47 = vld [vmem:[%s10842_s1 + $0x198] sm:$0xff] }
  0x5b   : > { %1649 = vmatpush.bf16.msra.mxu3 %v8490_v53  ;;  %809 = vmatmul.bf16.gmra.mxu0 %v6083_v13  ;;  %v1549_v53 = vrot.slane %v1547_v37, 4  ;;  %v6363_v1 = vor.u32 %v8466_v49, %v6362_v48  ;;  %v8467_v37 = vld [vmem:[%s8972_s12 + $0x64] sm:$0xf0]  ;;  %v6629_v48 = vld [vmem:[%s8972_s12 + $0xa4] sm:$0x1] }
  0x5c   : > { %1220 = vmatpush.bf16.msra.mxu0 %v8461_v3  ;;  %914 = vmatmul.bf16.gmra.mxu1 %v6143_v14  ;;  %v6631_v49 = vld [vmem:[%s8972_s12 + $0xac] sm:$0x1]  ;;  %v1894_v57 = vshll.u32 %v6629_v48, 16 }
  0x5d   : > { %1384 = vmatpush.bf16.msra.mxu1 %v8471_v4  ;;  %1019 = vmatmul.bf16.gmra.mxu2 %v6203_v15  ;;  %v1553_v3 = vor.u32 %v1552_v54, %v1549_v53  ;;  %v1556_v4 = vshll.u32 %v1512_v60, 16  ;;  %v6427_v54 = vor.u32 %v8477_v39, %v6426_v38  ;;  %v8508_v60 = vld [vmem:[%s10842_s1 + $0x110] sm:$0xff] }
  0x5e   : > { %1488 = vmatpush.bf16.msra.mxu2 %v8481_v61  ;;  %1124 = vmatmul.bf16.gmra.mxu3 %v6263_v16  ;;  %v1514_v61 = vld [vmem:[%s8972_s12 + $0x1c] sm:$0x1]  ;;  %v8568_v38 = vld [vmem:[%s10842_s1 + $0x70] sm:$0xff] }
  0x5f   : > { %1650 = vmatpush.bf16.msra.mxu3 %v8489_v5  ;;  %v1567_v5 = vor.u32 %v1566_v56, %v1563_v55  ;;  %v1570_v6 = vshll.u32 %v1514_v61, 16  ;;  %v1554_v13 = vrot.slane %v1553_v3, 4  ;;  %v1558_v14 = vrot.slane %v1556_v4, 5  ;;  %v8526_v61 = vld [vmem:[%s10842_s1 + $0x190] sm:$0xff]  ;;  %v8507_v4 = vld [vmem:[%s10842_s1 + $0x108] sm:$0xff] }
  0x60   : > { %1221 = vmatpush.bf16.msra.mxu0 %v8460_v17  ;;  %v8511_v17 = vld [vmem:[%s10842_s1 + $0x128] sm:$0xff]  ;;  %v6633_v39 = vld [vmem:[%s8972_s12 + $0xb4] sm:$0x1] }
  0x61   : > { %1385 = vmatpush.bf16.msra.mxu1 %v8470_v18  ;;  %v1568_v15 = vrot.slane %v1567_v5, 4  ;;  %v1572_v16 = vrot.slane %v1570_v6, 5  ;;  %v8529_v18 = vld [vmem:[%s10842_s1 + $0x1a8] sm:$0xff]  ;;  %v8514_v6 = vld [vmem:[%s10842_s1 + $0x140] sm:$0xff]  ;;  %v1922_v48 = vshll.u32 %v6633_v39, 16 }
  0x62   : > { %1489 = vmatpush.bf16.msra.mxu2 %v8480_v10  ;;  %v8530_v10 = vld [vmem:[%s10842_s1 + $0x1b0] sm:$0xff]  ;;  %v8525_v5 = vld [vmem:[%s10842_s1 + $0x188] sm:$0xff] }
  0x63   : > { %1651 = vmatpush.bf16.msra.mxu3 %v8488_v23  ;;  %v1559_v23 = vsel %vm9212_vm2, %v1554_v13, %v1558_v14  ;;  %v8506_v14 = vld [vmem:[%s10842_s1 + $0x100] sm:$0xff]  ;;  %v8563_v39 = vld [vmem:[%s10842_s1 + $0x48] sm:$0xff] }
  0x64   : > { %1222 = vmatpush.bf16.msra.mxu0 %v8459_v27  ;;  %v1899_v27 = vshrl.u32 %v6630_v20, 16  ;;  %v1592_v40 = vunpack.c.l.b16 %v1559_v23  ;;  %v8569_v23 = vld [vmem:[%s10842_s1 + $0x78] sm:$0xff] }
  0x65   : > { %1386 = vmatpush.bf16.msra.mxu1 %v8469_v28  ;;  %v1902_v28 = vshll.u32 %v6630_v20, 16  ;;  %v6530_v20 = vld [vmem:[%s8972_s12 + $0xf0] sm:$0xf] }
  0x66   : > { %1490 = vmatpush.bf16.msra.mxu2 %v8479_v24  ;;  %v1573_v24 = vsel %vm9212_vm2, %v1568_v15, %v1572_v16  ;;  %v1901_v45 = vrot.slane %v1899_v27, 4  ;;  %v8524_v15 = vld [vmem:[%s10842_s1 + $0x180] sm:$0xff] }
  0x67   : > { %1652 = vmatpush.bf16.msra.mxu3 %v8487_v33  ;;  %v6366_v33 = vld [vmem:[%s8972_s12 + $0x60] sm:$0xf]  ;;  %v1904_v46 = vrot.slane %v1902_v28, 5 }
  0x68   : > { %1223 = vmatpush.bf16.msra.mxu0 %v8458_v41  ;;  %v1593_v41 = vunpack.c.l.b16 %v1573_v24  ;;  %v6367_v53 = vor.u32 %v8467_v37, %v6366_v33  ;;  %v6590_v24 = vld [vmem:[%s8972_s12 + $0x118] sm:$0xf]  ;;  %v8504_v27 = vld [vmem:[%s8972_s12 + $0x11c] sm:$0xf0] }
  0x69   : > { %1387 = vmatpush.bf16.msra.mxu1 %v8468_v42  ;;  %v8509_v42 = vld [vmem:[%s10842_s1 + $0x118] sm:$0xff]  ;;  %v1905_v58 = vor.u32 %v1904_v46, %v1901_v45  ;;  %v8557_v45 = vld [vmem:[%s10842_s1 + $0x28] sm:$0xff] }
  0x6a   : > { %1491 = vmatpush.bf16.msra.mxu2 %v8478_v34  ;;  %v8517_v34 = vld [vmem:[%s10842_s1 + $0x158] sm:$0xff]  ;;  %v1595_v55 = vpack.c.b16 %v1593_v41, %v1592_v40  ;;  %v8539_v46 = vld [vmem:[%s10842_s1 + $0x1e8] sm:$0xff] }
  0x6b   : > { %1653 = vmatpush.bf16.msra.mxu3 %v8486_v43  ;;  %1224 = vmatmul.bf16.vlgmr.msra.gmra.mxu0 %v6319_v0  ;;  %v1887_v43 = vrot.slane %v1885_v25, 4  ;;  %v8558_v25 = vld [vmem:[%s10842_s1 + $0x30] sm:$0xff]  ;;  %v6635_v40 = vld [vmem:[%s8972_s12 + $0xbc] sm:$0x1] }
  0x6c   : > { %1749 = vmatpush.bf16.msrb.mxu0 %v8503_v50  ;;  %1388 = vmatmul.bf16.vlgmr.msra.gmra.mxu1 %v6363_v1  ;;  %v8516_v50 = vld [vmem:[%s10842_s1 + $0x150] sm:$0xff]  ;;  %v1896_v1 = vrot.slane %v1894_v57, 5 }
  0x6d   : > { %1853 = vmatpush.bf16.msrb.mxu1 %v8513_v51  ;;  %1492 = vmatmul.bf16.vlgmr.msra.gmra.mxu2 %v6423_v7  ;;  %v8498_v51 = vld [vmem:[%s10842_s1 + $0xd0] sm:$0xff]  ;;  %v1891_v56 = vor.u32 %v1890_v44, %v1887_v43  ;;  %v8496_v7 = vld [vmem:[%s10842_s1 + $0xc0] sm:$0xff] }
  0x6e   : > { %2012 = vmatpush.bf16.msrb.mxu2 %v8521_v36  ;;  %1654 = vmatmul.bf16.vlgmr.msra.gmra.mxu3 %v1594_v8  ;;  %v8499_v36 = vld [vmem:[%s10842_s1 + $0xd8] sm:$0xff]  ;;  %v6632_v8 = vld [vmem:[%s8972_s12 + $0xb0] sm:$0xf] }
  0x6f   : > { %2115 = vmatpush.bf16.msrb.mxu3 %v8531_v52  ;;  %v6323_v52 = vor.u32 %v8457_v32, %v6322_v31  ;;  %v1892_v0 = vrot.slane %v1891_v56, 4  ;;  %v1913_v16 = vshrl.u32 %v6632_v8, 16  ;;  %v8522_v31 = vld [vmem:[%s8972_s12 + $0x194] sm:$0xf0]  ;;  %v8548_v32 = vld [vmem:[%s10842_s1 + $0x230] sm:$0xff]  ;;  %v8538_v56 = vld [vmem:[%s10842_s1 + $0x1e0] sm:$0xff] }
  0x70   : > { %1750 = vmatpush.bf16.msrb.mxu0 %v8502_v2  ;;  %v1906_v2 = vrot.slane %v1905_v58, 4  ;;  %v1924_v58 = vrot.slane %v1922_v48, 5  ;;  %v8542_v48 = vld [vmem:[%s10842_s1 + $0x200] sm:$0xff] }
  0x71   : > { %1854 = vmatpush.bf16.msrb.mxu1 %v8512_v9  ;;  %v6634_v9 = vld [vmem:[%s8972_s12 + $0xb8] sm:$0xf]  ;;  %v1915_v33 = vrot.slane %v1913_v16, 4 }
  0x72   : > { %2013 = vmatpush.bf16.msrb.mxu2 %v8520_v59  ;;  %v1908_v59 = vshll.u32 %v6631_v49, 16  ;;  %v1930_v19 = vshll.u32 %v6634_v9, 16 }
  0x73   : > { %2116 = vmatpush.bf16.msrb.mxu3 %v8530_v10  ;;  %v8559_v10 = vld [vmem:[%s10842_s1 + $0x38] sm:$0xff] }
  0x74   : > { %1751 = vmatpush.bf16.msrb.mxu0 %v8501_v12  ;;  %v1910_v3 = vrot.slane %v1908_v59, 5  ;;  %v1897_v12 = vsel %vm9212_vm2, %v1892_v0, %v1896_v1  ;;  %v1932_v37 = vrot.slane %v1930_v19, 5  ;;  %v6710_v19 = vld [vmem:[%s8972_s12 + $0x1a0] sm:$0xf] }
  0x75   : > { %1855 = vmatpush.bf16.msrb.mxu1 %v8511_v17  ;;  %v1916_v17 = vshll.u32 %v6632_v8, 16  ;;  %v1956_v28 = vunpack.c.l.b16 %v1897_v12  ;;  %v8537_v8 = vld [vmem:[%s10842_s1 + $0x1d8] sm:$0xff]  ;;  %v8505_v12 = vld [vmem:[%s8972_s12 + $0x12c] sm:$0xf0] }
  0x76   : > { %2014 = vmatpush.bf16.msrb.mxu2 %v8519_v11  ;;  %v8541_v11 = vld [vmem:[%s10842_s1 + $0x1f8] sm:$0xff]  ;;  %v1911_v13 = vsel %vm9212_vm2, %v1906_v2, %v1910_v3  ;;  %v6534_v3 = vld [vmem:[%s8972_s12 + $0x100] sm:$0xf] }
  0x77   : > { %2117 = vmatpush.bf16.msrb.mxu3 %v8529_v18  ;;  %v1927_v18 = vshrl.u32 %v6634_v9, 16  ;;  %v6594_v9 = vld [vmem:[%s8972_s12 + $0x128] sm:$0xf] }
  0x78   : > { %1752 = vmatpush.bf16.msrb.mxu0 %v8500_v22  ;;  %v8549_v22 = vld [vmem:[%s10842_s1 + $0x238] sm:$0xff] }
  0x79   : > { %1856 = vmatpush.bf16.msrb.mxu1 %v8510_v29  ;;  %v1957_v29 = vunpack.c.l.b16 %v1911_v13 }
  0x7a   : > { %2015 = vmatpush.bf16.msrb.mxu2 %v8518_v21  ;;  %v8494_v21 = vld [vmem:[%s8972_s12 + $0xf4] sm:$0xf0] }
  0x7b   : > { %2118 = vmatpush.bf16.msrb.mxu3 %v8528_v30  ;;  %1229 = vmatmul.bf16.gmra.mxu0 %v6323_v52  ;;  %v6706_v30 = vld [vmem:[%s8972_s12 + $0x190] sm:$0xf]  ;;  %v6531_v41 = vor.u32 %v8494_v21, %v6530_v20  ;;  %v1960_v43 = vpack.c.b16 %v1957_v29, %v1956_v28  ;;  %v8567_v52 = vld [vmem:[%s10842_s1 + $0x68] sm:$0xff]  ;;  %v6805_v20 = vld [vmem:[%s8972_s12 + $0x144] sm:$0x1] }
  0x7c   : > { %1753 = vmatpush.bf16.msrb.mxu0 %v8499_v36  ;;  %1393 = vmatmul.bf16.gmra.mxu1 %v6367_v53  ;;  %v1929_v36 = vrot.slane %v1927_v18, 4  ;;  %v6707_v44 = vor.u32 %v8522_v31, %v6706_v30  ;;  %v6804_v53 = vld [vmem:[%s8972_s12 + $0x140] sm:$0xf]  ;;  %v6807_v21 = vld [vmem:[%s8972_s12 + $0x14c] sm:$0x1]  ;;  %v8564_v28 = vld [vmem:[%s10842_s1 + $0x50] sm:$0xff] }
  0x7d   : > { %1857 = vmatpush.bf16.msrb.mxu1 %v8509_v42  ;;  %1497 = vmatmul.bf16.gmra.mxu2 %v6427_v54  ;;  %v6591_v42 = vor.u32 %v8504_v27, %v6590_v24  ;;  %v6806_v54 = vld [vmem:[%s8972_s12 + $0x148] sm:$0xf]  ;;  %v2254_v0 = vshll.u32 %v6804_v53, 16  ;;  %v8536_v24 = vld [vmem:[%s10842_s1 + $0x1d0] sm:$0xff]  ;;  %v2260_v30 = vshll.u32 %v6805_v20, 16 }
  0x7e   : > { %2016 = vmatpush.bf16.msrb.mxu2 %v8517_v34  ;;  %1659 = vmatmul.bf16.gmra.mxu3 %v1595_v55  ;;  %v1918_v34 = vrot.slane %v1916_v17, 5  ;;  %v1933_v49 = vor.u32 %v1932_v37, %v1929_v36  ;;  %v8556_v55 = vld [vmem:[%s10842_s1 + $0x20] sm:$0xff]  ;;  %v2265_v1 = vshrl.u32 %v6806_v54, 16  ;;  %v2268_v2 = vshll.u32 %v6806_v54, 16  ;;  %v8544_v27 = vld [vmem:[%s10842_s1 + $0x210] sm:$0xff]  ;;  %v8553_v36 = vld [vmem:[%s10842_s1 + $0x8] sm:$0xff] }
  0x7f   : > { %2119 = vmatpush.bf16.msrb.mxu3 %v8527_v47  ;;  %v8535_v37 = vld [vmem:[%s10842_s1 + $0x1c8] sm:$0xff]  ;;  %v8589_v54 = vld [vmem:[%s10842_s1 + $0xf8] sm:$0xff] }
  0x80   : > { %1754 = vmatpush.bf16.msrb.mxu0 %v8498_v51  ;;  %v1919_v47 = vor.u32 %v1918_v34, %v1915_v33  ;;  %v8547_v51 = vld [vmem:[%s10842_s1 + $0x228] sm:$0xff]  ;;  %v1934_v59 = vrot.slane %v1933_v49, 4  ;;  %v2270_v16 = vrot.slane %v2268_v2, 5  ;;  %v8562_v49 = vld [vmem:[%s10842_s1 + $0x40] sm:$0xff] }
  0x81   : > { %1858 = vmatpush.bf16.msrb.mxu1 %v8508_v60 }
  0x82   : > { %2017 = vmatpush.bf16.msrb.mxu2 %v8516_v50  ;;  %v1936_v50 = vshll.u32 %v6635_v40, 16  ;;  %v1920_v57 = vrot.slane %v1919_v47, 4  ;;  %v6810_v47 = vld [vmem:[%s8972_s12 + $0x158] sm:$0xf] }
  0x83   : > { %2120 = vmatpush.bf16.msrb.mxu3 %v8526_v61  ;;  %v8546_v61 = vld [vmem:[%s10842_s1 + $0x220] sm:$0xff] }
  0x84   : > { %1755 = vmatpush.bf16.msrb.mxu0 %v8497_v63  ;;  %v1938_v60 = vrot.slane %v1936_v50, 5  ;;  %v2251_v63 = vshrl.u32 %v6804_v53, 16  ;;  %v8579_v53 = vld [vmem:[%s10842_s1 + $0xb8] sm:$0xff] }
  0x85   : > { %1859 = vmatpush.bf16.msrb.mxu1 %v8507_v4  ;;  %v8495_v4 = vld [vmem:[%s8972_s12 + $0x104] sm:$0xf0] }
  0x86   : > { %2018 = vmatpush.bf16.msrb.mxu2 %v8515_v62  ;;  %v8566_v62 = vld [vmem:[%s10842_s1 + $0x60] sm:$0xff]  ;;  %v2253_v13 = vrot.slane %v2251_v63, 4  ;;  %v8550_v63 = vld [vmem:[%s8972_s12 + $0x144] sm:$0xf0] }
  0x87   : > { %2121 = vmatpush.bf16.msrb.mxu3 %v8525_v5  ;;  %v1925_v5 = vsel %vm9212_vm2, %v1920_v57, %v1924_v58  ;;  %v2293_v58 = vshrl.u32 %v6810_v47, 16 }
  0x88   : > { %1756 = vmatpush.bf16.msrb.mxu0 %v8496_v7  ;;  %v8555_v7 = vld [vmem:[%s10842_s1 + $0x18] sm:$0xff]  ;;  %v1958_v17 = vunpack.c.l.b16 %v1925_v5  ;;  %v8578_v5 = vld [vmem:[%s10842_s1 + $0xb0] sm:$0xff] }
  0x89   : > { %1860 = vmatpush.bf16.msrb.mxu1 %v8506_v14  ;;  %v2256_v14 = vrot.slane %v2254_v0, 5  ;;  %v6930_v0 = vld [vmem:[%s8972_s12 + $0x168] sm:$0xf] }
  0x8a   : > { %2019 = vmatpush.bf16.msrb.mxu2 %v8514_v6  ;;  %v1939_v6 = vsel %vm9212_vm2, %v1934_v59, %v1938_v60  ;;  %v2296_v59 = vshll.u32 %v6810_v47, 16  ;;  %v6766_v60 = vld [vmem:[%s8972_s12 + $0x1b8] sm:$0xf]  ;;  %v6770_v47 = vld [vmem:[%s8972_s12 + $0x1c8] sm:$0xf] }
  0x8b   : > { %2122 = vmatpush.bf16.msrb.mxu3 %v8524_v15  ;;  %1757 = vmatmul.bf16.vlgmr.msrb.gmra.mxu0 %v6531_v41  ;;  %v2267_v15 = vrot.slane %v2265_v1, 4  ;;  %v1959_v18 = vunpack.c.l.b16 %v1939_v6  ;;  %v2257_v29 = vor.u32 %v2256_v14, %v2253_v13  ;;  %v2262_v41 = vrot.slane %v2260_v30, 5  ;;  %v8588_v6 = vld [vmem:[%s10842_s1 + $0xf0] sm:$0xff]  ;;  %v6811_v13 = vld [vmem:[%s8972_s12 + $0x15c] sm:$0x1] }
  0x8c   : > { %2219 = vmatpush.bf16.msra.mxu0 %v8541_v11  ;;  %1861 = vmatmul.bf16.vlgmr.msrb.gmra.mxu1 %v6591_v42  ;;  %v8565_v11 = vld [vmem:[%s10842_s1 + $0x58] sm:$0xff] }
  0x8d   : > { %2378 = vmatpush.bf16.msra.mxu1 %v8549_v22  ;;  %2020 = vmatmul.bf16.vlgmr.msrb.gmra.mxu2 %v1960_v43  ;;  %v8523_v22 = vld [vmem:[%s8972_s12 + $0x1a4] sm:$0xf0]  ;;  %v2271_v31 = vor.u32 %v2270_v16, %v2267_v15  ;;  %v1961_v33 = vpack.c.b16 %v1959_v18, %v1958_v17  ;;  %v2258_v40 = vrot.slane %v2257_v29, 4 }
  0x8e   : > { %2563 = vmatpush.bf16.msra.mxu2 %v8559_v10  ;;  %2123 = vmatmul.bf16.vlgmr.msrb.gmra.mxu3 %v6707_v44  ;;  %v8545_v10 = vld [vmem:[%s10842_s1 + $0x218] sm:$0xff]  ;;  %v6711_v34 = vor.u32 %v8523_v22, %v6710_v19  ;;  %v8552_v44 = vld [vmem:[%s10842_s1] sm:$0xff] }
  0x8f   : > { %2666 = vmatpush.bf16.msra.mxu3 %v8569_v23  ;;  %v8554_v23 = vld [vmem:[%s10842_s1 + $0x10] sm:$0xff]  ;;  %v2272_v42 = vrot.slane %v2271_v31, 4  ;;  %v2263_v50 = vsel %vm9212_vm2, %v2258_v40, %v2262_v41 }
  0x90   : > { %2220 = vmatpush.bf16.msra.mxu0 %v8540_v26  ;;  %v6595_v26 = vor.u32 %v8505_v12, %v6594_v9  ;;  %v2322_v1 = vunpack.c.l.b16 %v2263_v50  ;;  %v6809_v12 = vld [vmem:[%s8972_s12 + $0x154] sm:$0x1] }
  0x91   : > { %2379 = vmatpush.bf16.msra.mxu1 %v8548_v32  ;;  %v2274_v32 = vshll.u32 %v6807_v21, 16  ;;  %v2288_v21 = vshll.u32 %v6809_v12, 16 }
  0x92   : > { %2564 = vmatpush.bf16.msra.mxu2 %v8558_v25  ;;  %v6535_v25 = vor.u32 %v8495_v4, %v6534_v3  ;;  %v8560_v3 = vld [vmem:[%s8972_s12 + $0x16c] sm:$0xf0] }
  0x93   : > { %2667 = vmatpush.bf16.msra.mxu3 %v8568_v38  ;;  %v8543_v38 = vld [vmem:[%s10842_s1 + $0x208] sm:$0xff]  ;;  %v2276_v43 = vrot.slane %v2274_v32, 5  ;;  %v8598_v4 = vld [vmem:[%s10842_s1 + $0x130] sm:$0xff]  ;;  %v6931_v18 = vor.u32 %v8560_v3, %v6930_v0  ;;  %v2290_v29 = vrot.slane %v2288_v21, 5  ;;  %v8596_v32 = vld [vmem:[%s10842_s1 + $0x120] sm:$0xff] }
  0x94   : > { %2221 = vmatpush.bf16.msra.mxu0 %v8539_v46  ;;  %v6808_v46 = vld [vmem:[%s8972_s12 + $0x150] sm:$0xf]  ;;  %v8593_v3 = vld [vmem:[%s10842_s1 + $0x108] sm:$0xff] }
  0x95   : > { %2380 = vmatpush.bf16.msra.mxu1 %v8547_v51  ;;  %v2277_v51 = vsel %vm9212_vm2, %v2272_v42, %v2276_v43  ;;  %v2282_v57 = vshll.u32 %v6808_v46, 16  ;;  %v8595_v43 = vld [vmem:[%s10842_s1 + $0x118] sm:$0xff]  ;;  %v6990_v21 = vld [vmem:[%s8972_s12 + $0x190] sm:$0xf] }
  0x96   : > { %2565 = vmatpush.bf16.msra.mxu2 %v8557_v45  ;;  %v8534_v45 = vld [vmem:[%s10842_s1 + $0x1c0] sm:$0xff]  ;;  %v2323_v2 = vunpack.c.l.b16 %v2277_v51  ;;  %v6874_v51 = vld [vmem:[%s8972_s12 + $0x150] sm:$0xf] }
  0x97   : > { %2668 = vmatpush.bf16.msra.mxu3 %v8567_v52  ;;  %v8599_v52 = vld [vmem:[%s10842_s1 + $0x138] sm:$0xff]  ;;  %v2284_v9 = vrot.slane %v2282_v57, 5 }
  0x98   : > { %2222 = vmatpush.bf16.msra.mxu0 %v8538_v56  ;;  %v2279_v56 = vshrl.u32 %v6808_v46, 16  ;;  %v2326_v16 = vpack.c.b16 %v2323_v2, %v2322_v1  ;;  %v8605_v46 = vld [vmem:[%s10842_s1 + $0x158] sm:$0xff] }
  0x99   : > { %2381 = vmatpush.bf16.msra.mxu1 %v8546_v61  ;;  %v8532_v61 = vld [vmem:[%s8972_s12 + $0x1bc] sm:$0xf0] }
  0x9a   : > { %2566 = vmatpush.bf16.msra.mxu2 %v8556_v55  ;;  %v8609_v55 = vld [vmem:[%s10842_s1 + $0x178] sm:$0xff]  ;;  %v6767_v14 = vor.u32 %v8532_v61, %v6766_v60 }
  0x9b   : > { %2669 = vmatpush.bf16.msra.mxu3 %v8566_v62  ;;  %1762 = vmatmul.bf16.gmra.mxu0 %v6535_v25  ;;  %v6870_v62 = vld [vmem:[%s8972_s12 + $0x140] sm:$0xf]  ;;  %v8577_v25 = vld [vmem:[%s10842_s1 + $0xa8] sm:$0xff] }
  0x9c   : > { %2223 = vmatpush.bf16.msra.mxu0 %v8537_v8  ;;  %1866 = vmatmul.bf16.gmra.mxu1 %v6595_v26  ;;  %v2281_v8 = vrot.slane %v2279_v56, 4  ;;  %v6871_v17 = vor.u32 %v8550_v63, %v6870_v62  ;;  %v8587_v26 = vld [vmem:[%s10842_s1 + $0xe8] sm:$0xff]  ;;  %v8574_v56 = vld [vmem:[%s10842_s1 + $0x90] sm:$0xff] }
  0x9d   : > { %2382 = vmatpush.bf16.msra.mxu1 %v8545_v10  ;;  %2025 = vmatmul.bf16.gmra.mxu2 %v1961_v33  ;;  %v2295_v10 = vrot.slane %v2293_v58, 4  ;;  %v8576_v33 = vld [vmem:[%s10842_s1 + $0xa0] sm:$0xff]  ;;  %v8584_v58 = vld [vmem:[%s10842_s1 + $0xd0] sm:$0xff] }
  0x9e   : > { %2567 = vmatpush.bf16.msra.mxu2 %v8555_v7  ;;  %2128 = vmatmul.bf16.gmra.mxu3 %v6711_v34  ;;  %v8608_v7 = vld [vmem:[%s10842_s1 + $0x170] sm:$0xff]  ;;  %v2285_v20 = vor.u32 %v2284_v9, %v2281_v8  ;;  %v8572_v8 = vld [vmem:[%s10842_s1 + $0x80] sm:$0xff] }
  0x9f   : > { %2670 = vmatpush.bf16.msra.mxu3 %v8565_v11  ;;  %v2298_v11 = vrot.slane %v2296_v59, 5  ;;  %v8604_v59 = vld [vmem:[%s10842_s1 + $0x150] sm:$0xff] }
  0xa0   : > { %2224 = vmatpush.bf16.msra.mxu0 %v8536_v24  ;;  %v8597_v24 = vld [vmem:[%s10842_s1 + $0x128] sm:$0xff] }
  0xa1   : > { %2383 = vmatpush.bf16.msra.mxu1 %v8544_v27  ;;  %v2299_v22 = vor.u32 %v2298_v11, %v2295_v10  ;;  %v8607_v27 = vld [vmem:[%s10842_s1 + $0x168] sm:$0xff]  ;;  %v8582_v10 = vld [vmem:[%s10842_s1 + $0xc0] sm:$0xff] }
  0xa2   : > { %2568 = vmatpush.bf16.msra.mxu2 %v8554_v23  ;;  %v2302_v23 = vshll.u32 %v6811_v13, 16  ;;  %v8602_v11 = vld [vmem:[%s10842_s1 + $0x140] sm:$0xff] }
  0xa3   : > { %2671 = vmatpush.bf16.msra.mxu3 %v8564_v28  ;;  %v2286_v28 = vrot.slane %v2285_v20, 4  ;;  %v2300_v30 = vrot.slane %v2299_v22, 4  ;;  %v8649_v20 = vld [vmem:[%s10842_s1 + $0x38] sm:$0xff] }
  0xa4   : > { %2225 = vmatpush.bf16.msra.mxu0 %v8535_v37  ;;  %v2304_v31 = vrot.slane %v2302_v23, 5  ;;  %v8606_v37 = vld [vmem:[%s10842_s1 + $0x160] sm:$0xff]  ;;  %v8570_v22 = vld [vmem:[%s8972_s12 + $0x194] sm:$0xf0] }
  0xa5   : > { %2384 = vmatpush.bf16.msra.mxu1 %v8543_v38  ;;  %v2291_v41 = vsel %vm9212_vm2, %v2286_v28, %v2290_v29  ;;  %v7050_v23 = vld [vmem:[%s8972_s12 + $0x1e0] sm:$0xf]  ;;  %v8628_v28 = vld [vmem:[%s10842_s1 + $0x1f0] sm:$0xff] }
  0xa6   : > { %2569 = vmatpush.bf16.msra.mxu2 %v8553_v36  ;;  %v8586_v36 = vld [vmem:[%s10842_s1 + $0xe0] sm:$0xff]  ;;  %v2305_v42 = vsel %vm9212_vm2, %v2300_v30, %v2304_v31  ;;  %v8648_v29 = vld [vmem:[%s10842_s1 + $0x30] sm:$0xff] }
  0xa7   : > { %2672 = vmatpush.bf16.msra.mxu3 %v8563_v39  ;;  %v2325_v50 = vunpack.c.l.b16 %v2305_v42  ;;  %v8590_v30 = vld [vmem:[%s8972_s12 + $0x20c] sm:$0xf0] }
  0xa8   : > { %2226 = vmatpush.bf16.msra.mxu0 %v8534_v45  ;;  %v9509_v15 = vpop.f32.mrf.mxu0  ;;  %v8585_v45 = vld [vmem:[%s10842_s1 + $0xd8] sm:$0xff]  ;;  %v7170_v31 = vld [vmem:[%s8972_s12 + $0x230] sm:$0xf] }
  0xa9   : > { %2385 = vmatpush.bf16.msra.mxu1 %v8542_v48  ;;  %v9511_v19 = vpop.f32.mrf.mxu1  ;;  %v8533_v48 = vld [vmem:[%s8972_s12 + $0x1cc] sm:$0xf0] }
  0xaa   : > { %2570 = vmatpush.bf16.msra.mxu2 %v8552_v44  ;;  %v8575_v44 = vld [vmem:[%s10842_s1 + $0x98] sm:$0xff]  ;;  %v6771_v62 = vor.u32 %v8533_v48, %v6770_v47  ;;  %v8617_v47 = vld [vmem:[%s10842_s1 + $0x1a8] sm:$0xff] }
  0xab   : > { %2673 = vmatpush.bf16.msra.mxu3 %v8562_v49  ;;  %2227 = vmatmul.bf16.vlgmr.msra.gmra.mxu0 %v6767_v14  ;;  %v2324_v49 = vunpack.c.l.b16 %v2291_v41  ;;  %v8639_v14 = vld [vmem:[%s10842_s1 + $0x238] sm:$0xff]  ;;  %v8627_v48 = vld [vmem:[%s10842_s1 + $0x1e8] sm:$0xff] }
  0xac   : > { %2769 = vmatpush.bf16.msrb.mxu0 %v8579_v53  ;;  %2386 = vmatmul.bf16.vlgmr.msra.gmra.mxu1 %v2326_v16  ;;  %v6934_v53 = vld [vmem:[%s8972_s12 + $0x178] sm:$0xf] }
  0xad   : > { %2873 = vmatpush.bf16.msrb.mxu1 %v8589_v54  ;;  %2571 = vmatmul.bf16.vlgmr.msra.gmra.mxu2 %v6871_v17  ;;  %v8561_v54 = vld [vmem:[%s8972_s12 + $0x17c] sm:$0xf0]  ;;  %v2327_v63 = vpack.c.b16 %v2325_v50, %v2324_v49  ;;  %v8619_v16 = vld [vmem:[%s10842_s1 + $0x1b8] sm:$0xff]  ;;  %v8647_v49 = vld [vmem:[%s10842_s1 + $0x28] sm:$0xff] }
  0xae   : > { %2977 = vmatpush.bf16.msrb.mxu2 %v8599_v52  ;;  %2674 = vmatmul.bf16.vlgmr.msra.gmra.mxu3 %v6931_v18  ;;  %v8551_v52 = vld [vmem:[%s8972_s12 + $0x154] sm:$0xf0]  ;;  %v6935_v2 = vor.u32 %v8561_v54, %v6934_v53  ;;  %v9674_v50 = vld [vmem:[%s10843_s2] ss:$0 sm:$0xff] }
  0xaf   : > { %3081 = vmatpush.bf16.msrb.mxu3 %v8609_v55  ;;  %v8594_v55 = vld [vmem:[%s10842_s1 + $0x110] sm:$0xff]  ;;  %v6875_v1 = vor.u32 %v8551_v52, %v6874_v51  ;;  %v8629_v18 = vld [vmem:[%s10842_s1 + $0x1f8] sm:$0xff]  ;;  %v8636_v51 = vld [vmem:[%s10842_s1 + $0x220] sm:$0xff] }
  0xb0   : > { %2770 = vmatpush.bf16.msrb.mxu0 %v8578_v5  ;;  %v9531_v34 = vpop.f32.mrf.mxu2  ;;  %v9541_v39 = vpop.f32.mrf.mxu0  ;;  %v8583_v5 = vld [vmem:[%s10842_s1 + $0xc8] sm:$0xff]  ;;  %v8616_v52 = vld [vmem:[%s10842_s1 + $0x1a0] sm:$0xff] }
  0xb1   : > { %2874 = vmatpush.bf16.msrb.mxu1 %v8588_v6  ;;  %v9539_v38 = vpop.f32.mrf.mxu3  ;;  %v9543_v40 = vpop.f32.mrf.mxu1  ;;  %v8603_v6 = vld [vmem:[%s10842_s1 + $0x148] sm:$0xff]  ;;  %v8626_v53 = vld [vmem:[%s10842_s1 + $0x1e0] sm:$0xff] }
  0xb2   : > { %2978 = vmatpush.bf16.msrb.mxu2 %v8598_v4  ;;  %v8573_v4 = vld [vmem:[%s10842_s1 + $0x88] sm:$0xff]  ;;  %v8646_v54 = vld [vmem:[%s10842_s1 + $0x20] sm:$0xff] }
  0xb3   : > { %3082 = vmatpush.bf16.msrb.mxu3 %v8608_v7  ;;  %v8592_v7 = vld [vmem:[%s10842_s1 + $0x100] sm:$0xff] }
  0xb4   : > { %2771 = vmatpush.bf16.msrb.mxu0 %v8577_v25  ;;  %v8638_v25 = vld [vmem:[%s10842_s1 + $0x230] sm:$0xff] }
  0xb5   : > { %2875 = vmatpush.bf16.msrb.mxu1 %v8587_v26  ;;  %v8618_v26 = vld [vmem:[%s10842_s1 + $0x1b0] sm:$0xff] }
  0xb6   : > { %2979 = vmatpush.bf16.msrb.mxu2 %v8597_v24  ;;  %v8580_v24 = vld [vmem:[%s8972_s12 + $0x1e4] sm:$0xf0] }
  0xb7   : > { %3083 = vmatpush.bf16.msrb.mxu3 %v8607_v27  ;;  %v7110_v27 = vld [vmem:[%s8972_s12 + $0x208] sm:$0xf]  ;;  %v7051_v41 = vor.u32 %v8580_v24, %v7050_v23 }
  0xb8   : > { %2772 = vmatpush.bf16.msrb.mxu0 %v8576_v33  ;;  %v9573_v57 = vpop.f32.mrf.mxu2  ;;  %v9583_v61 = vpop.f32.mrf.mxu0 }
  0xb9   : > { %2876 = vmatpush.bf16.msrb.mxu1 %v8586_v36  ;;  %v9581_v60 = vpop.f32.mrf.mxu3  ;;  %v9585_v0 = vpop.f32.mrf.mxu1 }
  0xba   : > { %2980 = vmatpush.bf16.msrb.mxu2 %v8596_v32  ;;  %v8600_v32 = vld [vmem:[%s8972_s12 + $0x234] sm:$0xf0] }
  0xbb   : > { %3084 = vmatpush.bf16.msrb.mxu3 %v8606_v37  ;;  %2232 = vmatmul.bf16.gmra.mxu0 %v6771_v62  ;;  %v6991_v37 = vor.u32 %v8570_v22, %v6990_v21  ;;  %v8644_v21 = vld [vmem:[%s10842_s1 + $0x10] sm:$0xff] }
  0xbc   : > { %2773 = vmatpush.bf16.msrb.mxu0 %v8575_v44  ;;  %2391 = vmatmul.bf16.gmra.mxu1 %v2327_v63  ;;  %v7111_v44 = vor.u32 %v8590_v30, %v7110_v27  ;;  %v8635_v63 = vld [vmem:[%s10842_s1 + $0x218] sm:$0xff] }
  0xbd   : > { %2877 = vmatpush.bf16.msrb.mxu1 %v8585_v45  ;;  %2576 = vmatmul.bf16.gmra.mxu2 %v6875_v1  ;;  %v7171_v45 = vor.u32 %v8600_v32, %v7170_v31  ;;  %v6994_v1 = vld [vmem:[%s8972_s12 + $0x1a0] sm:$0xf]  ;;  %v396_v31 = vadd.f32 %v9674_v50, %v9541_v39  ;;  %v8613_v32 = vld [vmem:[%s10842_s1 + $0x188] sm:$0xff] }
  0xbe   : > { %2981 = vmatpush.bf16.msrb.mxu2 %v8595_v43  ;;  %2679 = vmatmul.bf16.gmra.mxu3 %v6935_v2  ;;  %v8571_v2 = vld [vmem:[%s8972_s12 + $0x1a4] sm:$0xf0] }
  0xbf   : > { %3085 = vmatpush.bf16.msrb.mxu3 %v8605_v46  ;;  %v8637_v46 = vld [vmem:[%s10842_s1 + $0x228] sm:$0xff] }
  0xc0   : > { %2774 = vmatpush.bf16.msrb.mxu0 %v8574_v56  ;;  %v9605_v9 = vpop.f32.mrf.mxu2  ;;  %v9615_v13 = vpop.f32.mrf.mxu0  ;;  %v8643_v39 = vld [vmem:[%s10842_s1 + $0x8] sm:$0xff] }
  0xc1   : > { %2878 = vmatpush.bf16.msrb.mxu1 %v8584_v58  ;;  %v9613_v12 = vpop.f32.mrf.mxu3  ;;  %v9623_v17 = vpop.f32.mrf.mxu1 }
  0xc2   : > { %2982 = vmatpush.bf16.msrb.mxu2 %v8594_v55  ;;  %v395_v55 = vadd.f32 %v9674_v50, %v9509_v15  ;;  %v8615_v15 = vld [vmem:[%s10842_s1 + $0x198] sm:$0xff] }
  0xc3   : > { %3086 = vmatpush.bf16.msrb.mxu3 %v8604_v59 }
  0xc4   : > { %2775 = vmatpush.bf16.msrb.mxu0 %v8573_v4  ;;  %v8625_v4 = vld [vmem:[%s10842_s1 + $0x1d8] sm:$0xff] }
  0xc5   : > { %2879 = vmatpush.bf16.msrb.mxu1 %v8583_v5  ;;  %v8645_v5 = vld [vmem:[%s10842_s1 + $0x18] sm:$0xff] }
  0xc6   : > { %2983 = vmatpush.bf16.msrb.mxu2 %v8593_v3  ;;  %v7054_v3 = vld [vmem:[%s8972_s12 + $0x1f0] sm:$0xf] }
  0xc7   : > { %3087 = vmatpush.bf16.msrb.mxu3 %v8603_v6  ;;  %v8837_v6 = vmov 0  }
  0xc8   : > { %2776 = vmatpush.bf16.msrb.mxu0 %v8572_v8  ;;  %v9651_v33 = vpop.f32.mrf.mxu2  ;;  %v9655_v42 = vpop.f32.mrf.mxu0  ;;  %2462 = vst [vmem:[#allocation2 + $0x28] sm:$0xf] %v8837_v6  ;;  %v8581_v8 = vld [vmem:[%s8972_s12 + $0x1f4] sm:$0xf0] }
  0xc9   : > { %2880 = vmatpush.bf16.msrb.mxu1 %v8582_v10  ;;  %v9653_v36 = vpop.f32.mrf.mxu3  ;;  %v9657_v43 = vpop.f32.mrf.mxu1  ;;  %v7114_v10 = vld [vmem:[%s8972_s12 + $0x218] sm:$0xf]  ;;  %2467 = vst [vmem:[#allocation2 + $0x30] sm:$0xc] %v8837_v6 }
  0xca   : > { %2984 = vmatpush.bf16.msrb.mxu2 %v8592_v7  ;;  %v500_v7 = vadd.f32 %v9511_v19, %v395_v55  ;;  %277 = vst [vmem:[#allocation2 + $0x78] sm:$0xc] %v8837_v6  ;;  %v8624_v19 = vld [vmem:[%s10842_s1 + $0x1d0] sm:$0xff]  ;;  %v8687_v55 = vld [vmem:[%s10842_s1 + $0x138] sm:$0xff] }
  0xcb   : > { %3088 = vmatpush.bf16.msrb.mxu3 %v8602_v11  ;;  %2777 = vmatmul.bf16.vlgmr.msrb.gmra.mxu0 %v6991_v37  ;;  %v8591_v11 = vld [vmem:[%s8972_s12 + $0x21c] sm:$0xf0]  ;;  %281 = vst [vmem:[#allocation2 + $0x80] sm:$0xc] %v8837_v6  ;;  %v8623_v37 = vld [vmem:[%s10842_s1 + $0x1c8] sm:$0xff] }
  0xcc   : > { %3185 = vmatpush.bf16.msra.mxu0 %v8619_v16  ;;  %2881 = vmatmul.bf16.vlgmr.msrb.gmra.mxu1 %v7051_v41  ;;  %v8601_v16 = vld [vmem:[%s8972_s12 + $0x244] sm:$0xf0]  ;;  %285 = vst [vmem:[#allocation2 + $0x88] sm:$0xc] %v8837_v6  ;;  %v605_v22 = vadd.f32 %v9531_v34, %v500_v7  ;;  %v7350_v7 = vld [vmem:[%s8972_s12 + $0x58] sm:$0xf] }
  0xcd   : > { %3289 = vmatpush.bf16.msra.mxu1 %v8629_v18  ;;  %2985 = vmatmul.bf16.vlgmr.msrb.gmra.mxu2 %v7111_v44  ;;  %v8634_v18 = vld [vmem:[%s10842_s1 + $0x210] sm:$0xff]  ;;  %289 = vst [vmem:[#allocation2 + $0x90] sm:$0xc] %v8837_v6  ;;  %v8633_v34 = vld [vmem:[%s10842_s1 + $0x208] sm:$0xff]  ;;  %v501_v44 = vadd.f32 %v9543_v40, %v396_v31  ;;  %v8622_v40 = vld [vmem:[%s10842_s1 + $0x1c0] sm:$0xff] }
  0xce   : > { %3393 = vmatpush.bf16.msra.mxu2 %v8639_v14  ;;  %3089 = vmatmul.bf16.vlgmr.msrb.gmra.mxu3 %v7171_v45  ;;  %v7174_v14 = vld [vmem:[%s8972_s12 + $0x240] sm:$0xf]  ;;  %2471 = vst [vmem:[#allocation2 + $0x38] sm:$0xc] %v8837_v6  ;;  %v710_v41 = vadd.f32 %v9539_v38, %v605_v22  ;;  %v397_v38 = vadd.f32 %v9674_v50, %v9583_v61  ;;  %v8677_v61 = vld [vmem:[%s10842_s1 + $0xf8] sm:$0xff]  ;;  %v8657_v31 = vld [vmem:[%s10842_s1 + $0x68] sm:$0xff] }
  0xcf   : > { %3554 = vmatpush.bf16.msra.mxu3 %v8649_v20  ;;  %v8614_v20 = vld [vmem:[%s10842_s1 + $0x190] sm:$0xff]  ;;  %v7175_v30 = vor.u32 %v8601_v16, %v7174_v14  ;;  %2475 = vst [vmem:[#allocation2 + $0x40] sm:$0xc] %v8837_v6  ;;  %v8640_v14 = vld [vmem:[%s8972_s12 + $0x194] sm:$0xf0] }
  0xd0   : > { %3186 = vmatpush.bf16.msra.mxu0 %v8618_v26  ;;  %v9690_v56 = vpop.f32.mrf.mxu2  ;;  %v9694_v59 = vpop.f32.mrf.mxu0  ;;  %v7055_v26 = vor.u32 %v8581_v8, %v7054_v3  ;;  %v815_v45 = vadd.f32 %v9655_v42, %v710_v41  ;;  %2479 = vst [vmem:[#allocation2 + $0x48] sm:$0xc] %v8837_v6  ;;  %v8642_v42 = vld [vmem:[%s10842_s1] sm:$0xff]  ;;  %v7290_v3 = vld [vmem:[%s8972_s12 + $0x30] sm:$0xf] }
  0xd1   : > { %3290 = vmatpush.bf16.msra.mxu1 %v8628_v28  ;;  %v9692_v58 = vpop.f32.mrf.mxu3  ;;  %v9696_v62 = vpop.f32.mrf.mxu1  ;;  %3433 = vst [vmem:[#allocation2] sm:$0xf] %v8837_v6  ;;  %v8620_v6 = vld [vmem:[%s8972_s12 + $0x34] sm:$0xf0] }
  0xd2   : > { %3394 = vmatpush.bf16.msra.mxu2 %v8638_v25  ;;  %v6995_v25 = vor.u32 %v8571_v2, %v6994_v1  ;;  %v7230_v1 = vld [vmem:[%s8972_s12 + $0x8] sm:$0xf]  ;;  %v8610_v2 = vld [vmem:[%s8972_s12 + $0xc] sm:$0xf0]  ;;  %v7291_v22 = vor.u32 %v8620_v6, %v7290_v3  ;;  %v8673_v3 = vld [vmem:[%s10842_s1 + $0xd8] sm:$0xff] }
  0xd3   : > { %3555 = vmatpush.bf16.msra.mxu3 %v8648_v29  ;;  %v7115_v29 = vor.u32 %v8591_v11, %v7114_v10  ;;  %v8630_v10 = vld [vmem:[%s8972_s12 + $0x5c] sm:$0xf0]  ;;  %v7398_v11 = vld [vmem:[%s8972_s12 + $0x190] sm:$0xf]  ;;  %v8621_v6 = vld [vmem:[%s8972_s12 + $0x44] sm:$0xf0] }
  0xd4   : > { %3187 = vmatpush.bf16.msra.mxu0 %v8617_v47  ;;  %v8612_v47 = vld [vmem:[%s10842_s1 + $0x180] sm:$0xff] }
  0xd5   : > { %3291 = vmatpush.bf16.msra.mxu1 %v8627_v48  ;;  %v606_v48 = vadd.f32 %v9573_v57, %v501_v44  ;;  %v8667_v57 = vld [vmem:[%s10842_s1 + $0xb8] sm:$0xff]  ;;  %v7496_v44 = vld [vmem:[%s8972_s12 + $0x140] sm:$0xf] }
  0xd6   : > { %3395 = vmatpush.bf16.msra.mxu2 %v8637_v46  ;;  %v8632_v46 = vld [vmem:[%s10842_s1 + $0x200] sm:$0xff] }
  0xd7   : > { %3556 = vmatpush.bf16.msra.mxu3 %v8647_v49 }
  0xd8   : > { %3188 = vmatpush.bf16.msra.mxu0 %v8616_v52  ;;  %v9732_v23 = vpop.f32.mrf.mxu2  ;;  %v9736_v27 = vpop.f32.mrf.mxu0  ;;  %v8659_v52 = vld [vmem:[%s10842_s1 + $0x78] sm:$0xff] }
  0xd9   : > { %3292 = vmatpush.bf16.msra.mxu1 %v8626_v53  ;;  %v9734_v24 = vpop.f32.mrf.mxu3  ;;  %v9738_v28 = vpop.f32.mrf.mxu1 }
  0xda   : > { %3396 = vmatpush.bf16.msra.mxu2 %v8636_v51 }
  0xdb   : > { %3557 = vmatpush.bf16.msra.mxu3 %v8646_v54  ;;  %2782 = vmatmul.bf16.gmra.mxu0 %v6995_v25  ;;  %v398_v25 = vadd.f32 %v9674_v50, %v9615_v13  ;;  %v8675_v13 = vld [vmem:[%s10842_s1 + $0xe8] sm:$0xff] }
  0xdc   : > { %3189 = vmatpush.bf16.msra.mxu0 %v8615_v15  ;;  %2886 = vmatmul.bf16.gmra.mxu1 %v7055_v26  ;;  %v502_v15 = vadd.f32 %v9585_v0, %v397_v38  ;;  %v8658_v0 = vld [vmem:[%s10842_s1 + $0x70] sm:$0xff]  ;;  %v7399_v26 = vor.u32 %v8640_v14, %v7398_v11  ;;  %v8641_v14 = vld [vmem:[%s8972_s12 + $0x1a4] sm:$0xf0] }
  0xdd   : > { %3293 = vmatpush.bf16.msra.mxu1 %v8625_v4  ;;  %2990 = vmatmul.bf16.gmra.mxu2 %v7115_v29  ;;  %v711_v4 = vadd.f32 %v9581_v60, %v606_v48  ;;  %v8666_v60 = vld [vmem:[%s10842_s1 + $0xb0] sm:$0xff]  ;;  %v503_v41 = vadd.f32 %v9623_v17, %v398_v25  ;;  %v8664_v17 = vld [vmem:[%s10842_s1 + $0xa0] sm:$0xff] }
  0xde   : > { %3397 = vmatpush.bf16.msra.mxu2 %v8635_v63  ;;  %3094 = vmatmul.bf16.gmra.mxu3 %v7175_v30  ;;  %v920_v63 = vadd.f32 %v9657_v43, %v815_v45  ;;  %v8676_v43 = vld [vmem:[%s10842_s1 + $0xf0] sm:$0xff]  ;;  %v607_v16 = vadd.f32 %v9605_v9, %v502_v15 }
  0xdf   : > { %3558 = vmatpush.bf16.msra.mxu3 %v8645_v5  ;;  %v816_v8 = vadd.f32 %v9694_v59, %v711_v4  ;;  %v608_v38 = vadd.f32 %v9651_v33, %v503_v41  ;;  %v3689_v33 = vshrl.u32 %v7496_v44, 16  ;;  %v8655_v4 = vld [vmem:[%s10842_s1 + $0x58] sm:$0xff] }
  0xe0   : > { %3190 = vmatpush.bf16.msra.mxu0 %v8614_v20  ;;  %v9772_v49 = vpop.f32.mrf.mxu2  ;;  %v9782_v53 = vpop.f32.mrf.mxu0  ;;  %v1025_v5 = vadd.f32 %v9690_v56, %v920_v63  ;;  %v8686_v56 = vld [vmem:[%s10842_s1 + $0x130] sm:$0xff] }
  0xe1   : > { %3294 = vmatpush.bf16.msra.mxu1 %v8624_v19  ;;  %v9774_v51 = vpop.f32.mrf.mxu3  ;;  %v9784_v54 = vpop.f32.mrf.mxu1  ;;  %v921_v29 = vadd.f32 %v9696_v62, %v816_v8  ;;  %v7402_v8 = vld [vmem:[%s8972_s12 + $0x1a0] sm:$0xf] }
  0xe2   : > { %3398 = vmatpush.bf16.msra.mxu2 %v8634_v18  ;;  %v1130_v18 = vadd.f32 %v9692_v58, %v1025_v5  ;;  %v7351_v58 = vor.u32 %v8630_v10, %v7350_v7  ;;  %v7294_v5 = vld [vmem:[%s8972_s12 + $0x40] sm:$0xf]  ;;  %v3691_v10 = vrot.slane %v3689_v33, 4 }
  0xe3   : > { %3559 = vmatpush.bf16.msra.mxu3 %v8644_v21  ;;  %v7231_v21 = vor.u32 %v8610_v2, %v7230_v1  ;;  %v1026_v62 = vadd.f32 %v9732_v23, %v921_v29  ;;  %v8656_v23 = vld [vmem:[%s10842_s1 + $0x60] sm:$0xff]  ;;  %v8682_v29 = vld [vmem:[%s10842_s1 + $0x110] sm:$0xff] }
  0xe4   : > { %3191 = vmatpush.bf16.msra.mxu0 %v8613_v32  ;;  %v8685_v32 = vld [vmem:[%s10842_s1 + $0x128] sm:$0xff]  ;;  %v8611_v2 = vld [vmem:[%s8972_s12 + $0x1c] sm:$0xf0] }
  0xe5   : > { %3295 = vmatpush.bf16.msra.mxu1 %v8623_v37  ;;  %v712_v37 = vadd.f32 %v9613_v12, %v607_v16  ;;  %v8674_v12 = vld [vmem:[%s10842_s1 + $0xe0] sm:$0xff] }
  0xe6   : > { %3399 = vmatpush.bf16.msra.mxu2 %v8633_v34  ;;  %v8665_v34 = vld [vmem:[%s10842_s1 + $0xa8] sm:$0xff]  ;;  %v7497_v16 = vld [vmem:[%s8972_s12 + $0x144] sm:$0x1] }
  0xe7   : > { %3560 = vmatpush.bf16.msra.mxu3 %v8643_v39  ;;  %v817_v45 = vadd.f32 %v9736_v27, %v712_v37  ;;  %v8684_v27 = vld [vmem:[%s10842_s1 + $0x120] sm:$0xff]  ;;  %v3698_v37 = vshll.u32 %v7497_v16, 16 }
  0xe8   : > { %3192 = vmatpush.bf16.msra.mxu0 %v8612_v47  ;;  %v9820_v20 = vpop.f32.mrf.mxu2  ;;  %v1225_v9 = vpop.f32.mrf.mxu0  ;;  %v7498_v47 = vld [vmem:[%s8972_s12 + $0x148] sm:$0xf] }
  0xe9   : > { %3296 = vmatpush.bf16.msra.mxu1 %v8622_v40  ;;  %v9822_v19 = vpop.f32.mrf.mxu3  ;;  %v9831_v59 = vpop.f32.mrf.mxu1  ;;  %v1235_v30 = vadd.f32 %v1225_v9, %v1130_v18  ;;  %v1131_v40 = vadd.f32 %v9734_v24, %v1026_v62  ;;  %v3706_v63 = vshll.u32 %v7498_v47, 16  ;;  %v922_v15 = vadd.f32 %v9738_v28, %v817_v45  ;;  %v9875_v24 = vld [vmem:[%s8972_s12 + $0x18] sm:$0xf]  ;;  %v8654_v9 = vld [vmem:[%s10842_s1 + $0x50] sm:$0xff] }
  0xea   : > { %3400 = vmatpush.bf16.msra.mxu2 %v8632_v46  ;;  %v713_v28 = vadd.f32 %v9653_v36, %v608_v38  ;;  %v8631_v36 = vld [vmem:[%s8972_s12 + $0x6c] sm:$0xf0] }
  0xeb   : > { %3561 = vmatpush.bf16.msra.mxu3 %v8642_v42  ;;  %1239 = vst [vmem:[%s9829_s7] sm:$0xff] %v1235_v30  ;;  %v1243_v39 = vmax.f32 %v1235_v30, 0.0  ;;  %3193 = vmatmul.bf16.vlgmr.msra.gmra.mxu0 %v7231_v21  ;;  %v1027_v7 = vadd.f32 %v9772_v49, %v922_v15  ;;  %v3708_v21 = vrot.slane %v3706_v63, 5  ;;  %v8672_v49 = vld [vmem:[%s10842_s1 + $0xd0] sm:$0xff] }
  0xec   : > { %3657 = vmatpush.bf16.msrb.mxu0 %v8659_v52  ;;  %3297 = vmatmul.bf16.vlgmr.msra.gmra.mxu1 %v7291_v22  ;;  %v818_v22 = vadd.f32 %v9782_v53, %v713_v28  ;;  %v8662_v53 = vld [vmem:[%s10842_s1 + $0x90] sm:$0xff]  ;;  %v8660_v28 = vld [vmem:[%s10842_s1 + $0x80] sm:$0xff] }
  0xed   : > { %3816 = vmatpush.bf16.msrb.mxu1 %v8667_v57  ;;  %3401 = vmatmul.bf16.vlgmr.msra.gmra.mxu2 %v7351_v58  ;;  %v1247_v46 = vpack.c.bf16 %v1243_v39, %v1243_v39  ;;  %v7499_v58 = vld [vmem:[%s8972_s12 + $0x14c] sm:$0x1]  ;;  %v1132_v30 = vadd.f32 %v9774_v51, %v1027_v7  ;;  %v7500_v38 = vld [vmem:[%s8972_s12 + $0x150] sm:$0xf]  ;;  %v8715_v7 = vld [vmem:[%s10842_s1 + $0x1f8] sm:$0xff] }
  0xee   : > { %3919 = vmatpush.bf16.msrb.mxu2 %v8677_v61  ;;  %3562 = vmatmul.bf16.vlgmr.msra.gmra.mxu3 %v7399_v26  ;;  %v3692_v61 = vshll.u32 %v7496_v44, 16  ;;  %v7235_v26 = vor.u32 %v8611_v2, %v9875_v24  ;;  %v7403_v44 = vor.u32 %v8641_v14, %v7402_v8  ;;  %v923_v51 = vadd.f32 %v9784_v54, %v818_v22  ;;  %v8681_v54 = vld [vmem:[%s10842_s1 + $0x108] sm:$0xff]  ;;  %v8670_v2 = vld [vmem:[%s10842_s1 + $0xc0] sm:$0xff] }
  0xef   : > { %4023 = vmatpush.bf16.msrb.mxu3 %v8687_v55  ;;  %1251 = vst [vmem:[#allocation2 + $0x78] sm:$0x3] %v1247_v46  ;;  %v3703_v55 = vshrl.u32 %v7498_v47, 16  ;;  %v3712_v46 = vshll.u32 %v7499_v58, 16  ;;  %v8653_v47 = vld [vmem:[%s10842_s1 + $0x48] sm:$0xff]  ;;  %v3717_v15 = vshrl.u32 %v7500_v38, 16 }
  0xf0   : > { %3658 = vmatpush.bf16.msrb.mxu0 %v8658_v0  ;;  %v9867_v42 = vpop.f32.mrf.mxu2  ;;  %v1227_v52 = vpop.f32.mrf.mxu0  ;;  %v8683_v0 = vld [vmem:[%s10842_s1 + $0x118] sm:$0xff]  ;;  %v3694_v11 = vrot.slane %v3692_v61, 5 }
  0xf1   : > { %3817 = vmatpush.bf16.msrb.mxu1 %v8666_v60  ;;  %v9869_v48 = vpop.f32.mrf.mxu3  ;;  %v9871_v57 = vpop.f32.mrf.mxu1  ;;  %v1236_v1 = vadd.f32 %v1227_v52, %v1131_v40  ;;  %v3705_v18 = vrot.slane %v3703_v55, 4  ;;  %v1028_v40 = vadd.f32 %v9820_v20, %v923_v51  ;;  %v3700_v52 = vrot.slane %v3698_v37, 5  ;;  %v8652_v20 = vld [vmem:[%s10842_s1 + $0x40] sm:$0xff]  ;;  %v7503_v58 = vld [vmem:[%s8972_s12 + $0x15c] sm:$0x1] }
  0xf2   : > { %3920 = vmatpush.bf16.msrb.mxu2 %v8676_v43  ;;  %v8663_v43 = vld [vmem:[%s10842_s1 + $0x98] sm:$0xff]  ;;  %v3714_v63 = vrot.slane %v3712_v46, 5  ;;  %v3719_v14 = vrot.slane %v3717_v15, 4  ;;  %v8703_v15 = vld [vmem:[%s10842_s1 + $0x1a8] sm:$0xff] }
  0xf3   : > { %4024 = vmatpush.bf16.msrb.mxu3 %v8686_v56  ;;  %1240 = vst [vmem:[%s9829_s7 + $0x8] sm:$0xff] %v1236_v1  ;;  %v1244_v60 = vmax.f32 %v1236_v1, 0.0  ;;  %v7354_v56 = vld [vmem:[%s8972_s12 + $0x68] sm:$0xf]  ;;  %v3709_v45 = vor.u32 %v3708_v21, %v3705_v18  ;;  %v3720_v1 = vshll.u32 %v7500_v38, 16 }
  0xf4   : > { %3659 = vmatpush.bf16.msrb.mxu0 %v8657_v31  ;;  %v7355_v41 = vor.u32 %v8631_v36, %v7354_v56  ;;  %v7501_v21 = vld [vmem:[%s8972_s12 + $0x154] sm:$0x1]  ;;  %v8668_v37 = vld [vmem:[%s8972_s12 + $0x234] sm:$0xf0] }
  0xf5   : > { %3818 = vmatpush.bf16.msrb.mxu1 %v8665_v34  ;;  %v1248_v25 = vpack.c.bf16 %v1244_v60, %v1244_v60  ;;  %v7295_v34 = vor.u32 %v8621_v6, %v7294_v5  ;;  %v3710_v55 = vrot.slane %v3709_v45, 4  ;;  %v8680_v5 = vld [vmem:[%s10842_s1 + $0x100] sm:$0xff]  ;;  %v1133_v6 = vadd.f32 %v9822_v19, %v1028_v40  ;;  %v8695_v60 = vld [vmem:[%s10842_s1 + $0x178] sm:$0xff]  ;;  %v8713_v40 = vld [vmem:[%s10842_s1 + $0x1e8] sm:$0xff] }
  0xf6   : > { %3921 = vmatpush.bf16.msrb.mxu2 %v8675_v13  ;;  %v3722_v16 = vrot.slane %v3720_v1, 5  ;;  %v3726_v45 = vshll.u32 %v7501_v21, 16  ;;  %v7634_v51 = vld [vmem:[%s8972_s12 + $0x258] sm:$0xf]  ;;  %v8721_v1 = vld [vmem:[%s10842_s1 + $0x228] sm:$0xff]  ;;  %v8702_v21 = vld [vmem:[%s10842_s1 + $0x1a0] sm:$0xff] }
  0xf7   : > { %4025 = vmatpush.bf16.msrb.mxu3 %v8685_v32  ;;  %1252 = vst [vmem:[#allocation2 + $0x80] sm:$0x3] %v1248_v25  ;;  %v3695_v32 = vor.u32 %v3694_v11, %v3691_v10  ;;  %v3715_v8 = vsel %vm9212_vm2, %v3710_v55, %v3714_v63  ;;  %v8705_v10 = vld [vmem:[%s10842_s1 + $0x1b8] sm:$0xff] }
  0xf8   : > { %3660 = vmatpush.bf16.msrb.mxu0 %v8656_v23  ;;  %v9916_v13 = vpop.f32.mrf.mxu2  ;;  %v1230_v62 = vpop.f32.mrf.mxu0  ;;  %v8671_v23 = vld [vmem:[%s10842_s1 + $0xc8] sm:$0xff]  ;;  %v8723_v11 = vld [vmem:[%s10842_s1 + $0x238] sm:$0xff] }
  0xf9   : > { %3819 = vmatpush.bf16.msrb.mxu1 %v8664_v17  ;;  %v9918_v31 = vpop.f32.mrf.mxu3  ;;  %v9920_v39 = vpop.f32.mrf.mxu1  ;;  %v8661_v17 = vld [vmem:[%s10842_s1 + $0x88] sm:$0xff]  ;;  %v3696_v61 = vrot.slane %v3695_v32, 4  ;;  %v8694_v32 = vld [vmem:[%s10842_s1 + $0x170] sm:$0xff] }
  0xfa   : > { %3922 = vmatpush.bf16.msrb.mxu2 %v8674_v12  ;;  %v1237_v12 = vadd.f32 %v1230_v62, %v1132_v30  ;;  %v7574_v30 = vld [vmem:[%s8972_s12 + $0x230] sm:$0xf] }
  0xfb   : > { %4026 = vmatpush.bf16.msrb.mxu3 %v8684_v27  ;;  %v7502_v27 = vld [vmem:[%s8972_s12 + $0x158] sm:$0xf]  ;;  %3198 = vmatmul.bf16.gmra.mxu0 %v7235_v26  ;;  %v3701_v19 = vsel %vm9212_vm2, %v3696_v61, %v3700_v52  ;;  %v8704_v62 = vld [vmem:[%s10842_s1 + $0x1b0] sm:$0xff]  ;;  %v7575_v55 = vor.u32 %v8668_v37, %v7574_v30 }
  0xfc   : > { %3661 = vmatpush.bf16.msrb.mxu0 %v8655_v4  ;;  %1241 = vst [vmem:[%s9829_s7 + $0x10] sm:$0xff] %v1237_v12  ;;  %v1245_v33 = vmax.f32 %v1237_v12, 0.0  ;;  %3302 = vmatmul.bf16.gmra.mxu1 %v7295_v34  ;;  %v3734_v4 = vshll.u32 %v7502_v27, 16  ;;  %v8714_v34 = vld [vmem:[%s10842_s1 + $0x1f0] sm:$0xff]  ;;  %v8678_v12 = vld [vmem:[%s8972_s12 + $0x25c] sm:$0xf0] }
  0xfd   : > { %3820 = vmatpush.bf16.msrb.mxu1 %v8663_v43  ;;  %3406 = vmatmul.bf16.gmra.mxu2 %v7355_v41  ;;  %v8722_v41 = vld [vmem:[%s10842_s1 + $0x230] sm:$0xff]  ;;  %v7635_v63 = vor.u32 %v8678_v12, %v7634_v51  ;;  %v10085_v51 = vld [vmem:[%s8972_s12 + $0x244] sm:$0xf0]  ;;  %v7673_v12 = vld [vmem:[%s8972_s12 + $0x1e4] sm:$0x1] }
  0xfe   : > { %3923 = vmatpush.bf16.msrb.mxu2 %v8673_v3  ;;  %3567 = vmatmul.bf16.gmra.mxu3 %v7403_v44  ;;  %v1249_v24 = vpack.c.bf16 %v1245_v33, %v1245_v33  ;;  %v3731_v3 = vshrl.u32 %v7502_v27, 16  ;;  %v3736_v25 = vrot.slane %v3734_v4, 5  ;;  %v3723_v44 = vor.u32 %v3722_v16, %v3719_v14  ;;  %v8693_v33 = vld [vmem:[%s10842_s1 + $0x168] sm:$0xff]  ;;  %v10063_v30 = vld [vmem:[%s8972_s12 + $0x1cc] sm:$0xf0] }
  0xff   : > { %4027 = vmatpush.bf16.msrb.mxu3 %v8683_v0  ;;  %v10701_v14 = vld [vmem:[%s10844_s3 + $0x230] sm:$0xff] }
 0x100   : > { %3662 = vmatpush.bf16.msrb.mxu0 %v8654_v9  ;;  %1253 = vst [vmem:[#allocation2 + $0x88] sm:$0x3] %v1249_v24  ;;  %v9952_v43 = vpop.f32.mrf.mxu2  ;;  %v1232_v56 = vpop.f32.mrf.mxu0  ;;  %v3733_v22 = vrot.slane %v3731_v3, 4  ;;  %v8650_v9 = vld [vmem:[%s8972_s12 + $0x1bc] sm:$0xf0]  ;;  %v10015_v24 = vrot.slane %v3723_v44, 4 }
 0x101   : > { %3821 = vmatpush.bf16.msrb.mxu1 %v8662_v53  ;;  %v9954_v0 = vpop.f32.mrf.mxu3  ;;  %v9962_v36 = vpop.f32.mrf.mxu1  ;;  %v1238_v18 = vadd.f32 %v1232_v56, %v1133_v6  ;;  %v3760_v53 = vunpack.c.l.b16 %v3701_v19  ;;  %v1261_v6 = vld [vmem:[#allocation2 + $0x50] sm:$0x1] }
 0x102   : > { %3924 = vmatpush.bf16.msrb.mxu2 %v8672_v49  ;;  %v7458_v49 = vld [vmem:[%s8972_s12 + $0x1b8] sm:$0xf] }
 0x103   : > { %4028 = vmatpush.bf16.msrb.mxu3 %v8682_v29  ;;  %1242 = vst [vmem:[%s9829_s7 + $0x18] sm:$0xff] %v1238_v18  ;;  %v1246_v26 = vmax.f32 %v1238_v18, 0.0  ;;  %v3761_v29 = vunpack.c.l.b16 %v3715_v8  ;;  %v1399_v8 = vadd.f32 %v9674_v50, %v9831_v59  ;;  %v8692_v59 = vld [vmem:[%s10842_s1 + $0x160] sm:$0xff] }
 0x104   : > { %3663 = vmatpush.bf16.msrb.mxu0 %v8653_v47  ;;  %v3740_v47 = vshll.u32 %v7503_v58, 16 }
 0x105   : > { %3822 = vmatpush.bf16.msrb.mxu1 %v8661_v17  ;;  %v1250_v46 = vpack.c.bf16 %v1246_v26, %v1246_v26  ;;  %v3764_v27 = vpack.c.b16 %v3761_v29, %v3760_v53  ;;  %v10060_v29 = vld [vmem:[%s8972_s12 + $0x1c8] sm:$0xf] }
 0x106   : > { %3925 = vmatpush.bf16.msrb.mxu2 %v8671_v23  ;;  %v3737_v23 = vor.u32 %v3736_v25, %v3733_v22  ;;  %v3742_v4 = vrot.slane %v3740_v47, 5  ;;  %v8720_v22 = vld [vmem:[%s10842_s1 + $0x220] sm:$0xff] }
 0x107   : > { %4029 = vmatpush.bf16.msrb.mxu3 %v8681_v54  ;;  %1254 = vst [vmem:[#allocation2 + $0x90] sm:$0x3] %v1250_v46  ;;  %v7459_v54 = vor.u32 %v8650_v9, %v7458_v49  ;;  %v7850_v49 = vld [vmem:[%s8972_s12 + $0x10] sm:$0xf]  ;;  %v10082_v46 = vld [vmem:[%s8972_s12 + $0x240] sm:$0xf] }
 0x108   : > { %3664 = vmatpush.bf16.msrb.mxu0 %v8652_v20  ;;  %v9995_v38 = vpop.f32.mrf.mxu2  ;;  %v10005_v61 = vpop.f32.mrf.mxu0  ;;  %v7672_v20 = vld [vmem:[%s8972_s12 + $0x1e0] sm:$0xf]  ;;  %v10020_v3 = vrot.slane %v3737_v23, 4  ;;  %v7675_v23 = vld [vmem:[%s8972_s12 + $0x1ec] sm:$0x1] }
 0x109   : > { %3823 = vmatpush.bf16.msrb.mxu1 %v8660_v28  ;;  %v9997_v17 = vpop.f32.mrf.mxu3  ;;  %v10007_v52 = vpop.f32.mrf.mxu1  ;;  %v7674_v28 = vld [vmem:[%s8972_s12 + $0x1e8] sm:$0xf]  ;;  %v4055_v56 = vshrl.u32 %v7672_v20, 16  ;;  %v4058_v19 = vshll.u32 %v7672_v20, 16 }
 0x10a   : > { %3926 = vmatpush.bf16.msrb.mxu2 %v8670_v2  ;;  %v10017_v2 = vrot.slane %v3726_v45, 5  ;;  %v4069_v16 = vshrl.u32 %v7674_v28, 16  ;;  %v4072_v18 = vshll.u32 %v7674_v28, 16  ;;  %v10118_v28 = vld [vmem:[%s8972_s12 + $0x26c] sm:$0xf0] }
 0x10b   : > { %4030 = vmatpush.bf16.msrb.mxu3 %v8680_v5  ;;  %v10024_v5 = vld [vmem:[%s8972_s12 + $0x8] sm:$0xf]  ;;  %3665 = vmatmul.bf16.vlgmr.msrb.gmra.mxu0 %v7459_v54  ;;  %v10072_v37 = vrot.slane %v4055_v56, 4  ;;  %v7851_v56 = vld [vmem:[%s8972_s12 + $0x14] sm:$0x1] }
 0x10c   : > { %4182 = vmatpush.bf16.msra.mxu0 %v8695_v60  ;;  %3824 = vmatmul.bf16.vlgmr.msrb.gmra.mxu1 %v3764_v27  ;;  %v1276_v60 = vld [vmem:[#allocation2 + $0x50] sm:$0xc]  ;;  %v4421_v9 = vshrl.u32 %v10024_v5, 16  ;;  %v4424_v58 = vshll.u32 %v10024_v5, 16  ;;  %v10089_v47 = vrot.slane %v4069_v16, 4  ;;  %v10091_v54 = vrot.slane %v4072_v18, 5 }
 0x10d   : > { %4285 = vmatpush.bf16.msra.mxu1 %v8705_v10  ;;  %3927 = vmatmul.bf16.vlgmr.msrb.gmra.mxu2 %v7575_v55  ;;  %v8712_v10 = vld [vmem:[%s10842_s1 + $0x1e0] sm:$0xff]  ;;  %v1277_v25 = vsel %vm10037_vm8, 0, %v1276_v60  ;;  %v10094_v27 = vld [vmem:[%s8972_s12 + $0x268] sm:$0xf]  ;;  %v4438_v55 = vshll.u32 %v7850_v49, 16  ;;  %v4078_v60 = vshll.u32 %v7675_v23, 16  ;;  %v1400_v16 = vadd.f32 %v9674_v50, %v9871_v57 }
 0x10e   : > { %4389 = vmatpush.bf16.msra.mxu2 %v8715_v7  ;;  %4031 = vmatmul.bf16.vlgmr.msrb.gmra.mxu3 %v7635_v63  ;;  %1278 = vst [vmem:[#allocation2 + $0x50] sm:$0xc] %v1277_v25  ;;  %v10113_v20 = vrot.slane %v4421_v9, 4  ;;  %v7463_v18 = vor.u32 %v10063_v30, %v10060_v29  ;;  %v8690_v57 = vld [vmem:[%s10842_s1 + $0x150] sm:$0xff]  ;;  %v7639_v30 = vor.u32 %v10118_v28, %v10094_v27  ;;  %v8689_v27 = vld [vmem:[%s10842_s1 + $0x148] sm:$0xff]  ;;  %v8786_v7 = vld [vmem:[%s10844_s3 + $0x1a0] sm:$0xff] }
 0x10f   : > { %4548 = vmatpush.bf16.msra.mxu3 %v8723_v11  ;;  %v1262_v11 = vsel %vm10026_vm6, 0, %v1261_v6  ;;  %v4064_v6 = vshll.u32 %v7673_v12, 16  ;;  %v10148_v9 = vrot.slane %v4438_v55, 5  ;;  %v10164_v12 = vld [vmem:[#allocation2 + $0x2c] sm:$0x1] }
 0x110   : > { %4183 = vmatpush.bf16.msra.mxu0 %v8694_v32  ;;  %1263 = vst [vmem:[#allocation2 + $0x50] sm:$0x1] %v1262_v11  ;;  %v10055_v26 = vpop.f32.mrf.mxu2  ;;  %v3743_v32 = vsel %vm9212_vm2, %v10020_v3, %v3742_v4  ;;  %v10077_v44 = vpop.f32.mrf.mxu0  ;;  %v10115_v3 = vrot.slane %v4424_v58, 5  ;;  %v273_v4 = vld [vmem:[#allocation2 + $0x9c] sm:$0x1] }
 0x111   : > { %4286 = vmatpush.bf16.msra.mxu1 %v8704_v62  ;;  %v10057_v53 = vpop.f32.mrf.mxu3  ;;  %v10074_v62 = vrot.slane %v4058_v19, 5  ;;  %v10079_v45 = vpop.f32.mrf.mxu1  ;;  %v278_v19 = vld [vmem:[#allocation2 + $0x7c] sm:$0x1]  ;;  %v10150_v58 = vld [vmem:[#allocation2 + $0x74] sm:$0x1] }
 0x112   : > { %4390 = vmatpush.bf16.msra.mxu2 %v8714_v34  ;;  %v3729_v34 = vsel %vm9212_vm2, %v10015_v24, %v10017_v2  ;;  %v8719_v24 = vld [vmem:[%s10842_s1 + $0x218] sm:$0xff]  ;;  %v7849_v2 = vld [vmem:[%s8972_s12 + $0xc] sm:$0x1]  ;;  %v279_v28 = vsel %vm10026_vm6, 0, %v278_v19 }
 0x113   : > { %4549 = vmatpush.bf16.msra.mxu3 %v8722_v41  ;;  %v1503_v41 = vadd.f32 %v9867_v42, %v1399_v8  ;;  %v8711_v42 = vld [vmem:[%s10842_s1 + $0x1d8] sm:$0xff]  ;;  %v10102_v63 = vunpack.c.l.b16 %v3729_v34  ;;  %v4061_v5 = vor.u32 %v10074_v62, %v10072_v37  ;;  %v10123_v8 = vld [vmem:[#allocation2 + $0x84] sm:$0x1]  ;;  %v4430_v25 = vshll.u32 %v7849_v2, 16  ;;  %v8700_v34 = vld [vmem:[%s10842_s1 + $0x190] sm:$0xff] }
 0x114   : > { %4184 = vmatpush.bf16.msra.mxu0 %v8693_v33  ;;  %v4435_v33 = vshrl.u32 %v7850_v49, 16  ;;  %v4427_v37 = vor.u32 %v10115_v3, %v10113_v20  ;;  %v4444_v62 = vshll.u32 %v7851_v56, 16  ;;  %v8699_v2 = vld [vmem:[%s10842_s1 + $0x188] sm:$0xff]  ;;  %v274_v3 = vsel %vm10026_vm6, 0, %v273_v4  ;;  %280 = vst [vmem:[#allocation2 + $0x7c] sm:$0x1] %v279_v28 }
 0x115   : > { %4287 = vmatpush.bf16.msra.mxu1 %v8703_v15  ;;  %v10104_v15 = vunpack.c.l.b16 %v3743_v32  ;;  %v10128_v11 = vadd.f32 %v9869_v48, %v1503_v41  ;;  %v8710_v48 = vld [vmem:[%s10842_s1 + $0x1d0] sm:$0xff]  ;;  %v1264_v41 = vld [vmem:[#allocation2 + $0x58] sm:$0x1]  ;;  %v8717_v20 = vld [vmem:[%s10842_s1 + $0x208] sm:$0xff]  ;;  %v1504_v56 = vadd.f32 %v9916_v13, %v1400_v16  ;;  %275 = vst [vmem:[#allocation2 + $0x9c] sm:$0x1] %v274_v3 }
 0x116   : > { %4391 = vmatpush.bf16.msra.mxu2 %v8713_v40  ;;  %v8691_v40 = vld [vmem:[%s10842_s1 + $0x158] sm:$0xff]  ;;  %v10146_v49 = vrot.slane %v4435_v33, 4  ;;  %v8718_v32 = vld [vmem:[%s10842_s1 + $0x210] sm:$0xff]  ;;  %v10180_v33 = vrot.slane %v4078_v60, 5  ;;  %v1265_v55 = vsel %vm10026_vm6, 0, %v1264_v41  ;;  %v10214_v41 = vrot.slane %v4430_v25, 5 }
 0x117   : > { %4550 = vmatpush.bf16.msra.mxu3 %v8721_v1  ;;  %v8701_v1 = vld [vmem:[%s10842_s1 + $0x198] sm:$0xff]  ;;  %v3765_v29 = vpack.c.b16 %v10104_v15, %v10102_v63  ;;  %v10185_v63 = vld [vmem:[%s8972_s12 + $0x1f0] sm:$0xf]  ;;  %v10187_v15 = vld [vmem:[#allocation2 + $0x34] sm:$0x1]  ;;  %v10226_v16 = vrot.slane %v4427_v37, 4  ;;  %v1401_v25 = vadd.f32 %v9674_v50, %v9920_v39  ;;  %v1768_v50 = vadd.f32 %v10005_v61, %v10128_v11 }
 0x118   : > { %4185 = vmatpush.bf16.msra.mxu0 %v8692_v59  ;;  %v4075_v59 = vor.u32 %v10091_v54, %v10089_v47  ;;  %v10166_v23 = vpop.f32.mrf.mxu2  ;;  %v8709_v54 = vld [vmem:[%s10842_s1 + $0x1c8] sm:$0xff]  ;;  %1266 = vst [vmem:[#allocation2 + $0x58] sm:$0x1] %v1265_v55  ;;  %v10208_v60 = vld [vmem:[#allocation2 + $0x3c] sm:$0x1]  ;;  %v4441_v19 = vor.u32 %v10148_v9, %v10146_v49  ;;  %v8708_v49 = vld [vmem:[%s10842_s1 + $0x1c0] sm:$0xff]  ;;  %v1666_v11 = vadd.f32 %v9918_v31, %v1504_v56 }
 0x119   : > { %4288 = vmatpush.bf16.msra.mxu1 %v8702_v21  ;;  %v10136_v21 = vld [vmem:[#allocation2 + $0x94] sm:$0x1]  ;;  %v10168_v47 = vpop.f32.mrf.mxu3  ;;  %v8688_v9 = vld [vmem:[%s10842_s1 + $0x140] sm:$0xff]  ;;  %v2464_v39 = vsel %vm10026_vm6, 0, %v10164_v12  ;;  %v8761_v37 = vld [vmem:[%s10844_s3 + $0xf8] sm:$0xff]  ;;  %v2473_v31 = vsel %vm10026_vm6, 0, %v10208_v60 }
 0x11a   : > { %4392 = vmatpush.bf16.msra.mxu2 %v8712_v10  ;;  %v10125_v10 = vld [vmem:[#allocation2 + $0x8c] sm:$0x1]  ;;  %v291_v13 = vsel %vm10026_vm6, 0, %v10136_v21  ;;  %v1258_v21 = vsel %vm10026_vm6, 0, %v10150_v58  ;;  %v8716_v58 = vld [vmem:[%s10842_s1 + $0x200] sm:$0xff] }
 0x11b   : > { %4551 = vmatpush.bf16.msra.mxu3 %v8720_v22  ;;  %v7579_v22 = vor.u32 %v10085_v51, %v10082_v46  ;;  %v287_v4 = vsel %vm10026_vm6, 0, %v10125_v10  ;;  %v10228_v10 = vrot.slane %v4444_v62, 5  ;;  %3670 = vmatmul.bf16.gmra.mxu0 %v7463_v18  ;;  %v8698_v18 = vld [vmem:[%s10842_s1 + $0x180] sm:$0xff]  ;;  %292 = vst [vmem:[#allocation2 + $0x94] sm:$0x1] %v291_v13 }
 0x11c   : > { %4186 = vmatpush.bf16.msra.mxu0 %v8691_v40  ;;  %v10178_v40 = vrot.slane %v4064_v6, 5  ;;  %v10206_v6 = vrot.slane %v4075_v59, 4  ;;  %v10221_v59 = vld [vmem:[#allocation2 + $0x44] sm:$0x1]  ;;  %3829 = vmatmul.bf16.gmra.mxu1 %v3765_v29  ;;  %288 = vst [vmem:[#allocation2 + $0x8c] sm:$0x1] %v287_v4 }
 0x11d   : > { %4289 = vmatpush.bf16.msra.mxu1 %v8701_v1  ;;  %v10189_v1 = vpop.f32.mrf.mxu0  ;;  %3932 = vmatmul.bf16.gmra.mxu2 %v7579_v22  ;;  %v10268_v51 = vld [vmem:[%s8972_s12 + $0x20] sm:$0xf]  ;;  %v2469_v22 = vsel %vm10026_vm6, 0, %v10187_v15  ;;  %v1282_v62 = vld [vmem:[#allocation2 + $0x58] sm:$0xc]  ;;  %v2477_v55 = vsel %vm10026_vm6, 0, %v10221_v59 }
 0x11e   : > { %4393 = vmatpush.bf16.msra.mxu2 %v8711_v42  ;;  %v10176_v42 = vrot.slane %v4061_v5, 4  ;;  %v283_v5 = vsel %vm10026_vm6, 0, %v10123_v8  ;;  %v10219_v8 = vld [vmem:[%s8972_s12 + $0x1f8] sm:$0xf]  ;;  %4036 = vmatmul.bf16.gmra.mxu3 %v7639_v30  ;;  %v4081_v29 = vsel %vm9212_vm2, %v10206_v6, %v10180_v33  ;;  %v4442_v30 = vrot.slane %v4441_v19, 4 }
 0x11f   : > { %4552 = vmatpush.bf16.msra.mxu3 %v8719_v24  ;;  %v10191_v24 = vpop.f32.mrf.mxu1  ;;  %284 = vst [vmem:[#allocation2 + $0x84] sm:$0x1] %v283_v5  ;;  %v4097_v46 = vshrl.u32 %v10219_v8, 16  ;;  %v4433_v6 = vsel %vm9212_vm2, %v10226_v16, %v10214_v41  ;;  %v1283_v60 = vsel %vm10037_vm8, 0, %v1282_v62  ;;  %v10316_v56 = vld [vmem:[%s8972_s12 + $0x1f4] sm:$0x1]  ;;  %v10321_v19 = vunpack.c.l.b16 %v4081_v29 }
 0x120   : > { %4187 = vmatpush.bf16.msra.mxu0 %v8690_v57  ;;  %v10231_v57 = vld [vmem:[#allocation2 + $0x4c] sm:$0x1]  ;;  %v4067_v61 = vsel %vm9212_vm2, %v10176_v42, %v10178_v40  ;;  %1259 = vst [vmem:[#allocation2 + $0x74] sm:$0x1] %v1258_v21  ;;  %v10289_v42 = vadd.f32 %v9952_v43, %v1401_v25  ;;  %v10291_v40 = vpop.f32.mrf.mxu2  ;;  %v1872_v43 = vadd.f32 %v10007_v52, %v1768_v50  ;;  %v1288_v52 = vld [vmem:[#allocation2 + $0x60] sm:$0xc] }
 0x121   : > { %4290 = vmatpush.bf16.msra.mxu1 %v8700_v34  ;;  %v4086_v34 = vshll.u32 %v10185_v63, 16  ;;  %v10293_v33 = vpop.f32.mrf.mxu3  ;;  %2465 = vst [vmem:[#allocation2 + $0x2c] sm:$0x1] %v2464_v39  ;;  %v10298_v15 = vunpack.c.l.b16 %v4067_v61  ;;  %v2481_v5 = vsel %vm10026_vm6, 0, %v10231_v57  ;;  %v10319_v4 = vld [vmem:[%s8972_s12 + $0x1fc] sm:$0x1]  ;;  %v4447_v16 = vsel %vm9212_vm2, %v4442_v30, %v10228_v10 }
 0x122   : > { %4394 = vmatpush.bf16.msra.mxu2 %v8710_v48  ;;  %v4083_v48 = vshrl.u32 %v10185_v63, 16  ;;  %2470 = vst [vmem:[#allocation2 + $0x34] sm:$0x1] %v2469_v22  ;;  %v10327_v59 = vld [vmem:[%s8972_s12 + $0x5c] sm:$0xf0]  ;;  %v4463_v57 = vshrl.u32 %v10268_v51, 16  ;;  %v2031_v50 = vadd.f32 %v10055_v26, %v1872_v43  ;;  %v4492_v39 = vunpack.c.l.b16 %v4433_v6 }
 0x123   : > { %4553 = vmatpush.bf16.msra.mxu3 %v8718_v32  ;;  %v10246_v32 = vld [vmem:[%s8972_s12 + $0x18] sm:$0xf]  ;;  %2474 = vst [vmem:[#allocation2 + $0x3c] sm:$0x1] %v2473_v31  ;;  %v10330_v13 = vld [vmem:[%s8972_s12 + $0x80] sm:$0xf]  ;;  %v4130_v62 = vpack.c.b16 %v10321_v19, %v10298_v15 }
 0x124   : > { %4188 = vmatpush.bf16.msra.mxu0 %v8689_v27  ;;  %v10284_v12 = vrot.slane %v4083_v48, 4  ;;  %v4449_v27 = vshrl.u32 %v10246_v32, 16  ;;  %v10333_v41 = vld [vmem:[%s8972_s12 + $0x84] sm:$0xf0]  ;;  %v8760_v48 = vld [vmem:[%s10844_s3 + $0xf0] sm:$0xff]  ;;  %v4466_v25 = vshll.u32 %v10268_v51, 16 }
 0x125   : > { %4291 = vmatpush.bf16.msra.mxu1 %v8699_v2  ;;  %v1267_v2 = vld [vmem:[#allocation2 + $0x60] sm:$0x1]  ;;  %v10302_v3 = vpop.f32.mrf.mxu0  ;;  %2478 = vst [vmem:[#allocation2 + $0x44] sm:$0x1] %v2477_v55  ;;  %v4099_v10 = vrot.slane %v4097_v46, 4  ;;  %v1289_v61 = vsel %vm10037_vm8, 0, %v1288_v52  ;;  %v2134_v55 = vadd.f32 %v10057_v53, %v2031_v50 }
 0x126   : > { %4395 = vmatpush.bf16.msra.mxu2 %v8709_v54  ;;  %v4100_v54 = vshll.u32 %v10219_v8, 16  ;;  %v10324_v8 = vld [vmem:[%s8972_s12 + $0x58] sm:$0xf]  ;;  %v1268_v21 = vsel %vm10026_vm6, 0, %v1267_v2  ;;  %2482 = vst [vmem:[#allocation2 + $0x4c] sm:$0x1] %v2481_v5 }
 0x127   : > { %4554 = vmatpush.bf16.msra.mxu3 %v8717_v20  ;;  %v4452_v20 = vshll.u32 %v10246_v32, 16  ;;  %v10304_v28 = vpop.f32.mrf.mxu1  ;;  %v7853_v51 = vld [vmem:[%s8972_s12 + $0x1c] sm:$0x1]  ;;  %v4451_v22 = vrot.slane %v4449_v27, 4  ;;  %1284 = vst [vmem:[#allocation2 + $0x58] sm:$0xc] %v1283_v60 }
 0x128   : > { %4189 = vmatpush.bf16.msra.mxu0 %v8688_v9  ;;  %v4088_v9 = vrot.slane %v4086_v34, 5  ;;  %v4102_v32 = vrot.slane %v4100_v54, 5  ;;  %v1285_v34 = vld [vmem:[#allocation2 + $0x5c] sm:$0x1]  ;;  %1269 = vst [vmem:[#allocation2 + $0x60] sm:$0x1] %v1268_v21  ;;  %v10365_v2 = vpop.f32.mrf.mxu2 }
 0x129   : > { %4292 = vmatpush.bf16.msra.mxu1 %v8698_v18  ;;  %v1769_v18 = vadd.f32 %v10077_v44, %v1666_v11  ;;  %v4454_v29 = vrot.slane %v4452_v20, 5  ;;  %v4092_v26 = vshll.u32 %v10316_v56, 16  ;;  %v4106_v46 = vshll.u32 %v10319_v4, 16  ;;  %1290 = vst [vmem:[#allocation2 + $0x60] sm:$0xc] %v1289_v61  ;;  %v10367_v20 = vpop.f32.mrf.mxu3 }
 0x12a   : > { %4396 = vmatpush.bf16.msra.mxu2 %v8708_v49  ;;  %v1279_v49 = vld [vmem:[#allocation2 + $0x54] sm:$0x1]  ;;  %v4465_v30 = vrot.slane %v4463_v57, 4  ;;  %v7751_v44 = vor.u32 %v10327_v59, %v10324_v8  ;;  %v7811_v11 = vor.u32 %v10333_v41, %v10330_v13  ;;  %v4089_v31 = vor.u32 %v4088_v9, %v10284_v12  ;;  %v7855_v54 = vld [vmem:[%s8972_s12 + $0x24] sm:$0x1]  ;;  %v8759_v59 = vld [vmem:[%s10844_s3 + $0xe8] sm:$0xff] }
 0x12b   : > { %4555 = vmatpush.bf16.msra.mxu3 %v8716_v58  ;;  %v4493_v58 = vunpack.c.l.b16 %v4447_v16  ;;  %v1280_v63 = vsel %vm10026_vm6, 0, %v1279_v49  ;;  %v1270_v27 = vld [vmem:[#allocation2 + $0x68] sm:$0x1]  ;;  %v4103_v43 = vor.u32 %v4102_v32, %v4099_v10  ;;  %v1294_v5 = vld [vmem:[#allocation2 + $0x68] sm:$0xc]  ;;  %v1286_v6 = vsel %vm10026_vm6, 0, %v1285_v34  ;;  %4190 = vmatmul.bf16.vlgmr.msra.gmra.mxu0 %v4130_v62 }
 0x12c   : > { %v1271_v15 = vsel %vm10026_vm6, 0, %v1270_v27  ;;  %1281 = vst [vmem:[#allocation2 + $0x54] sm:$0x1] %v1280_v63  ;;  %v4455_v56 = vor.u32 %v4454_v29, %v4451_v22  ;;  %v4458_v4 = vshll.u32 %v7853_v51, 16  ;;  %v1295_v53 = vsel %vm10037_vm8, 0, %v1294_v5  ;;  %4293 = vmatmul.bf16.vlgmr.msra.gmra.mxu1 %v7751_v44 }
 0x12d   : > { %v2228_v60 = vpop.f32.mrf.mxu0  ;;  %v4496_v52 = vpack.c.b16 %v4493_v58, %v4492_v39  ;;  %1272 = vst [vmem:[#allocation2 + $0x68] sm:$0x1] %v1271_v15  ;;  %v1873_v19 = vadd.f32 %v10079_v45, %v1769_v18  ;;  %v4472_v41 = vshll.u32 %v7855_v54, 16  ;;  %v1667_v16 = vadd.f32 %v9954_v0, %v10289_v42  ;;  %v10385_v9 = vld [vmem:[%s10843_s2] ss:$0 sm:$0xff]  ;;  %4397 = vmatmul.bf16.vlgmr.msra.gmra.mxu2 %v7811_v11 }
 0x12e   : > { %v2238_v8 = vadd.f32 %v2228_v60, %v2134_v55  ;;  %1296 = vst [vmem:[#allocation2 + $0x68] sm:$0xc] %v1295_v53  ;;  %v4094_v57 = vrot.slane %v4092_v26, 5  ;;  %v4104_v45 = vrot.slane %v4103_v43, 4  ;;  %v4108_v21 = vrot.slane %v4106_v46, 5  ;;  %v8758_v39 = vld [vmem:[%s10844_s3 + $0xe0] sm:$0xff] }
 0x12f   : > { %5079 = vmatpush.bf16.msrb.mxu3 %v8761_v37  ;;  %v4468_v37 = vrot.slane %v4466_v25, 5  ;;  %v2387_v12 = vpop.f32.mrf.mxu1  ;;  %1287 = vst [vmem:[#allocation2 + $0x5c] sm:$0x1] %v1286_v6  ;;  %v2032_v25 = vadd.f32 %v10166_v23, %v1873_v19  ;;  %v1402_v10 = vadd.f32 %v10385_v9, %v9962_v36  ;;  %v1770_v0 = vadd.f32 %v10189_v1, %v1667_v16  ;;  %v1291_v23 = vld [vmem:[#allocation2 + $0x64] sm:$0x1] }
 0x130   : > { %v2397_v49 = vadd.f32 %v2387_v12, %v2238_v8  ;;  %4556 = vmatmul.bf16.vlgmr.msra.gmra.mxu3 %v4496_v52  ;;  %v4456_v42 = vrot.slane %v4455_v56, 4  ;;  %v4460_v32 = vrot.slane %v4458_v4, 5  ;;  %v4474_v51 = vrot.slane %v4472_v41, 5  ;;  %v10398_v58 = vpop.f32.mrf.mxu2  ;;  %v2449_v11 = vld [vmem:[#allocation2 + $0x50] sm:$0x7] }
 0x131   : > { %v4469_v13 = vor.u32 %v4468_v37, %v4465_v30  ;;  %v1292_v22 = vsel %vm10026_vm6, 0, %v1291_v23  ;;  %v1506_v36 = vadd.f32 %v9995_v38, %v1402_v10  ;;  %v2135_v1 = vadd.f32 %v10168_v47, %v2032_v25  ;;  %v10400_v29 = vpop.f32.mrf.mxu3  ;;  %v7754_v5 = vld [vmem:[%s8972_s12 + $0x68] sm:$0xf]  ;;  %v8697_v6 = vld [vmem:[%s8972_s12 + $0x6c] sm:$0xf0] }
 0x132   : > { %6860 = vst [vmem:[%s9829_s7 + $0x20] sm:$0xff] %v2397_v49  ;;  %v2406_v50 = vmax.f32 %v2397_v49, 0.0  ;;  %v4109_v34 = vsel %vm9212_vm2, %v4104_v45, %v4108_v21  ;;  %v1874_v26 = vadd.f32 %v10191_v24, %v1770_v0  ;;  %v4461_v37 = vsel %vm9212_vm2, %v4456_v42, %v4460_v32  ;;  %v8757_v24 = vld [vmem:[%s10844_s3 + $0xd8] sm:$0xff]  ;;  %v7814_v12 = vld [vmem:[%s8972_s12 + $0x90] sm:$0xf] }
 0x133   : > { %5080 = vmatpush.bf16.msrb.mxu3 %v8760_v48  ;;  %v4090_v48 = vrot.slane %v4089_v31, 4  ;;  %v4470_v61 = vrot.slane %v4469_v13, 4  ;;  %1293 = vst [vmem:[#allocation2 + $0x64] sm:$0x1] %v1292_v22  ;;  %v1668_v44 = vadd.f32 %v9997_v17, %v1506_v36  ;;  %v4129_v54 = vunpack.c.l.b16 %v4109_v34  ;;  %v1297_v56 = vld [vmem:[#allocation2 + $0x6c] sm:$0x1] }
 0x134   : > { %v2410_v18 = vpack.c.bf16 %v2406_v50, %v2406_v50  ;;  %v2033_v27 = vadd.f32 %v10291_v40, %v1874_v26  ;;  %v4494_v17 = vunpack.c.l.b16 %v4461_v37  ;;  %v8707_v19 = vld [vmem:[%s8972_s12 + $0x94] sm:$0xf0]  ;;  %v8756_v8 = vld [vmem:[%s10844_s3 + $0xd0] sm:$0xff]  ;;  %v7755_v13 = vor.u32 %v8697_v6, %v7754_v5  ;;  %v8754_v36 = vld [vmem:[%s10844_s3 + $0xc0] sm:$0xff] }
 0x135   : > { %v4095_v63 = vsel %vm9212_vm2, %v4090_v48, %v4094_v57  ;;  %v2230_v46 = vpop.f32.mrf.mxu0  ;;  %v4475_v62 = vsel %vm9212_vm2, %v4470_v61, %v4474_v51  ;;  %v1771_v4 = vadd.f32 %v10302_v3, %v1668_v44  ;;  %v7815_v21 = vor.u32 %v8707_v19, %v7814_v12  ;;  %v2452_v51 = vld [vmem:[#allocation2 + $0x58] sm:$0x7]  ;;  %v2455_v44 = vld [vmem:[#allocation2 + $0x60] sm:$0x7]  ;;  %v8741_v6 = vld [vmem:[%s10844_s3 + $0x68] sm:$0xff] }
 0x136   : > { %v2415_v47 = vshrl.u32 %v2410_v18, 16  ;;  %v2239_v30 = vadd.f32 %v2230_v46, %v2135_v1  ;;  %v4128_v31 = vunpack.c.l.b16 %v4095_v63  ;;  %v2418_v43 = vshll.u32 %v2410_v18, 16  ;;  %v8743_v26 = vld [vmem:[%s10844_s3 + $0x78] sm:$0xff]  ;;  %v8740_v19 = vld [vmem:[%s10844_s3 + $0x60] sm:$0xff] }
 0x137   : > { %5081 = vmatpush.bf16.msrb.mxu3 %v8759_v59  ;;  %v2389_v38 = vpop.f32.mrf.mxu1  ;;  %v4495_v52 = vunpack.c.l.b16 %v4475_v62  ;;  %v1298_v59 = vsel %vm10026_vm6, 0, %v1297_v56  ;;  %v2136_v41 = vadd.f32 %v10293_v33, %v2033_v27  ;;  %v1875_v0 = vadd.f32 %v10304_v28, %v1771_v4  ;;  %v8755_v33 = vld [vmem:[%s10844_s3 + $0xc8] sm:$0xff]  ;;  %4815 = vmatpush.bf16.msrb.mxu1 %v8743_v26  ;;  %v8799_v12 = vld [vmem:[%s10844_s3 + $0x1f8] sm:$0xff] }
 0x138   : > { %v2417_v55 = vrot.slane %v2415_v47, 7  ;;  %v2398_v15 = vadd.f32 %v2389_v38, %v2239_v30  ;;  %1299 = vst [vmem:[#allocation2 + $0x6c] sm:$0x1] %v1298_v59  ;;  %v10436_v48 = vpop.f32.mrf.mxu2  ;;  %v4131_v25 = vpack.c.b16 %v4129_v54, %v4128_v31  ;;  %v2458_v59 = vld [vmem:[#allocation2 + $0x68] sm:$0x7] }
 0x139   : > { %v10438_v57 = vpop.f32.mrf.mxu3  ;;  %v4497_v10 = vpack.c.b16 %v4495_v52, %v4494_v17  ;;  %v2034_v23 = vadd.f32 %v10365_v2, %v1875_v0  ;;  %v8796_v0 = vld [vmem:[%s10844_s3 + $0x1e0] sm:$0xff] }
 0x13a   : > { %v2420_v53 = vor.u32 %v2418_v43, %v2417_v55  ;;  %6861 = vst [vmem:[%s9829_s7 + $0x28] sm:$0xff] %v2398_v15  ;;  %v2407_v40 = vmax.f32 %v2398_v15, 0.0 }
 0x13b   : > { %5082 = vmatpush.bf16.msrb.mxu3 %v8758_v39  ;;  %4195 = vmatmul.bf16.gmra.mxu0 %v4131_v25  ;;  %v2137_v1 = vadd.f32 %v10367_v20, %v2034_v23  ;;  %v8739_v25 = vld [vmem:[%s10844_s3 + $0x58] sm:$0xff] }
 0x13c   : > { %v2450_v16 = vsel %vm10420_vm11, %v2420_v53, %v2449_v11  ;;  %v2411_v3 = vpack.c.bf16 %v2407_v40, %v2407_v40  ;;  %4298 = vmatmul.bf16.gmra.mxu1 %v7755_v13 }
 0x13d   : > { %2451 = vst [vmem:[#allocation2 + $0x50] sm:$0x7] %v2450_v16  ;;  %v2233_v49 = vpop.f32.mrf.mxu0  ;;  %4402 = vmatmul.bf16.gmra.mxu2 %v7815_v21 }
 0x13e   : > { %v2422_v42 = vshrl.u32 %v2411_v3, 16  ;;  %v2240_v32 = vadd.f32 %v2233_v49, %v2136_v41  ;;  %v2425_v39 = vshll.u32 %v2411_v3, 16  ;;  %v8797_v49 = vld [vmem:[%s10844_s3 + $0x1e8] sm:$0xff] }
 0x13f   : > { %5083 = vmatpush.bf16.msrb.mxu3 %v8757_v24  ;;  %v2392_v45 = vpop.f32.mrf.mxu1  ;;  %v8742_v24 = vld [vmem:[%s10844_s3 + $0x70] sm:$0xff] }
 0x140   : > { %v2424_v50 = vrot.slane %v2422_v42, 7  ;;  %v2399_v61 = vadd.f32 %v2392_v45, %v2240_v32  ;;  %4561 = vmatmul.bf16.gmra.mxu3 %v4497_v10  ;;  %v10452_v63 = vpop.f32.mrf.mxu2  ;;  %4816 = vmatpush.bf16.msrb.mxu1 %v8742_v24  ;;  %v8738_v10 = vld [vmem:[%s10844_s3 + $0x50] sm:$0xff] }
 0x141   : > { %v10454_v34 = vpop.f32.mrf.mxu3 }
 0x142   : > { %v2427_v22 = vor.u32 %v2425_v39, %v2424_v50  ;;  %6862 = vst [vmem:[%s9829_s7 + $0x30] sm:$0xff] %v2399_v61  ;;  %v2408_v28 = vmax.f32 %v2399_v61, 0.0  ;;  %v8737_v50 = vld [vmem:[%s10844_s3 + $0x48] sm:$0xff]  ;;  %v8795_v39 = vld [vmem:[%s10844_s3 + $0x1d8] sm:$0xff]  ;;  %v2582_v61 = vadd.f32 %v10385_v9, %v10398_v58 }
 0x143   : > { %5084 = vmatpush.bf16.msrb.mxu3 %v8756_v8  ;;  %v8798_v8 = vld [vmem:[%s10844_s3 + $0x1f0] sm:$0xff] }
 0x144   : > { %v2453_v2 = vsel %vm10420_vm11, %v2427_v22, %v2452_v51  ;;  %v2412_v18 = vpack.c.bf16 %v2408_v28, %v2408_v28  ;;  %v8070_v54 = vld [vmem:[#allocation2 + $0x50] sm:$0xf]  ;;  %4817 = vmatpush.bf16.msrb.mxu1 %v8741_v6 }
 0x145   : > { %2454 = vst [vmem:[#allocation2 + $0x58] sm:$0x7] %v2453_v2  ;;  %v2235_v46 = vpop.f32.mrf.mxu0  ;;  %v2685_v2 = vadd.f32 %v10400_v29, %v2582_v61 }
 0x146   : > { %v2429_v47 = vshrl.u32 %v2412_v18, 16  ;;  %v2241_v30 = vadd.f32 %v2235_v46, %v2137_v1  ;;  %v2432_v37 = vshll.u32 %v2412_v18, 16  ;;  %v8794_v1 = vld [vmem:[%s10844_s3 + $0x1d0] sm:$0xff]  ;;  %v8779_v46 = vld [vmem:[%s10844_s3 + $0x178] sm:$0xff] }
 0x147   : > { %5085 = vmatpush.bf16.msrb.mxu3 %v8755_v33  ;;  %v2394_v38 = vpop.f32.mrf.mxu1 }
 0x148   : > { %v2431_v20 = vrot.slane %v2429_v47, 7  ;;  %v2400_v62 = vadd.f32 %v2394_v38, %v2241_v30  ;;  %v10465_v43 = vpop.f32.mrf.mxu2  ;;  %4818 = vmatpush.bf16.msrb.mxu1 %v8740_v19  ;;  %v8793_v38 = vld [vmem:[%s10844_s3 + $0x1c8] sm:$0xff]  ;;  %v2583_v47 = vadd.f32 %v10385_v9, %v10436_v48 }
 0x149   : > { %v10467_v15 = vpop.f32.mrf.mxu3 }
 0x14a   : > { %v2434_v11 = vor.u32 %v2432_v37, %v2431_v20  ;;  %6863 = vst [vmem:[%s9829_s7 + $0x38] sm:$0xff] %v2400_v62  ;;  %v2409_v31 = vmax.f32 %v2400_v62, 0.0  ;;  %v8778_v37 = vld [vmem:[%s10844_s3 + $0x170] sm:$0xff]  ;;  %v8792_v62 = vld [vmem:[%s10844_s3 + $0x1c0] sm:$0xff]  ;;  %v2686_v24 = vadd.f32 %v10438_v57, %v2583_v47 }
 0x14b   : > { %5086 = vmatpush.bf16.msrb.mxu3 %v8754_v36  ;;  %v8736_v36 = vld [vmem:[%s10844_s3 + $0x40] sm:$0xff] }
 0x14c   : > { %v2456_v27 = vsel %vm10420_vm11, %v2434_v11, %v2455_v44  ;;  %v2413_v55 = vpack.c.bf16 %v2409_v31, %v2409_v31  ;;  %v8752_v5 = vld [vmem:[#allocation2 + $0x54] sm:$0xf0]  ;;  %4819 = vmatpush.bf16.msrb.mxu1 %v8739_v25  ;;  %v8776_v57 = vld [vmem:[%s10844_s3 + $0x160] sm:$0xff] }
 0x14d   : > { %2457 = vst [vmem:[#allocation2 + $0x60] sm:$0x7] %v2456_v27  ;;  %v2778_v17 = vpop.f32.mrf.mxu0  ;;  %v8071_v56 = vor.u32 %v8752_v5, %v8070_v54  ;;  %v8777_v54 = vld [vmem:[%s10844_s3 + $0x168] sm:$0xff]  ;;  %v2584_v27 = vadd.f32 %v10385_v9, %v10452_v63  ;;  %v8775_v63 = vld [vmem:[%s10844_s3 + $0x158] sm:$0xff] }
 0x14e   : > { %v2436_v4 = vshrl.u32 %v2413_v55, 16  ;;  %v2439_v40 = vshll.u32 %v2413_v55, 16  ;;  %v2788_v18 = vadd.f32 %v2778_v17, %v2685_v2 }
 0x14f   : > { %v2882_v52 = vpop.f32.mrf.mxu1  ;;  %5551 = vmatpush.bf16.msra.mxu3 %v8799_v12 }
 0x150   : > { %v2438_v53 = vrot.slane %v2436_v4, 7  ;;  %5087 = vmatmul.bf16.vlgmr.msrb.gmra.mxu3 %v8071_v56  ;;  %v2986_v16 = vpop.f32.mrf.mxu2  ;;  %4820 = vmatpush.bf16.msrb.mxu1 %v8738_v10  ;;  %v2892_v29 = vadd.f32 %v2882_v52, %v2788_v18  ;;  %v2687_v52 = vadd.f32 %v10454_v34, %v2584_v27 }
 0x151   : > { %v3090_v3 = vpop.f32.mrf.mxu3 }
 0x152   : > { %v2441_v13 = vor.u32 %v2439_v40, %v2438_v53  ;;  %v2996_v44 = vadd.f32 %v2986_v16, %v2892_v29 }
 0x153   : > { %5552 = vmatpush.bf16.msra.mxu3 %v8798_v8  ;;  %v2585_v8 = vadd.f32 %v10385_v9, %v10465_v43 }
 0x154   : > { %v2459_v41 = vsel %vm10420_vm11, %v2441_v13, %v2458_v59  ;;  %v8074_v42 = vld [vmem:[#allocation2 + $0x60] sm:$0xf]  ;;  %4821 = vmatpush.bf16.msrb.mxu1 %v8737_v50  ;;  %v3100_v55 = vadd.f32 %v3090_v3, %v2996_v44 }
 0x155   : > { %2460 = vst [vmem:[#allocation2 + $0x68] sm:$0x7] %v2459_v41  ;;  %v2780_v45 = vpop.f32.mrf.mxu0 }
 0x156   : > { %v2789_v11 = vadd.f32 %v2780_v45, %v2686_v24  ;;  %v2688_v45 = vadd.f32 %v10467_v15, %v2585_v8  ;;  %v5208_v24 = vld [vmem:[#allocation2 + $0x58] sm:$0xf] }
 0x157   : > { %v2884_v21 = vpop.f32.mrf.mxu1  ;;  %5553 = vmatpush.bf16.msra.mxu3 %v8797_v49  ;;  %v8774_v49 = vld [vmem:[%s10844_s3 + $0x150] sm:$0xff] }
 0x158   : > { %v2988_v32 = vpop.f32.mrf.mxu2  ;;  %4822 = vmatpush.bf16.msrb.mxu1 %v8736_v36  ;;  %v2893_v12 = vadd.f32 %v2884_v21, %v2789_v11  ;;  %v8772_v36 = vld [vmem:[%s10844_s3 + $0x140] sm:$0xff] }
 0x159   : > { %v3092_v33 = vpop.f32.mrf.mxu3 }
 0x15a   : > { %v2997_v56 = vadd.f32 %v2988_v32, %v2893_v12 }
 0x15b   : > { %5554 = vmatpush.bf16.msra.mxu3 %v8796_v0 }
 0x15c   : > { %v8753_v23 = vld [vmem:[#allocation2 + $0x64] sm:$0xf0]  ;;  %5343 = vmatpush.bf16.msra.mxu1 %v8779_v46  ;;  %v3101_v59 = vadd.f32 %v3092_v33, %v2997_v56 }
 0x15d   : > { %v2783_v51 = vpop.f32.mrf.mxu0  ;;  %v8075_v28 = vor.u32 %v8753_v23, %v8074_v42  ;;  %v8773_v33 = vld [vmem:[%s10844_s3 + $0x148] sm:$0xff] }
 0x15e   : > { %v2790_v4 = vadd.f32 %v2783_v51, %v2687_v52 }
 0x15f   : > { %v2887_v22 = vpop.f32.mrf.mxu1  ;;  %5555 = vmatpush.bf16.msra.mxu3 %v8795_v39 }
 0x160   : > { %5092 = vmatmul.bf16.gmra.mxu3 %v8075_v28  ;;  %v2991_v58 = vpop.f32.mrf.mxu2  ;;  %5344 = vmatpush.bf16.msra.mxu1 %v8778_v37  ;;  %v2894_v34 = vadd.f32 %v2887_v22, %v2790_v4  ;;  %v7966_v28 = vld [vmem:[#allocation2 + $0x28] sm:$0xf] }
 0x161   : > { %v3095_v26 = vpop.f32.mrf.mxu3 }
 0x162   : > { %v2998_v21 = vadd.f32 %v2991_v58, %v2894_v34 }
 0x163   : > { %5556 = vmatpush.bf16.msra.mxu3 %v8794_v1 }
 0x164   : > { %5345 = vmatpush.bf16.msra.mxu1 %v8777_v54  ;;  %v3102_v23 = vadd.f32 %v3095_v26, %v2998_v21  ;;  %v5206_v54 = vld [vmem:[#allocation2 + $0x50] sm:$0xf] }
 0x165   : > { %v2785_v30 = vpop.f32.mrf.mxu0  ;;  %v5215_v56 = vshrl.u32 %v5206_v54, 16  ;;  %v5218_v4 = vshll.u32 %v5206_v54, 16 }
 0x166   : > { %v2791_v43 = vadd.f32 %v2785_v30, %v2688_v45 }
 0x167   : > { %v2889_v20 = vpop.f32.mrf.mxu1  ;;  %5557 = vmatpush.bf16.msra.mxu3 %v8793_v38  ;;  %v5220_v34 = vrot.slane %v5218_v4, 5 }
 0x168   : > { %v2993_v48 = vpop.f32.mrf.mxu2  ;;  %5346 = vmatpush.bf16.msra.mxu1 %v8776_v57  ;;  %v2895_v15 = vadd.f32 %v2889_v20, %v2791_v43 }
 0x169   : > { %v3097_v31 = vpop.f32.mrf.mxu3 }
 0x16a   : > { %v2999_v1 = vadd.f32 %v2993_v48, %v2895_v15 }
 0x16b   : > { %5558 = vmatpush.bf16.msra.mxu3 %v8792_v62 }
 0x16c   : > { %5347 = vmatpush.bf16.msra.mxu1 %v8775_v63  ;;  %v3103_v47 = vadd.f32 %v3097_v31, %v2999_v1  ;;  %v5212_v1 = vld [vmem:[#allocation2 + $0x68] sm:$0xf] }
 0x16d   : > { %v3194_v5 = vpop.f32.mrf.mxu0 }
 0x16e   : > { %v3204_v17 = vadd.f32 %v3194_v5, %v3100_v55  ;;  %v5229_v5 = vshrl.u32 %v5208_v24, 16 }
 0x16f   : > { %v3298_v6 = vpop.f32.mrf.mxu1 }
 0x170   : > { %v3308_v53 = vadd.f32 %v3298_v6, %v3204_v17  ;;  %v3402_v40 = vpop.f32.mrf.mxu2  ;;  %5348 = vmatpush.bf16.msra.mxu1 %v8774_v49  ;;  %v5232_v6 = vshll.u32 %v5208_v24, 16  ;;  %v5231_v63 = vrot.slane %v5229_v5, 4  ;;  %v5207_v49 = vld [vmem:[#allocation2 + $0x54] sm:$0x1] }
 0x171   : > { %v10534_v19 = vpop.f32.mrf.mxu3  ;;  %v8750_v5 = vld [vmem:[%s10844_s3 + $0xb0] sm:$0xff] }
 0x172   : > { %v3412_v13 = vadd.f32 %v3402_v40, %v3308_v53  ;;  %v8733_v53 = vld [vmem:[%s10844_s3 + $0x38] sm:$0xff]  ;;  %v5234_v8 = vrot.slane %v5232_v6, 5 }
 0x173   : > { %4711 = vmatpush.bf16.msrb.mxu0 %v8733_v53 }
 0x174   : > { %7388 = vst [vmem:[%s9829_s7 + $0x40] sm:$0xff] %v3412_v13  ;;  %v3421_v3 = vmax.f32 %v3412_v13, 0.0  ;;  %5349 = vmatpush.bf16.msra.mxu1 %v8773_v33  ;;  %v8732_v13 = vld [vmem:[%s10844_s3 + $0x30] sm:$0xff]  ;;  %v5235_v21 = vor.u32 %v5234_v8, %v5231_v63  ;;  %v5211_v63 = vld [vmem:[#allocation2 + $0x64] sm:$0x1] }
 0x175   : > { %v3196_v41 = vpop.f32.mrf.mxu0 }
 0x176   : > { %v3205_v25 = vadd.f32 %v3196_v41, %v3101_v59  ;;  %v3425_v10 = vpack.c.bf16 %v3421_v3, %v3421_v3  ;;  %v5209_v59 = vld [vmem:[#allocation2 + $0x5c] sm:$0x1] }
 0x177   : > { %v3300_v16 = vpop.f32.mrf.mxu1  ;;  %4712 = vmatpush.bf16.msrb.mxu0 %v8732_v13  ;;  %v8749_v13 = vld [vmem:[%s10844_s3 + $0xa8] sm:$0xff] }
 0x178   : > { %3429 = vst [vmem:[#allocation2 + $0x30] sm:$0x3] %v3425_v10  ;;  %v3309_v0 = vadd.f32 %v3300_v16, %v3205_v25  ;;  %v3404_v42 = vpop.f32.mrf.mxu2  ;;  %5350 = vmatpush.bf16.msra.mxu1 %v8772_v36  ;;  %v5217_v16 = vrot.slane %v5215_v56, 4  ;;  %v5238_v10 = vshll.u32 %v5209_v59, 16 }
 0x179   : > { %v10546_v32 = vpop.f32.mrf.mxu3 }
 0x17a   : > { %v3413_v50 = vadd.f32 %v3404_v42, %v3309_v0  ;;  %v5240_v36 = vrot.slane %v5238_v10, 5 }
 0x17c   : > { %7389 = vst [vmem:[%s9829_s7 + $0x48] sm:$0xff] %v3413_v50  ;;  %v3422_v51 = vmax.f32 %v3413_v50, 0.0  ;;  %v5224_v50 = vshll.u32 %v5207_v49, 16 }
 0x17d   : > { %v3199_v39 = vpop.f32.mrf.mxu0 }
 0x17e   : > { %v3206_v22 = vadd.f32 %v3199_v39, %v3102_v23  ;;  %v3426_v2 = vpack.c.bf16 %v3422_v51, %v3422_v51  ;;  %v5221_v23 = vor.u32 %v5220_v34, %v5217_v16  ;;  %v3438_v39 = vld [vmem:[#allocation2 + $0x8] sm:$0x1]  ;;  %v3441_v34 = vld [vmem:[#allocation2 + $0x10] sm:$0x1] }
 0x17f   : > { %v3303_v61 = vpop.f32.mrf.mxu1  ;;  %v8734_v18 = vld [vmem:[#allocation2 + $0x2c] sm:$0xf0]  ;;  %v3439_v15 = vsel %vm10026_vm6, 0, %v3438_v39 }
 0x180   : > { %3430 = vst [vmem:[#allocation2 + $0x38] sm:$0x3] %v3426_v2  ;;  %v3310_v58 = vadd.f32 %v3303_v61, %v3206_v22  ;;  %v7967_v26 = vor.u32 %v8734_v18, %v7966_v28  ;;  %v3407_v46 = vpop.f32.mrf.mxu2  ;;  %v8286_v11 = vld [vmem:[#allocation2 + $0x30] sm:$0xf]  ;;  %v3450_v61 = vld [vmem:[#allocation2 + $0x8] sm:$0xc] }
 0x181   : > { %v10555_v38 = vpop.f32.mrf.mxu3  ;;  %v3451_v51 = vsel %vm10037_vm8, 0, %v3450_v61  ;;  %v8731_v22 = vld [vmem:[%s10844_s3 + $0x28] sm:$0xff]  ;;  %v5236_v28 = vrot.slane %v5235_v21, 4  ;;  %3440 = vst [vmem:[#allocation2 + $0x8] sm:$0x1] %v3439_v15  ;;  %v5222_v2 = vrot.slane %v5221_v23, 4 }
 0x182   : > { %v3414_v30 = vadd.f32 %v3407_v46, %v3310_v58  ;;  %4823 = vmatmul.bf16.vlgmr.msrb.gmra.mxu1 %v7967_v26  ;;  %3452 = vst [vmem:[#allocation2 + $0x8] sm:$0xc] %v3451_v51  ;;  %4713 = vmatpush.bf16.msrb.mxu0 %v8731_v22  ;;  %v5226_v18 = vrot.slane %v5224_v50, 5  ;;  %v5210_v58 = vld [vmem:[#allocation2 + $0x60] sm:$0xf]  ;;  %v8751_v26 = vld [vmem:[%s10844_s3 + $0xb8] sm:$0xff] }
 0x183   : > { %4975 = vmatpush.bf16.msrb.mxu2 %v8751_v26  ;;  %v5252_v61 = vshll.u32 %v5211_v63, 16  ;;  %v8748_v15 = vld [vmem:[%s10844_s3 + $0xa0] sm:$0xff]  ;;  %v8727_v51 = vld [vmem:[%s10844_s3 + $0x8] sm:$0xff]  ;;  %v3574_v26 = vadd.f32 %v10385_v9, %v10546_v32 }
 0x184   : > { %7390 = vst [vmem:[%s9829_s7 + $0x50] sm:$0xff] %v3414_v30  ;;  %v3423_v37 = vmax.f32 %v3414_v30, 0.0  ;;  %v8730_v30 = vld [vmem:[%s10844_s3 + $0x20] sm:$0xff]  ;;  %v5227_v54 = vsel %vm9212_vm2, %v5222_v2, %v5226_v18  ;;  %v3453_v2 = vld [vmem:[#allocation2 + $0xc] sm:$0x1] }
 0x185   : > { %v3201_v20 = vpop.f32.mrf.mxu0  ;;  %v5287_v53 = vunpack.c.l.b16 %v5227_v54 }
 0x186   : > { %v3207_v62 = vadd.f32 %v3201_v20, %v3103_v47  ;;  %v3427_v44 = vpack.c.bf16 %v3423_v37, %v3423_v37  ;;  %v5257_v37 = vshrl.u32 %v5212_v1, 16  ;;  %4714 = vmatpush.bf16.msrb.mxu0 %v8730_v30  ;;  %v5254_v30 = vrot.slane %v5252_v61, 5 }
 0x187   : > { %v3305_v29 = vpop.f32.mrf.mxu1  ;;  %v8790_v48 = vld [vmem:[#allocation2 + $0x34] sm:$0xf0]  ;;  %4976 = vmatpush.bf16.msrb.mxu2 %v8750_v5 }
 0x188   : > { %3431 = vst [vmem:[#allocation2 + $0x40] sm:$0x3] %v3427_v44  ;;  %v3311_v27 = vadd.f32 %v3305_v29, %v3207_v62  ;;  %v8287_v55 = vor.u32 %v8790_v48, %v8286_v11  ;;  %v3409_v12 = vpop.f32.mrf.mxu2  ;;  %v7970_v3 = vld [vmem:[#allocation2 + $0x38] sm:$0xf]  ;;  %v5241_v29 = vsel %vm9212_vm2, %v5236_v28, %v5240_v36  ;;  %v5260_v62 = vshll.u32 %v5212_v1, 16 }
 0x189   : > { %v10558_v31 = vpop.f32.mrf.mxu3  ;;  %v5288_v6 = vunpack.c.l.b16 %v5241_v29  ;;  %v5259_v56 = vrot.slane %v5257_v37, 4  ;;  %v3434_v1 = vld [vmem:[#allocation2 + $0x4] sm:$0x1]  ;;  %v3462_v29 = vld [vmem:[#allocation2 + $0x18] sm:$0xc] }
 0x18a   : > { %v3415_v17 = vadd.f32 %v3409_v12, %v3311_v27  ;;  %5559 = vmatmul.bf16.vlgmr.msra.gmra.mxu3 %v8287_v55  ;;  %v5243_v27 = vshrl.u32 %v5210_v58, 16  ;;  %v5246_v55 = vshll.u32 %v5210_v58, 16  ;;  %v8729_v12 = vld [vmem:[%s10844_s3 + $0x18] sm:$0xff]  ;;  %v5262_v4 = vrot.slane %v5260_v62, 5  ;;  %v8726_v37 = vld [vmem:[%s10844_s3] sm:$0xff] }
 0x18b   : > { %4715 = vmatpush.bf16.msrb.mxu0 %v8729_v12  ;;  %4977 = vmatpush.bf16.msrb.mxu2 %v8749_v13  ;;  %v3435_v18 = vsel %vm10026_vm6, 0, %v3434_v1  ;;  %v3454_v58 = vsel %vm10026_vm6, 0, %v3453_v2  ;;  %v3463_v54 = vsel %vm10037_vm8, 0, %v3462_v29  ;;  %v3465_v1 = vld [vmem:[#allocation2 + $0x1c] sm:$0x1]  ;;  %v3576_v2 = vadd.f32 %v10385_v9, %v10558_v31  ;;  %v8788_v29 = vld [vmem:[%s10844_s3 + $0x1b0] sm:$0xff] }
 0x18c   : > { %7391 = vst [vmem:[%s9829_s7 + $0x58] sm:$0xff] %v3415_v17  ;;  %v3424_v40 = vmax.f32 %v3415_v17, 0.0  ;;  %v5213_v17 = vld [vmem:[#allocation2 + $0x6c] sm:$0x1]  ;;  %v5245_v8 = vrot.slane %v5243_v27, 4  ;;  %v5248_v59 = vrot.slane %v5246_v55, 5 }
 0x18d   : > { %v10560_v57 = vpop.f32.mrf.mxu0  ;;  %v5266_v16 = vshll.u32 %v5213_v17, 16  ;;  %3436 = vst [vmem:[#allocation2 + $0x4] sm:$0x1] %v3435_v18  ;;  %v8746_v17 = vld [vmem:[%s10844_s3 + $0x90] sm:$0xff]  ;;  %v3466_v18 = vsel %vm10026_vm6, 0, %v3465_v1 }
 0x18e   : > { %v3428_v41 = vpack.c.bf16 %v3424_v40, %v3424_v40  ;;  %v3573_v40 = vadd.f32 %v10385_v9, %v10534_v19  ;;  %v3442_v19 = vsel %vm10026_vm6, 0, %v3441_v34  ;;  %3455 = vst [vmem:[#allocation2 + $0xc] sm:$0x1] %v3454_v58  ;;  %v3447_v34 = vld [vmem:[#allocation2 + $0x20] sm:$0x1] }
 0x18f   : > { %v10562_v52 = vpop.f32.mrf.mxu1  ;;  %v8735_v25 = vld [vmem:[#allocation2 + $0x3c] sm:$0xf0]  ;;  %3443 = vst [vmem:[#allocation2 + $0x10] sm:$0x1] %v3442_v19  ;;  %v5268_v36 = vrot.slane %v5266_v16, 5  ;;  %4978 = vmatpush.bf16.msrb.mxu2 %v8748_v15 }
 0x190   : > { %3432 = vst [vmem:[#allocation2 + $0x48] sm:$0x3] %v3428_v41  ;;  %v7971_v45 = vor.u32 %v8735_v25, %v7970_v3  ;;  %v10571_v43 = vpop.f32.mrf.mxu2  ;;  %v8290_v46 = vld [vmem:[#allocation2 + $0x40] sm:$0xf]  ;;  %v5291_v41 = vpack.c.b16 %v5288_v6, %v5287_v53  ;;  %v3456_v3 = vld [vmem:[#allocation2 + $0x10] sm:$0xc]  ;;  %v3676_v49 = vadd.f32 %v10560_v57, %v3573_v40  ;;  %v5249_v57 = vor.u32 %v5248_v59, %v5245_v8 }
 0x191   : > { %v10573_v0 = vpop.f32.mrf.mxu3  ;;  %v8728_v25 = vld [vmem:[%s10844_s3 + $0x10] sm:$0xff]  ;;  %v3457_v21 = vsel %vm10037_vm8, 0, %v3456_v3  ;;  %3464 = vst [vmem:[#allocation2 + $0x18] sm:$0xc] %v3463_v54  ;;  %v3575_v59 = vadd.f32 %v10385_v9, %v10555_v38  ;;  %v3468_v3 = vld [vmem:[#allocation2 + $0x20] sm:$0xc] }
 0x192   : > { %4828 = vmatmul.bf16.gmra.mxu1 %v7971_v45  ;;  %v5263_v45 = vor.u32 %v5262_v4, %v5259_v56  ;;  %4716 = vmatpush.bf16.msrb.mxu0 %v8728_v25  ;;  %3458 = vst [vmem:[#allocation2 + $0x10] sm:$0xc] %v3457_v21  ;;  %v3835_v22 = vadd.f32 %v10562_v52, %v3676_v49  ;;  %v8747_v52 = vld [vmem:[%s10844_s3 + $0x98] sm:$0xff]  ;;  %v8770_v25 = vld [vmem:[%s10844_s3 + $0x130] sm:$0xff]  ;;  %v3448_v49 = vsel %vm10026_vm6, 0, %v3447_v34  ;;  %v8768_v9 = vld [vmem:[%s10844_s3 + $0x120] sm:$0xff] }
 0x193   : > { %4979 = vmatpush.bf16.msrb.mxu2 %v8747_v52  ;;  %v8771_v4 = vld [vmem:[%s10844_s3 + $0x138] sm:$0xff]  ;;  %3449 = vst [vmem:[#allocation2 + $0x20] sm:$0x1] %v3448_v49 }
 0x194   : > { %v5264_v28 = vrot.slane %v5263_v45, 4  ;;  %v3469_v45 = vsel %vm10037_vm8, 0, %v3468_v3  ;;  %3467 = vst [vmem:[#allocation2 + $0x1c] sm:$0x1] %v3466_v18 }
 0x195   : > { %v10575_v42 = vpop.f32.mrf.mxu0  ;;  %3470 = vst [vmem:[#allocation2 + $0x20] sm:$0xc] %v3469_v45  ;;  %v10765_v45 = vld [vmem:[%s10844_s3 + $0x210] sm:$0xff]  ;;  %v4841_v18 = vld [vmem:[#allocation2 + $0xc] sm:$0x1] }
 0x196   : > { %4717 = vmatpush.bf16.msrb.mxu0 %v8727_v51  ;;  %v3677_v62 = vadd.f32 %v10575_v42, %v3574_v26  ;;  %v5269_v32 = vsel %vm9212_vm2, %v5264_v28, %v5268_v36 }
 0x197   : > { %v10577_v33 = vpop.f32.mrf.mxu1  ;;  %v8791_v47 = vld [vmem:[#allocation2 + $0x44] sm:$0xf0]  ;;  %v5290_v56 = vunpack.c.l.b16 %v5269_v32  ;;  %4980 = vmatpush.bf16.msrb.mxu2 %v8746_v17 }
 0x198   : > { %v8291_v20 = vor.u32 %v8791_v47, %v8290_v46  ;;  %v10594_v24 = vpop.f32.mrf.mxu2  ;;  %v3938_v46 = vadd.f32 %v10571_v43, %v3835_v22  ;;  %v5250_v47 = vrot.slane %v5249_v57, 4  ;;  %v3836_v53 = vadd.f32 %v10577_v33, %v3677_v62  ;;  %v10683_v33 = vld [vmem:[%s10844_s3 + $0x238] sm:$0xff]  ;;  %v8769_v22 = vld [vmem:[%s10844_s3 + $0x128] sm:$0xff] }
 0x199   : > { %v10596_v44 = vpop.f32.mrf.mxu3  ;;  %8808 = vmatpush.bf16.msrb.mxu1 %v10683_v33  ;;  %v4619_v1 = vld [vmem:[#allocation2 + $0x10] sm:$0x7] }
 0x19a   : > { %5564 = vmatmul.bf16.gmra.mxu3 %v8291_v20  ;;  %v3444_v20 = vld [vmem:[#allocation2 + $0x18] sm:$0x1]  ;;  %4718 = vmatpush.bf16.msrb.mxu0 %v8726_v37  ;;  %v4042_v5 = vadd.f32 %v10573_v0, %v3938_v46  ;;  %v5255_v12 = vsel %vm9212_vm2, %v5250_v47, %v5254_v30  ;;  %v3459_v0 = vld [vmem:[#allocation2 + $0x14] sm:$0x1]  ;;  %v3939_v13 = vadd.f32 %v10594_v24, %v3836_v53  ;;  %v10720_v46 = vld [vmem:[%s10844_s3 + $0x228] sm:$0xff] }
 0x19b   : > { %v3445_v43 = vsel %vm10026_vm6, 0, %v3444_v20  ;;  %v5289_v63 = vunpack.c.l.b16 %v5255_v12  ;;  %v3460_v8 = vsel %vm10026_vm6, 0, %v3459_v0  ;;  %v4838_v30 = vld [vmem:[#allocation2] sm:$0xf]  ;;  %v4616_v53 = vld [vmem:[#allocation2 + $0x8] sm:$0x7] }
 0x19c   : > { %3446 = vst [vmem:[#allocation2 + $0x18] sm:$0x1] %v3445_v43  ;;  %v4043_v57 = vadd.f32 %v10596_v44, %v3939_v13  ;;  %v10734_v43 = vld [vmem:[%s10844_s3 + $0x220] sm:$0xff]  ;;  %v8766_v0 = vld [vmem:[%s10844_s3 + $0x110] sm:$0xff] }
 0x19d   : > { %v10598_v11 = vpop.f32.mrf.mxu0  ;;  %3461 = vst [vmem:[#allocation2 + $0x14] sm:$0x1] %v3460_v8  ;;  %v5292_v16 = vpack.c.b16 %v5290_v56, %v5289_v63  ;;  %8809 = vmatpush.bf16.msrb.mxu1 %v10701_v14  ;;  %v3471_v63 = vld [vmem:[#allocation2 + $0x24] sm:$0x1] }
 0x19e   : > { %5183 = vmatpush.bf16.msra.mxu0 %v8771_v4  ;;  %v3678_v38 = vadd.f32 %v10598_v11, %v3575_v59  ;;  %v8744_v11 = vld [vmem:[%s10844_s3 + $0x80] sm:$0xff]  ;;  %v8787_v4 = vld [vmem:[%s10844_s3 + $0x1a8] sm:$0xff] }
 0x19f   : > { %v10600_v48 = vpop.f32.mrf.mxu1 }
 0x1a0   : > { %v10623_v10 = vpop.f32.mrf.mxu2  ;;  %v3837_v44 = vadd.f32 %v10600_v48, %v3678_v38  ;;  %v8789_v48 = vld [vmem:[%s10844_s3 + $0x1b8] sm:$0xff] }
 0x1a1   : > { %v10625_v23 = vpop.f32.mrf.mxu3  ;;  %8810 = vmatpush.bf16.msrb.mxu1 %v10720_v46 }
 0x1a2   : > { %5351 = vmatmul.bf16.vlgmr.msra.gmra.mxu1 %v5291_v41  ;;  %v8745_v41 = vld [vmem:[%s10844_s3 + $0x88] sm:$0xff]  ;;  %5184 = vmatpush.bf16.msra.mxu0 %v8770_v25  ;;  %v3940_v58 = vadd.f32 %v10623_v10, %v3837_v44 }
 0x1a3   : > { %4981 = vmatpush.bf16.msrb.mxu2 %v8745_v41  ;;  %v3472_v41 = vsel %vm10026_vm6, 0, %v3471_v63  ;;  %v8783_v63 = vld [vmem:[%s10844_s3 + $0x188] sm:$0xff] }
 0x1a4   : > { %3473 = vst [vmem:[#allocation2 + $0x24] sm:$0x1] %v3472_v41 }
 0x1a5   : > { %v10627_v50 = vpop.f32.mrf.mxu0  ;;  %8811 = vmatpush.bf16.msrb.mxu1 %v10734_v43 }
 0x1a6   : > { %5185 = vmatpush.bf16.msra.mxu0 %v8769_v22  ;;  %v3679_v47 = vadd.f32 %v10627_v50, %v3576_v2  ;;  %v4044_v50 = vadd.f32 %v10625_v23, %v3940_v58  ;;  %v7910_v2 = vld [vmem:[#allocation2] sm:$0xf] }
 0x1a7   : > { %v10629_v39 = vpop.f32.mrf.mxu1  ;;  %4982 = vmatpush.bf16.msrb.mxu2 %v8744_v11 }
 0x1a8   : > { %v10658_v27 = vpop.f32.mrf.mxu2  ;;  %v3838_v54 = vadd.f32 %v10629_v39, %v3679_v47  ;;  %v10747_v39 = vld [vmem:[%s10844_s3 + $0x218] sm:$0xff]  ;;  %v8764_v47 = vld [vmem:[%s10844_s3 + $0x100] sm:$0xff] }
 0x1a9   : > { %v10660_v55 = vpop.f32.mrf.mxu3  ;;  %8812 = vmatpush.bf16.msrb.mxu1 %v10747_v39 }
 0x1aa   : > { %5186 = vmatpush.bf16.msra.mxu0 %v8768_v9  ;;  %v3941_v8 = vadd.f32 %v10658_v27, %v3838_v54 }
 0x1ab   : > { %5447 = vmatpush.bf16.msra.mxu2 %v8789_v48  ;;  %v10779_v48 = vld [vmem:[%s10844_s3 + $0x208] sm:$0xff] }
 0x1ad   : > { %v4191_v42 = vpop.f32.mrf.mxu0  ;;  %8813 = vmatpush.bf16.msrb.mxu1 %v10765_v45 }
 0x1ae   : > { %v4201_v40 = vadd.f32 %v4191_v42, %v4042_v5  ;;  %v4847_v5 = vshrl.u32 %v4838_v30, 16  ;;  %v4850_v42 = vshll.u32 %v4838_v30, 16 }
 0x1af   : > { %v4294_v6 = vpop.f32.mrf.mxu1  ;;  %5448 = vmatpush.bf16.msra.mxu2 %v8788_v29 }
 0x1b0   : > { %v4304_v24 = vadd.f32 %v4294_v6, %v4201_v40  ;;  %v4398_v19 = vpop.f32.mrf.mxu2  ;;  %v8767_v6 = vld [vmem:[%s10844_s3 + $0x118] sm:$0xff]  ;;  %v4852_v34 = vrot.slane %v4850_v42, 5  ;;  %v8784_v42 = vld [vmem:[%s10844_s3 + $0x190] sm:$0xff] }
 0x1b1   : > { %5187 = vmatpush.bf16.msra.mxu0 %v8767_v6  ;;  %8814 = vmatpush.bf16.msrb.mxu1 %v10779_v48 }
 0x1b2   : > { %v4408_v61 = vadd.f32 %v4398_v19, %v4304_v24  ;;  %5356 = vmatmul.bf16.gmra.mxu1 %v5292_v16  ;;  %v4849_v16 = vrot.slane %v4847_v5, 4  ;;  %v4839_v24 = vld [vmem:[#allocation2 + $0x4] sm:$0x1]  ;;  %v8765_v19 = vld [vmem:[%s10844_s3 + $0x108] sm:$0xff]  ;;  %v4870_v5 = vshll.u32 %v4841_v18, 16 }
 0x1b3   : > { %v4557_v21 = vpop.f32.mrf.mxu3  ;;  %5449 = vmatpush.bf16.msra.mxu2 %v8787_v4  ;;  %v10793_v4 = vld [vmem:[%s10844_s3 + $0x200] sm:$0xff] }
 0x1b4   : > { %v4567_v28 = vadd.f32 %v4557_v21, %v4408_v61  ;;  %v4045_v21 = vadd.f32 %v10660_v55, %v3941_v8  ;;  %v4853_v11 = vor.u32 %v4852_v34, %v4849_v16  ;;  %v4622_v8 = vld [vmem:[#allocation2 + $0x18] sm:$0x7]  ;;  %v4872_v41 = vrot.slane %v4870_v5, 5 }
 0x1b5   : > { %v4193_v15 = vpop.f32.mrf.mxu0  ;;  %5188 = vmatpush.bf16.msra.mxu0 %v8766_v0  ;;  %8815 = vmatpush.bf16.msrb.mxu1 %v10793_v4 }
 0x1b6   : > { %v4202_v36 = vadd.f32 %v4193_v15, %v4043_v57  ;;  %7904 = vst [vmem:[%s9829_s7 + $0x60] sm:$0xff] %v4567_v28  ;;  %v4576_v26 = vmax.f32 %v4567_v28, 0.0 }
 0x1b7   : > { %v4296_v51 = vpop.f32.mrf.mxu1  ;;  %5450 = vmatpush.bf16.msra.mxu2 %v8786_v7 }
 0x1b8   : > { %v4580_v31 = vpack.c.bf16 %v4576_v26, %v4576_v26  ;;  %v4305_v10 = vadd.f32 %v4296_v51, %v4202_v36  ;;  %v4400_v52 = vpop.f32.mrf.mxu2  ;;  %v4856_v51 = vshll.u32 %v4839_v24, 16  ;;  %v8785_v26 = vld [vmem:[%s10844_s3 + $0x198] sm:$0xff] }
 0x1b9   : > { %5189 = vmatpush.bf16.msra.mxu0 %v8765_v19 }
 0x1ba   : > { %v4585_v37 = vshrl.u32 %v4580_v31, 16  ;;  %v4409_v62 = vadd.f32 %v4400_v52, %v4305_v10  ;;  %v4588_v17 = vshll.u32 %v4580_v31, 16  ;;  %v4858_v31 = vrot.slane %v4856_v51, 5 }
 0x1bb   : > { %v4559_v20 = vpop.f32.mrf.mxu3  ;;  %5451 = vmatpush.bf16.msra.mxu2 %v8785_v26 }
 0x1bc   : > { %v4587_v12 = vrot.slane %v4585_v37, 7  ;;  %v4568_v23 = vadd.f32 %v4559_v20, %v4409_v62 }
 0x1bd   : > { %v4196_v32 = vpop.f32.mrf.mxu0  ;;  %5190 = vmatpush.bf16.msra.mxu0 %v8764_v47 }
 0x1be   : > { %v4203_v56 = vadd.f32 %v4196_v32, %v4044_v50  ;;  %v4590_v59 = vor.u32 %v4588_v17, %v4587_v12  ;;  %7905 = vst [vmem:[%s9829_s7 + $0x68] sm:$0xff] %v4568_v23  ;;  %v4577_v13 = vmax.f32 %v4568_v23, 0.0  ;;  %v4854_v50 = vrot.slane %v4853_v11, 4 }
 0x1bf   : > { %v4299_v40 = vpop.f32.mrf.mxu1  ;;  %5452 = vmatpush.bf16.msra.mxu2 %v8784_v42 }
 0x1c0   : > { %v4617_v3 = vsel %vm10420_vm11, %v4590_v59, %v4616_v53  ;;  %v4581_v25 = vpack.c.bf16 %v4577_v13, %v4577_v13  ;;  %v4306_v38 = vadd.f32 %v4299_v40, %v4203_v56  ;;  %v4403_v27 = vpop.f32.mrf.mxu2  ;;  %v4859_v59 = vsel %vm9212_vm2, %v4854_v50, %v4858_v31 }
 0x1c1   : > { %4618 = vst [vmem:[#allocation2 + $0x8] sm:$0x7] %v4617_v3 }
 0x1c2   : > { %v4592_v57 = vshrl.u32 %v4581_v25, 16  ;;  %v4410_v61 = vadd.f32 %v4403_v27, %v4306_v38  ;;  %v4595_v44 = vshll.u32 %v4581_v25, 16  ;;  %v4919_v38 = vunpack.c.l.b16 %v4859_v59  ;;  %v8782_v27 = vld [vmem:[%s10844_s3 + $0x180] sm:$0xff] }
 0x1c3   : > { %v4562_v49 = vpop.f32.mrf.mxu3  ;;  %5453 = vmatpush.bf16.msra.mxu2 %v8783_v63 }
 0x1c4   : > { %v4594_v22 = vrot.slane %v4592_v57, 7  ;;  %v4569_v28 = vadd.f32 %v4562_v49, %v4410_v61 }
 0x1c5   : > { %v4198_v15 = vpop.f32.mrf.mxu0 }
 0x1c6   : > { %v4204_v36 = vadd.f32 %v4198_v15, %v4045_v21  ;;  %v4597_v58 = vor.u32 %v4595_v44, %v4594_v22  ;;  %7906 = vst [vmem:[%s9829_s7 + $0x70] sm:$0xff] %v4569_v28  ;;  %v4578_v55 = vmax.f32 %v4569_v28, 0.0  ;;  %v4843_v44 = vld [vmem:[#allocation2 + $0x14] sm:$0x1] }
 0x1c7   : > { %v4301_v9 = vpop.f32.mrf.mxu1  ;;  %5454 = vmatpush.bf16.msra.mxu2 %v8782_v27  ;;  %v4884_v18 = vshll.u32 %v4843_v44, 16 }
 0x1c8   : > { %v4620_v10 = vsel %vm10420_vm11, %v4597_v58, %v4619_v1  ;;  %v4582_v30 = vpack.c.bf16 %v4578_v55, %v4578_v55  ;;  %v4307_v52 = vadd.f32 %v4301_v9, %v4204_v36  ;;  %v8724_v20 = vld [vmem:[#allocation2 + $0x4] sm:$0xf0]  ;;  %v4405_v37 = vpop.f32.mrf.mxu2  ;;  %v4845_v36 = vld [vmem:[#allocation2 + $0x1c] sm:$0x1] }
 0x1c9   : > { %v4840_v29 = vld [vmem:[#allocation2 + $0x8] sm:$0xf]  ;;  %4621 = vst [vmem:[#allocation2 + $0x10] sm:$0x7] %v4620_v10  ;;  %v7911_v62 = vor.u32 %v8724_v20, %v7910_v2 }
 0x1ca   : > { %v4861_v32 = vshrl.u32 %v4840_v29, 16  ;;  %v4864_v54 = vshll.u32 %v4840_v29, 16  ;;  %v4599_v6 = vshrl.u32 %v4582_v30, 16  ;;  %v4411_v12 = vadd.f32 %v4405_v37, %v4307_v52 }
 0x1cb   : > { %v4564_v17 = vpop.f32.mrf.mxu3  ;;  %4719 = vmatmul.bf16.vlgmr.msrb.gmra.mxu0 %v7911_v62  ;;  %v4602_v40 = vshll.u32 %v4582_v30, 16  ;;  %v4886_v29 = vrot.slane %v4884_v18, 5  ;;  %v5579_v62 = vld [vmem:[#allocation2 + $0x1c] sm:$0x1] }
 0x1cc   : > { %v4863_v23 = vrot.slane %v4861_v32, 4  ;;  %v4866_v56 = vrot.slane %v4864_v54, 5  ;;  %v4601_v53 = vrot.slane %v4599_v6, 7  ;;  %v4570_v0 = vadd.f32 %v4564_v17, %v4411_v12  ;;  %5711 = vmatpush.bf16.msrb.mxu0 %v10683_v33 }
 0x1cd   : > { %v5620_v17 = vshll.u32 %v5579_v62, 16 }
 0x1ce   : > { %v4867_v13 = vor.u32 %v4866_v56, %v4863_v23  ;;  %v4604_v16 = vor.u32 %v4602_v40, %v4601_v53  ;;  %7907 = vst [vmem:[%s9829_s7 + $0x78] sm:$0xff] %v4570_v0  ;;  %v4579_v34 = vmax.f32 %v4570_v0, 0.0 }
 0x1cf   : > { %v5622_v59 = vrot.slane %v5620_v17, 5 }
 0x1d0   : > { %v4868_v3 = vrot.slane %v4867_v13, 4  ;;  %v4623_v25 = vsel %vm10420_vm11, %v4604_v16, %v4622_v8  ;;  %v4583_v33 = vpack.c.bf16 %v4579_v34, %v4579_v34  ;;  %v4842_v24 = vld [vmem:[#allocation2 + $0x10] sm:$0xf]  ;;  %5712 = vmatpush.bf16.msrb.mxu0 %v10701_v14  ;;  %v4625_v14 = vld [vmem:[#allocation2 + $0x20] sm:$0x7] }
 0x1d1   : > { %4624 = vst [vmem:[#allocation2 + $0x18] sm:$0x7] %v4623_v25  ;;  %v4875_v7 = vshrl.u32 %v4842_v24, 16  ;;  %v4878_v19 = vshll.u32 %v4842_v24, 16  ;;  %v7914_v1 = vld [vmem:[#allocation2 + $0x10] sm:$0xf] }
 0x1d2   : > { %v4873_v49 = vsel %vm9212_vm2, %v4868_v3, %v4872_v41  ;;  %v4606_v21 = vshrl.u32 %v4583_v33, 16  ;;  %v4609_v51 = vshll.u32 %v4583_v33, 16  ;;  %v8762_v25 = vld [vmem:[#allocation2 + $0x7c] sm:$0xf0] }
 0x1d3   : > { %v4920_v57 = vunpack.c.l.b16 %v4873_v49  ;;  %v4877_v61 = vrot.slane %v4875_v7, 4  ;;  %v4880_v15 = vrot.slane %v4878_v19, 5 }
 0x1d4   : > { %v4608_v11 = vrot.slane %v4606_v21, 7  ;;  %5713 = vmatpush.bf16.msrb.mxu0 %v10720_v46  ;;  %v4898_v46 = vshll.u32 %v4845_v36, 16  ;;  %v8780_v21 = vld [vmem:[#allocation2 + $0xc] sm:$0xf0]  ;;  %v5577_v36 = vld [vmem:[#allocation2 + $0x14] sm:$0x1] }
 0x1d5   : > { %v4923_v22 = vpack.c.b16 %v4920_v57, %v4919_v38  ;;  %v4881_v2 = vor.u32 %v4880_v15, %v4877_v61  ;;  %v8126_v38 = vld [vmem:[#allocation2 + $0x78] sm:$0xf]  ;;  %v5574_v57 = vld [vmem:[#allocation2 + $0x8] sm:$0xf] }
 0x1d6   : > { %v4611_v28 = vor.u32 %v4609_v51, %v4608_v11  ;;  %v4900_v5 = vrot.slane %v4898_v46, 5  ;;  %v8127_v24 = vor.u32 %v8762_v25, %v8126_v38  ;;  %v8230_v11 = vld [vmem:[#allocation2 + $0x8] sm:$0xf]  ;;  %v5586_v44 = vshll.u32 %v5574_v57, 16 }
 0x1d7   : > { %4983 = vmatmul.bf16.vlgmr.msrb.gmra.mxu2 %v4923_v22  ;;  %v4882_v20 = vrot.slane %v4881_v2, 4  ;;  %v8231_v51 = vor.u32 %v8780_v21, %v8230_v11  ;;  %v5583_v22 = vshrl.u32 %v5574_v57, 16 }
 0x1d8   : > { %v4626_v58 = vsel %vm10420_vm11, %v4611_v28, %v4625_v14  ;;  %v8725_v55 = vld [vmem:[#allocation2 + $0x14] sm:$0xf0]  ;;  %5714 = vmatpush.bf16.msrb.mxu0 %v10734_v43  ;;  %v5581_v43 = vld [vmem:[#allocation2 + $0x24] sm:$0x1]  ;;  %v5588_v18 = vrot.slane %v5586_v44, 5 }
 0x1d9   : > { %v4844_v26 = vld [vmem:[#allocation2 + $0x18] sm:$0xf]  ;;  %4627 = vst [vmem:[#allocation2 + $0x20] sm:$0x7] %v4626_v58  ;;  %v7915_v9 = vor.u32 %v8725_v55, %v7914_v1  ;;  %v4887_v42 = vsel %vm9212_vm2, %v4882_v20, %v4886_v29  ;;  %v5634_v0 = vshll.u32 %v5581_v43, 16  ;;  %v5585_v2 = vrot.slane %v5583_v22, 4 }
 0x1da   : > { %v5578_v47 = vld [vmem:[#allocation2 + $0x18] sm:$0xf]  ;;  %v4889_v31 = vshrl.u32 %v4844_v26, 16  ;;  %v4892_v10 = vshll.u32 %v4844_v26, 16  ;;  %v4921_v63 = vunpack.c.l.b16 %v4887_v42  ;;  %v8130_v1 = vld [vmem:[#allocation2 + $0x88] sm:$0xf] }
 0x1db   : > { %v5611_v30 = vshrl.u32 %v5578_v47, 16  ;;  %v5614_v52 = vshll.u32 %v5578_v47, 16  ;;  %4724 = vmatmul.bf16.gmra.mxu0 %v7915_v9  ;;  %v5636_v3 = vrot.slane %v5634_v0, 5  ;;  %v5575_v55 = vld [vmem:[#allocation2 + $0xc] sm:$0x1]  ;;  %v5606_v47 = vshll.u32 %v5577_v36, 16 }
 0x1dc   : > { %v4891_v50 = vrot.slane %v4889_v31, 4  ;;  %v4894_v37 = vrot.slane %v4892_v10, 5  ;;  %5715 = vmatpush.bf16.msrb.mxu0 %v10747_v39  ;;  %v5589_v9 = vor.u32 %v5588_v18, %v5585_v2  ;;  %v5592_v31 = vshll.u32 %v5575_v55, 16 }
 0x1dd   : > { %v5613_v60 = vrot.slane %v5611_v30, 4  ;;  %v5616_v32 = vrot.slane %v5614_v52, 5  ;;  %v5608_v46 = vrot.slane %v5606_v47, 5 }
 0x1de   : > { %v4895_v54 = vor.u32 %v4894_v37, %v4891_v50  ;;  %v5590_v30 = vrot.slane %v5589_v9, 4  ;;  %v5594_v52 = vrot.slane %v5592_v31, 5  ;;  %v8234_v50 = vld [vmem:[#allocation2 + $0x18] sm:$0xf] }
 0x1df   : > { %v5617_v12 = vor.u32 %v5616_v32, %v5613_v60 }
 0x1e0   : > { %v4896_v6 = vrot.slane %v4895_v54, 4  ;;  %v5580_v23 = vld [vmem:[#allocation2 + $0x20] sm:$0xf]  ;;  %5716 = vmatpush.bf16.msrb.mxu0 %v10765_v45  ;;  %v5595_v62 = vsel %vm9212_vm2, %v5590_v30, %v5594_v52 }
 0x1e1   : > { %v5625_v53 = vshrl.u32 %v5580_v23, 16  ;;  %v5628_v40 = vshll.u32 %v5580_v23, 16  ;;  %v5618_v8 = vrot.slane %v5617_v12, 4  ;;  %v8781_v20 = vld [vmem:[#allocation2 + $0x1c] sm:$0xf0]  ;;  %v5655_v32 = vunpack.c.l.b16 %v5595_v62 }
 0x1e2   : > { %v4901_v56 = vsel %vm9212_vm2, %v4896_v6, %v4900_v5  ;;  %v8235_v37 = vor.u32 %v8781_v20, %v8234_v50  ;;  %v5088_v6 = vpop.f32.mrf.mxu3 }
 0x1e3   : > { %v4922_v39 = vunpack.c.l.b16 %v4901_v56  ;;  %v5627_v13 = vrot.slane %v5625_v53, 4  ;;  %v5630_v41 = vrot.slane %v5628_v40, 5  ;;  %v5623_v45 = vsel %vm9212_vm2, %v5618_v8, %v5622_v59 }
 0x1e4   : > { %5717 = vmatpush.bf16.msrb.mxu0 %v10779_v48  ;;  %v5657_v49 = vunpack.c.l.b16 %v5623_v45  ;;  %v5576_v48 = vld [vmem:[#allocation2 + $0x10] sm:$0xf] }
 0x1e5   : > { %v4924_v16 = vpack.c.b16 %v4922_v39, %v4921_v63  ;;  %v5631_v34 = vor.u32 %v5630_v41, %v5627_v13  ;;  %v5597_v61 = vshrl.u32 %v5576_v48, 16  ;;  %v5600_v15 = vshll.u32 %v5576_v48, 16  ;;  %v8827_v41 = vld [vmem:[%s10845_s4] ss:$0 sm:$0xff] }
 0x1e7   : > { %4988 = vmatmul.bf16.gmra.mxu2 %v4924_v16  ;;  %v5632_v33 = vrot.slane %v5631_v34, 4  ;;  %v5599_v14 = vrot.slane %v5597_v61, 4  ;;  %v5602_v28 = vrot.slane %v5600_v15, 5 }
 0x1e8   : > { %5718 = vmatpush.bf16.msrb.mxu0 %v10793_v4  ;;  %v8763_v4 = vld [vmem:[#allocation2 + $0x8c] sm:$0xf0] }
 0x1e9   : > { %v5637_v27 = vsel %vm9212_vm2, %v5632_v33, %v5636_v3  ;;  %v8131_v58 = vor.u32 %v8763_v4, %v8130_v1  ;;  %v5603_v26 = vor.u32 %v5602_v28, %v5599_v14 }
 0x1ea   : > { %v5658_v7 = vunpack.c.l.b16 %v5637_v27  ;;  %v5090_v56 = vpop.f32.mrf.mxu3 }
 0x1eb   : > { %5191 = vmatmul.bf16.vlgmr.msra.gmra.mxu0 %v8127_v24  ;;  %v5604_v10 = vrot.slane %v5603_v26, 4 }
 0x1ec   : > { %v5660_v19 = vpack.c.b16 %v5658_v7, %v5657_v49 }
 0x1ed   : > { %v5609_v29 = vsel %vm9212_vm2, %v5604_v10, %v5608_v46 }
 0x1ee   : > { %5724 = vmatmul.bf16.vlgmr.msrb.gmra.mxu1 %v5660_v19  ;;  %v5656_v60 = vunpack.c.l.b16 %v5609_v29 }
 0x1f0   : > { %v5659_v54 = vpack.c.b16 %v5656_v60, %v5655_v32 }
 0x1f2   : > { %v5093_v39 = vpop.f32.mrf.mxu3 }
 0x1f7   : > { %5455 = vmatmul.bf16.vlgmr.msra.gmra.mxu2 %v8231_v51 }
 0x1fa   : > { %v5095_v13 = vpop.f32.mrf.mxu3 }
 0x1fb   : > { %5196 = vmatmul.bf16.gmra.mxu0 %v8131_v58 }
 0x1ff   : > { %v4824_v5 = vpop.f32.mrf.mxu1 }
 0x207   : > { %5460 = vmatmul.bf16.gmra.mxu2 %v8235_v37  ;;  %v4826_v43 = vpop.f32.mrf.mxu1 }
 0x20b   : > { %5719 = vmatmul.bf16.vlgmr.msrb.gmra.mxu0 %v5659_v54 }
 0x20d   : > { %v5560_v45 = vpop.f32.mrf.mxu3 }
 0x20f   : > { %v4829_v17 = vpop.f32.mrf.mxu1 }
 0x215   : > { %v5562_v11 = vpop.f32.mrf.mxu3 }
 0x217   : > { %v4831_v40 = vpop.f32.mrf.mxu1 }
 0x21d   : > { %v5565_v10 = vpop.f32.mrf.mxu3 }
 0x21f   : > { %v5352_v35 = vpop.f32.mrf.mxu1 }
 0x227   : > { %v5354_v16 = vpop.f32.mrf.mxu1 }
 0x22f   : > { %v5357_v49 = vpop.f32.mrf.mxu1 }
 0x237   : > { %v5359_v36 = vpop.f32.mrf.mxu1 }
 0x248   : > { %v4720_v42 = vpop.f32.mrf.mxu0 }
 0x249   : > { %v4730_v3 = vadd.f32 %v8827_v41, %v4720_v42 }
 0x24b   : > { %v4834_v33 = vadd.f32 %v4824_v5, %v4730_v3 }
 0x250   : > { %v4722_v12 = vpop.f32.mrf.mxu0 }
 0x251   : > { %v4731_v7 = vadd.f32 %v8827_v41, %v4722_v12 }
 0x253   : > { %v4835_v57 = vadd.f32 %v4826_v43, %v4731_v7 }
 0x258   : > { %v4725_v23 = vpop.f32.mrf.mxu0 }
 0x259   : > { %v4732_v24 = vadd.f32 %v8827_v41, %v4725_v23 }
 0x25a   : > { %v4984_v53 = vpop.f32.mrf.mxu2 }
 0x25b   : > { %v4994_v38 = vadd.f32 %v4984_v53, %v4834_v33  ;;  %v4836_v21 = vadd.f32 %v4829_v17, %v4732_v24  ;;  %v5567_v17 = vpop.f32.mrf.mxu3 }
 0x25d   : > { %v5098_v48 = vadd.f32 %v5088_v6, %v4994_v38 }
 0x260   : > { %v4727_v0 = vpop.f32.mrf.mxu0 }
 0x261   : > { %v4733_v22 = vadd.f32 %v8827_v41, %v4727_v0 }
 0x262   : > { %v4986_v63 = vpop.f32.mrf.mxu2 }
 0x263   : > { %v4995_v51 = vadd.f32 %v4986_v63, %v4835_v57  ;;  %v4837_v18 = vadd.f32 %v4831_v40, %v4733_v22 }
 0x265   : > { %v5099_v1 = vadd.f32 %v5090_v56, %v4995_v51 }
 0x268   : > { %v5192_v8 = vpop.f32.mrf.mxu0 }
 0x269   : > { %v5202_v61 = vadd.f32 %v5192_v8, %v5098_v48 }
 0x26a   : > { %v4989_v59 = vpop.f32.mrf.mxu2 }
 0x26b   : > { %v4996_v15 = vadd.f32 %v4989_v59, %v4836_v21  ;;  %v5362_v4 = vadd.f32 %v5352_v35, %v5202_v61  ;;  %v5725_v50 = vpop.f32.mrf.mxu1 }
 0x26d   : > { %v5100_v28 = vadd.f32 %v5093_v39, %v4996_v15 }
 0x270   : > { %v5194_v34 = vpop.f32.mrf.mxu0 }
 0x271   : > { %v5203_v55 = vadd.f32 %v5194_v34, %v5099_v1 }
 0x272   : > { %v4991_v25 = vpop.f32.mrf.mxu2 }
 0x273   : > { %v4997_v26 = vadd.f32 %v4991_v25, %v4837_v18  ;;  %v5363_v46 = vadd.f32 %v5354_v16, %v5203_v55  ;;  %v5727_v56 = vpop.f32.mrf.mxu1 }
 0x275   : > { %v5101_v20 = vadd.f32 %v5095_v13, %v4997_v26 }
 0x278   : > { %v5197_v27 = vpop.f32.mrf.mxu0 }
 0x279   : > { %v5204_v58 = vadd.f32 %v5197_v27, %v5100_v28 }
 0x27a   : > { %v5456_v19 = vpop.f32.mrf.mxu2 }
 0x27b   : > { %v5466_v2 = vadd.f32 %v5456_v19, %v5362_v4  ;;  %v5364_v31 = vadd.f32 %v5357_v49, %v5204_v58 }
 0x27d   : > { %v5570_v47 = vadd.f32 %v5560_v45, %v5466_v2 }
 0x280   : > { %v5199_v44 = vpop.f32.mrf.mxu0 }
 0x281   : > { %v5205_v62 = vadd.f32 %v5199_v44, %v5101_v20 }
 0x282   : > { %v5458_v14 = vpop.f32.mrf.mxu2 }
 0x283   : > { %v5467_v37 = vadd.f32 %v5458_v14, %v5363_v46  ;;  %v5365_v43 = vadd.f32 %v5359_v36, %v5205_v62 }
 0x285   : > { %v5571_v54 = vadd.f32 %v5562_v11, %v5467_v37 }
 0x288   : > { %v5720_v9 = vpop.f32.mrf.mxu0 }
 0x289   : > { %v5730_v30 = vadd.f32 %v5720_v9, %v5570_v47 }
 0x28a   : > { %v5461_v52 = vpop.f32.mrf.mxu2 }
 0x28b   : > { %v5468_v29 = vadd.f32 %v5461_v52, %v5364_v31  ;;  %5734 = vst [vmem:[%s264_s26] sm:$0xff] %v5730_v30 }
 0x28d   : > { %v5572_v60 = vadd.f32 %v5565_v10, %v5468_v29 }
 0x28f   : > { %v5732_v32 = vadd.f32 %v5725_v50, %v5572_v60 }
 0x290   : > { %v5722_v5 = vpop.f32.mrf.mxu0 }
 0x291   : > { %5736 = vst [vmem:[%s264_s26 + $0x10] sm:$0xff] %v5732_v32  ;;  %v5731_v42 = vadd.f32 %v5722_v5, %v5571_v54 }
 0x292   : > { %v5463_v6 = vpop.f32.mrf.mxu2 }
 0x293   : > { %v5469_v12 = vadd.f32 %v5463_v6, %v5365_v43  ;;  %5735 = vst [vmem:[%s264_s26 + $0x8] sm:$0xff] %v5731_v42 }
 0x295   : > { %v5573_v23 = vadd.f32 %v5567_v17, %v5469_v12 }
 0x297   : > { %v5733_v53 = vadd.f32 %v5727_v56, %v5573_v23 }
 0x299   : > { %5737 = vst [vmem:[%s264_s26 + $0x18] sm:$0xff] %v5733_v53 }
 0x29a PF: > { %s17_s21 = sadd.s32 1, %s8835_s21  }
 0x29b   : > { %p14_p4 = scmp.ge.s32.totalorder %s17_s21, 4  }
 0x29d   :  { %16 = sbr.rel (!%p14_p4) target bundleno = 1 (0x1), region = 127 }

// kernel: last_level_p6p7_p5.1
= control target key start
LH: loop header
LB: loop body
LE: loop exit
PB: predicated region body
PF: predicated region fallthrough
CT: control target
= control target key end

     0   :  { %s8873_s21 = smov 0   ;;  %s10841_s0 = inlined_call_operand.vmem [shape: bf16[2,80,9,128], index: 0, kind: input, shape index: {}]   ;;  %s10842_s1 = inlined_call_operand.vmem [shape: bf16[9,128,128], index: 1, kind: input, shape index: {}]   ;;  %s10843_s2 = inlined_call_operand.vmem [shape: f32[1,128], index: 2, kind: input, shape index: {}]   ;;  %s10844_s3 = inlined_call_operand.vmem [shape: bf16[9,128,128], index: 3, kind: input, shape index: {}]   ;;  %s10845_s4 = inlined_call_operand.vmem [shape: f32[1,128], index: 4, kind: input, shape index: {}]   ;;  %s10846_s5 = inlined_call_operand.vmem [shape: f32[2,16,8,128], index: 5, kind: output, shape index: {0}]   ;;  %s10847_s6 = inlined_call_operand.vmem [shape: f32[2,4,8,128], index: 6, kind: output, shape index: {1}]  }
   0x1 LB: > { %s5826_s22 = sadd.s32 4294967295, %s8835_s21   ;;  %p5830_p0 = scmp.ge.s32.totalorder %s8835_s21, 1  ;;  %s8835_s21 = sphi %s8873_s21, %s17_s21  }
   0x2   : > { %p215_p1 = scmp.lt.s32.totalorder %s8835_s21, 3 }
   0x4   : > { %p216_p2 = pnand %p5830_p0, %p215_p1 }
   0x5   : > { %p250_p3 = scmp.lt.s32.totalorder (!%p216_p2), %s5826_s22, 1 }
   0x6   : > { %219 = sbr.rel (%p216_p2) target bundleno = 666 (0x29a), region = 40 }
   0xb   : > { %v8385_v0 = vld [vmem:[%s10842_s1 + $0x38] sm:$0xff]  ;;  %v8384_v4 = vld [vmem:[%s10842_s1 + $0x30] sm:$0xff]  ;;  %v8383_v8 = vld [vmem:[%s10842_s1 + $0x28] sm:$0xff]  ;;  %s10857_s22 = smov (!%p250_p3, %s5826_s22), 1  ;;  %vm1515_vm0 = vsmask.f32 3328 }
   0xc   : > { %v8395_v1 = vld [vmem:[%s10842_s1 + $0x78] sm:$0xff]  ;;  %376 = vmatpush.bf16.msra.mxu0 %v8385_v0  ;;  %v8394_v5 = vld [vmem:[%s10842_s1 + $0x70] sm:$0xff]  ;;  %v8393_v9 = vld [vmem:[%s10842_s1 + $0x68] sm:$0xff]  ;;  %s8816_s25 = smul.u32 640, %s10857_s22  ;;  %vm1516_vm1 = vsmask.f32 7440 }
   0xd   : > { %v8405_v2 = vld [vmem:[%s10842_s1 + $0xb8] sm:$0xff]  ;;  %481 = vmatpush.bf16.msra.mxu1 %v8395_v1  ;;  %v8404_v6 = vld [vmem:[%s10842_s1 + $0xb0] sm:$0xff]  ;;  %v8403_v10 = vld [vmem:[%s10842_s1 + $0xa8] sm:$0xff]  ;;  %s8374_s24 = sshll.u32 %s10857_s22, 7  ;;  %vm270_vm3 = vcmask 1040384   ;;  %vm1273_vm5 = vcmask 1043458  }
   0xe   : > { %v8415_v3 = vld [vmem:[%s10842_s1 + $0xf8] sm:$0xff]  ;;  %586 = vmatpush.bf16.msra.mxu2 %v8405_v2  ;;  %v8414_v7 = vld [vmem:[%s10842_s1 + $0xf0] sm:$0xff]  ;;  %v8413_v11 = vld [vmem:[%s10842_s1 + $0xe8] sm:$0xff]  ;;  %s8972_s12 = scalar_lea.vmem %s10841_s0, %s8816_s25  ;;  %s9829_s7 = scalar_lea.vmem %s10846_s5, %s8374_s24  ;;  %vm271_vm4 = vsmask.f32 256  ;;  %vm2446_vm9 = vcmask 1042432  }
   0xf   : > { %691 = vmatpush.bf16.msra.mxu3 %v8415_v3  ;;  %v8382_v12 = vld [vmem:[%s10842_s1 + $0x20] sm:$0xff]  ;;  %v8381_v16 = vld [vmem:[%s10842_s1 + $0x18] sm:$0xff]  ;;  %v8380_v20 = vld [vmem:[%s10842_s1 + $0x10] sm:$0xff]  ;;  %vm1274_vm7 = vsmask.f32 7946  ;;  %s8375_s23 = sshll.u32 %s10857_s22, 5 }
  0x10   : > { %377 = vmatpush.bf16.msra.mxu0 %v8384_v4  ;;  %v8392_v13 = vld [vmem:[%s10842_s1 + $0x60] sm:$0xff]  ;;  %v8391_v17 = vld [vmem:[%s10842_s1 + $0x58] sm:$0xff]  ;;  %v8390_v21 = vld [vmem:[%s10842_s1 + $0x50] sm:$0xff]  ;;  %vm2447_vm10 = vsmask.f32 2306  ;;  %s264_s26 = scalar_lea.vmem %s10847_s6, %s8375_s23 }
  0x11   : > { %482 = vmatpush.bf16.msra.mxu1 %v8394_v5  ;;  %v8402_v14 = vld [vmem:[%s10842_s1 + $0xa0] sm:$0xff]  ;;  %v8401_v18 = vld [vmem:[%s10842_s1 + $0x98] sm:$0xff]  ;;  %v8400_v22 = vld [vmem:[%s10842_s1 + $0x90] sm:$0xff] }
  0x12   : > { %587 = vmatpush.bf16.msra.mxu2 %v8404_v6  ;;  %v8412_v15 = vld [vmem:[%s10842_s1 + $0xe0] sm:$0xff]  ;;  %v8411_v19 = vld [vmem:[%s10842_s1 + $0xd8] sm:$0xff]  ;;  %v8410_v23 = vld [vmem:[%s10842_s1 + $0xd0] sm:$0xff] }
  0x13   : > { %692 = vmatpush.bf16.msra.mxu3 %v8414_v7  ;;  %v8379_v24 = vld [vmem:[%s10842_s1 + $0x8] sm:$0xff]  ;;  %v8378_v28 = vld [vmem:[%s10842_s1] sm:$0xff]  ;;  %v8386_v35 = vld [vmem:[%s8972_s12 + $0x2c] sm:$0xf0] }
  0x14   : > { %378 = vmatpush.bf16.msra.mxu0 %v8383_v8  ;;  %v8389_v25 = vld [vmem:[%s10842_s1 + $0x48] sm:$0xff]  ;;  %v8388_v29 = vld [vmem:[%s10842_s1 + $0x40] sm:$0xff]  ;;  %v5958_v36 = vld [vmem:[%s8972_s12 + $0x50] sm:$0xf] }
  0x15   : > { %483 = vmatpush.bf16.msra.mxu1 %v8393_v9  ;;  %v8399_v26 = vld [vmem:[%s10842_s1 + $0x88] sm:$0xff]  ;;  %v8398_v30 = vld [vmem:[%s10842_s1 + $0x80] sm:$0xff]  ;;  %v8396_v37 = vld [vmem:[%s8972_s12 + $0x54] sm:$0xf0] }
  0x16   : > { %588 = vmatpush.bf16.msra.mxu2 %v8403_v10  ;;  %v8409_v27 = vld [vmem:[%s10842_s1 + $0xc8] sm:$0xff]  ;;  %v8408_v31 = vld [vmem:[%s10842_s1 + $0xc0] sm:$0xff]  ;;  %v8445_v40 = vld [vmem:[%s10842_s1 + $0x1b8] sm:$0xff]  ;;  %v5959_v44 = vor.u32 %v8396_v37, %v5958_v36 }
  0x17   : > { %693 = vmatpush.bf16.msra.mxu3 %v8413_v11  ;;  %v5838_v32 = vld [vmem:[%s8972_s12] sm:$0xf]  ;;  %v8376_v33 = vld [vmem:[%s8972_s12 + $0x4] sm:$0xf0]  ;;  %v8435_v42 = vld [vmem:[%s10842_s1 + $0x178] sm:$0xff] }
  0x18   : > { %379 = vmatpush.bf16.msra.mxu0 %v8382_v12  ;;  %v5898_v34 = vld [vmem:[%s8972_s12 + $0x28] sm:$0xf]  ;;  %v6018_v38 = vld [vmem:[%s8972_s12 + $0xa0] sm:$0xf]  ;;  %v5839_v41 = vor.u32 %v8376_v33, %v5838_v32  ;;  %v8425_v46 = vld [vmem:[%s10842_s1 + $0x138] sm:$0xff] }
  0x19   : > { %484 = vmatpush.bf16.msra.mxu1 %v8392_v13  ;;  %v8406_v39 = vld [vmem:[%s8972_s12 + $0xa4] sm:$0xf0]  ;;  %v5899_v43 = vor.u32 %v8386_v35, %v5898_v34  ;;  %v8455_v47 = vld [vmem:[%s10842_s1 + $0x1f8] sm:$0xff]  ;;  %v8444_v48 = vld [vmem:[%s10842_s1 + $0x1b0] sm:$0xff] }
  0x1a   : > { %589 = vmatpush.bf16.msra.mxu2 %v8402_v14  ;;  %v6019_v45 = vor.u32 %v8406_v39, %v6018_v38  ;;  %v8434_v49 = vld [vmem:[%s10842_s1 + $0x170] sm:$0xff]  ;;  %v8443_v52 = vld [vmem:[%s10842_s1 + $0x1a8] sm:$0xff]  ;;  %v8442_v56 = vld [vmem:[%s10842_s1 + $0x1a0] sm:$0xff] }
  0x1b   : > { %694 = vmatpush.bf16.msra.mxu3 %v8412_v15  ;;  %v8424_v50 = vld [vmem:[%s10842_s1 + $0x130] sm:$0xff]  ;;  %v8433_v53 = vld [vmem:[%s10842_s1 + $0x168] sm:$0xff]  ;;  %v8422_v57 = vld [vmem:[%s10842_s1 + $0x120] sm:$0xff] }
  0x1c   : > { %380 = vmatpush.bf16.msra.mxu0 %v8381_v16  ;;  %v8454_v51 = vld [vmem:[%s10842_s1 + $0x1f0] sm:$0xff]  ;;  %v8423_v54 = vld [vmem:[%s10842_s1 + $0x128] sm:$0xff]  ;;  %v8432_v58 = vld [vmem:[%s10842_s1 + $0x160] sm:$0xff] }
  0x1d   : > { %485 = vmatpush.bf16.msra.mxu1 %v8391_v17  ;;  %v8453_v55 = vld [vmem:[%s10842_s1 + $0x1e8] sm:$0xff]  ;;  %v8452_v59 = vld [vmem:[%s10842_s1 + $0x1e0] sm:$0xff]  ;;  %v5842_v60 = vld [vmem:[%s8972_s12 + $0x10] sm:$0xf] }
  0x1e   : > { %590 = vmatpush.bf16.msra.mxu2 %v8401_v18  ;;  %v8377_v61 = vld [vmem:[%s8972_s12 + $0x14] sm:$0xf0]  ;;  %v8387_v63 = vld [vmem:[%s8972_s12 + $0x3c] sm:$0xf0]  ;;  %v8397_v1 = vld [vmem:[%s8972_s12 + $0x64] sm:$0xf0] }
  0x1f   : > { %695 = vmatpush.bf16.msra.mxu3 %v8411_v19  ;;  %v5902_v62 = vld [vmem:[%s8972_s12 + $0x38] sm:$0xf]  ;;  %v5962_v0 = vld [vmem:[%s8972_s12 + $0x60] sm:$0xf]  ;;  %v6022_v2 = vld [vmem:[%s8972_s12 + $0xb0] sm:$0xf]  ;;  %v5843_v5 = vor.u32 %v8377_v61, %v5842_v60 }
  0x20   : > { %381 = vmatpush.bf16.msra.mxu0 %v8380_v20  ;;  %v8407_v3 = vld [vmem:[%s8972_s12 + $0xb4] sm:$0xf0]  ;;  %v5903_v7 = vor.u32 %v8387_v63, %v5902_v62  ;;  %v5963_v8 = vor.u32 %v8397_v1, %v5962_v0  ;;  %v8440_v12 = vld [vmem:[%s10842_s1 + $0x190] sm:$0xff]  ;;  %v8439_v16 = vld [vmem:[%s10842_s1 + $0x188] sm:$0xff] }
  0x21   : > { %486 = vmatpush.bf16.msra.mxu1 %v8390_v21  ;;  %v8441_v4 = vld [vmem:[%s10842_s1 + $0x198] sm:$0xff]  ;;  %v6023_v9 = vor.u32 %v8407_v3, %v6022_v2  ;;  %v8430_v13 = vld [vmem:[%s10842_s1 + $0x150] sm:$0xff]  ;;  %v8429_v17 = vld [vmem:[%s10842_s1 + $0x148] sm:$0xff] }
  0x22   : > { %591 = vmatpush.bf16.msra.mxu2 %v8400_v22  ;;  %v8431_v6 = vld [vmem:[%s10842_s1 + $0x158] sm:$0xff]  ;;  %v8420_v14 = vld [vmem:[%s10842_s1 + $0x110] sm:$0xff]  ;;  %v8419_v18 = vld [vmem:[%s10842_s1 + $0x108] sm:$0xff] }
  0x23   : > { %696 = vmatpush.bf16.msra.mxu3 %v8410_v23  ;;  %v8421_v10 = vld [vmem:[%s10842_s1 + $0x118] sm:$0xff]  ;;  %v8450_v15 = vld [vmem:[%s10842_s1 + $0x1d0] sm:$0xff]  ;;  %v8449_v19 = vld [vmem:[%s10842_s1 + $0x1c8] sm:$0xff] }
  0x24   : > { %382 = vmatpush.bf16.msra.mxu0 %v8379_v24  ;;  %v8451_v11 = vld [vmem:[%s10842_s1 + $0x1d8] sm:$0xff]  ;;  %v8438_v20 = vld [vmem:[%s10842_s1 + $0x180] sm:$0xff]  ;;  %v6078_v23 = vld [vmem:[%s8972_s12 + $0xc8] sm:$0xf] }
  0x25   : > { %487 = vmatpush.bf16.msra.mxu1 %v8389_v25  ;;  %v8418_v21 = vld [vmem:[%s10842_s1 + $0x100] sm:$0xff]  ;;  %v8485_v24 = vld [vmem:[%s10842_s1 + $0x78] sm:$0xff]  ;;  %v6258_v32 = vld [vmem:[%s8972_s12 + $0x168] sm:$0xf] }
  0x26   : > { %592 = vmatpush.bf16.msra.mxu2 %v8399_v26  ;;  %v8428_v22 = vld [vmem:[%s10842_s1 + $0x140] sm:$0xff]  ;;  %v8416_v26 = vld [vmem:[%s8972_s12 + $0xcc] sm:$0xf0]  ;;  %v8465_v34 = vld [vmem:[%s10842_s1 + $0x238] sm:$0xff] }
  0x27   : > { %697 = vmatpush.bf16.msra.mxu3 %v8409_v27  ;;  %v8448_v25 = vld [vmem:[%s10842_s1 + $0x1c0] sm:$0xff]  ;;  %v6138_v27 = vld [vmem:[%s8972_s12 + $0xf0] sm:$0xf]  ;;  %v8493_v35 = vld [vmem:[%s10842_s1 + $0xb8] sm:$0xff]  ;;  %v6079_v37 = vor.u32 %v8416_v26, %v6078_v23 }
  0x28   : > { %383 = vmatpush.bf16.msra.mxu0 %v8378_v28  ;;  %v8475_v28 = vld [vmem:[%s10842_s1 + $0x38] sm:$0xff]  ;;  %v8446_v33 = vld [vmem:[%s8972_s12 + $0x16c] sm:$0xf0]  ;;  %v6142_v60 = vld [vmem:[%s8972_s12 + $0x100] sm:$0xf] }
  0x29   : > { %488 = vmatpush.bf16.msra.mxu1 %v8388_v29  ;;  %v8426_v29 = vld [vmem:[%s8972_s12 + $0xf4] sm:$0xf0]  ;;  %v8484_v36 = vld [vmem:[%s10842_s1 + $0x70] sm:$0xff]  ;;  %v8427_v62 = vld [vmem:[%s8972_s12 + $0x104] sm:$0xf0] }
  0x2a   : > { %593 = vmatpush.bf16.msra.mxu2 %v8398_v30  ;;  %v6198_v30 = vld [vmem:[%s8972_s12 + $0x140] sm:$0xf]  ;;  %v6139_v38 = vor.u32 %v8426_v29, %v6138_v27  ;;  %v8481_v61 = vld [vmem:[%s10842_s1 + $0x58] sm:$0xff]  ;;  %v6202_v63 = vld [vmem:[%s8972_s12 + $0x150] sm:$0xf] }
  0x2b   : > { %698 = vmatpush.bf16.msra.mxu3 %v8408_v31  ;;  %384 = vmatmul.bf16.vlgmr.msra.gmra.mxu0 %v5839_v41  ;;  %v8436_v31 = vld [vmem:[%s8972_s12 + $0x144] sm:$0xf0]  ;;  %v8464_v41 = vld [vmem:[%s10842_s1 + $0x230] sm:$0xff]  ;;  %v8437_v0 = vld [vmem:[%s8972_s12 + $0x154] sm:$0xf0] }
  0x2c   : > { %489 = vmatmul.bf16.vlgmr.msra.gmra.mxu1 %v5899_v43  ;;  %796 = vmatpush.bf16.msrb.mxu0 %v8425_v46  ;;  %v6199_v39 = vor.u32 %v8436_v31, %v6198_v30  ;;  %v8492_v43 = vld [vmem:[%s10842_s1 + $0xb0] sm:$0xff]  ;;  %v8473_v46 = vld [vmem:[%s10842_s1 + $0x28] sm:$0xff]  ;;  %v6262_v1 = vld [vmem:[%s8972_s12 + $0x178] sm:$0xf] }
  0x2d   : > { %901 = vmatpush.bf16.msrb.mxu1 %v8435_v42  ;;  %594 = vmatmul.bf16.vlgmr.msra.gmra.mxu2 %v5959_v44  ;;  %v8474_v42 = vld [vmem:[%s10842_s1 + $0x30] sm:$0xff]  ;;  %v8483_v44 = vld [vmem:[%s10842_s1 + $0x68] sm:$0xff]  ;;  %v8447_v2 = vld [vmem:[%s8972_s12 + $0x17c] sm:$0xf0] }
  0x2e   : > { %1006 = vmatpush.bf16.msrb.mxu2 %v8445_v40  ;;  %699 = vmatmul.bf16.vlgmr.msra.gmra.mxu3 %v6019_v45  ;;  %v6259_v40 = vor.u32 %v8446_v33, %v6258_v32  ;;  %v8463_v45 = vld [vmem:[%s10842_s1 + $0x228] sm:$0xff]  ;;  %v8461_v3 = vld [vmem:[%s10842_s1 + $0x218] sm:$0xff]  ;;  %v8488_v23 = vld [vmem:[%s10842_s1 + $0x90] sm:$0xff] }
  0x2f   : > { %1111 = vmatpush.bf16.msrb.mxu3 %v8455_v47  ;;  %v8491_v47 = vld [vmem:[%s10842_s1 + $0xa8] sm:$0xff]  ;;  %v1513_v26 = vld [vmem:[%s8972_s12 + $0x18] sm:$0xf]  ;;  %vm9212_vm2 = vmor %vm1515_vm0, %vm1516_vm1 }
  0x30   : > { %797 = vmatpush.bf16.msrb.mxu0 %v8424_v50  ;;  %v1509_v50 = vld [vmem:[%s8972_s12 + $0x8] sm:$0xf]  ;;  %vm10026_vm6 = vmand %vm270_vm3, %vm271_vm4 }
  0x31   : > { %902 = vmatpush.bf16.msrb.mxu1 %v8434_v49  ;;  %v1507_v49 = vld [vmem:[%s8972_s12] sm:$0xf]  ;;  %v8459_v27 = vld [vmem:[%s10842_s1 + $0x208] sm:$0xff]  ;;  %vm10037_vm8 = vmand %vm1273_vm5, %vm1274_vm7 }
  0x32   : > { %1007 = vmatpush.bf16.msrb.mxu2 %v8444_v48  ;;  %v8482_v48 = vld [vmem:[%s10842_s1 + $0x60] sm:$0xff]  ;;  %v8487_v33 = vld [vmem:[%s10842_s1 + $0x88] sm:$0xff]  ;;  %vm10420_vm11 = vmand %vm2446_vm9, %vm2447_vm10 }
  0x33   : > { %1112 = vmatpush.bf16.msrb.mxu3 %v8454_v51  ;;  %v8462_v51 = vld [vmem:[%s10842_s1 + $0x220] sm:$0xff] }
  0x34   : > { %798 = vmatpush.bf16.msrb.mxu0 %v8423_v54  ;;  %v1519_v54 = vshrl.u32 %v1507_v49, 16 }
  0x35   : > { %903 = vmatpush.bf16.msrb.mxu1 %v8433_v53  ;;  %v8490_v53 = vld [vmem:[%s10842_s1 + $0xa0] sm:$0xff] }
  0x36   : > { %1008 = vmatpush.bf16.msrb.mxu2 %v8443_v52  ;;  %v8472_v52 = vld [vmem:[%s10842_s1 + $0x20] sm:$0xff] }
  0x37   : > { %1113 = vmatpush.bf16.msrb.mxu3 %v8453_v55  ;;  %v1522_v55 = vshll.u32 %v1507_v49, 16  ;;  %v8466_v49 = vld [vmem:[%s8972_s12 + $0x54] sm:$0xf0] }
  0x38   : > { %799 = vmatpush.bf16.msrb.mxu0 %v8422_v57  ;;  %v1536_v57 = vshll.u32 %v1509_v50, 16 }
  0x39   : > { %904 = vmatpush.bf16.msrb.mxu1 %v8432_v58  ;;  %v6082_v58 = vld [vmem:[%s8972_s12 + $0xd8] sm:$0xf] }
  0x3a   : > { %1009 = vmatpush.bf16.msrb.mxu2 %v8442_v56  ;;  %v1533_v56 = vshrl.u32 %v1509_v50, 16  ;;  %v8503_v50 = vld [vmem:[%s10842_s1 + $0xf8] sm:$0xff] }
  0x3b   : > { %1114 = vmatpush.bf16.msrb.mxu3 %v8452_v59  ;;  %389 = vmatmul.bf16.gmra.mxu0 %v5843_v5  ;;  %v8417_v59 = vld [vmem:[%s8972_s12 + $0xdc] sm:$0xf0]  ;;  %v8489_v5 = vld [vmem:[%s10842_s1 + $0x98] sm:$0xff] }
  0x3c   : > { %494 = vmatmul.bf16.gmra.mxu1 %v5903_v7  ;;  %800 = vmatpush.bf16.msrb.mxu0 %v8421_v10  ;;  %v1524_v7 = vrot.slane %v1522_v55, 5  ;;  %v8480_v10 = vld [vmem:[%s10842_s1 + $0x50] sm:$0xff] }
  0x3d   : > { %905 = vmatpush.bf16.msrb.mxu1 %v8431_v6  ;;  %599 = vmatmul.bf16.gmra.mxu2 %v5963_v8  ;;  %v1521_v6 = vrot.slane %v1519_v54, 4  ;;  %v1535_v8 = vrot.slane %v1533_v56, 4 }
  0x3e   : > { %1010 = vmatpush.bf16.msrb.mxu2 %v8441_v4  ;;  %704 = vmatmul.bf16.gmra.mxu3 %v6023_v9  ;;  %v8471_v4 = vld [vmem:[%s10842_s1 + $0x18] sm:$0xff]  ;;  %v1538_v9 = vrot.slane %v1536_v57, 5 }
  0x3f   : > { %1115 = vmatpush.bf16.msrb.mxu3 %v8451_v11  ;;  %v1508_v11 = vld [vmem:[%s8972_s12 + $0x4] sm:$0x1] }
  0x40   : > { %801 = vmatpush.bf16.msrb.mxu0 %v8420_v14  ;;  %v6143_v14 = vor.u32 %v8427_v62, %v6142_v60  ;;  %v1512_v60 = vld [vmem:[%s8972_s12 + $0x14] sm:$0x1]  ;;  %v6422_v62 = vld [vmem:[%s8972_s12 + $0x78] sm:$0xf] }
  0x41   : > { %906 = vmatpush.bf16.msrb.mxu1 %v8430_v13  ;;  %v6083_v13 = vor.u32 %v8417_v59, %v6082_v58  ;;  %v8520_v59 = vld [vmem:[%s10842_s1 + $0x170] sm:$0xff] }
  0x42   : > { %1011 = vmatpush.bf16.msrb.mxu2 %v8440_v12  ;;  %v1510_v12 = vld [vmem:[%s8972_s12 + $0xc] sm:$0x1] }
  0x43   : > { %1116 = vmatpush.bf16.msrb.mxu3 %v8450_v15  ;;  %v6203_v15 = vor.u32 %v8437_v0, %v6202_v63  ;;  %v8476_v63 = vld [vmem:[%s8972_s12 + $0x7c] sm:$0xf0] }
  0x44   : > { %802 = vmatpush.bf16.msrb.mxu0 %v8419_v18  ;;  %v8470_v18 = vld [vmem:[%s10842_s1 + $0x10] sm:$0xff] }
  0x45   : > { %907 = vmatpush.bf16.msrb.mxu1 %v8429_v17  ;;  %v8460_v17 = vld [vmem:[%s10842_s1 + $0x210] sm:$0xff] }
  0x46   : > { %1012 = vmatpush.bf16.msrb.mxu2 %v8439_v16  ;;  %v6263_v16 = vor.u32 %v8447_v2, %v6262_v1  ;;  %v8502_v2 = vld [vmem:[%s10842_s1 + $0xf0] sm:$0xff] }
  0x47   : > { %1117 = vmatpush.bf16.msrb.mxu3 %v8449_v19  ;;  %v1525_v19 = vor.u32 %v1524_v7, %v1521_v6  ;;  %v6423_v7 = vor.u32 %v8476_v63, %v6422_v62  ;;  %v8515_v62 = vld [vmem:[%s10842_s1 + $0x148] sm:$0xff] }
  0x48   : > { %803 = vmatpush.bf16.msrb.mxu0 %v8418_v21  ;;  %v1539_v21 = vor.u32 %v1538_v9, %v1535_v8  ;;  %v8512_v9 = vld [vmem:[%s10842_s1 + $0x130] sm:$0xff]  ;;  %v8497_v63 = vld [vmem:[%s10842_s1 + $0xc8] sm:$0xff] }
  0x49   : > { %908 = vmatpush.bf16.msrb.mxu1 %v8428_v22  ;;  %v1542_v22 = vshll.u32 %v1510_v12, 16  ;;  %v1526_v29 = vrot.slane %v1525_v19, 4  ;;  %v8501_v12 = vld [vmem:[%s10842_s1 + $0xe8] sm:$0xff]  ;;  %v6628_v19 = vld [vmem:[%s8972_s12 + $0xa0] sm:$0xf] }
  0x4a   : > { %1013 = vmatpush.bf16.msrb.mxu2 %v8438_v20  ;;  %v1528_v20 = vshll.u32 %v1508_v11, 16  ;;  %v1540_v31 = vrot.slane %v1539_v21, 4  ;;  %v8519_v11 = vld [vmem:[%s10842_s1 + $0x168] sm:$0xff]  ;;  %v8518_v21 = vld [vmem:[%s10842_s1 + $0x160] sm:$0xff] }
  0x4b   : > { %1118 = vmatpush.bf16.msrb.mxu3 %v8448_v25  ;;  %804 = vmatmul.bf16.vlgmr.msrb.gmra.mxu0 %v6079_v37  ;;  %v1511_v25 = vld [vmem:[%s8972_s12 + $0x10] sm:$0xf]  ;;  %v1544_v32 = vrot.slane %v1542_v22, 5  ;;  %v8500_v22 = vld [vmem:[%s10842_s1 + $0xe0] sm:$0xff] }
  0x4c   : > { %1216 = vmatpush.bf16.msra.mxu0 %v8465_v34  ;;  %909 = vmatmul.bf16.vlgmr.msrb.gmra.mxu1 %v6139_v38  ;;  %v1530_v30 = vrot.slane %v1528_v20, 5  ;;  %v8478_v34 = vld [vmem:[%s10842_s1 + $0x40] sm:$0xff]  ;;  %v1547_v37 = vshrl.u32 %v1511_v25, 16  ;;  %v1550_v38 = vshll.u32 %v1511_v25, 16  ;;  %v6630_v20 = vld [vmem:[%s8972_s12 + $0xa8] sm:$0xf] }
  0x4d   : > { %1380 = vmatpush.bf16.msra.mxu1 %v8475_v28  ;;  %1014 = vmatmul.bf16.vlgmr.msrb.gmra.mxu2 %v6199_v39  ;;  %v8469_v28 = vld [vmem:[%s10842_s1 + $0x8] sm:$0xff]  ;;  %v1561_v39 = vshrl.u32 %v1513_v26, 16  ;;  %v1885_v25 = vshrl.u32 %v6628_v19, 16 }
  0x4e   : > { %1484 = vmatpush.bf16.msra.mxu2 %v8485_v24  ;;  %1119 = vmatmul.bf16.vlgmr.msrb.gmra.mxu3 %v6259_v40  ;;  %v8479_v24 = vld [vmem:[%s10842_s1 + $0x48] sm:$0xff]  ;;  %v1564_v40 = vshll.u32 %v1513_v26, 16  ;;  %v1552_v54 = vrot.slane %v1550_v38, 5  ;;  %v1888_v26 = vshll.u32 %v6628_v19, 16 }
  0x4f   : > { %1646 = vmatpush.bf16.msra.mxu3 %v8493_v35  ;;  %v1563_v55 = vrot.slane %v1561_v39, 4  ;;  %v6426_v38 = vld [vmem:[%s8972_s12 + $0x88] sm:$0xf]  ;;  %v8477_v39 = vld [vmem:[%s8972_s12 + $0x8c] sm:$0xf0] }
  0x50   : > { %1217 = vmatpush.bf16.msra.mxu0 %v8464_v41  ;;  %v8458_v41 = vld [vmem:[%s10842_s1 + $0x200] sm:$0xff]  ;;  %v1566_v56 = vrot.slane %v1564_v40, 5 }
  0x51   : > { %1381 = vmatpush.bf16.msra.mxu1 %v8474_v42  ;;  %v8468_v42 = vld [vmem:[%s10842_s1] sm:$0xff] }
  0x52   : > { %1485 = vmatpush.bf16.msra.mxu2 %v8484_v36  ;;  %v8521_v36 = vld [vmem:[%s10842_s1 + $0x178] sm:$0xff] }
  0x53   : > { %1647 = vmatpush.bf16.msra.mxu3 %v8492_v43  ;;  %v8486_v43 = vld [vmem:[%s10842_s1 + $0x80] sm:$0xff] }
  0x54   : > { %1218 = vmatpush.bf16.msra.mxu0 %v8463_v45  ;;  %v8456_v45 = vld [vmem:[%s8972_s12 + $0x194] sm:$0xf0] }
  0x55   : > { %1382 = vmatpush.bf16.msra.mxu1 %v8473_v46  ;;  %v1531_v46 = vsel %vm9212_vm2, %v1526_v29, %v1530_v30  ;;  %v8510_v29 = vld [vmem:[%s10842_s1 + $0x120] sm:$0xff] }
  0x56   : > { %1486 = vmatpush.bf16.msra.mxu2 %v8483_v44  ;;  %v6318_v44 = vld [vmem:[%s8972_s12 + $0x190] sm:$0xf]  ;;  %v1590_v57 = vunpack.c.l.b16 %v1531_v46  ;;  %v8528_v30 = vld [vmem:[%s10842_s1 + $0x1a0] sm:$0xff] }
  0x57   : > { %1648 = vmatpush.bf16.msra.mxu3 %v8491_v47  ;;  %v1545_v47 = vsel %vm9212_vm2, %v1540_v31, %v1544_v32  ;;  %v6319_v0 = vor.u32 %v8456_v45, %v6318_v44  ;;  %v6322_v31 = vld [vmem:[%s8972_s12 + $0x1a0] sm:$0xf]  ;;  %v8457_v32 = vld [vmem:[%s8972_s12 + $0x1a4] sm:$0xf0]  ;;  %v1890_v44 = vrot.slane %v1888_v26, 5  ;;  %v8540_v26 = vld [vmem:[%s10842_s1 + $0x1f0] sm:$0xff] }
  0x58   : > { %1219 = vmatpush.bf16.msra.mxu0 %v8462_v51  ;;  %v8513_v51 = vld [vmem:[%s10842_s1 + $0x138] sm:$0xff]  ;;  %v1591_v58 = vunpack.c.l.b16 %v1545_v47 }
  0x59   : > { %1383 = vmatpush.bf16.msra.mxu1 %v8472_v52  ;;  %v8531_v52 = vld [vmem:[%s10842_s1 + $0x1b8] sm:$0xff] }
  0x5a   : > { %1487 = vmatpush.bf16.msra.mxu2 %v8482_v48  ;;  %v6362_v48 = vld [vmem:[%s8972_s12 + $0x50] sm:$0xf]  ;;  %v1594_v8 = vpack.c.b16 %v1591_v58, %v1590_v57  ;;  %v8527_v47 = vld [vmem:[%s10842_s1 + $0x198] sm:$0xff] }
  0x5b   : > { %1649 = vmatpush.bf16.msra.mxu3 %v8490_v53  ;;  %809 = vmatmul.bf16.gmra.mxu0 %v6083_v13  ;;  %v1549_v53 = vrot.slane %v1547_v37, 4  ;;  %v6363_v1 = vor.u32 %v8466_v49, %v6362_v48  ;;  %v8467_v37 = vld [vmem:[%s8972_s12 + $0x64] sm:$0xf0]  ;;  %v6629_v48 = vld [vmem:[%s8972_s12 + $0xa4] sm:$0x1] }
  0x5c   : > { %1220 = vmatpush.bf16.msra.mxu0 %v8461_v3  ;;  %914 = vmatmul.bf16.gmra.mxu1 %v6143_v14  ;;  %v6631_v49 = vld [vmem:[%s8972_s12 + $0xac] sm:$0x1]  ;;  %v1894_v57 = vshll.u32 %v6629_v48, 16 }
  0x5d   : > { %1384 = vmatpush.bf16.msra.mxu1 %v8471_v4  ;;  %1019 = vmatmul.bf16.gmra.mxu2 %v6203_v15  ;;  %v1553_v3 = vor.u32 %v1552_v54, %v1549_v53  ;;  %v1556_v4 = vshll.u32 %v1512_v60, 16  ;;  %v6427_v54 = vor.u32 %v8477_v39, %v6426_v38  ;;  %v8508_v60 = vld [vmem:[%s10842_s1 + $0x110] sm:$0xff] }
  0x5e   : > { %1488 = vmatpush.bf16.msra.mxu2 %v8481_v61  ;;  %1124 = vmatmul.bf16.gmra.mxu3 %v6263_v16  ;;  %v1514_v61 = vld [vmem:[%s8972_s12 + $0x1c] sm:$0x1]  ;;  %v8568_v38 = vld [vmem:[%s10842_s1 + $0x70] sm:$0xff] }
  0x5f   : > { %1650 = vmatpush.bf16.msra.mxu3 %v8489_v5  ;;  %v1567_v5 = vor.u32 %v1566_v56, %v1563_v55  ;;  %v1570_v6 = vshll.u32 %v1514_v61, 16  ;;  %v1554_v13 = vrot.slane %v1553_v3, 4  ;;  %v1558_v14 = vrot.slane %v1556_v4, 5  ;;  %v8526_v61 = vld [vmem:[%s10842_s1 + $0x190] sm:$0xff]  ;;  %v8507_v4 = vld [vmem:[%s10842_s1 + $0x108] sm:$0xff] }
  0x60   : > { %1221 = vmatpush.bf16.msra.mxu0 %v8460_v17  ;;  %v8511_v17 = vld [vmem:[%s10842_s1 + $0x128] sm:$0xff]  ;;  %v6633_v39 = vld [vmem:[%s8972_s12 + $0xb4] sm:$0x1] }
  0x61   : > { %1385 = vmatpush.bf16.msra.mxu1 %v8470_v18  ;;  %v1568_v15 = vrot.slane %v1567_v5, 4  ;;  %v1572_v16 = vrot.slane %v1570_v6, 5  ;;  %v8529_v18 = vld [vmem:[%s10842_s1 + $0x1a8] sm:$0xff]  ;;  %v8514_v6 = vld [vmem:[%s10842_s1 + $0x140] sm:$0xff]  ;;  %v1922_v48 = vshll.u32 %v6633_v39, 16 }
  0x62   : > { %1489 = vmatpush.bf16.msra.mxu2 %v8480_v10  ;;  %v8530_v10 = vld [vmem:[%s10842_s1 + $0x1b0] sm:$0xff]  ;;  %v8525_v5 = vld [vmem:[%s10842_s1 + $0x188] sm:$0xff] }
  0x63   : > { %1651 = vmatpush.bf16.msra.mxu3 %v8488_v23  ;;  %v1559_v23 = vsel %vm9212_vm2, %v1554_v13, %v1558_v14  ;;  %v8506_v14 = vld [vmem:[%s10842_s1 + $0x100] sm:$0xff]  ;;  %v8563_v39 = vld [vmem:[%s10842_s1 + $0x48] sm:$0xff] }
  0x64   : > { %1222 = vmatpush.bf16.msra.mxu0 %v8459_v27  ;;  %v1899_v27 = vshrl.u32 %v6630_v20, 16  ;;  %v1592_v40 = vunpack.c.l.b16 %v1559_v23  ;;  %v8569_v23 = vld [vmem:[%s10842_s1 + $0x78] sm:$0xff] }
  0x65   : > { %1386 = vmatpush.bf16.msra.mxu1 %v8469_v28  ;;  %v1902_v28 = vshll.u32 %v6630_v20, 16  ;;  %v6530_v20 = vld [vmem:[%s8972_s12 + $0xf0] sm:$0xf] }
  0x66   : > { %1490 = vmatpush.bf16.msra.mxu2 %v8479_v24  ;;  %v1573_v24 = vsel %vm9212_vm2, %v1568_v15, %v1572_v16  ;;  %v1901_v45 = vrot.slane %v1899_v27, 4  ;;  %v8524_v15 = vld [vmem:[%s10842_s1 + $0x180] sm:$0xff] }
  0x67   : > { %1652 = vmatpush.bf16.msra.mxu3 %v8487_v33  ;;  %v6366_v33 = vld [vmem:[%s8972_s12 + $0x60] sm:$0xf]  ;;  %v1904_v46 = vrot.slane %v1902_v28, 5 }
  0x68   : > { %1223 = vmatpush.bf16.msra.mxu0 %v8458_v41  ;;  %v1593_v41 = vunpack.c.l.b16 %v1573_v24  ;;  %v6367_v53 = vor.u32 %v8467_v37, %v6366_v33  ;;  %v6590_v24 = vld [vmem:[%s8972_s12 + $0x118] sm:$0xf]  ;;  %v8504_v27 = vld [vmem:[%s8972_s12 + $0x11c] sm:$0xf0] }
  0x69   : > { %1387 = vmatpush.bf16.msra.mxu1 %v8468_v42  ;;  %v8509_v42 = vld [vmem:[%s10842_s1 + $0x118] sm:$0xff]  ;;  %v1905_v58 = vor.u32 %v1904_v46, %v1901_v45  ;;  %v8557_v45 = vld [vmem:[%s10842_s1 + $0x28] sm:$0xff] }
  0x6a   : > { %1491 = vmatpush.bf16.msra.mxu2 %v8478_v34  ;;  %v8517_v34 = vld [vmem:[%s10842_s1 + $0x158] sm:$0xff]  ;;  %v1595_v55 = vpack.c.b16 %v1593_v41, %v1592_v40  ;;  %v8539_v46 = vld [vmem:[%s10842_s1 + $0x1e8] sm:$0xff] }
  0x6b   : > { %1653 = vmatpush.bf16.msra.mxu3 %v8486_v43  ;;  %1224 = vmatmul.bf16.vlgmr.msra.gmra.mxu0 %v6319_v0  ;;  %v1887_v43 = vrot.slane %v1885_v25, 4  ;;  %v8558_v25 = vld [vmem:[%s10842_s1 + $0x30] sm:$0xff]  ;;  %v6635_v40 = vld [vmem:[%s8972_s12 + $0xbc] sm:$0x1] }
  0x6c   : > { %1749 = vmatpush.bf16.msrb.mxu0 %v8503_v50  ;;  %1388 = vmatmul.bf16.vlgmr.msra.gmra.mxu1 %v6363_v1  ;;  %v8516_v50 = vld [vmem:[%s10842_s1 + $0x150] sm:$0xff]  ;;  %v1896_v1 = vrot.slane %v1894_v57, 5 }
  0x6d   : > { %1853 = vmatpush.bf16.msrb.mxu1 %v8513_v51  ;;  %1492 = vmatmul.bf16.vlgmr.msra.gmra.mxu2 %v6423_v7  ;;  %v8498_v51 = vld [vmem:[%s10842_s1 + $0xd0] sm:$0xff]  ;;  %v1891_v56 = vor.u32 %v1890_v44, %v1887_v43  ;;  %v8496_v7 = vld [vmem:[%s10842_s1 + $0xc0] sm:$0xff] }
  0x6e   : > { %2012 = vmatpush.bf16.msrb.mxu2 %v8521_v36  ;;  %1654 = vmatmul.bf16.vlgmr.msra.gmra.mxu3 %v1594_v8  ;;  %v8499_v36 = vld [vmem:[%s10842_s1 + $0xd8] sm:$0xff]  ;;  %v6632_v8 = vld [vmem:[%s8972_s12 + $0xb0] sm:$0xf] }
  0x6f   : > { %2115 = vmatpush.bf16.msrb.mxu3 %v8531_v52  ;;  %v6323_v52 = vor.u32 %v8457_v32, %v6322_v31  ;;  %v1892_v0 = vrot.slane %v1891_v56, 4  ;;  %v1913_v16 = vshrl.u32 %v6632_v8, 16  ;;  %v8522_v31 = vld [vmem:[%s8972_s12 + $0x194] sm:$0xf0]  ;;  %v8548_v32 = vld [vmem:[%s10842_s1 + $0x230] sm:$0xff]  ;;  %v8538_v56 = vld [vmem:[%s10842_s1 + $0x1e0] sm:$0xff] }
  0x70   : > { %1750 = vmatpush.bf16.msrb.mxu0 %v8502_v2  ;;  %v1906_v2 = vrot.slane %v1905_v58, 4  ;;  %v1924_v58 = vrot.slane %v1922_v48, 5  ;;  %v8542_v48 = vld [vmem:[%s10842_s1 + $0x200] sm:$0xff] }
  0x71   : > { %1854 = vmatpush.bf16.msrb.mxu1 %v8512_v9  ;;  %v6634_v9 = vld [vmem:[%s8972_s12 + $0xb8] sm:$0xf]  ;;  %v1915_v33 = vrot.slane %v1913_v16, 4 }
  0x72   : > { %2013 = vmatpush.bf16.msrb.mxu2 %v8520_v59  ;;  %v1908_v59 = vshll.u32 %v6631_v49, 16  ;;  %v1930_v19 = vshll.u32 %v6634_v9, 16 }
  0x73   : > { %2116 = vmatpush.bf16.msrb.mxu3 %v8530_v10  ;;  %v8559_v10 = vld [vmem:[%s10842_s1 + $0x38] sm:$0xff] }
  0x74   : > { %1751 = vmatpush.bf16.msrb.mxu0 %v8501_v12  ;;  %v1910_v3 = vrot.slane %v1908_v59, 5  ;;  %v1897_v12 = vsel %vm9212_vm2, %v1892_v0, %v1896_v1  ;;  %v1932_v37 = vrot.slane %v1930_v19, 5  ;;  %v6710_v19 = vld [vmem:[%s8972_s12 + $0x1a0] sm:$0xf] }
  0x75   : > { %1855 = vmatpush.bf16.msrb.mxu1 %v8511_v17  ;;  %v1916_v17 = vshll.u32 %v6632_v8, 16  ;;  %v1956_v28 = vunpack.c.l.b16 %v1897_v12  ;;  %v8537_v8 = vld [vmem:[%s10842_s1 + $0x1d8] sm:$0xff]  ;;  %v8505_v12 = vld [vmem:[%s8972_s12 + $0x12c] sm:$0xf0] }
  0x76   : > { %2014 = vmatpush.bf16.msrb.mxu2 %v8519_v11  ;;  %v8541_v11 = vld [vmem:[%s10842_s1 + $0x1f8] sm:$0xff]  ;;  %v1911_v13 = vsel %vm9212_vm2, %v1906_v2, %v1910_v3  ;;  %v6534_v3 = vld [vmem:[%s8972_s12 + $0x100] sm:$0xf] }
  0x77   : > { %2117 = vmatpush.bf16.msrb.mxu3 %v8529_v18  ;;  %v1927_v18 = vshrl.u32 %v6634_v9, 16  ;;  %v6594_v9 = vld [vmem:[%s8972_s12 + $0x128] sm:$0xf] }
  0x78   : > { %1752 = vmatpush.bf16.msrb.mxu0 %v8500_v22  ;;  %v8549_v22 = vld [vmem:[%s10842_s1 + $0x238] sm:$0xff] }
  0x79   : > { %1856 = vmatpush.bf16.msrb.mxu1 %v8510_v29  ;;  %v1957_v29 = vunpack.c.l.b16 %v1911_v13 }
  0x7a   : > { %2015 = vmatpush.bf16.msrb.mxu2 %v8518_v21  ;;  %v8494_v21 = vld [vmem:[%s8972_s12 + $0xf4] sm:$0xf0] }
  0x7b   : > { %2118 = vmatpush.bf16.msrb.mxu3 %v8528_v30  ;;  %1229 = vmatmul.bf16.gmra.mxu0 %v6323_v52  ;;  %v6706_v30 = vld [vmem:[%s8972_s12 + $0x190] sm:$0xf]  ;;  %v6531_v41 = vor.u32 %v8494_v21, %v6530_v20  ;;  %v1960_v43 = vpack.c.b16 %v1957_v29, %v1956_v28  ;;  %v8567_v52 = vld [vmem:[%s10842_s1 + $0x68] sm:$0xff]  ;;  %v6805_v20 = vld [vmem:[%s8972_s12 + $0x144] sm:$0x1] }
  0x7c   : > { %1753 = vmatpush.bf16.msrb.mxu0 %v8499_v36  ;;  %1393 = vmatmul.bf16.gmra.mxu1 %v6367_v53  ;;  %v1929_v36 = vrot.slane %v1927_v18, 4  ;;  %v6707_v44 = vor.u32 %v8522_v31, %v6706_v30  ;;  %v6804_v53 = vld [vmem:[%s8972_s12 + $0x140] sm:$0xf]  ;;  %v6807_v21 = vld [vmem:[%s8972_s12 + $0x14c] sm:$0x1]  ;;  %v8564_v28 = vld [vmem:[%s10842_s1 + $0x50] sm:$0xff] }
  0x7d   : > { %1857 = vmatpush.bf16.msrb.mxu1 %v8509_v42  ;;  %1497 = vmatmul.bf16.gmra.mxu2 %v6427_v54  ;;  %v6591_v42 = vor.u32 %v8504_v27, %v6590_v24  ;;  %v6806_v54 = vld [vmem:[%s8972_s12 + $0x148] sm:$0xf]  ;;  %v2254_v0 = vshll.u32 %v6804_v53, 16  ;;  %v8536_v24 = vld [vmem:[%s10842_s1 + $0x1d0] sm:$0xff]  ;;  %v2260_v30 = vshll.u32 %v6805_v20, 16 }
  0x7e   : > { %2016 = vmatpush.bf16.msrb.mxu2 %v8517_v34  ;;  %1659 = vmatmul.bf16.gmra.mxu3 %v1595_v55  ;;  %v1918_v34 = vrot.slane %v1916_v17, 5  ;;  %v1933_v49 = vor.u32 %v1932_v37, %v1929_v36  ;;  %v8556_v55 = vld [vmem:[%s10842_s1 + $0x20] sm:$0xff]  ;;  %v2265_v1 = vshrl.u32 %v6806_v54, 16  ;;  %v2268_v2 = vshll.u32 %v6806_v54, 16  ;;  %v8544_v27 = vld [vmem:[%s10842_s1 + $0x210] sm:$0xff]  ;;  %v8553_v36 = vld [vmem:[%s10842_s1 + $0x8] sm:$0xff] }
  0x7f   : > { %2119 = vmatpush.bf16.msrb.mxu3 %v8527_v47  ;;  %v8535_v37 = vld [vmem:[%s10842_s1 + $0x1c8] sm:$0xff]  ;;  %v8589_v54 = vld [vmem:[%s10842_s1 + $0xf8] sm:$0xff] }
  0x80   : > { %1754 = vmatpush.bf16.msrb.mxu0 %v8498_v51  ;;  %v1919_v47 = vor.u32 %v1918_v34, %v1915_v33  ;;  %v8547_v51 = vld [vmem:[%s10842_s1 + $0x228] sm:$0xff]  ;;  %v1934_v59 = vrot.slane %v1933_v49, 4  ;;  %v2270_v16 = vrot.slane %v2268_v2, 5  ;;  %v8562_v49 = vld [vmem:[%s10842_s1 + $0x40] sm:$0xff] }
  0x81   : > { %1858 = vmatpush.bf16.msrb.mxu1 %v8508_v60 }
  0x82   : > { %2017 = vmatpush.bf16.msrb.mxu2 %v8516_v50  ;;  %v1936_v50 = vshll.u32 %v6635_v40, 16  ;;  %v1920_v57 = vrot.slane %v1919_v47, 4  ;;  %v6810_v47 = vld [vmem:[%s8972_s12 + $0x158] sm:$0xf] }
  0x83   : > { %2120 = vmatpush.bf16.msrb.mxu3 %v8526_v61  ;;  %v8546_v61 = vld [vmem:[%s10842_s1 + $0x220] sm:$0xff] }
  0x84   : > { %1755 = vmatpush.bf16.msrb.mxu0 %v8497_v63  ;;  %v1938_v60 = vrot.slane %v1936_v50, 5  ;;  %v2251_v63 = vshrl.u32 %v6804_v53, 16  ;;  %v8579_v53 = vld [vmem:[%s10842_s1 + $0xb8] sm:$0xff] }
  0x85   : > { %1859 = vmatpush.bf16.msrb.mxu1 %v8507_v4  ;;  %v8495_v4 = vld [vmem:[%s8972_s12 + $0x104] sm:$0xf0] }
  0x86   : > { %2018 = vmatpush.bf16.msrb.mxu2 %v8515_v62  ;;  %v8566_v62 = vld [vmem:[%s10842_s1 + $0x60] sm:$0xff]  ;;  %v2253_v13 = vrot.slane %v2251_v63, 4  ;;  %v8550_v63 = vld [vmem:[%s8972_s12 + $0x144] sm:$0xf0] }
  0x87   : > { %2121 = vmatpush.bf16.msrb.mxu3 %v8525_v5  ;;  %v1925_v5 = vsel %vm9212_vm2, %v1920_v57, %v1924_v58  ;;  %v2293_v58 = vshrl.u32 %v6810_v47, 16 }
  0x88   : > { %1756 = vmatpush.bf16.msrb.mxu0 %v8496_v7  ;;  %v8555_v7 = vld [vmem:[%s10842_s1 + $0x18] sm:$0xff]  ;;  %v1958_v17 = vunpack.c.l.b16 %v1925_v5  ;;  %v8578_v5 = vld [vmem:[%s10842_s1 + $0xb0] sm:$0xff] }
  0x89   : > { %1860 = vmatpush.bf16.msrb.mxu1 %v8506_v14  ;;  %v2256_v14 = vrot.slane %v2254_v0, 5  ;;  %v6930_v0 = vld [vmem:[%s8972_s12 + $0x168] sm:$0xf] }
  0x8a   : > { %2019 = vmatpush.bf16.msrb.mxu2 %v8514_v6  ;;  %v1939_v6 = vsel %vm9212_vm2, %v1934_v59, %v1938_v60  ;;  %v2296_v59 = vshll.u32 %v6810_v47, 16  ;;  %v6766_v60 = vld [vmem:[%s8972_s12 + $0x1b8] sm:$0xf]  ;;  %v6770_v47 = vld [vmem:[%s8972_s12 + $0x1c8] sm:$0xf] }
  0x8b   : > { %2122 = vmatpush.bf16.msrb.mxu3 %v8524_v15  ;;  %1757 = vmatmul.bf16.vlgmr.msrb.gmra.mxu0 %v6531_v41  ;;  %v2267_v15 = vrot.slane %v2265_v1, 4  ;;  %v1959_v18 = vunpack.c.l.b16 %v1939_v6  ;;  %v2257_v29 = vor.u32 %v2256_v14, %v2253_v13  ;;  %v2262_v41 = vrot.slane %v2260_v30, 5  ;;  %v8588_v6 = vld [vmem:[%s10842_s1 + $0xf0] sm:$0xff]  ;;  %v6811_v13 = vld [vmem:[%s8972_s12 + $0x15c] sm:$0x1] }
  0x8c   : > { %2219 = vmatpush.bf16.msra.mxu0 %v8541_v11  ;;  %1861 = vmatmul.bf16.vlgmr.msrb.gmra.mxu1 %v6591_v42  ;;  %v8565_v11 = vld [vmem:[%s10842_s1 + $0x58] sm:$0xff] }
  0x8d   : > { %2378 = vmatpush.bf16.msra.mxu1 %v8549_v22  ;;  %2020 = vmatmul.bf16.vlgmr.msrb.gmra.mxu2 %v1960_v43  ;;  %v8523_v22 = vld [vmem:[%s8972_s12 + $0x1a4] sm:$0xf0]  ;;  %v2271_v31 = vor.u32 %v2270_v16, %v2267_v15  ;;  %v1961_v33 = vpack.c.b16 %v1959_v18, %v1958_v17  ;;  %v2258_v40 = vrot.slane %v2257_v29, 4 }
  0x8e   : > { %2563 = vmatpush.bf16.msra.mxu2 %v8559_v10  ;;  %2123 = vmatmul.bf16.vlgmr.msrb.gmra.mxu3 %v6707_v44  ;;  %v8545_v10 = vld [vmem:[%s10842_s1 + $0x218] sm:$0xff]  ;;  %v6711_v34 = vor.u32 %v8523_v22, %v6710_v19  ;;  %v8552_v44 = vld [vmem:[%s10842_s1] sm:$0xff] }
  0x8f   : > { %2666 = vmatpush.bf16.msra.mxu3 %v8569_v23  ;;  %v8554_v23 = vld [vmem:[%s10842_s1 + $0x10] sm:$0xff]  ;;  %v2272_v42 = vrot.slane %v2271_v31, 4  ;;  %v2263_v50 = vsel %vm9212_vm2, %v2258_v40, %v2262_v41 }
  0x90   : > { %2220 = vmatpush.bf16.msra.mxu0 %v8540_v26  ;;  %v6595_v26 = vor.u32 %v8505_v12, %v6594_v9  ;;  %v2322_v1 = vunpack.c.l.b16 %v2263_v50  ;;  %v6809_v12 = vld [vmem:[%s8972_s12 + $0x154] sm:$0x1] }
  0x91   : > { %2379 = vmatpush.bf16.msra.mxu1 %v8548_v32  ;;  %v2274_v32 = vshll.u32 %v6807_v21, 16  ;;  %v2288_v21 = vshll.u32 %v6809_v12, 16 }
  0x92   : > { %2564 = vmatpush.bf16.msra.mxu2 %v8558_v25  ;;  %v6535_v25 = vor.u32 %v8495_v4, %v6534_v3  ;;  %v8560_v3 = vld [vmem:[%s8972_s12 + $0x16c] sm:$0xf0] }
  0x93   : > { %2667 = vmatpush.bf16.msra.mxu3 %v8568_v38  ;;  %v8543_v38 = vld [vmem:[%s10842_s1 + $0x208] sm:$0xff]  ;;  %v2276_v43 = vrot.slane %v2274_v32, 5  ;;  %v8598_v4 = vld [vmem:[%s10842_s1 + $0x130] sm:$0xff]  ;;  %v6931_v18 = vor.u32 %v8560_v3, %v6930_v0  ;;  %v2290_v29 = vrot.slane %v2288_v21, 5  ;;  %v8596_v32 = vld [vmem:[%s10842_s1 + $0x120] sm:$0xff] }
  0x94   : > { %2221 = vmatpush.bf16.msra.mxu0 %v8539_v46  ;;  %v6808_v46 = vld [vmem:[%s8972_s12 + $0x150] sm:$0xf]  ;;  %v8593_v3 = vld [vmem:[%s10842_s1 + $0x108] sm:$0xff] }
  0x95   : > { %2380 = vmatpush.bf16.msra.mxu1 %v8547_v51  ;;  %v2277_v51 = vsel %vm9212_vm2, %v2272_v42, %v2276_v43  ;;  %v2282_v57 = vshll.u32 %v6808_v46, 16  ;;  %v8595_v43 = vld [vmem:[%s10842_s1 + $0x118] sm:$0xff]  ;;  %v6990_v21 = vld [vmem:[%s8972_s12 + $0x190] sm:$0xf] }
  0x96   : > { %2565 = vmatpush.bf16.msra.mxu2 %v8557_v45  ;;  %v8534_v45 = vld [vmem:[%s10842_s1 + $0x1c0] sm:$0xff]  ;;  %v2323_v2 = vunpack.c.l.b16 %v2277_v51  ;;  %v6874_v51 = vld [vmem:[%s8972_s12 + $0x150] sm:$0xf] }
  0x97   : > { %2668 = vmatpush.bf16.msra.mxu3 %v8567_v52  ;;  %v8599_v52 = vld [vmem:[%s10842_s1 + $0x138] sm:$0xff]  ;;  %v2284_v9 = vrot.slane %v2282_v57, 5 }
  0x98   : > { %2222 = vmatpush.bf16.msra.mxu0 %v8538_v56  ;;  %v2279_v56 = vshrl.u32 %v6808_v46, 16  ;;  %v2326_v16 = vpack.c.b16 %v2323_v2, %v2322_v1  ;;  %v8605_v46 = vld [vmem:[%s10842_s1 + $0x158] sm:$0xff] }
  0x99   : > { %2381 = vmatpush.bf16.msra.mxu1 %v8546_v61  ;;  %v8532_v61 = vld [vmem:[%s8972_s12 + $0x1bc] sm:$0xf0] }
  0x9a   : > { %2566 = vmatpush.bf16.msra.mxu2 %v8556_v55  ;;  %v8609_v55 = vld [vmem:[%s10842_s1 + $0x178] sm:$0xff]  ;;  %v6767_v14 = vor.u32 %v8532_v61, %v6766_v60 }
  0x9b   : > { %2669 = vmatpush.bf16.msra.mxu3 %v8566_v62  ;;  %1762 = vmatmul.bf16.gmra.mxu0 %v6535_v25  ;;  %v6870_v62 = vld [vmem:[%s8972_s12 + $0x140] sm:$0xf]  ;;  %v8577_v25 = vld [vmem:[%s10842_s1 + $0xa8] sm:$0xff] }
  0x9c   : > { %2223 = vmatpush.bf16.msra.mxu0 %v8537_v8  ;;  %1866 = vmatmul.bf16.gmra.mxu1 %v6595_v26  ;;  %v2281_v8 = vrot.slane %v2279_v56, 4  ;;  %v6871_v17 = vor.u32 %v8550_v63, %v6870_v62  ;;  %v8587_v26 = vld [vmem:[%s10842_s1 + $0xe8] sm:$0xff]  ;;  %v8574_v56 = vld [vmem:[%s10842_s1 + $0x90] sm:$0xff] }
  0x9d   : > { %2382 = vmatpush.bf16.msra.mxu1 %v8545_v10  ;;  %2025 = vmatmul.bf16.gmra.mxu2 %v1961_v33  ;;  %v2295_v10 = vrot.slane %v2293_v58, 4  ;;  %v8576_v33 = vld [vmem:[%s10842_s1 + $0xa0] sm:$0xff]  ;;  %v8584_v58 = vld [vmem:[%s10842_s1 + $0xd0] sm:$0xff] }
  0x9e   : > { %2567 = vmatpush.bf16.msra.mxu2 %v8555_v7  ;;  %2128 = vmatmul.bf16.gmra.mxu3 %v6711_v34  ;;  %v8608_v7 = vld [vmem:[%s10842_s1 + $0x170] sm:$0xff]  ;;  %v2285_v20 = vor.u32 %v2284_v9, %v2281_v8  ;;  %v8572_v8 = vld [vmem:[%s10842_s1 + $0x80] sm:$0xff] }
  0x9f   : > { %2670 = vmatpush.bf16.msra.mxu3 %v8565_v11  ;;  %v2298_v11 = vrot.slane %v2296_v59, 5  ;;  %v8604_v59 = vld [vmem:[%s10842_s1 + $0x150] sm:$0xff] }
  0xa0   : > { %2224 = vmatpush.bf16.msra.mxu0 %v8536_v24  ;;  %v8597_v24 = vld [vmem:[%s10842_s1 + $0x128] sm:$0xff] }
  0xa1   : > { %2383 = vmatpush.bf16.msra.mxu1 %v8544_v27  ;;  %v2299_v22 = vor.u32 %v2298_v11, %v2295_v10  ;;  %v8607_v27 = vld [vmem:[%s10842_s1 + $0x168] sm:$0xff]  ;;  %v8582_v10 = vld [vmem:[%s10842_s1 + $0xc0] sm:$0xff] }
  0xa2   : > { %2568 = vmatpush.bf16.msra.mxu2 %v8554_v23  ;;  %v2302_v23 = vshll.u32 %v6811_v13, 16  ;;  %v8602_v11 = vld [vmem:[%s10842_s1 + $0x140] sm:$0xff] }
  0xa3   : > { %2671 = vmatpush.bf16.msra.mxu3 %v8564_v28  ;;  %v2286_v28 = vrot.slane %v2285_v20, 4  ;;  %v2300_v30 = vrot.slane %v2299_v22, 4  ;;  %v8649_v20 = vld [vmem:[%s10842_s1 + $0x38] sm:$0xff] }
  0xa4   : > { %2225 = vmatpush.bf16.msra.mxu0 %v8535_v37  ;;  %v2304_v31 = vrot.slane %v2302_v23, 5  ;;  %v8606_v37 = vld [vmem:[%s10842_s1 + $0x160] sm:$0xff]  ;;  %v8570_v22 = vld [vmem:[%s8972_s12 + $0x194] sm:$0xf0] }
  0xa5   : > { %2384 = vmatpush.bf16.msra.mxu1 %v8543_v38  ;;  %v2291_v41 = vsel %vm9212_vm2, %v2286_v28, %v2290_v29  ;;  %v7050_v23 = vld [vmem:[%s8972_s12 + $0x1e0] sm:$0xf]  ;;  %v8628_v28 = vld [vmem:[%s10842_s1 + $0x1f0] sm:$0xff] }
  0xa6   : > { %2569 = vmatpush.bf16.msra.mxu2 %v8553_v36  ;;  %v8586_v36 = vld [vmem:[%s10842_s1 + $0xe0] sm:$0xff]  ;;  %v2305_v42 = vsel %vm9212_vm2, %v2300_v30, %v2304_v31  ;;  %v8648_v29 = vld [vmem:[%s10842_s1 + $0x30] sm:$0xff] }
  0xa7   : > { %2672 = vmatpush.bf16.msra.mxu3 %v8563_v39  ;;  %v2325_v50 = vunpack.c.l.b16 %v2305_v42  ;;  %v8590_v30 = vld [vmem:[%s8972_s12 + $0x20c] sm:$0xf0] }
  0xa8   : > { %2226 = vmatpush.bf16.msra.mxu0 %v8534_v45  ;;  %v9509_v15 = vpop.f32.mrf.mxu0  ;;  %v8585_v45 = vld [vmem:[%s10842_s1 + $0xd8] sm:$0xff]  ;;  %v7170_v31 = vld [vmem:[%s8972_s12 + $0x230] sm:$0xf] }
  0xa9   : > { %2385 = vmatpush.bf16.msra.mxu1 %v8542_v48  ;;  %v9511_v19 = vpop.f32.mrf.mxu1  ;;  %v8533_v48 = vld [vmem:[%s8972_s12 + $0x1cc] sm:$0xf0] }
  0xaa   : > { %2570 = vmatpush.bf16.msra.mxu2 %v8552_v44  ;;  %v8575_v44 = vld [vmem:[%s10842_s1 + $0x98] sm:$0xff]  ;;  %v6771_v62 = vor.u32 %v8533_v48, %v6770_v47  ;;  %v8617_v47 = vld [vmem:[%s10842_s1 + $0x1a8] sm:$0xff] }
  0xab   : > { %2673 = vmatpush.bf16.msra.mxu3 %v8562_v49  ;;  %2227 = vmatmul.bf16.vlgmr.msra.gmra.mxu0 %v6767_v14  ;;  %v2324_v49 = vunpack.c.l.b16 %v2291_v41  ;;  %v8639_v14 = vld [vmem:[%s10842_s1 + $0x238] sm:$0xff]  ;;  %v8627_v48 = vld [vmem:[%s10842_s1 + $0x1e8] sm:$0xff] }
  0xac   : > { %2769 = vmatpush.bf16.msrb.mxu0 %v8579_v53  ;;  %2386 = vmatmul.bf16.vlgmr.msra.gmra.mxu1 %v2326_v16  ;;  %v6934_v53 = vld [vmem:[%s8972_s12 + $0x178] sm:$0xf] }
  0xad   : > { %2873 = vmatpush.bf16.msrb.mxu1 %v8589_v54  ;;  %2571 = vmatmul.bf16.vlgmr.msra.gmra.mxu2 %v6871_v17  ;;  %v8561_v54 = vld [vmem:[%s8972_s12 + $0x17c] sm:$0xf0]  ;;  %v2327_v63 = vpack.c.b16 %v2325_v50, %v2324_v49  ;;  %v8619_v16 = vld [vmem:[%s10842_s1 + $0x1b8] sm:$0xff]  ;;  %v8647_v49 = vld [vmem:[%s10842_s1 + $0x28] sm:$0xff] }
  0xae   : > { %2977 = vmatpush.bf16.msrb.mxu2 %v8599_v52  ;;  %2674 = vmatmul.bf16.vlgmr.msra.gmra.mxu3 %v6931_v18  ;;  %v8551_v52 = vld [vmem:[%s8972_s12 + $0x154] sm:$0xf0]  ;;  %v6935_v2 = vor.u32 %v8561_v54, %v6934_v53  ;;  %v9674_v50 = vld [vmem:[%s10843_s2] ss:$0 sm:$0xff] }
  0xaf   : > { %3081 = vmatpush.bf16.msrb.mxu3 %v8609_v55  ;;  %v8594_v55 = vld [vmem:[%s10842_s1 + $0x110] sm:$0xff]  ;;  %v6875_v1 = vor.u32 %v8551_v52, %v6874_v51  ;;  %v8629_v18 = vld [vmem:[%s10842_s1 + $0x1f8] sm:$0xff]  ;;  %v8636_v51 = vld [vmem:[%s10842_s1 + $0x220] sm:$0xff] }
  0xb0   : > { %2770 = vmatpush.bf16.msrb.mxu0 %v8578_v5  ;;  %v9531_v34 = vpop.f32.mrf.mxu2  ;;  %v9541_v39 = vpop.f32.mrf.mxu0  ;;  %v8583_v5 = vld [vmem:[%s10842_s1 + $0xc8] sm:$0xff]  ;;  %v8616_v52 = vld [vmem:[%s10842_s1 + $0x1a0] sm:$0xff] }
  0xb1   : > { %2874 = vmatpush.bf16.msrb.mxu1 %v8588_v6  ;;  %v9539_v38 = vpop.f32.mrf.mxu3  ;;  %v9543_v40 = vpop.f32.mrf.mxu1  ;;  %v8603_v6 = vld [vmem:[%s10842_s1 + $0x148] sm:$0xff]  ;;  %v8626_v53 = vld [vmem:[%s10842_s1 + $0x1e0] sm:$0xff] }
  0xb2   : > { %2978 = vmatpush.bf16.msrb.mxu2 %v8598_v4  ;;  %v8573_v4 = vld [vmem:[%s10842_s1 + $0x88] sm:$0xff]  ;;  %v8646_v54 = vld [vmem:[%s10842_s1 + $0x20] sm:$0xff] }
  0xb3   : > { %3082 = vmatpush.bf16.msrb.mxu3 %v8608_v7  ;;  %v8592_v7 = vld [vmem:[%s10842_s1 + $0x100] sm:$0xff] }
  0xb4   : > { %2771 = vmatpush.bf16.msrb.mxu0 %v8577_v25  ;;  %v8638_v25 = vld [vmem:[%s10842_s1 + $0x230] sm:$0xff] }
  0xb5   : > { %2875 = vmatpush.bf16.msrb.mxu1 %v8587_v26  ;;  %v8618_v26 = vld [vmem:[%s10842_s1 + $0x1b0] sm:$0xff] }
  0xb6   : > { %2979 = vmatpush.bf16.msrb.mxu2 %v8597_v24  ;;  %v8580_v24 = vld [vmem:[%s8972_s12 + $0x1e4] sm:$0xf0] }
  0xb7   : > { %3083 = vmatpush.bf16.msrb.mxu3 %v8607_v27  ;;  %v7110_v27 = vld [vmem:[%s8972_s12 + $0x208] sm:$0xf]  ;;  %v7051_v41 = vor.u32 %v8580_v24, %v7050_v23 }
  0xb8   : > { %2772 = vmatpush.bf16.msrb.mxu0 %v8576_v33  ;;  %v9573_v57 = vpop.f32.mrf.mxu2  ;;  %v9583_v61 = vpop.f32.mrf.mxu0 }
  0xb9   : > { %2876 = vmatpush.bf16.msrb.mxu1 %v8586_v36  ;;  %v9581_v60 = vpop.f32.mrf.mxu3  ;;  %v9585_v0 = vpop.f32.mrf.mxu1 }
  0xba   : > { %2980 = vmatpush.bf16.msrb.mxu2 %v8596_v32  ;;  %v8600_v32 = vld [vmem:[%s8972_s12 + $0x234] sm:$0xf0] }
  0xbb   : > { %3084 = vmatpush.bf16.msrb.mxu3 %v8606_v37  ;;  %2232 = vmatmul.bf16.gmra.mxu0 %v6771_v62  ;;  %v6991_v37 = vor.u32 %v8570_v22, %v6990_v21  ;;  %v8644_v21 = vld [vmem:[%s10842_s1 + $0x10] sm:$0xff] }
  0xbc   : > { %2773 = vmatpush.bf16.msrb.mxu0 %v8575_v44  ;;  %2391 = vmatmul.bf16.gmra.mxu1 %v2327_v63  ;;  %v7111_v44 = vor.u32 %v8590_v30, %v7110_v27  ;;  %v8635_v63 = vld [vmem:[%s10842_s1 + $0x218] sm:$0xff] }
  0xbd   : > { %2877 = vmatpush.bf16.msrb.mxu1 %v8585_v45  ;;  %2576 = vmatmul.bf16.gmra.mxu2 %v6875_v1  ;;  %v7171_v45 = vor.u32 %v8600_v32, %v7170_v31  ;;  %v6994_v1 = vld [vmem:[%s8972_s12 + $0x1a0] sm:$0xf]  ;;  %v396_v31 = vadd.f32 %v9674_v50, %v9541_v39  ;;  %v8613_v32 = vld [vmem:[%s10842_s1 + $0x188] sm:$0xff] }
  0xbe   : > { %2981 = vmatpush.bf16.msrb.mxu2 %v8595_v43  ;;  %2679 = vmatmul.bf16.gmra.mxu3 %v6935_v2  ;;  %v8571_v2 = vld [vmem:[%s8972_s12 + $0x1a4] sm:$0xf0] }
  0xbf   : > { %3085 = vmatpush.bf16.msrb.mxu3 %v8605_v46  ;;  %v8637_v46 = vld [vmem:[%s10842_s1 + $0x228] sm:$0xff] }
  0xc0   : > { %2774 = vmatpush.bf16.msrb.mxu0 %v8574_v56  ;;  %v9605_v9 = vpop.f32.mrf.mxu2  ;;  %v9615_v13 = vpop.f32.mrf.mxu0  ;;  %v8643_v39 = vld [vmem:[%s10842_s1 + $0x8] sm:$0xff] }
  0xc1   : > { %2878 = vmatpush.bf16.msrb.mxu1 %v8584_v58  ;;  %v9613_v12 = vpop.f32.mrf.mxu3  ;;  %v9623_v17 = vpop.f32.mrf.mxu1 }
  0xc2   : > { %2982 = vmatpush.bf16.msrb.mxu2 %v8594_v55  ;;  %v395_v55 = vadd.f32 %v9674_v50, %v9509_v15  ;;  %v8615_v15 = vld [vmem:[%s10842_s1 + $0x198] sm:$0xff] }
  0xc3   : > { %3086 = vmatpush.bf16.msrb.mxu3 %v8604_v59 }
  0xc4   : > { %2775 = vmatpush.bf16.msrb.mxu0 %v8573_v4  ;;  %v8625_v4 = vld [vmem:[%s10842_s1 + $0x1d8] sm:$0xff] }
  0xc5   : > { %2879 = vmatpush.bf16.msrb.mxu1 %v8583_v5  ;;  %v8645_v5 = vld [vmem:[%s10842_s1 + $0x18] sm:$0xff] }
  0xc6   : > { %2983 = vmatpush.bf16.msrb.mxu2 %v8593_v3  ;;  %v7054_v3 = vld [vmem:[%s8972_s12 + $0x1f0] sm:$0xf] }
  0xc7   : > { %3087 = vmatpush.bf16.msrb.mxu3 %v8603_v6  ;;  %v8837_v6 = vmov 0  }
  0xc8   : > { %2776 = vmatpush.bf16.msrb.mxu0 %v8572_v8  ;;  %v9651_v33 = vpop.f32.mrf.mxu2  ;;  %v9655_v42 = vpop.f32.mrf.mxu0  ;;  %2462 = vst [vmem:[#allocation2 + $0x28] sm:$0xf] %v8837_v6  ;;  %v8581_v8 = vld [vmem:[%s8972_s12 + $0x1f4] sm:$0xf0] }
  0xc9   : > { %2880 = vmatpush.bf16.msrb.mxu1 %v8582_v10  ;;  %v9653_v36 = vpop.f32.mrf.mxu3  ;;  %v9657_v43 = vpop.f32.mrf.mxu1  ;;  %v7114_v10 = vld [vmem:[%s8972_s12 + $0x218] sm:$0xf]  ;;  %2467 = vst [vmem:[#allocation2 + $0x30] sm:$0xc] %v8837_v6 }
  0xca   : > { %2984 = vmatpush.bf16.msrb.mxu2 %v8592_v7  ;;  %v500_v7 = vadd.f32 %v9511_v19, %v395_v55  ;;  %277 = vst [vmem:[#allocation2 + $0x78] sm:$0xc] %v8837_v6  ;;  %v8624_v19 = vld [vmem:[%s10842_s1 + $0x1d0] sm:$0xff]  ;;  %v8687_v55 = vld [vmem:[%s10842_s1 + $0x138] sm:$0xff] }
  0xcb   : > { %3088 = vmatpush.bf16.msrb.mxu3 %v8602_v11  ;;  %2777 = vmatmul.bf16.vlgmr.msrb.gmra.mxu0 %v6991_v37  ;;  %v8591_v11 = vld [vmem:[%s8972_s12 + $0x21c] sm:$0xf0]  ;;  %281 = vst [vmem:[#allocation2 + $0x80] sm:$0xc] %v8837_v6  ;;  %v8623_v37 = vld [vmem:[%s10842_s1 + $0x1c8] sm:$0xff] }
  0xcc   : > { %3185 = vmatpush.bf16.msra.mxu0 %v8619_v16  ;;  %2881 = vmatmul.bf16.vlgmr.msrb.gmra.mxu1 %v7051_v41  ;;  %v8601_v16 = vld [vmem:[%s8972_s12 + $0x244] sm:$0xf0]  ;;  %285 = vst [vmem:[#allocation2 + $0x88] sm:$0xc] %v8837_v6  ;;  %v605_v22 = vadd.f32 %v9531_v34, %v500_v7  ;;  %v7350_v7 = vld [vmem:[%s8972_s12 + $0x58] sm:$0xf] }
  0xcd   : > { %3289 = vmatpush.bf16.msra.mxu1 %v8629_v18  ;;  %2985 = vmatmul.bf16.vlgmr.msrb.gmra.mxu2 %v7111_v44  ;;  %v8634_v18 = vld [vmem:[%s10842_s1 + $0x210] sm:$0xff]  ;;  %289 = vst [vmem:[#allocation2 + $0x90] sm:$0xc] %v8837_v6  ;;  %v8633_v34 = vld [vmem:[%s10842_s1 + $0x208] sm:$0xff]  ;;  %v501_v44 = vadd.f32 %v9543_v40, %v396_v31  ;;  %v8622_v40 = vld [vmem:[%s10842_s1 + $0x1c0] sm:$0xff] }
  0xce   : > { %3393 = vmatpush.bf16.msra.mxu2 %v8639_v14  ;;  %3089 = vmatmul.bf16.vlgmr.msrb.gmra.mxu3 %v7171_v45  ;;  %v7174_v14 = vld [vmem:[%s8972_s12 + $0x240] sm:$0xf]  ;;  %2471 = vst [vmem:[#allocation2 + $0x38] sm:$0xc] %v8837_v6  ;;  %v710_v41 = vadd.f32 %v9539_v38, %v605_v22  ;;  %v397_v38 = vadd.f32 %v9674_v50, %v9583_v61  ;;  %v8677_v61 = vld [vmem:[%s10842_s1 + $0xf8] sm:$0xff]  ;;  %v8657_v31 = vld [vmem:[%s10842_s1 + $0x68] sm:$0xff] }
  0xcf   : > { %3554 = vmatpush.bf16.msra.mxu3 %v8649_v20  ;;  %v8614_v20 = vld [vmem:[%s10842_s1 + $0x190] sm:$0xff]  ;;  %v7175_v30 = vor.u32 %v8601_v16, %v7174_v14  ;;  %2475 = vst [vmem:[#allocation2 + $0x40] sm:$0xc] %v8837_v6  ;;  %v8640_v14 = vld [vmem:[%s8972_s12 + $0x194] sm:$0xf0] }
  0xd0   : > { %3186 = vmatpush.bf16.msra.mxu0 %v8618_v26  ;;  %v9690_v56 = vpop.f32.mrf.mxu2  ;;  %v9694_v59 = vpop.f32.mrf.mxu0  ;;  %v7055_v26 = vor.u32 %v8581_v8, %v7054_v3  ;;  %v815_v45 = vadd.f32 %v9655_v42, %v710_v41  ;;  %2479 = vst [vmem:[#allocation2 + $0x48] sm:$0xc] %v8837_v6  ;;  %v8642_v42 = vld [vmem:[%s10842_s1] sm:$0xff]  ;;  %v7290_v3 = vld [vmem:[%s8972_s12 + $0x30] sm:$0xf] }
  0xd1   : > { %3290 = vmatpush.bf16.msra.mxu1 %v8628_v28  ;;  %v9692_v58 = vpop.f32.mrf.mxu3  ;;  %v9696_v62 = vpop.f32.mrf.mxu1  ;;  %3433 = vst [vmem:[#allocation2] sm:$0xf] %v8837_v6  ;;  %v8620_v6 = vld [vmem:[%s8972_s12 + $0x34] sm:$0xf0] }
  0xd2   : > { %3394 = vmatpush.bf16.msra.mxu2 %v8638_v25  ;;  %v6995_v25 = vor.u32 %v8571_v2, %v6994_v1  ;;  %v7230_v1 = vld [vmem:[%s8972_s12 + $0x8] sm:$0xf]  ;;  %v8610_v2 = vld [vmem:[%s8972_s12 + $0xc] sm:$0xf0]  ;;  %v7291_v22 = vor.u32 %v8620_v6, %v7290_v3  ;;  %v8673_v3 = vld [vmem:[%s10842_s1 + $0xd8] sm:$0xff] }
  0xd3   : > { %3555 = vmatpush.bf16.msra.mxu3 %v8648_v29  ;;  %v7115_v29 = vor.u32 %v8591_v11, %v7114_v10  ;;  %v8630_v10 = vld [vmem:[%s8972_s12 + $0x5c] sm:$0xf0]  ;;  %v7398_v11 = vld [vmem:[%s8972_s12 + $0x190] sm:$0xf]  ;;  %v8621_v6 = vld [vmem:[%s8972_s12 + $0x44] sm:$0xf0] }
  0xd4   : > { %3187 = vmatpush.bf16.msra.mxu0 %v8617_v47  ;;  %v8612_v47 = vld [vmem:[%s10842_s1 + $0x180] sm:$0xff] }
  0xd5   : > { %3291 = vmatpush.bf16.msra.mxu1 %v8627_v48  ;;  %v606_v48 = vadd.f32 %v9573_v57, %v501_v44  ;;  %v8667_v57 = vld [vmem:[%s10842_s1 + $0xb8] sm:$0xff]  ;;  %v7496_v44 = vld [vmem:[%s8972_s12 + $0x140] sm:$0xf] }
  0xd6   : > { %3395 = vmatpush.bf16.msra.mxu2 %v8637_v46  ;;  %v8632_v46 = vld [vmem:[%s10842_s1 + $0x200] sm:$0xff] }
  0xd7   : > { %3556 = vmatpush.bf16.msra.mxu3 %v8647_v49 }
  0xd8   : > { %3188 = vmatpush.bf16.msra.mxu0 %v8616_v52  ;;  %v9732_v23 = vpop.f32.mrf.mxu2  ;;  %v9736_v27 = vpop.f32.mrf.mxu0  ;;  %v8659_v52 = vld [vmem:[%s10842_s1 + $0x78] sm:$0xff] }
  0xd9   : > { %3292 = vmatpush.bf16.msra.mxu1 %v8626_v53  ;;  %v9734_v24 = vpop.f32.mrf.mxu3  ;;  %v9738_v28 = vpop.f32.mrf.mxu1 }
  0xda   : > { %3396 = vmatpush.bf16.msra.mxu2 %v8636_v51 }
  0xdb   : > { %3557 = vmatpush.bf16.msra.mxu3 %v8646_v54  ;;  %2782 = vmatmul.bf16.gmra.mxu0 %v6995_v25  ;;  %v398_v25 = vadd.f32 %v9674_v50, %v9615_v13  ;;  %v8675_v13 = vld [vmem:[%s10842_s1 + $0xe8] sm:$0xff] }
  0xdc   : > { %3189 = vmatpush.bf16.msra.mxu0 %v8615_v15  ;;  %2886 = vmatmul.bf16.gmra.mxu1 %v7055_v26  ;;  %v502_v15 = vadd.f32 %v9585_v0, %v397_v38  ;;  %v8658_v0 = vld [vmem:[%s10842_s1 + $0x70] sm:$0xff]  ;;  %v7399_v26 = vor.u32 %v8640_v14, %v7398_v11  ;;  %v8641_v14 = vld [vmem:[%s8972_s12 + $0x1a4] sm:$0xf0] }
  0xdd   : > { %3293 = vmatpush.bf16.msra.mxu1 %v8625_v4  ;;  %2990 = vmatmul.bf16.gmra.mxu2 %v7115_v29  ;;  %v711_v4 = vadd.f32 %v9581_v60, %v606_v48  ;;  %v8666_v60 = vld [vmem:[%s10842_s1 + $0xb0] sm:$0xff]  ;;  %v503_v41 = vadd.f32 %v9623_v17, %v398_v25  ;;  %v8664_v17 = vld [vmem:[%s10842_s1 + $0xa0] sm:$0xff] }
  0xde   : > { %3397 = vmatpush.bf16.msra.mxu2 %v8635_v63  ;;  %3094 = vmatmul.bf16.gmra.mxu3 %v7175_v30  ;;  %v920_v63 = vadd.f32 %v9657_v43, %v815_v45  ;;  %v8676_v43 = vld [vmem:[%s10842_s1 + $0xf0] sm:$0xff]  ;;  %v607_v16 = vadd.f32 %v9605_v9, %v502_v15 }
  0xdf   : > { %3558 = vmatpush.bf16.msra.mxu3 %v8645_v5  ;;  %v816_v8 = vadd.f32 %v9694_v59, %v711_v4  ;;  %v608_v38 = vadd.f32 %v9651_v33, %v503_v41  ;;  %v3689_v33 = vshrl.u32 %v7496_v44, 16  ;;  %v8655_v4 = vld [vmem:[%s10842_s1 + $0x58] sm:$0xff] }
  0xe0   : > { %3190 = vmatpush.bf16.msra.mxu0 %v8614_v20  ;;  %v9772_v49 = vpop.f32.mrf.mxu2  ;;  %v9782_v53 = vpop.f32.mrf.mxu0  ;;  %v1025_v5 = vadd.f32 %v9690_v56, %v920_v63  ;;  %v8686_v56 = vld [vmem:[%s10842_s1 + $0x130] sm:$0xff] }
  0xe1   : > { %3294 = vmatpush.bf16.msra.mxu1 %v8624_v19  ;;  %v9774_v51 = vpop.f32.mrf.mxu3  ;;  %v9784_v54 = vpop.f32.mrf.mxu1  ;;  %v921_v29 = vadd.f32 %v9696_v62, %v816_v8  ;;  %v7402_v8 = vld [vmem:[%s8972_s12 + $0x1a0] sm:$0xf] }
  0xe2   : > { %3398 = vmatpush.bf16.msra.mxu2 %v8634_v18  ;;  %v1130_v18 = vadd.f32 %v9692_v58, %v1025_v5  ;;  %v7351_v58 = vor.u32 %v8630_v10, %v7350_v7  ;;  %v7294_v5 = vld [vmem:[%s8972_s12 + $0x40] sm:$0xf]  ;;  %v3691_v10 = vrot.slane %v3689_v33, 4 }
  0xe3   : > { %3559 = vmatpush.bf16.msra.mxu3 %v8644_v21  ;;  %v7231_v21 = vor.u32 %v8610_v2, %v7230_v1  ;;  %v1026_v62 = vadd.f32 %v9732_v23, %v921_v29  ;;  %v8656_v23 = vld [vmem:[%s10842_s1 + $0x60] sm:$0xff]  ;;  %v8682_v29 = vld [vmem:[%s10842_s1 + $0x110] sm:$0xff] }
  0xe4   : > { %3191 = vmatpush.bf16.msra.mxu0 %v8613_v32  ;;  %v8685_v32 = vld [vmem:[%s10842_s1 + $0x128] sm:$0xff]  ;;  %v8611_v2 = vld [vmem:[%s8972_s12 + $0x1c] sm:$0xf0] }
  0xe5   : > { %3295 = vmatpush.bf16.msra.mxu1 %v8623_v37  ;;  %v712_v37 = vadd.f32 %v9613_v12, %v607_v16  ;;  %v8674_v12 = vld [vmem:[%s10842_s1 + $0xe0] sm:$0xff] }
  0xe6   : > { %3399 = vmatpush.bf16.msra.mxu2 %v8633_v34  ;;  %v8665_v34 = vld [vmem:[%s10842_s1 + $0xa8] sm:$0xff]  ;;  %v7497_v16 = vld [vmem:[%s8972_s12 + $0x144] sm:$0x1] }
  0xe7   : > { %3560 = vmatpush.bf16.msra.mxu3 %v8643_v39  ;;  %v817_v45 = vadd.f32 %v9736_v27, %v712_v37  ;;  %v8684_v27 = vld [vmem:[%s10842_s1 + $0x120] sm:$0xff]  ;;  %v3698_v37 = vshll.u32 %v7497_v16, 16 }
  0xe8   : > { %3192 = vmatpush.bf16.msra.mxu0 %v8612_v47  ;;  %v9820_v20 = vpop.f32.mrf.mxu2  ;;  %v1225_v9 = vpop.f32.mrf.mxu0  ;;  %v7498_v47 = vld [vmem:[%s8972_s12 + $0x148] sm:$0xf] }
  0xe9   : > { %3296 = vmatpush.bf16.msra.mxu1 %v8622_v40  ;;  %v9822_v19 = vpop.f32.mrf.mxu3  ;;  %v9831_v59 = vpop.f32.mrf.mxu1  ;;  %v1235_v30 = vadd.f32 %v1225_v9, %v1130_v18  ;;  %v1131_v40 = vadd.f32 %v9734_v24, %v1026_v62  ;;  %v3706_v63 = vshll.u32 %v7498_v47, 16  ;;  %v922_v15 = vadd.f32 %v9738_v28, %v817_v45  ;;  %v9875_v24 = vld [vmem:[%s8972_s12 + $0x18] sm:$0xf]  ;;  %v8654_v9 = vld [vmem:[%s10842_s1 + $0x50] sm:$0xff] }
  0xea   : > { %3400 = vmatpush.bf16.msra.mxu2 %v8632_v46  ;;  %v713_v28 = vadd.f32 %v9653_v36, %v608_v38  ;;  %v8631_v36 = vld [vmem:[%s8972_s12 + $0x6c] sm:$0xf0] }
  0xeb   : > { %3561 = vmatpush.bf16.msra.mxu3 %v8642_v42  ;;  %1239 = vst [vmem:[%s9829_s7] sm:$0xff] %v1235_v30  ;;  %v1243_v39 = vmax.f32 %v1235_v30, 0.0  ;;  %3193 = vmatmul.bf16.vlgmr.msra.gmra.mxu0 %v7231_v21  ;;  %v1027_v7 = vadd.f32 %v9772_v49, %v922_v15  ;;  %v3708_v21 = vrot.slane %v3706_v63, 5  ;;  %v8672_v49 = vld [vmem:[%s10842_s1 + $0xd0] sm:$0xff] }
  0xec   : > { %3657 = vmatpush.bf16.msrb.mxu0 %v8659_v52  ;;  %3297 = vmatmul.bf16.vlgmr.msra.gmra.mxu1 %v7291_v22  ;;  %v818_v22 = vadd.f32 %v9782_v53, %v713_v28  ;;  %v8662_v53 = vld [vmem:[%s10842_s1 + $0x90] sm:$0xff]  ;;  %v8660_v28 = vld [vmem:[%s10842_s1 + $0x80] sm:$0xff] }
  0xed   : > { %3816 = vmatpush.bf16.msrb.mxu1 %v8667_v57  ;;  %3401 = vmatmul.bf16.vlgmr.msra.gmra.mxu2 %v7351_v58  ;;  %v1247_v46 = vpack.c.bf16 %v1243_v39, %v1243_v39  ;;  %v7499_v58 = vld [vmem:[%s8972_s12 + $0x14c] sm:$0x1]  ;;  %v1132_v30 = vadd.f32 %v9774_v51, %v1027_v7  ;;  %v7500_v38 = vld [vmem:[%s8972_s12 + $0x150] sm:$0xf]  ;;  %v8715_v7 = vld [vmem:[%s10842_s1 + $0x1f8] sm:$0xff] }
  0xee   : > { %3919 = vmatpush.bf16.msrb.mxu2 %v8677_v61  ;;  %3562 = vmatmul.bf16.vlgmr.msra.gmra.mxu3 %v7399_v26  ;;  %v3692_v61 = vshll.u32 %v7496_v44, 16  ;;  %v7235_v26 = vor.u32 %v8611_v2, %v9875_v24  ;;  %v7403_v44 = vor.u32 %v8641_v14, %v7402_v8  ;;  %v923_v51 = vadd.f32 %v9784_v54, %v818_v22  ;;  %v8681_v54 = vld [vmem:[%s10842_s1 + $0x108] sm:$0xff]  ;;  %v8670_v2 = vld [vmem:[%s10842_s1 + $0xc0] sm:$0xff] }
  0xef   : > { %4023 = vmatpush.bf16.msrb.mxu3 %v8687_v55  ;;  %1251 = vst [vmem:[#allocation2 + $0x78] sm:$0x3] %v1247_v46  ;;  %v3703_v55 = vshrl.u32 %v7498_v47, 16  ;;  %v3712_v46 = vshll.u32 %v7499_v58, 16  ;;  %v8653_v47 = vld [vmem:[%s10842_s1 + $0x48] sm:$0xff]  ;;  %v3717_v15 = vshrl.u32 %v7500_v38, 16 }
  0xf0   : > { %3658 = vmatpush.bf16.msrb.mxu0 %v8658_v0  ;;  %v9867_v42 = vpop.f32.mrf.mxu2  ;;  %v1227_v52 = vpop.f32.mrf.mxu0  ;;  %v8683_v0 = vld [vmem:[%s10842_s1 + $0x118] sm:$0xff]  ;;  %v3694_v11 = vrot.slane %v3692_v61, 5 }
  0xf1   : > { %3817 = vmatpush.bf16.msrb.mxu1 %v8666_v60  ;;  %v9869_v48 = vpop.f32.mrf.mxu3  ;;  %v9871_v57 = vpop.f32.mrf.mxu1  ;;  %v1236_v1 = vadd.f32 %v1227_v52, %v1131_v40  ;;  %v3705_v18 = vrot.slane %v3703_v55, 4  ;;  %v1028_v40 = vadd.f32 %v9820_v20, %v923_v51  ;;  %v3700_v52 = vrot.slane %v3698_v37, 5  ;;  %v8652_v20 = vld [vmem:[%s10842_s1 + $0x40] sm:$0xff]  ;;  %v7503_v58 = vld [vmem:[%s8972_s12 + $0x15c] sm:$0x1] }
  0xf2   : > { %3920 = vmatpush.bf16.msrb.mxu2 %v8676_v43  ;;  %v8663_v43 = vld [vmem:[%s10842_s1 + $0x98] sm:$0xff]  ;;  %v3714_v63 = vrot.slane %v3712_v46, 5  ;;  %v3719_v14 = vrot.slane %v3717_v15, 4  ;;  %v8703_v15 = vld [vmem:[%s10842_s1 + $0x1a8] sm:$0xff] }
  0xf3   : > { %4024 = vmatpush.bf16.msrb.mxu3 %v8686_v56  ;;  %1240 = vst [vmem:[%s9829_s7 + $0x8] sm:$0xff] %v1236_v1  ;;  %v1244_v60 = vmax.f32 %v1236_v1, 0.0  ;;  %v7354_v56 = vld [vmem:[%s8972_s12 + $0x68] sm:$0xf]  ;;  %v3709_v45 = vor.u32 %v3708_v21, %v3705_v18  ;;  %v3720_v1 = vshll.u32 %v7500_v38, 16 }
  0xf4   : > { %3659 = vmatpush.bf16.msrb.mxu0 %v8657_v31  ;;  %v7355_v41 = vor.u32 %v8631_v36, %v7354_v56  ;;  %v7501_v21 = vld [vmem:[%s8972_s12 + $0x154] sm:$0x1]  ;;  %v8668_v37 = vld [vmem:[%s8972_s12 + $0x234] sm:$0xf0] }
  0xf5   : > { %3818 = vmatpush.bf16.msrb.mxu1 %v8665_v34  ;;  %v1248_v25 = vpack.c.bf16 %v1244_v60, %v1244_v60  ;;  %v7295_v34 = vor.u32 %v8621_v6, %v7294_v5  ;;  %v3710_v55 = vrot.slane %v3709_v45, 4  ;;  %v8680_v5 = vld [vmem:[%s10842_s1 + $0x100] sm:$0xff]  ;;  %v1133_v6 = vadd.f32 %v9822_v19, %v1028_v40  ;;  %v8695_v60 = vld [vmem:[%s10842_s1 + $0x178] sm:$0xff]  ;;  %v8713_v40 = vld [vmem:[%s10842_s1 + $0x1e8] sm:$0xff] }
  0xf6   : > { %3921 = vmatpush.bf16.msrb.mxu2 %v8675_v13  ;;  %v3722_v16 = vrot.slane %v3720_v1, 5  ;;  %v3726_v45 = vshll.u32 %v7501_v21, 16  ;;  %v7634_v51 = vld [vmem:[%s8972_s12 + $0x258] sm:$0xf]  ;;  %v8721_v1 = vld [vmem:[%s10842_s1 + $0x228] sm:$0xff]  ;;  %v8702_v21 = vld [vmem:[%s10842_s1 + $0x1a0] sm:$0xff] }
  0xf7   : > { %4025 = vmatpush.bf16.msrb.mxu3 %v8685_v32  ;;  %1252 = vst [vmem:[#allocation2 + $0x80] sm:$0x3] %v1248_v25  ;;  %v3695_v32 = vor.u32 %v3694_v11, %v3691_v10  ;;  %v3715_v8 = vsel %vm9212_vm2, %v3710_v55, %v3714_v63  ;;  %v8705_v10 = vld [vmem:[%s10842_s1 + $0x1b8] sm:$0xff] }
  0xf8   : > { %3660 = vmatpush.bf16.msrb.mxu0 %v8656_v23  ;;  %v9916_v13 = vpop.f32.mrf.mxu2  ;;  %v1230_v62 = vpop.f32.mrf.mxu0  ;;  %v8671_v23 = vld [vmem:[%s10842_s1 + $0xc8] sm:$0xff]  ;;  %v8723_v11 = vld [vmem:[%s10842_s1 + $0x238] sm:$0xff] }
  0xf9   : > { %3819 = vmatpush.bf16.msrb.mxu1 %v8664_v17  ;;  %v9918_v31 = vpop.f32.mrf.mxu3  ;;  %v9920_v39 = vpop.f32.mrf.mxu1  ;;  %v8661_v17 = vld [vmem:[%s10842_s1 + $0x88] sm:$0xff]  ;;  %v3696_v61 = vrot.slane %v3695_v32, 4  ;;  %v8694_v32 = vld [vmem:[%s10842_s1 + $0x170] sm:$0xff] }
  0xfa   : > { %3922 = vmatpush.bf16.msrb.mxu2 %v8674_v12  ;;  %v1237_v12 = vadd.f32 %v1230_v62, %v1132_v30  ;;  %v7574_v30 = vld [vmem:[%s8972_s12 + $0x230] sm:$0xf] }
  0xfb   : > { %4026 = vmatpush.bf16.msrb.mxu3 %v8684_v27  ;;  %v7502_v27 = vld [vmem:[%s8972_s12 + $0x158] sm:$0xf]  ;;  %3198 = vmatmul.bf16.gmra.mxu0 %v7235_v26  ;;  %v3701_v19 = vsel %vm9212_vm2, %v3696_v61, %v3700_v52  ;;  %v8704_v62 = vld [vmem:[%s10842_s1 + $0x1b0] sm:$0xff]  ;;  %v7575_v55 = vor.u32 %v8668_v37, %v7574_v30 }
  0xfc   : > { %3661 = vmatpush.bf16.msrb.mxu0 %v8655_v4  ;;  %1241 = vst [vmem:[%s9829_s7 + $0x10] sm:$0xff] %v1237_v12  ;;  %v1245_v33 = vmax.f32 %v1237_v12, 0.0  ;;  %3302 = vmatmul.bf16.gmra.mxu1 %v7295_v34  ;;  %v3734_v4 = vshll.u32 %v7502_v27, 16  ;;  %v8714_v34 = vld [vmem:[%s10842_s1 + $0x1f0] sm:$0xff]  ;;  %v8678_v12 = vld [vmem:[%s8972_s12 + $0x25c] sm:$0xf0] }
  0xfd   : > { %3820 = vmatpush.bf16.msrb.mxu1 %v8663_v43  ;;  %3406 = vmatmul.bf16.gmra.mxu2 %v7355_v41  ;;  %v8722_v41 = vld [vmem:[%s10842_s1 + $0x230] sm:$0xff]  ;;  %v7635_v63 = vor.u32 %v8678_v12, %v7634_v51  ;;  %v10085_v51 = vld [vmem:[%s8972_s12 + $0x244] sm:$0xf0]  ;;  %v7673_v12 = vld [vmem:[%s8972_s12 + $0x1e4] sm:$0x1] }
  0xfe   : > { %3923 = vmatpush.bf16.msrb.mxu2 %v8673_v3  ;;  %3567 = vmatmul.bf16.gmra.mxu3 %v7403_v44  ;;  %v1249_v24 = vpack.c.bf16 %v1245_v33, %v1245_v33  ;;  %v3731_v3 = vshrl.u32 %v7502_v27, 16  ;;  %v3736_v25 = vrot.slane %v3734_v4, 5  ;;  %v3723_v44 = vor.u32 %v3722_v16, %v3719_v14  ;;  %v8693_v33 = vld [vmem:[%s10842_s1 + $0x168] sm:$0xff]  ;;  %v10063_v30 = vld [vmem:[%s8972_s12 + $0x1cc] sm:$0xf0] }
  0xff   : > { %4027 = vmatpush.bf16.msrb.mxu3 %v8683_v0  ;;  %v10701_v14 = vld [vmem:[%s10844_s3 + $0x230] sm:$0xff] }
 0x100   : > { %3662 = vmatpush.bf16.msrb.mxu0 %v8654_v9  ;;  %1253 = vst [vmem:[#allocation2 + $0x88] sm:$0x3] %v1249_v24  ;;  %v9952_v43 = vpop.f32.mrf.mxu2  ;;  %v1232_v56 = vpop.f32.mrf.mxu0  ;;  %v3733_v22 = vrot.slane %v3731_v3, 4  ;;  %v8650_v9 = vld [vmem:[%s8972_s12 + $0x1bc] sm:$0xf0]  ;;  %v10015_v24 = vrot.slane %v3723_v44, 4 }
 0x101   : > { %3821 = vmatpush.bf16.msrb.mxu1 %v8662_v53  ;;  %v9954_v0 = vpop.f32.mrf.mxu3  ;;  %v9962_v36 = vpop.f32.mrf.mxu1  ;;  %v1238_v18 = vadd.f32 %v1232_v56, %v1133_v6  ;;  %v3760_v53 = vunpack.c.l.b16 %v3701_v19  ;;  %v1261_v6 = vld [vmem:[#allocation2 + $0x50] sm:$0x1] }
 0x102   : > { %3924 = vmatpush.bf16.msrb.mxu2 %v8672_v49  ;;  %v7458_v49 = vld [vmem:[%s8972_s12 + $0x1b8] sm:$0xf] }
 0x103   : > { %4028 = vmatpush.bf16.msrb.mxu3 %v8682_v29  ;;  %1242 = vst [vmem:[%s9829_s7 + $0x18] sm:$0xff] %v1238_v18  ;;  %v1246_v26 = vmax.f32 %v1238_v18, 0.0  ;;  %v3761_v29 = vunpack.c.l.b16 %v3715_v8  ;;  %v1399_v8 = vadd.f32 %v9674_v50, %v9831_v59  ;;  %v8692_v59 = vld [vmem:[%s10842_s1 + $0x160] sm:$0xff] }
 0x104   : > { %3663 = vmatpush.bf16.msrb.mxu0 %v8653_v47  ;;  %v3740_v47 = vshll.u32 %v7503_v58, 16 }
 0x105   : > { %3822 = vmatpush.bf16.msrb.mxu1 %v8661_v17  ;;  %v1250_v46 = vpack.c.bf16 %v1246_v26, %v1246_v26  ;;  %v3764_v27 = vpack.c.b16 %v3761_v29, %v3760_v53  ;;  %v10060_v29 = vld [vmem:[%s8972_s12 + $0x1c8] sm:$0xf] }
 0x106   : > { %3925 = vmatpush.bf16.msrb.mxu2 %v8671_v23  ;;  %v3737_v23 = vor.u32 %v3736_v25, %v3733_v22  ;;  %v3742_v4 = vrot.slane %v3740_v47, 5  ;;  %v8720_v22 = vld [vmem:[%s10842_s1 + $0x220] sm:$0xff] }
 0x107   : > { %4029 = vmatpush.bf16.msrb.mxu3 %v8681_v54  ;;  %1254 = vst [vmem:[#allocation2 + $0x90] sm:$0x3] %v1250_v46  ;;  %v7459_v54 = vor.u32 %v8650_v9, %v7458_v49  ;;  %v7850_v49 = vld [vmem:[%s8972_s12 + $0x10] sm:$0xf]  ;;  %v10082_v46 = vld [vmem:[%s8972_s12 + $0x240] sm:$0xf] }
 0x108   : > { %3664 = vmatpush.bf16.msrb.mxu0 %v8652_v20  ;;  %v9995_v38 = vpop.f32.mrf.mxu2  ;;  %v10005_v61 = vpop.f32.mrf.mxu0  ;;  %v7672_v20 = vld [vmem:[%s8972_s12 + $0x1e0] sm:$0xf]  ;;  %v10020_v3 = vrot.slane %v3737_v23, 4  ;;  %v7675_v23 = vld [vmem:[%s8972_s12 + $0x1ec] sm:$0x1] }
 0x109   : > { %3823 = vmatpush.bf16.msrb.mxu1 %v8660_v28  ;;  %v9997_v17 = vpop.f32.mrf.mxu3  ;;  %v10007_v52 = vpop.f32.mrf.mxu1  ;;  %v7674_v28 = vld [vmem:[%s8972_s12 + $0x1e8] sm:$0xf]  ;;  %v4055_v56 = vshrl.u32 %v7672_v20, 16  ;;  %v4058_v19 = vshll.u32 %v7672_v20, 16 }
 0x10a   : > { %3926 = vmatpush.bf16.msrb.mxu2 %v8670_v2  ;;  %v10017_v2 = vrot.slane %v3726_v45, 5  ;;  %v4069_v16 = vshrl.u32 %v7674_v28, 16  ;;  %v4072_v18 = vshll.u32 %v7674_v28, 16  ;;  %v10118_v28 = vld [vmem:[%s8972_s12 + $0x26c] sm:$0xf0] }
 0x10b   : > { %4030 = vmatpush.bf16.msrb.mxu3 %v8680_v5  ;;  %v10024_v5 = vld [vmem:[%s8972_s12 + $0x8] sm:$0xf]  ;;  %3665 = vmatmul.bf16.vlgmr.msrb.gmra.mxu0 %v7459_v54  ;;  %v10072_v37 = vrot.slane %v4055_v56, 4  ;;  %v7851_v56 = vld [vmem:[%s8972_s12 + $0x14] sm:$0x1] }
 0x10c   : > { %4182 = vmatpush.bf16.msra.mxu0 %v8695_v60  ;;  %3824 = vmatmul.bf16.vlgmr.msrb.gmra.mxu1 %v3764_v27  ;;  %v1276_v60 = vld [vmem:[#allocation2 + $0x50] sm:$0xc]  ;;  %v4421_v9 = vshrl.u32 %v10024_v5, 16  ;;  %v4424_v58 = vshll.u32 %v10024_v5, 16  ;;  %v10089_v47 = vrot.slane %v4069_v16, 4  ;;  %v10091_v54 = vrot.slane %v4072_v18, 5 }
 0x10d   : > { %4285 = vmatpush.bf16.msra.mxu1 %v8705_v10  ;;  %3927 = vmatmul.bf16.vlgmr.msrb.gmra.mxu2 %v7575_v55  ;;  %v8712_v10 = vld [vmem:[%s10842_s1 + $0x1e0] sm:$0xff]  ;;  %v1277_v25 = vsel %vm10037_vm8, 0, %v1276_v60  ;;  %v10094_v27 = vld [vmem:[%s8972_s12 + $0x268] sm:$0xf]  ;;  %v4438_v55 = vshll.u32 %v7850_v49, 16  ;;  %v4078_v60 = vshll.u32 %v7675_v23, 16  ;;  %v1400_v16 = vadd.f32 %v9674_v50, %v9871_v57 }
 0x10e   : > { %4389 = vmatpush.bf16.msra.mxu2 %v8715_v7  ;;  %4031 = vmatmul.bf16.vlgmr.msrb.gmra.mxu3 %v7635_v63  ;;  %1278 = vst [vmem:[#allocation2 + $0x50] sm:$0xc] %v1277_v25  ;;  %v10113_v20 = vrot.slane %v4421_v9, 4  ;;  %v7463_v18 = vor.u32 %v10063_v30, %v10060_v29  ;;  %v8690_v57 = vld [vmem:[%s10842_s1 + $0x150] sm:$0xff]  ;;  %v7639_v30 = vor.u32 %v10118_v28, %v10094_v27  ;;  %v8689_v27 = vld [vmem:[%s10842_s1 + $0x148] sm:$0xff]  ;;  %v8786_v7 = vld [vmem:[%s10844_s3 + $0x1a0] sm:$0xff] }
 0x10f   : > { %4548 = vmatpush.bf16.msra.mxu3 %v8723_v11  ;;  %v1262_v11 = vsel %vm10026_vm6, 0, %v1261_v6  ;;  %v4064_v6 = vshll.u32 %v7673_v12, 16  ;;  %v10148_v9 = vrot.slane %v4438_v55, 5  ;;  %v10164_v12 = vld [vmem:[#allocation2 + $0x2c] sm:$0x1] }
 0x110   : > { %4183 = vmatpush.bf16.msra.mxu0 %v8694_v32  ;;  %1263 = vst [vmem:[#allocation2 + $0x50] sm:$0x1] %v1262_v11  ;;  %v10055_v26 = vpop.f32.mrf.mxu2  ;;  %v3743_v32 = vsel %vm9212_vm2, %v10020_v3, %v3742_v4  ;;  %v10077_v44 = vpop.f32.mrf.mxu0  ;;  %v10115_v3 = vrot.slane %v4424_v58, 5  ;;  %v273_v4 = vld [vmem:[#allocation2 + $0x9c] sm:$0x1] }
 0x111   : > { %4286 = vmatpush.bf16.msra.mxu1 %v8704_v62  ;;  %v10057_v53 = vpop.f32.mrf.mxu3  ;;  %v10074_v62 = vrot.slane %v4058_v19, 5  ;;  %v10079_v45 = vpop.f32.mrf.mxu1  ;;  %v278_v19 = vld [vmem:[#allocation2 + $0x7c] sm:$0x1]  ;;  %v10150_v58 = vld [vmem:[#allocation2 + $0x74] sm:$0x1] }
 0x112   : > { %4390 = vmatpush.bf16.msra.mxu2 %v8714_v34  ;;  %v3729_v34 = vsel %vm9212_vm2, %v10015_v24, %v10017_v2  ;;  %v8719_v24 = vld [vmem:[%s10842_s1 + $0x218] sm:$0xff]  ;;  %v7849_v2 = vld [vmem:[%s8972_s12 + $0xc] sm:$0x1]  ;;  %v279_v28 = vsel %vm10026_vm6, 0, %v278_v19 }
 0x113   : > { %4549 = vmatpush.bf16.msra.mxu3 %v8722_v41  ;;  %v1503_v41 = vadd.f32 %v9867_v42, %v1399_v8  ;;  %v8711_v42 = vld [vmem:[%s10842_s1 + $0x1d8] sm:$0xff]  ;;  %v10102_v63 = vunpack.c.l.b16 %v3729_v34  ;;  %v4061_v5 = vor.u32 %v10074_v62, %v10072_v37  ;;  %v10123_v8 = vld [vmem:[#allocation2 + $0x84] sm:$0x1]  ;;  %v4430_v25 = vshll.u32 %v7849_v2, 16  ;;  %v8700_v34 = vld [vmem:[%s10842_s1 + $0x190] sm:$0xff] }
 0x114   : > { %4184 = vmatpush.bf16.msra.mxu0 %v8693_v33  ;;  %v4435_v33 = vshrl.u32 %v7850_v49, 16  ;;  %v4427_v37 = vor.u32 %v10115_v3, %v10113_v20  ;;  %v4444_v62 = vshll.u32 %v7851_v56, 16  ;;  %v8699_v2 = vld [vmem:[%s10842_s1 + $0x188] sm:$0xff]  ;;  %v274_v3 = vsel %vm10026_vm6, 0, %v273_v4  ;;  %280 = vst [vmem:[#allocation2 + $0x7c] sm:$0x1] %v279_v28 }
 0x115   : > { %4287 = vmatpush.bf16.msra.mxu1 %v8703_v15  ;;  %v10104_v15 = vunpack.c.l.b16 %v3743_v32  ;;  %v10128_v11 = vadd.f32 %v9869_v48, %v1503_v41  ;;  %v8710_v48 = vld [vmem:[%s10842_s1 + $0x1d0] sm:$0xff]  ;;  %v1264_v41 = vld [vmem:[#allocation2 + $0x58] sm:$0x1]  ;;  %v8717_v20 = vld [vmem:[%s10842_s1 + $0x208] sm:$0xff]  ;;  %v1504_v56 = vadd.f32 %v9916_v13, %v1400_v16  ;;  %275 = vst [vmem:[#allocation2 + $0x9c] sm:$0x1] %v274_v3 }
 0x116   : > { %4391 = vmatpush.bf16.msra.mxu2 %v8713_v40  ;;  %v8691_v40 = vld [vmem:[%s10842_s1 + $0x158] sm:$0xff]  ;;  %v10146_v49 = vrot.slane %v4435_v33, 4  ;;  %v8718_v32 = vld [vmem:[%s10842_s1 + $0x210] sm:$0xff]  ;;  %v10180_v33 = vrot.slane %v4078_v60, 5  ;;  %v1265_v55 = vsel %vm10026_vm6, 0, %v1264_v41  ;;  %v10214_v41 = vrot.slane %v4430_v25, 5 }
 0x117   : > { %4550 = vmatpush.bf16.msra.mxu3 %v8721_v1  ;;  %v8701_v1 = vld [vmem:[%s10842_s1 + $0x198] sm:$0xff]  ;;  %v3765_v29 = vpack.c.b16 %v10104_v15, %v10102_v63  ;;  %v10185_v63 = vld [vmem:[%s8972_s12 + $0x1f0] sm:$0xf]  ;;  %v10187_v15 = vld [vmem:[#allocation2 + $0x34] sm:$0x1]  ;;  %v10226_v16 = vrot.slane %v4427_v37, 4  ;;  %v1401_v25 = vadd.f32 %v9674_v50, %v9920_v39  ;;  %v1768_v50 = vadd.f32 %v10005_v61, %v10128_v11 }
 0x118   : > { %4185 = vmatpush.bf16.msra.mxu0 %v8692_v59  ;;  %v4075_v59 = vor.u32 %v10091_v54, %v10089_v47  ;;  %v10166_v23 = vpop.f32.mrf.mxu2  ;;  %v8709_v54 = vld [vmem:[%s10842_s1 + $0x1c8] sm:$0xff]  ;;  %1266 = vst [vmem:[#allocation2 + $0x58] sm:$0x1] %v1265_v55  ;;  %v10208_v60 = vld [vmem:[#allocation2 + $0x3c] sm:$0x1]  ;;  %v4441_v19 = vor.u32 %v10148_v9, %v10146_v49  ;;  %v8708_v49 = vld [vmem:[%s10842_s1 + $0x1c0] sm:$0xff]  ;;  %v1666_v11 = vadd.f32 %v9918_v31, %v1504_v56 }
 0x119   : > { %4288 = vmatpush.bf16.msra.mxu1 %v8702_v21  ;;  %v10136_v21 = vld [vmem:[#allocation2 + $0x94] sm:$0x1]  ;;  %v10168_v47 = vpop.f32.mrf.mxu3  ;;  %v8688_v9 = vld [vmem:[%s10842_s1 + $0x140] sm:$0xff]  ;;  %v2464_v39 = vsel %vm10026_vm6, 0, %v10164_v12  ;;  %v8761_v37 = vld [vmem:[%s10844_s3 + $0xf8] sm:$0xff]  ;;  %v2473_v31 = vsel %vm10026_vm6, 0, %v10208_v60 }
 0x11a   : > { %4392 = vmatpush.bf16.msra.mxu2 %v8712_v10  ;;  %v10125_v10 = vld [vmem:[#allocation2 + $0x8c] sm:$0x1]  ;;  %v291_v13 = vsel %vm10026_vm6, 0, %v10136_v21  ;;  %v1258_v21 = vsel %vm10026_vm6, 0, %v10150_v58  ;;  %v8716_v58 = vld [vmem:[%s10842_s1 + $0x200] sm:$0xff] }
 0x11b   : > { %4551 = vmatpush.bf16.msra.mxu3 %v8720_v22  ;;  %v7579_v22 = vor.u32 %v10085_v51, %v10082_v46  ;;  %v287_v4 = vsel %vm10026_vm6, 0, %v10125_v10  ;;  %v10228_v10 = vrot.slane %v4444_v62, 5  ;;  %3670 = vmatmul.bf16.gmra.mxu0 %v7463_v18  ;;  %v8698_v18 = vld [vmem:[%s10842_s1 + $0x180] sm:$0xff]  ;;  %292 = vst [vmem:[#allocation2 + $0x94] sm:$0x1] %v291_v13 }
 0x11c   : > { %4186 = vmatpush.bf16.msra.mxu0 %v8691_v40  ;;  %v10178_v40 = vrot.slane %v4064_v6, 5  ;;  %v10206_v6 = vrot.slane %v4075_v59, 4  ;;  %v10221_v59 = vld [vmem:[#allocation2 + $0x44] sm:$0x1]  ;;  %3829 = vmatmul.bf16.gmra.mxu1 %v3765_v29  ;;  %288 = vst [vmem:[#allocation2 + $0x8c] sm:$0x1] %v287_v4 }
 0x11d   : > { %4289 = vmatpush.bf16.msra.mxu1 %v8701_v1  ;;  %v10189_v1 = vpop.f32.mrf.mxu0  ;;  %3932 = vmatmul.bf16.gmra.mxu2 %v7579_v22  ;;  %v10268_v51 = vld [vmem:[%s8972_s12 + $0x20] sm:$0xf]  ;;  %v2469_v22 = vsel %vm10026_vm6, 0, %v10187_v15  ;;  %v1282_v62 = vld [vmem:[#allocation2 + $0x58] sm:$0xc]  ;;  %v2477_v55 = vsel %vm10026_vm6, 0, %v10221_v59 }
 0x11e   : > { %4393 = vmatpush.bf16.msra.mxu2 %v8711_v42  ;;  %v10176_v42 = vrot.slane %v4061_v5, 4  ;;  %v283_v5 = vsel %vm10026_vm6, 0, %v10123_v8  ;;  %v10219_v8 = vld [vmem:[%s8972_s12 + $0x1f8] sm:$0xf]  ;;  %4036 = vmatmul.bf16.gmra.mxu3 %v7639_v30  ;;  %v4081_v29 = vsel %vm9212_vm2, %v10206_v6, %v10180_v33  ;;  %v4442_v30 = vrot.slane %v4441_v19, 4 }
 0x11f   : > { %4552 = vmatpush.bf16.msra.mxu3 %v8719_v24  ;;  %v10191_v24 = vpop.f32.mrf.mxu1  ;;  %284 = vst [vmem:[#allocation2 + $0x84] sm:$0x1] %v283_v5  ;;  %v4097_v46 = vshrl.u32 %v10219_v8, 16  ;;  %v4433_v6 = vsel %vm9212_vm2, %v10226_v16, %v10214_v41  ;;  %v1283_v60 = vsel %vm10037_vm8, 0, %v1282_v62  ;;  %v10316_v56 = vld [vmem:[%s8972_s12 + $0x1f4] sm:$0x1]  ;;  %v10321_v19 = vunpack.c.l.b16 %v4081_v29 }
 0x120   : > { %4187 = vmatpush.bf16.msra.mxu0 %v8690_v57  ;;  %v10231_v57 = vld [vmem:[#allocation2 + $0x4c] sm:$0x1]  ;;  %v4067_v61 = vsel %vm9212_vm2, %v10176_v42, %v10178_v40  ;;  %1259 = vst [vmem:[#allocation2 + $0x74] sm:$0x1] %v1258_v21  ;;  %v10289_v42 = vadd.f32 %v9952_v43, %v1401_v25  ;;  %v10291_v40 = vpop.f32.mrf.mxu2  ;;  %v1872_v43 = vadd.f32 %v10007_v52, %v1768_v50  ;;  %v1288_v52 = vld [vmem:[#allocation2 + $0x60] sm:$0xc] }
 0x121   : > { %4290 = vmatpush.bf16.msra.mxu1 %v8700_v34  ;;  %v4086_v34 = vshll.u32 %v10185_v63, 16  ;;  %v10293_v33 = vpop.f32.mrf.mxu3  ;;  %2465 = vst [vmem:[#allocation2 + $0x2c] sm:$0x1] %v2464_v39  ;;  %v10298_v15 = vunpack.c.l.b16 %v4067_v61  ;;  %v2481_v5 = vsel %vm10026_vm6, 0, %v10231_v57  ;;  %v10319_v4 = vld [vmem:[%s8972_s12 + $0x1fc] sm:$0x1]  ;;  %v4447_v16 = vsel %vm9212_vm2, %v4442_v30, %v10228_v10 }
 0x122   : > { %4394 = vmatpush.bf16.msra.mxu2 %v8710_v48  ;;  %v4083_v48 = vshrl.u32 %v10185_v63, 16  ;;  %2470 = vst [vmem:[#allocation2 + $0x34] sm:$0x1] %v2469_v22  ;;  %v10327_v59 = vld [vmem:[%s8972_s12 + $0x5c] sm:$0xf0]  ;;  %v4463_v57 = vshrl.u32 %v10268_v51, 16  ;;  %v2031_v50 = vadd.f32 %v10055_v26, %v1872_v43  ;;  %v4492_v39 = vunpack.c.l.b16 %v4433_v6 }
 0x123   : > { %4553 = vmatpush.bf16.msra.mxu3 %v8718_v32  ;;  %v10246_v32 = vld [vmem:[%s8972_s12 + $0x18] sm:$0xf]  ;;  %2474 = vst [vmem:[#allocation2 + $0x3c] sm:$0x1] %v2473_v31  ;;  %v10330_v13 = vld [vmem:[%s8972_s12 + $0x80] sm:$0xf]  ;;  %v4130_v62 = vpack.c.b16 %v10321_v19, %v10298_v15 }
 0x124   : > { %4188 = vmatpush.bf16.msra.mxu0 %v8689_v27  ;;  %v10284_v12 = vrot.slane %v4083_v48, 4  ;;  %v4449_v27 = vshrl.u32 %v10246_v32, 16  ;;  %v10333_v41 = vld [vmem:[%s8972_s12 + $0x84] sm:$0xf0]  ;;  %v8760_v48 = vld [vmem:[%s10844_s3 + $0xf0] sm:$0xff]  ;;  %v4466_v25 = vshll.u32 %v10268_v51, 16 }
 0x125   : > { %4291 = vmatpush.bf16.msra.mxu1 %v8699_v2  ;;  %v1267_v2 = vld [vmem:[#allocation2 + $0x60] sm:$0x1]  ;;  %v10302_v3 = vpop.f32.mrf.mxu0  ;;  %2478 = vst [vmem:[#allocation2 + $0x44] sm:$0x1] %v2477_v55  ;;  %v4099_v10 = vrot.slane %v4097_v46, 4  ;;  %v1289_v61 = vsel %vm10037_vm8, 0, %v1288_v52  ;;  %v2134_v55 = vadd.f32 %v10057_v53, %v2031_v50 }
 0x126   : > { %4395 = vmatpush.bf16.msra.mxu2 %v8709_v54  ;;  %v4100_v54 = vshll.u32 %v10219_v8, 16  ;;  %v10324_v8 = vld [vmem:[%s8972_s12 + $0x58] sm:$0xf]  ;;  %v1268_v21 = vsel %vm10026_vm6, 0, %v1267_v2  ;;  %2482 = vst [vmem:[#allocation2 + $0x4c] sm:$0x1] %v2481_v5 }
 0x127   : > { %4554 = vmatpush.bf16.msra.mxu3 %v8717_v20  ;;  %v4452_v20 = vshll.u32 %v10246_v32, 16  ;;  %v10304_v28 = vpop.f32.mrf.mxu1  ;;  %v7853_v51 = vld [vmem:[%s8972_s12 + $0x1c] sm:$0x1]  ;;  %v4451_v22 = vrot.slane %v4449_v27, 4  ;;  %1284 = vst [vmem:[#allocation2 + $0x58] sm:$0xc] %v1283_v60 }
 0x128   : > { %4189 = vmatpush.bf16.msra.mxu0 %v8688_v9  ;;  %v4088_v9 = vrot.slane %v4086_v34, 5  ;;  %v4102_v32 = vrot.slane %v4100_v54, 5  ;;  %v1285_v34 = vld [vmem:[#allocation2 + $0x5c] sm:$0x1]  ;;  %1269 = vst [vmem:[#allocation2 + $0x60] sm:$0x1] %v1268_v21  ;;  %v10365_v2 = vpop.f32.mrf.mxu2 }
 0x129   : > { %4292 = vmatpush.bf16.msra.mxu1 %v8698_v18  ;;  %v1769_v18 = vadd.f32 %v10077_v44, %v1666_v11  ;;  %v4454_v29 = vrot.slane %v4452_v20, 5  ;;  %v4092_v26 = vshll.u32 %v10316_v56, 16  ;;  %v4106_v46 = vshll.u32 %v10319_v4, 16  ;;  %1290 = vst [vmem:[#allocation2 + $0x60] sm:$0xc] %v1289_v61  ;;  %v10367_v20 = vpop.f32.mrf.mxu3 }
 0x12a   : > { %4396 = vmatpush.bf16.msra.mxu2 %v8708_v49  ;;  %v1279_v49 = vld [vmem:[#allocation2 + $0x54] sm:$0x1]  ;;  %v4465_v30 = vrot.slane %v4463_v57, 4  ;;  %v7751_v44 = vor.u32 %v10327_v59, %v10324_v8  ;;  %v7811_v11 = vor.u32 %v10333_v41, %v10330_v13  ;;  %v4089_v31 = vor.u32 %v4088_v9, %v10284_v12  ;;  %v7855_v54 = vld [vmem:[%s8972_s12 + $0x24] sm:$0x1]  ;;  %v8759_v59 = vld [vmem:[%s10844_s3 + $0xe8] sm:$0xff] }
 0x12b   : > { %4555 = vmatpush.bf16.msra.mxu3 %v8716_v58  ;;  %v4493_v58 = vunpack.c.l.b16 %v4447_v16  ;;  %v1280_v63 = vsel %vm10026_vm6, 0, %v1279_v49  ;;  %v1270_v27 = vld [vmem:[#allocation2 + $0x68] sm:$0x1]  ;;  %v4103_v43 = vor.u32 %v4102_v32, %v4099_v10  ;;  %v1294_v5 = vld [vmem:[#allocation2 + $0x68] sm:$0xc]  ;;  %v1286_v6 = vsel %vm10026_vm6, 0, %v1285_v34  ;;  %4190 = vmatmul.bf16.vlgmr.msra.gmra.mxu0 %v4130_v62 }
 0x12c   : > { %v1271_v15 = vsel %vm10026_vm6, 0, %v1270_v27  ;;  %1281 = vst [vmem:[#allocation2 + $0x54] sm:$0x1] %v1280_v63  ;;  %v4455_v56 = vor.u32 %v4454_v29, %v4451_v22  ;;  %v4458_v4 = vshll.u32 %v7853_v51, 16  ;;  %v1295_v53 = vsel %vm10037_vm8, 0, %v1294_v5  ;;  %4293 = vmatmul.bf16.vlgmr.msra.gmra.mxu1 %v7751_v44 }
 0x12d   : > { %v2228_v60 = vpop.f32.mrf.mxu0  ;;  %v4496_v52 = vpack.c.b16 %v4493_v58, %v4492_v39  ;;  %1272 = vst [vmem:[#allocation2 + $0x68] sm:$0x1] %v1271_v15  ;;  %v1873_v19 = vadd.f32 %v10079_v45, %v1769_v18  ;;  %v4472_v41 = vshll.u32 %v7855_v54, 16  ;;  %v1667_v16 = vadd.f32 %v9954_v0, %v10289_v42  ;;  %v10385_v9 = vld [vmem:[%s10843_s2] ss:$0 sm:$0xff]  ;;  %4397 = vmatmul.bf16.vlgmr.msra.gmra.mxu2 %v7811_v11 }
 0x12e   : > { %v2238_v8 = vadd.f32 %v2228_v60, %v2134_v55  ;;  %1296 = vst [vmem:[#allocation2 + $0x68] sm:$0xc] %v1295_v53  ;;  %v4094_v57 = vrot.slane %v4092_v26, 5  ;;  %v4104_v45 = vrot.slane %v4103_v43, 4  ;;  %v4108_v21 = vrot.slane %v4106_v46, 5  ;;  %v8758_v39 = vld [vmem:[%s10844_s3 + $0xe0] sm:$0xff] }
 0x12f   : > { %5079 = vmatpush.bf16.msrb.mxu3 %v8761_v37  ;;  %v4468_v37 = vrot.slane %v4466_v25, 5  ;;  %v2387_v12 = vpop.f32.mrf.mxu1  ;;  %1287 = vst [vmem:[#allocation2 + $0x5c] sm:$0x1] %v1286_v6  ;;  %v2032_v25 = vadd.f32 %v10166_v23, %v1873_v19  ;;  %v1402_v10 = vadd.f32 %v10385_v9, %v9962_v36  ;;  %v1770_v0 = vadd.f32 %v10189_v1, %v1667_v16  ;;  %v1291_v23 = vld [vmem:[#allocation2 + $0x64] sm:$0x1] }
 0x130   : > { %v2397_v49 = vadd.f32 %v2387_v12, %v2238_v8  ;;  %4556 = vmatmul.bf16.vlgmr.msra.gmra.mxu3 %v4496_v52  ;;  %v4456_v42 = vrot.slane %v4455_v56, 4  ;;  %v4460_v32 = vrot.slane %v4458_v4, 5  ;;  %v4474_v51 = vrot.slane %v4472_v41, 5  ;;  %v10398_v58 = vpop.f32.mrf.mxu2  ;;  %v2449_v11 = vld [vmem:[#allocation2 + $0x50] sm:$0x7] }
 0x131   : > { %v4469_v13 = vor.u32 %v4468_v37, %v4465_v30  ;;  %v1292_v22 = vsel %vm10026_vm6, 0, %v1291_v23  ;;  %v1506_v36 = vadd.f32 %v9995_v38, %v1402_v10  ;;  %v2135_v1 = vadd.f32 %v10168_v47, %v2032_v25  ;;  %v10400_v29 = vpop.f32.mrf.mxu3  ;;  %v7754_v5 = vld [vmem:[%s8972_s12 + $0x68] sm:$0xf]  ;;  %v8697_v6 = vld [vmem:[%s8972_s12 + $0x6c] sm:$0xf0] }
 0x132   : > { %6860 = vst [vmem:[%s9829_s7 + $0x20] sm:$0xff] %v2397_v49  ;;  %v2406_v50 = vmax.f32 %v2397_v49, 0.0  ;;  %v4109_v34 = vsel %vm9212_vm2, %v4104_v45, %v4108_v21  ;;  %v1874_v26 = vadd.f32 %v10191_v24, %v1770_v0  ;;  %v4461_v37 = vsel %vm9212_vm2, %v4456_v42, %v4460_v32  ;;  %v8757_v24 = vld [vmem:[%s10844_s3 + $0xd8] sm:$0xff]  ;;  %v7814_v12 = vld [vmem:[%s8972_s12 + $0x90] sm:$0xf] }
 0x133   : > { %5080 = vmatpush.bf16.msrb.mxu3 %v8760_v48  ;;  %v4090_v48 = vrot.slane %v4089_v31, 4  ;;  %v4470_v61 = vrot.slane %v4469_v13, 4  ;;  %1293 = vst [vmem:[#allocation2 + $0x64] sm:$0x1] %v1292_v22  ;;  %v1668_v44 = vadd.f32 %v9997_v17, %v1506_v36  ;;  %v4129_v54 = vunpack.c.l.b16 %v4109_v34  ;;  %v1297_v56 = vld [vmem:[#allocation2 + $0x6c] sm:$0x1] }
 0x134   : > { %v2410_v18 = vpack.c.bf16 %v2406_v50, %v2406_v50  ;;  %v2033_v27 = vadd.f32 %v10291_v40, %v1874_v26  ;;  %v4494_v17 = vunpack.c.l.b16 %v4461_v37  ;;  %v8707_v19 = vld [vmem:[%s8972_s12 + $0x94] sm:$0xf0]  ;;  %v8756_v8 = vld [vmem:[%s10844_s3 + $0xd0] sm:$0xff]  ;;  %v7755_v13 = vor.u32 %v8697_v6, %v7754_v5  ;;  %v8754_v36 = vld [vmem:[%s10844_s3 + $0xc0] sm:$0xff] }
 0x135   : > { %v4095_v63 = vsel %vm9212_vm2, %v4090_v48, %v4094_v57  ;;  %v2230_v46 = vpop.f32.mrf.mxu0  ;;  %v4475_v62 = vsel %vm9212_vm2, %v4470_v61, %v4474_v51  ;;  %v1771_v4 = vadd.f32 %v10302_v3, %v1668_v44  ;;  %v7815_v21 = vor.u32 %v8707_v19, %v7814_v12  ;;  %v2452_v51 = vld [vmem:[#allocation2 + $0x58] sm:$0x7]  ;;  %v2455_v44 = vld [vmem:[#allocation2 + $0x60] sm:$0x7]  ;;  %v8741_v6 = vld [vmem:[%s10844_s3 + $0x68] sm:$0xff] }
 0x136   : > { %v2415_v47 = vshrl.u32 %v2410_v18, 16  ;;  %v2239_v30 = vadd.f32 %v2230_v46, %v2135_v1  ;;  %v4128_v31 = vunpack.c.l.b16 %v4095_v63  ;;  %v2418_v43 = vshll.u32 %v2410_v18, 16  ;;  %v8743_v26 = vld [vmem:[%s10844_s3 + $0x78] sm:$0xff]  ;;  %v8740_v19 = vld [vmem:[%s10844_s3 + $0x60] sm:$0xff] }
 0x137   : > { %5081 = vmatpush.bf16.msrb.mxu3 %v8759_v59  ;;  %v2389_v38 = vpop.f32.mrf.mxu1  ;;  %v4495_v52 = vunpack.c.l.b16 %v4475_v62  ;;  %v1298_v59 = vsel %vm10026_vm6, 0, %v1297_v56  ;;  %v2136_v41 = vadd.f32 %v10293_v33, %v2033_v27  ;;  %v1875_v0 = vadd.f32 %v10304_v28, %v1771_v4  ;;  %v8755_v33 = vld [vmem:[%s10844_s3 + $0xc8] sm:$0xff]  ;;  %4815 = vmatpush.bf16.msrb.mxu1 %v8743_v26  ;;  %v8799_v12 = vld [vmem:[%s10844_s3 + $0x1f8] sm:$0xff] }
 0x138   : > { %v2417_v55 = vrot.slane %v2415_v47, 7  ;;  %v2398_v15 = vadd.f32 %v2389_v38, %v2239_v30  ;;  %1299 = vst [vmem:[#allocation2 + $0x6c] sm:$0x1] %v1298_v59  ;;  %v10436_v48 = vpop.f32.mrf.mxu2  ;;  %v4131_v25 = vpack.c.b16 %v4129_v54, %v4128_v31  ;;  %v2458_v59 = vld [vmem:[#allocation2 + $0x68] sm:$0x7] }
 0x139   : > { %v10438_v57 = vpop.f32.mrf.mxu3  ;;  %v4497_v10 = vpack.c.b16 %v4495_v52, %v4494_v17  ;;  %v2034_v23 = vadd.f32 %v10365_v2, %v1875_v0  ;;  %v8796_v0 = vld [vmem:[%s10844_s3 + $0x1e0] sm:$0xff] }
 0x13a   : > { %v2420_v53 = vor.u32 %v2418_v43, %v2417_v55  ;;  %6861 = vst [vmem:[%s9829_s7 + $0x28] sm:$0xff] %v2398_v15  ;;  %v2407_v40 = vmax.f32 %v2398_v15, 0.0 }
 0x13b   : > { %5082 = vmatpush.bf16.msrb.mxu3 %v8758_v39  ;;  %4195 = vmatmul.bf16.gmra.mxu0 %v4131_v25  ;;  %v2137_v1 = vadd.f32 %v10367_v20, %v2034_v23  ;;  %v8739_v25 = vld [vmem:[%s10844_s3 + $0x58] sm:$0xff] }
 0x13c   : > { %v2450_v16 = vsel %vm10420_vm11, %v2420_v53, %v2449_v11  ;;  %v2411_v3 = vpack.c.bf16 %v2407_v40, %v2407_v40  ;;  %4298 = vmatmul.bf16.gmra.mxu1 %v7755_v13 }
 0x13d   : > { %2451 = vst [vmem:[#allocation2 + $0x50] sm:$0x7] %v2450_v16  ;;  %v2233_v49 = vpop.f32.mrf.mxu0  ;;  %4402 = vmatmul.bf16.gmra.mxu2 %v7815_v21 }
 0x13e   : > { %v2422_v42 = vshrl.u32 %v2411_v3, 16  ;;  %v2240_v32 = vadd.f32 %v2233_v49, %v2136_v41  ;;  %v2425_v39 = vshll.u32 %v2411_v3, 16  ;;  %v8797_v49 = vld [vmem:[%s10844_s3 + $0x1e8] sm:$0xff] }
 0x13f   : > { %5083 = vmatpush.bf16.msrb.mxu3 %v8757_v24  ;;  %v2392_v45 = vpop.f32.mrf.mxu1  ;;  %v8742_v24 = vld [vmem:[%s10844_s3 + $0x70] sm:$0xff] }
 0x140   : > { %v2424_v50 = vrot.slane %v2422_v42, 7  ;;  %v2399_v61 = vadd.f32 %v2392_v45, %v2240_v32  ;;  %4561 = vmatmul.bf16.gmra.mxu3 %v4497_v10  ;;  %v10452_v63 = vpop.f32.mrf.mxu2  ;;  %4816 = vmatpush.bf16.msrb.mxu1 %v8742_v24  ;;  %v8738_v10 = vld [vmem:[%s10844_s3 + $0x50] sm:$0xff] }
 0x141   : > { %v10454_v34 = vpop.f32.mrf.mxu3 }
 0x142   : > { %v2427_v22 = vor.u32 %v2425_v39, %v2424_v50  ;;  %6862 = vst [vmem:[%s9829_s7 + $0x30] sm:$0xff] %v2399_v61  ;;  %v2408_v28 = vmax.f32 %v2399_v61, 0.0  ;;  %v8737_v50 = vld [vmem:[%s10844_s3 + $0x48] sm:$0xff]  ;;  %v8795_v39 = vld [vmem:[%s10844_s3 + $0x1d8] sm:$0xff]  ;;  %v2582_v61 = vadd.f32 %v10385_v9, %v10398_v58 }
 0x143   : > { %5084 = vmatpush.bf16.msrb.mxu3 %v8756_v8  ;;  %v8798_v8 = vld [vmem:[%s10844_s3 + $0x1f0] sm:$0xff] }
 0x144   : > { %v2453_v2 = vsel %vm10420_vm11, %v2427_v22, %v2452_v51  ;;  %v2412_v18 = vpack.c.bf16 %v2408_v28, %v2408_v28  ;;  %v8070_v54 = vld [vmem:[#allocation2 + $0x50] sm:$0xf]  ;;  %4817 = vmatpush.bf16.msrb.mxu1 %v8741_v6 }
 0x145   : > { %2454 = vst [vmem:[#allocation2 + $0x58] sm:$0x7] %v2453_v2  ;;  %v2235_v46 = vpop.f32.mrf.mxu0  ;;  %v2685_v2 = vadd.f32 %v10400_v29, %v2582_v61 }
 0x146   : > { %v2429_v47 = vshrl.u32 %v2412_v18, 16  ;;  %v2241_v30 = vadd.f32 %v2235_v46, %v2137_v1  ;;  %v2432_v37 = vshll.u32 %v2412_v18, 16  ;;  %v8794_v1 = vld [vmem:[%s10844_s3 + $0x1d0] sm:$0xff]  ;;  %v8779_v46 = vld [vmem:[%s10844_s3 + $0x178] sm:$0xff] }
 0x147   : > { %5085 = vmatpush.bf16.msrb.mxu3 %v8755_v33  ;;  %v2394_v38 = vpop.f32.mrf.mxu1 }
 0x148   : > { %v2431_v20 = vrot.slane %v2429_v47, 7  ;;  %v2400_v62 = vadd.f32 %v2394_v38, %v2241_v30  ;;  %v10465_v43 = vpop.f32.mrf.mxu2  ;;  %4818 = vmatpush.bf16.msrb.mxu1 %v8740_v19  ;;  %v8793_v38 = vld [vmem:[%s10844_s3 + $0x1c8] sm:$0xff]  ;;  %v2583_v47 = vadd.f32 %v10385_v9, %v10436_v48 }
 0x149   : > { %v10467_v15 = vpop.f32.mrf.mxu3 }
 0x14a   : > { %v2434_v11 = vor.u32 %v2432_v37, %v2431_v20  ;;  %6863 = vst [vmem:[%s9829_s7 + $0x38] sm:$0xff] %v2400_v62  ;;  %v2409_v31 = vmax.f32 %v2400_v62, 0.0  ;;  %v8778_v37 = vld [vmem:[%s10844_s3 + $0x170] sm:$0xff]  ;;  %v8792_v62 = vld [vmem:[%s10844_s3 + $0x1c0] sm:$0xff]  ;;  %v2686_v24 = vadd.f32 %v10438_v57, %v2583_v47 }
 0x14b   : > { %5086 = vmatpush.bf16.msrb.mxu3 %v8754_v36  ;;  %v8736_v36 = vld [vmem:[%s10844_s3 + $0x40] sm:$0xff] }
 0x14c   : > { %v2456_v27 = vsel %vm10420_vm11, %v2434_v11, %v2455_v44  ;;  %v2413_v55 = vpack.c.bf16 %v2409_v31, %v2409_v31  ;;  %v8752_v5 = vld [vmem:[#allocation2 + $0x54] sm:$0xf0]  ;;  %4819 = vmatpush.bf16.msrb.mxu1 %v8739_v25  ;;  %v8776_v57 = vld [vmem:[%s10844_s3 + $0x160] sm:$0xff] }
 0x14d   : > { %2457 = vst [vmem:[#allocation2 + $0x60] sm:$0x7] %v2456_v27  ;;  %v2778_v17 = vpop.f32.mrf.mxu0  ;;  %v8071_v56 = vor.u32 %v8752_v5, %v8070_v54  ;;  %v8777_v54 = vld [vmem:[%s10844_s3 + $0x168] sm:$0xff]  ;;  %v2584_v27 = vadd.f32 %v10385_v9, %v10452_v63  ;;  %v8775_v63 = vld [vmem:[%s10844_s3 + $0x158] sm:$0xff] }
 0x14e   : > { %v2436_v4 = vshrl.u32 %v2413_v55, 16  ;;  %v2439_v40 = vshll.u32 %v2413_v55, 16  ;;  %v2788_v18 = vadd.f32 %v2778_v17, %v2685_v2 }
 0x14f   : > { %v2882_v52 = vpop.f32.mrf.mxu1  ;;  %5551 = vmatpush.bf16.msra.mxu3 %v8799_v12 }
 0x150   : > { %v2438_v53 = vrot.slane %v2436_v4, 7  ;;  %5087 = vmatmul.bf16.vlgmr.msrb.gmra.mxu3 %v8071_v56  ;;  %v2986_v16 = vpop.f32.mrf.mxu2  ;;  %4820 = vmatpush.bf16.msrb.mxu1 %v8738_v10  ;;  %v2892_v29 = vadd.f32 %v2882_v52, %v2788_v18  ;;  %v2687_v52 = vadd.f32 %v10454_v34, %v2584_v27 }
 0x151   : > { %v3090_v3 = vpop.f32.mrf.mxu3 }
 0x152   : > { %v2441_v13 = vor.u32 %v2439_v40, %v2438_v53  ;;  %v2996_v44 = vadd.f32 %v2986_v16, %v2892_v29 }
 0x153   : > { %5552 = vmatpush.bf16.msra.mxu3 %v8798_v8  ;;  %v2585_v8 = vadd.f32 %v10385_v9, %v10465_v43 }
 0x154   : > { %v2459_v41 = vsel %vm10420_vm11, %v2441_v13, %v2458_v59  ;;  %v8074_v42 = vld [vmem:[#allocation2 + $0x60] sm:$0xf]  ;;  %4821 = vmatpush.bf16.msrb.mxu1 %v8737_v50  ;;  %v3100_v55 = vadd.f32 %v3090_v3, %v2996_v44 }
 0x155   : > { %2460 = vst [vmem:[#allocation2 + $0x68] sm:$0x7] %v2459_v41  ;;  %v2780_v45 = vpop.f32.mrf.mxu0 }
 0x156   : > { %v2789_v11 = vadd.f32 %v2780_v45, %v2686_v24  ;;  %v2688_v45 = vadd.f32 %v10467_v15, %v2585_v8  ;;  %v5208_v24 = vld [vmem:[#allocation2 + $0x58] sm:$0xf] }
 0x157   : > { %v2884_v21 = vpop.f32.mrf.mxu1  ;;  %5553 = vmatpush.bf16.msra.mxu3 %v8797_v49  ;;  %v8774_v49 = vld [vmem:[%s10844_s3 + $0x150] sm:$0xff] }
 0x158   : > { %v2988_v32 = vpop.f32.mrf.mxu2  ;;  %4822 = vmatpush.bf16.msrb.mxu1 %v8736_v36  ;;  %v2893_v12 = vadd.f32 %v2884_v21, %v2789_v11  ;;  %v8772_v36 = vld [vmem:[%s10844_s3 + $0x140] sm:$0xff] }
 0x159   : > { %v3092_v33 = vpop.f32.mrf.mxu3 }
 0x15a   : > { %v2997_v56 = vadd.f32 %v2988_v32, %v2893_v12 }
 0x15b   : > { %5554 = vmatpush.bf16.msra.mxu3 %v8796_v0 }
 0x15c   : > { %v8753_v23 = vld [vmem:[#allocation2 + $0x64] sm:$0xf0]  ;;  %5343 = vmatpush.bf16.msra.mxu1 %v8779_v46  ;;  %v3101_v59 = vadd.f32 %v3092_v33, %v2997_v56 }
 0x15d   : > { %v2783_v51 = vpop.f32.mrf.mxu0  ;;  %v8075_v28 = vor.u32 %v8753_v23, %v8074_v42  ;;  %v8773_v33 = vld [vmem:[%s10844_s3 + $0x148] sm:$0xff] }
 0x15e   : > { %v2790_v4 = vadd.f32 %v2783_v51, %v2687_v52 }
 0x15f   : > { %v2887_v22 = vpop.f32.mrf.mxu1  ;;  %5555 = vmatpush.bf16.msra.mxu3 %v8795_v39 }
 0x160   : > { %5092 = vmatmul.bf16.gmra.mxu3 %v8075_v28  ;;  %v2991_v58 = vpop.f32.mrf.mxu2  ;;  %5344 = vmatpush.bf16.msra.mxu1 %v8778_v37  ;;  %v2894_v34 = vadd.f32 %v2887_v22, %v2790_v4  ;;  %v7966_v28 = vld [vmem:[#allocation2 + $0x28] sm:$0xf] }
 0x161   : > { %v3095_v26 = vpop.f32.mrf.mxu3 }
 0x162   : > { %v2998_v21 = vadd.f32 %v2991_v58, %v2894_v34 }
 0x163   : > { %5556 = vmatpush.bf16.msra.mxu3 %v8794_v1 }
 0x164   : > { %5345 = vmatpush.bf16.msra.mxu1 %v8777_v54  ;;  %v3102_v23 = vadd.f32 %v3095_v26, %v2998_v21  ;;  %v5206_v54 = vld [vmem:[#allocation2 + $0x50] sm:$0xf] }
 0x165   : > { %v2785_v30 = vpop.f32.mrf.mxu0  ;;  %v5215_v56 = vshrl.u32 %v5206_v54, 16  ;;  %v5218_v4 = vshll.u32 %v5206_v54, 16 }
 0x166   : > { %v2791_v43 = vadd.f32 %v2785_v30, %v2688_v45 }
 0x167   : > { %v2889_v20 = vpop.f32.mrf.mxu1  ;;  %5557 = vmatpush.bf16.msra.mxu3 %v8793_v38  ;;  %v5220_v34 = vrot.slane %v5218_v4, 5 }
 0x168   : > { %v2993_v48 = vpop.f32.mrf.mxu2  ;;  %5346 = vmatpush.bf16.msra.mxu1 %v8776_v57  ;;  %v2895_v15 = vadd.f32 %v2889_v20, %v2791_v43 }
 0x169   : > { %v3097_v31 = vpop.f32.mrf.mxu3 }
 0x16a   : > { %v2999_v1 = vadd.f32 %v2993_v48, %v2895_v15 }
 0x16b   : > { %5558 = vmatpush.bf16.msra.mxu3 %v8792_v62 }
 0x16c   : > { %5347 = vmatpush.bf16.msra.mxu1 %v8775_v63  ;;  %v3103_v47 = vadd.f32 %v3097_v31, %v2999_v1  ;;  %v5212_v1 = vld [vmem:[#allocation2 + $0x68] sm:$0xf] }
 0x16d   : > { %v3194_v5 = vpop.f32.mrf.mxu0 }
 0x16e   : > { %v3204_v17 = vadd.f32 %v3194_v5, %v3100_v55  ;;  %v5229_v5 = vshrl.u32 %v5208_v24, 16 }
 0x16f   : > { %v3298_v6 = vpop.f32.mrf.mxu1 }
 0x170   : > { %v3308_v53 = vadd.f32 %v3298_v6, %v3204_v17  ;;  %v3402_v40 = vpop.f32.mrf.mxu2  ;;  %5348 = vmatpush.bf16.msra.mxu1 %v8774_v49  ;;  %v5232_v6 = vshll.u32 %v5208_v24, 16  ;;  %v5231_v63 = vrot.slane %v5229_v5, 4  ;;  %v5207_v49 = vld [vmem:[#allocation2 + $0x54] sm:$0x1] }
 0x171   : > { %v10534_v19 = vpop.f32.mrf.mxu3  ;;  %v8750_v5 = vld [vmem:[%s10844_s3 + $0xb0] sm:$0xff] }
 0x172   : > { %v3412_v13 = vadd.f32 %v3402_v40, %v3308_v53  ;;  %v8733_v53 = vld [vmem:[%s10844_s3 + $0x38] sm:$0xff]  ;;  %v5234_v8 = vrot.slane %v5232_v6, 5 }
 0x173   : > { %4711 = vmatpush.bf16.msrb.mxu0 %v8733_v53 }
 0x174   : > { %7388 = vst [vmem:[%s9829_s7 + $0x40] sm:$0xff] %v3412_v13  ;;  %v3421_v3 = vmax.f32 %v3412_v13, 0.0  ;;  %5349 = vmatpush.bf16.msra.mxu1 %v8773_v33  ;;  %v8732_v13 = vld [vmem:[%s10844_s3 + $0x30] sm:$0xff]  ;;  %v5235_v21 = vor.u32 %v5234_v8, %v5231_v63  ;;  %v5211_v63 = vld [vmem:[#allocation2 + $0x64] sm:$0x1] }
 0x175   : > { %v3196_v41 = vpop.f32.mrf.mxu0 }
 0x176   : > { %v3205_v25 = vadd.f32 %v3196_v41, %v3101_v59  ;;  %v3425_v10 = vpack.c.bf16 %v3421_v3, %v3421_v3  ;;  %v5209_v59 = vld [vmem:[#allocation2 + $0x5c] sm:$0x1] }
 0x177   : > { %v3300_v16 = vpop.f32.mrf.mxu1  ;;  %4712 = vmatpush.bf16.msrb.mxu0 %v8732_v13  ;;  %v8749_v13 = vld [vmem:[%s10844_s3 + $0xa8] sm:$0xff] }
 0x178   : > { %3429 = vst [vmem:[#allocation2 + $0x30] sm:$0x3] %v3425_v10  ;;  %v3309_v0 = vadd.f32 %v3300_v16, %v3205_v25  ;;  %v3404_v42 = vpop.f32.mrf.mxu2  ;;  %5350 = vmatpush.bf16.msra.mxu1 %v8772_v36  ;;  %v5217_v16 = vrot.slane %v5215_v56, 4  ;;  %v5238_v10 = vshll.u32 %v5209_v59, 16 }
 0x179   : > { %v10546_v32 = vpop.f32.mrf.mxu3 }
 0x17a   : > { %v3413_v50 = vadd.f32 %v3404_v42, %v3309_v0  ;;  %v5240_v36 = vrot.slane %v5238_v10, 5 }
 0x17c   : > { %7389 = vst [vmem:[%s9829_s7 + $0x48] sm:$0xff] %v3413_v50  ;;  %v3422_v51 = vmax.f32 %v3413_v50, 0.0  ;;  %v5224_v50 = vshll.u32 %v5207_v49, 16 }
 0x17d   : > { %v3199_v39 = vpop.f32.mrf.mxu0 }
 0x17e   : > { %v3206_v22 = vadd.f32 %v3199_v39, %v3102_v23  ;;  %v3426_v2 = vpack.c.bf16 %v3422_v51, %v3422_v51  ;;  %v5221_v23 = vor.u32 %v5220_v34, %v5217_v16  ;;  %v3438_v39 = vld [vmem:[#allocation2 + $0x8] sm:$0x1]  ;;  %v3441_v34 = vld [vmem:[#allocation2 + $0x10] sm:$0x1] }
 0x17f   : > { %v3303_v61 = vpop.f32.mrf.mxu1  ;;  %v8734_v18 = vld [vmem:[#allocation2 + $0x2c] sm:$0xf0]  ;;  %v3439_v15 = vsel %vm10026_vm6, 0, %v3438_v39 }
 0x180   : > { %3430 = vst [vmem:[#allocation2 + $0x38] sm:$0x3] %v3426_v2  ;;  %v3310_v58 = vadd.f32 %v3303_v61, %v3206_v22  ;;  %v7967_v26 = vor.u32 %v8734_v18, %v7966_v28  ;;  %v3407_v46 = vpop.f32.mrf.mxu2  ;;  %v8286_v11 = vld [vmem:[#allocation2 + $0x30] sm:$0xf]  ;;  %v3450_v61 = vld [vmem:[#allocation2 + $0x8] sm:$0xc] }
 0x181   : > { %v10555_v38 = vpop.f32.mrf.mxu3  ;;  %v3451_v51 = vsel %vm10037_vm8, 0, %v3450_v61  ;;  %v8731_v22 = vld [vmem:[%s10844_s3 + $0x28] sm:$0xff]  ;;  %v5236_v28 = vrot.slane %v5235_v21, 4  ;;  %3440 = vst [vmem:[#allocation2 + $0x8] sm:$0x1] %v3439_v15  ;;  %v5222_v2 = vrot.slane %v5221_v23, 4 }
 0x182   : > { %v3414_v30 = vadd.f32 %v3407_v46, %v3310_v58  ;;  %4823 = vmatmul.bf16.vlgmr.msrb.gmra.mxu1 %v7967_v26  ;;  %3452 = vst [vmem:[#allocation2 + $0x8] sm:$0xc] %v3451_v51  ;;  %4713 = vmatpush.bf16.msrb.mxu0 %v8731_v22  ;;  %v5226_v18 = vrot.slane %v5224_v50, 5  ;;  %v5210_v58 = vld [vmem:[#allocation2 + $0x60] sm:$0xf]  ;;  %v8751_v26 = vld [vmem:[%s10844_s3 + $0xb8] sm:$0xff] }
 0x183   : > { %4975 = vmatpush.bf16.msrb.mxu2 %v8751_v26  ;;  %v5252_v61 = vshll.u32 %v5211_v63, 16  ;;  %v8748_v15 = vld [vmem:[%s10844_s3 + $0xa0] sm:$0xff]  ;;  %v8727_v51 = vld [vmem:[%s10844_s3 + $0x8] sm:$0xff]  ;;  %v3574_v26 = vadd.f32 %v10385_v9, %v10546_v32 }
 0x184   : > { %7390 = vst [vmem:[%s9829_s7 + $0x50] sm:$0xff] %v3414_v30  ;;  %v3423_v37 = vmax.f32 %v3414_v30, 0.0  ;;  %v8730_v30 = vld [vmem:[%s10844_s3 + $0x20] sm:$0xff]  ;;  %v5227_v54 = vsel %vm9212_vm2, %v5222_v2, %v5226_v18  ;;  %v3453_v2 = vld [vmem:[#allocation2 + $0xc] sm:$0x1] }
 0x185   : > { %v3201_v20 = vpop.f32.mrf.mxu0  ;;  %v5287_v53 = vunpack.c.l.b16 %v5227_v54 }
 0x186   : > { %v3207_v62 = vadd.f32 %v3201_v20, %v3103_v47  ;;  %v3427_v44 = vpack.c.bf16 %v3423_v37, %v3423_v37  ;;  %v5257_v37 = vshrl.u32 %v5212_v1, 16  ;;  %4714 = vmatpush.bf16.msrb.mxu0 %v8730_v30  ;;  %v5254_v30 = vrot.slane %v5252_v61, 5 }
 0x187   : > { %v3305_v29 = vpop.f32.mrf.mxu1  ;;  %v8790_v48 = vld [vmem:[#allocation2 + $0x34] sm:$0xf0]  ;;  %4976 = vmatpush.bf16.msrb.mxu2 %v8750_v5 }
 0x188   : > { %3431 = vst [vmem:[#allocation2 + $0x40] sm:$0x3] %v3427_v44  ;;  %v3311_v27 = vadd.f32 %v3305_v29, %v3207_v62  ;;  %v8287_v55 = vor.u32 %v8790_v48, %v8286_v11  ;;  %v3409_v12 = vpop.f32.mrf.mxu2  ;;  %v7970_v3 = vld [vmem:[#allocation2 + $0x38] sm:$0xf]  ;;  %v5241_v29 = vsel %vm9212_vm2, %v5236_v28, %v5240_v36  ;;  %v5260_v62 = vshll.u32 %v5212_v1, 16 }
 0x189   : > { %v10558_v31 = vpop.f32.mrf.mxu3  ;;  %v5288_v6 = vunpack.c.l.b16 %v5241_v29  ;;  %v5259_v56 = vrot.slane %v5257_v37, 4  ;;  %v3434_v1 = vld [vmem:[#allocation2 + $0x4] sm:$0x1]  ;;  %v3462_v29 = vld [vmem:[#allocation2 + $0x18] sm:$0xc] }
 0x18a   : > { %v3415_v17 = vadd.f32 %v3409_v12, %v3311_v27  ;;  %5559 = vmatmul.bf16.vlgmr.msra.gmra.mxu3 %v8287_v55  ;;  %v5243_v27 = vshrl.u32 %v5210_v58, 16  ;;  %v5246_v55 = vshll.u32 %v5210_v58, 16  ;;  %v8729_v12 = vld [vmem:[%s10844_s3 + $0x18] sm:$0xff]  ;;  %v5262_v4 = vrot.slane %v5260_v62, 5  ;;  %v8726_v37 = vld [vmem:[%s10844_s3] sm:$0xff] }
 0x18b   : > { %4715 = vmatpush.bf16.msrb.mxu0 %v8729_v12  ;;  %4977 = vmatpush.bf16.msrb.mxu2 %v8749_v13  ;;  %v3435_v18 = vsel %vm10026_vm6, 0, %v3434_v1  ;;  %v3454_v58 = vsel %vm10026_vm6, 0, %v3453_v2  ;;  %v3463_v54 = vsel %vm10037_vm8, 0, %v3462_v29  ;;  %v3465_v1 = vld [vmem:[#allocation2 + $0x1c] sm:$0x1]  ;;  %v3576_v2 = vadd.f32 %v10385_v9, %v10558_v31  ;;  %v8788_v29 = vld [vmem:[%s10844_s3 + $0x1b0] sm:$0xff] }
 0x18c   : > { %7391 = vst [vmem:[%s9829_s7 + $0x58] sm:$0xff] %v3415_v17  ;;  %v3424_v40 = vmax.f32 %v3415_v17, 0.0  ;;  %v5213_v17 = vld [vmem:[#allocation2 + $0x6c] sm:$0x1]  ;;  %v5245_v8 = vrot.slane %v5243_v27, 4  ;;  %v5248_v59 = vrot.slane %v5246_v55, 5 }
 0x18d   : > { %v10560_v57 = vpop.f32.mrf.mxu0  ;;  %v5266_v16 = vshll.u32 %v5213_v17, 16  ;;  %3436 = vst [vmem:[#allocation2 + $0x4] sm:$0x1] %v3435_v18  ;;  %v8746_v17 = vld [vmem:[%s10844_s3 + $0x90] sm:$0xff]  ;;  %v3466_v18 = vsel %vm10026_vm6, 0, %v3465_v1 }
 0x18e   : > { %v3428_v41 = vpack.c.bf16 %v3424_v40, %v3424_v40  ;;  %v3573_v40 = vadd.f32 %v10385_v9, %v10534_v19  ;;  %v3442_v19 = vsel %vm10026_vm6, 0, %v3441_v34  ;;  %3455 = vst [vmem:[#allocation2 + $0xc] sm:$0x1] %v3454_v58  ;;  %v3447_v34 = vld [vmem:[#allocation2 + $0x20] sm:$0x1] }
 0x18f   : > { %v10562_v52 = vpop.f32.mrf.mxu1  ;;  %v8735_v25 = vld [vmem:[#allocation2 + $0x3c] sm:$0xf0]  ;;  %3443 = vst [vmem:[#allocation2 + $0x10] sm:$0x1] %v3442_v19  ;;  %v5268_v36 = vrot.slane %v5266_v16, 5  ;;  %4978 = vmatpush.bf16.msrb.mxu2 %v8748_v15 }
 0x190   : > { %3432 = vst [vmem:[#allocation2 + $0x48] sm:$0x3] %v3428_v41  ;;  %v7971_v45 = vor.u32 %v8735_v25, %v7970_v3  ;;  %v10571_v43 = vpop.f32.mrf.mxu2  ;;  %v8290_v46 = vld [vmem:[#allocation2 + $0x40] sm:$0xf]  ;;  %v5291_v41 = vpack.c.b16 %v5288_v6, %v5287_v53  ;;  %v3456_v3 = vld [vmem:[#allocation2 + $0x10] sm:$0xc]  ;;  %v3676_v49 = vadd.f32 %v10560_v57, %v3573_v40  ;;  %v5249_v57 = vor.u32 %v5248_v59, %v5245_v8 }
 0x191   : > { %v10573_v0 = vpop.f32.mrf.mxu3  ;;  %v8728_v25 = vld [vmem:[%s10844_s3 + $0x10] sm:$0xff]  ;;  %v3457_v21 = vsel %vm10037_vm8, 0, %v3456_v3  ;;  %3464 = vst [vmem:[#allocation2 + $0x18] sm:$0xc] %v3463_v54  ;;  %v3575_v59 = vadd.f32 %v10385_v9, %v10555_v38  ;;  %v3468_v3 = vld [vmem:[#allocation2 + $0x20] sm:$0xc] }
 0x192   : > { %4828 = vmatmul.bf16.gmra.mxu1 %v7971_v45  ;;  %v5263_v45 = vor.u32 %v5262_v4, %v5259_v56  ;;  %4716 = vmatpush.bf16.msrb.mxu0 %v8728_v25  ;;  %3458 = vst [vmem:[#allocation2 + $0x10] sm:$0xc] %v3457_v21  ;;  %v3835_v22 = vadd.f32 %v10562_v52, %v3676_v49  ;;  %v8747_v52 = vld [vmem:[%s10844_s3 + $0x98] sm:$0xff]  ;;  %v8770_v25 = vld [vmem:[%s10844_s3 + $0x130] sm:$0xff]  ;;  %v3448_v49 = vsel %vm10026_vm6, 0, %v3447_v34  ;;  %v8768_v9 = vld [vmem:[%s10844_s3 + $0x120] sm:$0xff] }
 0x193   : > { %4979 = vmatpush.bf16.msrb.mxu2 %v8747_v52  ;;  %v8771_v4 = vld [vmem:[%s10844_s3 + $0x138] sm:$0xff]  ;;  %3449 = vst [vmem:[#allocation2 + $0x20] sm:$0x1] %v3448_v49 }
 0x194   : > { %v5264_v28 = vrot.slane %v5263_v45, 4  ;;  %v3469_v45 = vsel %vm10037_vm8, 0, %v3468_v3  ;;  %3467 = vst [vmem:[#allocation2 + $0x1c] sm:$0x1] %v3466_v18 }
 0x195   : > { %v10575_v42 = vpop.f32.mrf.mxu0  ;;  %3470 = vst [vmem:[#allocation2 + $0x20] sm:$0xc] %v3469_v45  ;;  %v10765_v45 = vld [vmem:[%s10844_s3 + $0x210] sm:$0xff]  ;;  %v4841_v18 = vld [vmem:[#allocation2 + $0xc] sm:$0x1] }
 0x196   : > { %4717 = vmatpush.bf16.msrb.mxu0 %v8727_v51  ;;  %v3677_v62 = vadd.f32 %v10575_v42, %v3574_v26  ;;  %v5269_v32 = vsel %vm9212_vm2, %v5264_v28, %v5268_v36 }
 0x197   : > { %v10577_v33 = vpop.f32.mrf.mxu1  ;;  %v8791_v47 = vld [vmem:[#allocation2 + $0x44] sm:$0xf0]  ;;  %v5290_v56 = vunpack.c.l.b16 %v5269_v32  ;;  %4980 = vmatpush.bf16.msrb.mxu2 %v8746_v17 }
 0x198   : > { %v8291_v20 = vor.u32 %v8791_v47, %v8290_v46  ;;  %v10594_v24 = vpop.f32.mrf.mxu2  ;;  %v3938_v46 = vadd.f32 %v10571_v43, %v3835_v22  ;;  %v5250_v47 = vrot.slane %v5249_v57, 4  ;;  %v3836_v53 = vadd.f32 %v10577_v33, %v3677_v62  ;;  %v10683_v33 = vld [vmem:[%s10844_s3 + $0x238] sm:$0xff]  ;;  %v8769_v22 = vld [vmem:[%s10844_s3 + $0x128] sm:$0xff] }
 0x199   : > { %v10596_v44 = vpop.f32.mrf.mxu3  ;;  %8808 = vmatpush.bf16.msrb.mxu1 %v10683_v33  ;;  %v4619_v1 = vld [vmem:[#allocation2 + $0x10] sm:$0x7] }
 0x19a   : > { %5564 = vmatmul.bf16.gmra.mxu3 %v8291_v20  ;;  %v3444_v20 = vld [vmem:[#allocation2 + $0x18] sm:$0x1]  ;;  %4718 = vmatpush.bf16.msrb.mxu0 %v8726_v37  ;;  %v4042_v5 = vadd.f32 %v10573_v0, %v3938_v46  ;;  %v5255_v12 = vsel %vm9212_vm2, %v5250_v47, %v5254_v30  ;;  %v3459_v0 = vld [vmem:[#allocation2 + $0x14] sm:$0x1]  ;;  %v3939_v13 = vadd.f32 %v10594_v24, %v3836_v53  ;;  %v10720_v46 = vld [vmem:[%s10844_s3 + $0x228] sm:$0xff] }
 0x19b   : > { %v3445_v43 = vsel %vm10026_vm6, 0, %v3444_v20  ;;  %v5289_v63 = vunpack.c.l.b16 %v5255_v12  ;;  %v3460_v8 = vsel %vm10026_vm6, 0, %v3459_v0  ;;  %v4838_v30 = vld [vmem:[#allocation2] sm:$0xf]  ;;  %v4616_v53 = vld [vmem:[#allocation2 + $0x8] sm:$0x7] }
 0x19c   : > { %3446 = vst [vmem:[#allocation2 + $0x18] sm:$0x1] %v3445_v43  ;;  %v4043_v57 = vadd.f32 %v10596_v44, %v3939_v13  ;;  %v10734_v43 = vld [vmem:[%s10844_s3 + $0x220] sm:$0xff]  ;;  %v8766_v0 = vld [vmem:[%s10844_s3 + $0x110] sm:$0xff] }
 0x19d   : > { %v10598_v11 = vpop.f32.mrf.mxu0  ;;  %3461 = vst [vmem:[#allocation2 + $0x14] sm:$0x1] %v3460_v8  ;;  %v5292_v16 = vpack.c.b16 %v5290_v56, %v5289_v63  ;;  %8809 = vmatpush.bf16.msrb.mxu1 %v10701_v14  ;;  %v3471_v63 = vld [vmem:[#allocation2 + $0x24] sm:$0x1] }
 0x19e   : > { %5183 = vmatpush.bf16.msra.mxu0 %v8771_v4  ;;  %v3678_v38 = vadd.f32 %v10598_v11, %v3575_v59  ;;  %v8744_v11 = vld [vmem:[%s10844_s3 + $0x80] sm:$0xff]  ;;  %v8787_v4 = vld [vmem:[%s10844_s3 + $0x1a8] sm:$0xff] }
 0x19f   : > { %v10600_v48 = vpop.f32.mrf.mxu1 }
 0x1a0   : > { %v10623_v10 = vpop.f32.mrf.mxu2  ;;  %v3837_v44 = vadd.f32 %v10600_v48, %v3678_v38  ;;  %v8789_v48 = vld [vmem:[%s10844_s3 + $0x1b8] sm:$0xff] }
 0x1a1   : > { %v10625_v23 = vpop.f32.mrf.mxu3  ;;  %8810 = vmatpush.bf16.msrb.mxu1 %v10720_v46 }
 0x1a2   : > { %5351 = vmatmul.bf16.vlgmr.msra.gmra.mxu1 %v5291_v41  ;;  %v8745_v41 = vld [vmem:[%s10844_s3 + $0x88] sm:$0xff]  ;;  %5184 = vmatpush.bf16.msra.mxu0 %v8770_v25  ;;  %v3940_v58 = vadd.f32 %v10623_v10, %v3837_v44 }
 0x1a3   : > { %4981 = vmatpush.bf16.msrb.mxu2 %v8745_v41  ;;  %v3472_v41 = vsel %vm10026_vm6, 0, %v3471_v63  ;;  %v8783_v63 = vld [vmem:[%s10844_s3 + $0x188] sm:$0xff] }
 0x1a4   : > { %3473 = vst [vmem:[#allocation2 + $0x24] sm:$0x1] %v3472_v41 }
 0x1a5   : > { %v10627_v50 = vpop.f32.mrf.mxu0  ;;  %8811 = vmatpush.bf16.msrb.mxu1 %v10734_v43 }
 0x1a6   : > { %5185 = vmatpush.bf16.msra.mxu0 %v8769_v22  ;;  %v3679_v47 = vadd.f32 %v10627_v50, %v3576_v2  ;;  %v4044_v50 = vadd.f32 %v10625_v23, %v3940_v58  ;;  %v7910_v2 = vld [vmem:[#allocation2] sm:$0xf] }
 0x1a7   : > { %v10629_v39 = vpop.f32.mrf.mxu1  ;;  %4982 = vmatpush.bf16.msrb.mxu2 %v8744_v11 }
 0x1a8   : > { %v10658_v27 = vpop.f32.mrf.mxu2  ;;  %v3838_v54 = vadd.f32 %v10629_v39, %v3679_v47  ;;  %v10747_v39 = vld [vmem:[%s10844_s3 + $0x218] sm:$0xff]  ;;  %v8764_v47 = vld [vmem:[%s10844_s3 + $0x100] sm:$0xff] }
 0x1a9   : > { %v10660_v55 = vpop.f32.mrf.mxu3  ;;  %8812 = vmatpush.bf16.msrb.mxu1 %v10747_v39 }
 0x1aa   : > { %5186 = vmatpush.bf16.msra.mxu0 %v8768_v9  ;;  %v3941_v8 = vadd.f32 %v10658_v27, %v3838_v54 }
 0x1ab   : > { %5447 = vmatpush.bf16.msra.mxu2 %v8789_v48  ;;  %v10779_v48 = vld [vmem:[%s10844_s3 + $0x208] sm:$0xff] }
 0x1ad   : > { %v4191_v42 = vpop.f32.mrf.mxu0  ;;  %8813 = vmatpush.bf16.msrb.mxu1 %v10765_v45 }
 0x1ae   : > { %v4201_v40 = vadd.f32 %v4191_v42, %v4042_v5  ;;  %v4847_v5 = vshrl.u32 %v4838_v30, 16  ;;  %v4850_v42 = vshll.u32 %v4838_v30, 16 }
 0x1af   : > { %v4294_v6 = vpop.f32.mrf.mxu1  ;;  %5448 = vmatpush.bf16.msra.mxu2 %v8788_v29 }
 0x1b0   : > { %v4304_v24 = vadd.f32 %v4294_v6, %v4201_v40  ;;  %v4398_v19 = vpop.f32.mrf.mxu2  ;;  %v8767_v6 = vld [vmem:[%s10844_s3 + $0x118] sm:$0xff]  ;;  %v4852_v34 = vrot.slane %v4850_v42, 5  ;;  %v8784_v42 = vld [vmem:[%s10844_s3 + $0x190] sm:$0xff] }
 0x1b1   : > { %5187 = vmatpush.bf16.msra.mxu0 %v8767_v6  ;;  %8814 = vmatpush.bf16.msrb.mxu1 %v10779_v48 }
 0x1b2   : > { %v4408_v61 = vadd.f32 %v4398_v19, %v4304_v24  ;;  %5356 = vmatmul.bf16.gmra.mxu1 %v5292_v16  ;;  %v4849_v16 = vrot.slane %v4847_v5, 4  ;;  %v4839_v24 = vld [vmem:[#allocation2 + $0x4] sm:$0x1]  ;;  %v8765_v19 = vld [vmem:[%s10844_s3 + $0x108] sm:$0xff]  ;;  %v4870_v5 = vshll.u32 %v4841_v18, 16 }
 0x1b3   : > { %v4557_v21 = vpop.f32.mrf.mxu3  ;;  %5449 = vmatpush.bf16.msra.mxu2 %v8787_v4  ;;  %v10793_v4 = vld [vmem:[%s10844_s3 + $0x200] sm:$0xff] }
 0x1b4   : > { %v4567_v28 = vadd.f32 %v4557_v21, %v4408_v61  ;;  %v4045_v21 = vadd.f32 %v10660_v55, %v3941_v8  ;;  %v4853_v11 = vor.u32 %v4852_v34, %v4849_v16  ;;  %v4622_v8 = vld [vmem:[#allocation2 + $0x18] sm:$0x7]  ;;  %v4872_v41 = vrot.slane %v4870_v5, 5 }
 0x1b5   : > { %v4193_v15 = vpop.f32.mrf.mxu0  ;;  %5188 = vmatpush.bf16.msra.mxu0 %v8766_v0  ;;  %8815 = vmatpush.bf16.msrb.mxu1 %v10793_v4 }
 0x1b6   : > { %v4202_v36 = vadd.f32 %v4193_v15, %v4043_v57  ;;  %7904 = vst [vmem:[%s9829_s7 + $0x60] sm:$0xff] %v4567_v28  ;;  %v4576_v26 = vmax.f32 %v4567_v28, 0.0 }
 0x1b7   : > { %v4296_v51 = vpop.f32.mrf.mxu1  ;;  %5450 = vmatpush.bf16.msra.mxu2 %v8786_v7 }
 0x1b8   : > { %v4580_v31 = vpack.c.bf16 %v4576_v26, %v4576_v26  ;;  %v4305_v10 = vadd.f32 %v4296_v51, %v4202_v36  ;;  %v4400_v52 = vpop.f32.mrf.mxu2  ;;  %v4856_v51 = vshll.u32 %v4839_v24, 16  ;;  %v8785_v26 = vld [vmem:[%s10844_s3 + $0x198] sm:$0xff] }
 0x1b9   : > { %5189 = vmatpush.bf16.msra.mxu0 %v8765_v19 }
 0x1ba   : > { %v4585_v37 = vshrl.u32 %v4580_v31, 16  ;;  %v4409_v62 = vadd.f32 %v4400_v52, %v4305_v10  ;;  %v4588_v17 = vshll.u32 %v4580_v31, 16  ;;  %v4858_v31 = vrot.slane %v4856_v51, 5 }
 0x1bb   : > { %v4559_v20 = vpop.f32.mrf.mxu3  ;;  %5451 = vmatpush.bf16.msra.mxu2 %v8785_v26 }
 0x1bc   : > { %v4587_v12 = vrot.slane %v4585_v37, 7  ;;  %v4568_v23 = vadd.f32 %v4559_v20, %v4409_v62 }
 0x1bd   : > { %v4196_v32 = vpop.f32.mrf.mxu0  ;;  %5190 = vmatpush.bf16.msra.mxu0 %v8764_v47 }
 0x1be   : > { %v4203_v56 = vadd.f32 %v4196_v32, %v4044_v50  ;;  %v4590_v59 = vor.u32 %v4588_v17, %v4587_v12  ;;  %7905 = vst [vmem:[%s9829_s7 + $0x68] sm:$0xff] %v4568_v23  ;;  %v4577_v13 = vmax.f32 %v4568_v23, 0.0  ;;  %v4854_v50 = vrot.slane %v4853_v11, 4 }
 0x1bf   : > { %v4299_v40 = vpop.f32.mrf.mxu1  ;;  %5452 = vmatpush.bf16.msra.mxu2 %v8784_v42 }
 0x1c0   : > { %v4617_v3 = vsel %vm10420_vm11, %v4590_v59, %v4616_v53  ;;  %v4581_v25 = vpack.c.bf16 %v4577_v13, %v4577_v13  ;;  %v4306_v38 = vadd.f32 %v4299_v40, %v4203_v56  ;;  %v4403_v27 = vpop.f32.mrf.mxu2  ;;  %v4859_v59 = vsel %vm9212_vm2, %v4854_v50, %v4858_v31 }
 0x1c1   : > { %4618 = vst [vmem:[#allocation2 + $0x8] sm:$0x7] %v4617_v3 }
 0x1c2   : > { %v4592_v57 = vshrl.u32 %v4581_v25, 16  ;;  %v4410_v61 = vadd.f32 %v4403_v27, %v4306_v38  ;;  %v4595_v44 = vshll.u32 %v4581_v25, 16  ;;  %v4919_v38 = vunpack.c.l.b16 %v4859_v59  ;;  %v8782_v27 = vld [vmem:[%s10844_s3 + $0x180] sm:$0xff] }
 0x1c3   : > { %v4562_v49 = vpop.f32.mrf.mxu3  ;;  %5453 = vmatpush.bf16.msra.mxu2 %v8783_v63 }
 0x1c4   : > { %v4594_v22 = vrot.slane %v4592_v57, 7  ;;  %v4569_v28 = vadd.f32 %v4562_v49, %v4410_v61 }
 0x1c5   : > { %v4198_v15 = vpop.f32.mrf.mxu0 }
 0x1c6   : > { %v4204_v36 = vadd.f32 %v4198_v15, %v4045_v21  ;;  %v4597_v58 = vor.u32 %v4595_v44, %v4594_v22  ;;  %7906 = vst [vmem:[%s9829_s7 + $0x70] sm:$0xff] %v4569_v28  ;;  %v4578_v55 = vmax.f32 %v4569_v28, 0.0  ;;  %v4843_v44 = vld [vmem:[#allocation2 + $0x14] sm:$0x1] }
 0x1c7   : > { %v4301_v9 = vpop.f32.mrf.mxu1  ;;  %5454 = vmatpush.bf16.msra.mxu2 %v8782_v27  ;;  %v4884_v18 = vshll.u32 %v4843_v44, 16 }
 0x1c8   : > { %v4620_v10 = vsel %vm10420_vm11, %v4597_v58, %v4619_v1  ;;  %v4582_v30 = vpack.c.bf16 %v4578_v55, %v4578_v55  ;;  %v4307_v52 = vadd.f32 %v4301_v9, %v4204_v36  ;;  %v8724_v20 = vld [vmem:[#allocation2 + $0x4] sm:$0xf0]  ;;  %v4405_v37 = vpop.f32.mrf.mxu2  ;;  %v4845_v36 = vld [vmem:[#allocation2 + $0x1c] sm:$0x1] }
 0x1c9   : > { %v4840_v29 = vld [vmem:[#allocation2 + $0x8] sm:$0xf]  ;;  %4621 = vst [vmem:[#allocation2 + $0x10] sm:$0x7] %v4620_v10  ;;  %v7911_v62 = vor.u32 %v8724_v20, %v7910_v2 }
 0x1ca   : > { %v4861_v32 = vshrl.u32 %v4840_v29, 16  ;;  %v4864_v54 = vshll.u32 %v4840_v29, 16  ;;  %v4599_v6 = vshrl.u32 %v4582_v30, 16  ;;  %v4411_v12 = vadd.f32 %v4405_v37, %v4307_v52 }
 0x1cb   : > { %v4564_v17 = vpop.f32.mrf.mxu3  ;;  %4719 = vmatmul.bf16.vlgmr.msrb.gmra.mxu0 %v7911_v62  ;;  %v4602_v40 = vshll.u32 %v4582_v30, 16  ;;  %v4886_v29 = vrot.slane %v4884_v18, 5  ;;  %v5579_v62 = vld [vmem:[#allocation2 + $0x1c] sm:$0x1] }
 0x1cc   : > { %v4863_v23 = vrot.slane %v4861_v32, 4  ;;  %v4866_v56 = vrot.slane %v4864_v54, 5  ;;  %v4601_v53 = vrot.slane %v4599_v6, 7  ;;  %v4570_v0 = vadd.f32 %v4564_v17, %v4411_v12  ;;  %5711 = vmatpush.bf16.msrb.mxu0 %v10683_v33 }
 0x1cd   : > { %v5620_v17 = vshll.u32 %v5579_v62, 16 }
 0x1ce   : > { %v4867_v13 = vor.u32 %v4866_v56, %v4863_v23  ;;  %v4604_v16 = vor.u32 %v4602_v40, %v4601_v53  ;;  %7907 = vst [vmem:[%s9829_s7 + $0x78] sm:$0xff] %v4570_v0  ;;  %v4579_v34 = vmax.f32 %v4570_v0, 0.0 }
 0x1cf   : > { %v5622_v59 = vrot.slane %v5620_v17, 5 }
 0x1d0   : > { %v4868_v3 = vrot.slane %v4867_v13, 4  ;;  %v4623_v25 = vsel %vm10420_vm11, %v4604_v16, %v4622_v8  ;;  %v4583_v33 = vpack.c.bf16 %v4579_v34, %v4579_v34  ;;  %v4842_v24 = vld [vmem:[#allocation2 + $0x10] sm:$0xf]  ;;  %5712 = vmatpush.bf16.msrb.mxu0 %v10701_v14  ;;  %v4625_v14 = vld [vmem:[#allocation2 + $0x20] sm:$0x7] }
 0x1d1   : > { %4624 = vst [vmem:[#allocation2 + $0x18] sm:$0x7] %v4623_v25  ;;  %v4875_v7 = vshrl.u32 %v4842_v24, 16  ;;  %v4878_v19 = vshll.u32 %v4842_v24, 16  ;;  %v7914_v1 = vld [vmem:[#allocation2 + $0x10] sm:$0xf] }
 0x1d2   : > { %v4873_v49 = vsel %vm9212_vm2, %v4868_v3, %v4872_v41  ;;  %v4606_v21 = vshrl.u32 %v4583_v33, 16  ;;  %v4609_v51 = vshll.u32 %v4583_v33, 16  ;;  %v8762_v25 = vld [vmem:[#allocation2 + $0x7c] sm:$0xf0] }
 0x1d3   : > { %v4920_v57 = vunpack.c.l.b16 %v4873_v49  ;;  %v4877_v61 = vrot.slane %v4875_v7, 4  ;;  %v4880_v15 = vrot.slane %v4878_v19, 5 }
 0x1d4   : > { %v4608_v11 = vrot.slane %v4606_v21, 7  ;;  %5713 = vmatpush.bf16.msrb.mxu0 %v10720_v46  ;;  %v4898_v46 = vshll.u32 %v4845_v36, 16  ;;  %v8780_v21 = vld [vmem:[#allocation2 + $0xc] sm:$0xf0]  ;;  %v5577_v36 = vld [vmem:[#allocation2 + $0x14] sm:$0x1] }
 0x1d5   : > { %v4923_v22 = vpack.c.b16 %v4920_v57, %v4919_v38  ;;  %v4881_v2 = vor.u32 %v4880_v15, %v4877_v61  ;;  %v8126_v38 = vld [vmem:[#allocation2 + $0x78] sm:$0xf]  ;;  %v5574_v57 = vld [vmem:[#allocation2 + $0x8] sm:$0xf] }
 0x1d6   : > { %v4611_v28 = vor.u32 %v4609_v51, %v4608_v11  ;;  %v4900_v5 = vrot.slane %v4898_v46, 5  ;;  %v8127_v24 = vor.u32 %v8762_v25, %v8126_v38  ;;  %v8230_v11 = vld [vmem:[#allocation2 + $0x8] sm:$0xf]  ;;  %v5586_v44 = vshll.u32 %v5574_v57, 16 }
 0x1d7   : > { %4983 = vmatmul.bf16.vlgmr.msrb.gmra.mxu2 %v4923_v22  ;;  %v4882_v20 = vrot.slane %v4881_v2, 4  ;;  %v8231_v51 = vor.u32 %v8780_v21, %v8230_v11  ;;  %v5583_v22 = vshrl.u32 %v5574_v57, 16 }
 0x1d8   : > { %v4626_v58 = vsel %vm10420_vm11, %v4611_v28, %v4625_v14  ;;  %v8725_v55 = vld [vmem:[#allocation2 + $0x14] sm:$0xf0]  ;;  %5714 = vmatpush.bf16.msrb.mxu0 %v10734_v43  ;;  %v5581_v43 = vld [vmem:[#allocation2 + $0x24] sm:$0x1]  ;;  %v5588_v18 = vrot.slane %v5586_v44, 5 }
 0x1d9   : > { %v4844_v26 = vld [vmem:[#allocation2 + $0x18] sm:$0xf]  ;;  %4627 = vst [vmem:[#allocation2 + $0x20] sm:$0x7] %v4626_v58  ;;  %v7915_v9 = vor.u32 %v8725_v55, %v7914_v1  ;;  %v4887_v42 = vsel %vm9212_vm2, %v4882_v20, %v4886_v29  ;;  %v5634_v0 = vshll.u32 %v5581_v43, 16  ;;  %v5585_v2 = vrot.slane %v5583_v22, 4 }
 0x1da   : > { %v5578_v47 = vld [vmem:[#allocation2 + $0x18] sm:$0xf]  ;;  %v4889_v31 = vshrl.u32 %v4844_v26, 16  ;;  %v4892_v10 = vshll.u32 %v4844_v26, 16  ;;  %v4921_v63 = vunpack.c.l.b16 %v4887_v42  ;;  %v8130_v1 = vld [vmem:[#allocation2 + $0x88] sm:$0xf] }
 0x1db   : > { %v5611_v30 = vshrl.u32 %v5578_v47, 16  ;;  %v5614_v52 = vshll.u32 %v5578_v47, 16  ;;  %4724 = vmatmul.bf16.gmra.mxu0 %v7915_v9  ;;  %v5636_v3 = vrot.slane %v5634_v0, 5  ;;  %v5575_v55 = vld [vmem:[#allocation2 + $0xc] sm:$0x1]  ;;  %v5606_v47 = vshll.u32 %v5577_v36, 16 }
 0x1dc   : > { %v4891_v50 = vrot.slane %v4889_v31, 4  ;;  %v4894_v37 = vrot.slane %v4892_v10, 5  ;;  %5715 = vmatpush.bf16.msrb.mxu0 %v10747_v39  ;;  %v5589_v9 = vor.u32 %v5588_v18, %v5585_v2  ;;  %v5592_v31 = vshll.u32 %v5575_v55, 16 }
 0x1dd   : > { %v5613_v60 = vrot.slane %v5611_v30, 4  ;;  %v5616_v32 = vrot.slane %v5614_v52, 5  ;;  %v5608_v46 = vrot.slane %v5606_v47, 5 }
 0x1de   : > { %v4895_v54 = vor.u32 %v4894_v37, %v4891_v50  ;;  %v5590_v30 = vrot.slane %v5589_v9, 4  ;;  %v5594_v52 = vrot.slane %v5592_v31, 5  ;;  %v8234_v50 = vld [vmem:[#allocation2 + $0x18] sm:$0xf] }
 0x1df   : > { %v5617_v12 = vor.u32 %v5616_v32, %v5613_v60 }
 0x1e0   : > { %v4896_v6 = vrot.slane %v4895_v54, 4  ;;  %v5580_v23 = vld [vmem:[#allocation2 + $0x20] sm:$0xf]  ;;  %5716 = vmatpush.bf16.msrb.mxu0 %v10765_v45  ;;  %v5595_v62 = vsel %vm9212_vm2, %v5590_v30, %v5594_v52 }
 0x1e1   : > { %v5625_v53 = vshrl.u32 %v5580_v23, 16  ;;  %v5628_v40 = vshll.u32 %v5580_v23, 16  ;;  %v5618_v8 = vrot.slane %v5617_v12, 4  ;;  %v8781_v20 = vld [vmem:[#allocation2 + $0x1c] sm:$0xf0]  ;;  %v5655_v32 = vunpack.c.l.b16 %v5595_v62 }
 0x1e2   : > { %v4901_v56 = vsel %vm9212_vm2, %v4896_v6, %v4900_v5  ;;  %v8235_v37 = vor.u32 %v8781_v20, %v8234_v50  ;;  %v5088_v6 = vpop.f32.mrf.mxu3 }
 0x1e3   : > { %v4922_v39 = vunpack.c.l.b16 %v4901_v56  ;;  %v5627_v13 = vrot.slane %v5625_v53, 4  ;;  %v5630_v41 = vrot.slane %v5628_v40, 5  ;;  %v5623_v45 = vsel %vm9212_vm2, %v5618_v8, %v5622_v59 }
 0x1e4   : > { %5717 = vmatpush.bf16.msrb.mxu0 %v10779_v48  ;;  %v5657_v49 = vunpack.c.l.b16 %v5623_v45  ;;  %v5576_v48 = vld [vmem:[#allocation2 + $0x10] sm:$0xf] }
 0x1e5   : > { %v4924_v16 = vpack.c.b16 %v4922_v39, %v4921_v63  ;;  %v5631_v34 = vor.u32 %v5630_v41, %v5627_v13  ;;  %v5597_v61 = vshrl.u32 %v5576_v48, 16  ;;  %v5600_v15 = vshll.u32 %v5576_v48, 16  ;;  %v8827_v41 = vld [vmem:[%s10845_s4] ss:$0 sm:$0xff] }
 0x1e7   : > { %4988 = vmatmul.bf16.gmra.mxu2 %v4924_v16  ;;  %v5632_v33 = vrot.slane %v5631_v34, 4  ;;  %v5599_v14 = vrot.slane %v5597_v61, 4  ;;  %v5602_v28 = vrot.slane %v5600_v15, 5 }
 0x1e8   : > { %5718 = vmatpush.bf16.msrb.mxu0 %v10793_v4  ;;  %v8763_v4 = vld [vmem:[#allocation2 + $0x8c] sm:$0xf0] }
 0x1e9   : > { %v5637_v27 = vsel %vm9212_vm2, %v5632_v33, %v5636_v3  ;;  %v8131_v58 = vor.u32 %v8763_v4, %v8130_v1  ;;  %v5603_v26 = vor.u32 %v5602_v28, %v5599_v14 }
 0x1ea   : > { %v5658_v7 = vunpack.c.l.b16 %v5637_v27  ;;  %v5090_v56 = vpop.f32.mrf.mxu3 }
 0x1eb   : > { %5191 = vmatmul.bf16.vlgmr.msra.gmra.mxu0 %v8127_v24  ;;  %v5604_v10 = vrot.slane %v5603_v26, 4 }
 0x1ec   : > { %v5660_v19 = vpack.c.b16 %v5658_v7, %v5657_v49 }
 0x1ed   : > { %v5609_v29 = vsel %vm9212_vm2, %v5604_v10, %v5608_v46 }
 0x1ee   : > { %5724 = vmatmul.bf16.vlgmr.msrb.gmra.mxu1 %v5660_v19  ;;  %v5656_v60 = vunpack.c.l.b16 %v5609_v29 }
 0x1f0   : > { %v5659_v54 = vpack.c.b16 %v5656_v60, %v5655_v32 }
 0x1f2   : > { %v5093_v39 = vpop.f32.mrf.mxu3 }
 0x1f7   : > { %5455 = vmatmul.bf16.vlgmr.msra.gmra.mxu2 %v8231_v51 }
 0x1fa   : > { %v5095_v13 = vpop.f32.mrf.mxu3 }
 0x1fb   : > { %5196 = vmatmul.bf16.gmra.mxu0 %v8131_v58 }
 0x1ff   : > { %v4824_v5 = vpop.f32.mrf.mxu1 }
 0x207   : > { %5460 = vmatmul.bf16.gmra.mxu2 %v8235_v37  ;;  %v4826_v43 = vpop.f32.mrf.mxu1 }
 0x20b   : > { %5719 = vmatmul.bf16.vlgmr.msrb.gmra.mxu0 %v5659_v54 }
 0x20d   : > { %v5560_v45 = vpop.f32.mrf.mxu3 }
 0x20f   : > { %v4829_v17 = vpop.f32.mrf.mxu1 }
 0x215   : > { %v5562_v11 = vpop.f32.mrf.mxu3 }
 0x217   : > { %v4831_v40 = vpop.f32.mrf.mxu1 }
 0x21d   : > { %v5565_v10 = vpop.f32.mrf.mxu3 }
 0x21f   : > { %v5352_v35 = vpop.f32.mrf.mxu1 }
 0x227   : > { %v5354_v16 = vpop.f32.mrf.mxu1 }
 0x22f   : > { %v5357_v49 = vpop.f32.mrf.mxu1 }
 0x237   : > { %v5359_v36 = vpop.f32.mrf.mxu1 }
 0x248   : > { %v4720_v42 = vpop.f32.mrf.mxu0 }
 0x249   : > { %v4730_v3 = vadd.f32 %v8827_v41, %v4720_v42 }
 0x24b   : > { %v4834_v33 = vadd.f32 %v4824_v5, %v4730_v3 }
 0x250   : > { %v4722_v12 = vpop.f32.mrf.mxu0 }
 0x251   : > { %v4731_v7 = vadd.f32 %v8827_v41, %v4722_v12 }
 0x253   : > { %v4835_v57 = vadd.f32 %v4826_v43, %v4731_v7 }
 0x258   : > { %v4725_v23 = vpop.f32.mrf.mxu0 }
 0x259   : > { %v4732_v24 = vadd.f32 %v8827_v41, %v4725_v23 }
 0x25a   : > { %v4984_v53 = vpop.f32.mrf.mxu2 }
 0x25b   : > { %v4994_v38 = vadd.f32 %v4984_v53, %v4834_v33  ;;  %v4836_v21 = vadd.f32 %v4829_v17, %v4732_v24  ;;  %v5567_v17 = vpop.f32.mrf.mxu3 }
 0x25d   : > { %v5098_v48 = vadd.f32 %v5088_v6, %v4994_v38 }
 0x260   : > { %v4727_v0 = vpop.f32.mrf.mxu0 }
 0x261   : > { %v4733_v22 = vadd.f32 %v8827_v41, %v4727_v0 }
 0x262   : > { %v4986_v63 = vpop.f32.mrf.mxu2 }
 0x263   : > { %v4995_v51 = vadd.f32 %v4986_v63, %v4835_v57  ;;  %v4837_v18 = vadd.f32 %v4831_v40, %v4733_v22 }
 0x265   : > { %v5099_v1 = vadd.f32 %v5090_v56, %v4995_v51 }
 0x268   : > { %v5192_v8 = vpop.f32.mrf.mxu0 }
 0x269   : > { %v5202_v61 = vadd.f32 %v5192_v8, %v5098_v48 }
 0x26a   : > { %v4989_v59 = vpop.f32.mrf.mxu2 }
 0x26b   : > { %v4996_v15 = vadd.f32 %v4989_v59, %v4836_v21  ;;  %v5362_v4 = vadd.f32 %v5352_v35, %v5202_v61  ;;  %v5725_v50 = vpop.f32.mrf.mxu1 }
 0x26d   : > { %v5100_v28 = vadd.f32 %v5093_v39, %v4996_v15 }
 0x270   : > { %v5194_v34 = vpop.f32.mrf.mxu0 }
 0x271   : > { %v5203_v55 = vadd.f32 %v5194_v34, %v5099_v1 }
 0x272   : > { %v4991_v25 = vpop.f32.mrf.mxu2 }
 0x273   : > { %v4997_v26 = vadd.f32 %v4991_v25, %v4837_v18  ;;  %v5363_v46 = vadd.f32 %v5354_v16, %v5203_v55  ;;  %v5727_v56 = vpop.f32.mrf.mxu1 }
 0x275   : > { %v5101_v20 = vadd.f32 %v5095_v13, %v4997_v26 }
 0x278   : > { %v5197_v27 = vpop.f32.mrf.mxu0 }
 0x279   : > { %v5204_v58 = vadd.f32 %v5197_v27, %v5100_v28 }
 0x27a   : > { %v5456_v19 = vpop.f32.mrf.mxu2 }
 0x27b   : > { %v5466_v2 = vadd.f32 %v5456_v19, %v5362_v4  ;;  %v5364_v31 = vadd.f32 %v5357_v49, %v5204_v58 }
 0x27d   : > { %v5570_v47 = vadd.f32 %v5560_v45, %v5466_v2 }
 0x280   : > { %v5199_v44 = vpop.f32.mrf.mxu0 }
 0x281   : > { %v5205_v62 = vadd.f32 %v5199_v44, %v5101_v20 }
 0x282   : > { %v5458_v14 = vpop.f32.mrf.mxu2 }
 0x283   : > { %v5467_v37 = vadd.f32 %v5458_v14, %v5363_v46  ;;  %v5365_v43 = vadd.f32 %v5359_v36, %v5205_v62 }
 0x285   : > { %v5571_v54 = vadd.f32 %v5562_v11, %v5467_v37 }
 0x288   : > { %v5720_v9 = vpop.f32.mrf.mxu0 }
 0x289   : > { %v5730_v30 = vadd.f32 %v5720_v9, %v5570_v47 }
 0x28a   : > { %v5461_v52 = vpop.f32.mrf.mxu2 }
 0x28b   : > { %v5468_v29 = vadd.f32 %v5461_v52, %v5364_v31  ;;  %5734 = vst [vmem:[%s264_s26] sm:$0xff] %v5730_v30 }
 0x28d   : > { %v5572_v60 = vadd.f32 %v5565_v10, %v5468_v29 }
 0x28f   : > { %v5732_v32 = vadd.f32 %v5725_v50, %v5572_v60 }
 0x290   : > { %v5722_v5 = vpop.f32.mrf.mxu0 }
 0x291   : > { %5736 = vst [vmem:[%s264_s26 + $0x10] sm:$0xff] %v5732_v32  ;;  %v5731_v42 = vadd.f32 %v5722_v5, %v5571_v54 }
 0x292   : > { %v5463_v6 = vpop.f32.mrf.mxu2 }
 0x293   : > { %v5469_v12 = vadd.f32 %v5463_v6, %v5365_v43  ;;  %5735 = vst [vmem:[%s264_s26 + $0x8] sm:$0xff] %v5731_v42 }
 0x295   : > { %v5573_v23 = vadd.f32 %v5567_v17, %v5469_v12 }
 0x297   : > { %v5733_v53 = vadd.f32 %v5727_v56, %v5573_v23 }
 0x299   : > { %5737 = vst [vmem:[%s264_s26 + $0x18] sm:$0xff] %v5733_v53 }
 0x29a PF: > { %s17_s21 = sadd.s32 1, %s8835_s21  }
 0x29b   : > { %p14_p4 = scmp.ge.s32.totalorder %s17_s21, 4  }
 0x29d   :  { %16 = sbr.rel (!%p14_p4) target bundleno = 1 (0x1), region = 127 }

</bundles_post_ra>
